<compile_context>
chip_gen: v7x
topology: tpu7x:2x2x1
jax: 0.10.0
libtpu: 0.0.40
codegen_flags: <defaults>
</compile_context>

<pallas_src>
import math
import functools

import jax
import jax.numpy as jnp
from jax.experimental import pallas as pl
from jax.experimental.pallas import tpu as pltpu

# ----------------------------- configuration -----------------------------
D_MODEL = 32
D_K = 16
NUM_HEADS = 2                 # d_model == num_heads * d_k (required for noML)
D_HIDDEN_FF = 64
WHICH_TM = [True, False]      # which_transition_matrices
NO_AG = False
MAX_LEN = 12                  # retention D_and_pos buffer length


# ----------------------------- in-kernel helpers -----------------------------
def _mm(a, b):
    return jnp.dot(a, b, preferred_element_type=jnp.float32)


def _nt(a, b):
    # a: [m, k], b: [n, k] -> [m, n]  (contract last dims; avoids explicit .T)
    return jax.lax.dot_general(a, b, (((1,), (1,)), ((), ())),
                               preferred_element_type=jnp.float32)


def _recip(x):
    return pl.reciprocal(x, approx=True)


def _layer_norm(h, gamma, beta):
    # single-pass mean / variance
    mean = jnp.mean(h, axis=-1, keepdims=True)
    msq = jnp.mean(h * h, axis=-1, keepdims=True)
    var = jnp.maximum(msq - mean * mean, 0.0)
    return (h - mean) * jax.lax.rsqrt(var + 1e-5) * gamma + beta


def _gdc_packed(parts, w1, w2, num_gates, dm):
    # Gated_Dynamic_Connection (noGC=False) with block-diagonal packed weights:
    #   parts : [M, G*dk]    (gate g occupies columns g*dk:(g+1)*dk)
    #   w1,w2 : [G*dk, G*dm] (block-diagonal; block g is the torch Weight[g])
    #   out[m, c] = sum_g y1_g[m, c] * softmax_g(relu(y2_g[m, c]))
    y1 = _mm(parts, w1)
    y2 = jnp.maximum(_mm(parts, w2), 0.0)
    y1s = [y1[:, g * dm:(g + 1) * dm] for g in range(num_gates)]
    y2s = [y2[:, g * dm:(g + 1) * dm] for g in range(num_gates)]
    mx = y2s[0]
    for t in y2s[1:]:
        mx = jnp.maximum(mx, t)
    ex = [jnp.exp(t - mx) for t in y2s]
    den = ex[0]
    for t in ex[1:]:
        den = den + t
    num = y1s[0] * ex[0]
    for a, e in zip(y1s[1:], ex[1:]):
        num = num + a * e
    return num * _recip(den)


def _swish_ln(x, g, wg, bg, wo, bo, gamma, beta):
    # LayerNorm( linear_wo(swish(linear_wg(x) * g)) + x )
    z = _mm(x, wg) + bg
    z = z * g
    s = z * jax.nn.sigmoid(z)
    o = _mm(s, wo) + bo
    return _layer_norm(o + x, gamma, beta)


# ----------------------------- fused decoder-layer kernel -----------------------------
def _decoder_layer_kernel(
        # per-batch blocks
        x_ref, ag_ref, ek_ref, ev_ref,
        # TemporalSelfRetention
        tsr_wqkv_ref, rmask_ref,
        # SpatialSelfAttention
        ssa_wqkv_ref, tm_full_ref, blk_ref, tilen_ref,
        # TemporalEncoderDecoderAttention
        teda_wq_ref, mbias_ref,
        # Gated_Dynamic_Connection packed block-diagonal weights
        gdc_w1_ref, gdc_w2_ref, gdc2_w1_ref, gdc2_w2_ref,
        # Swish (TSR, SSA, TEDA) and LayerNorm (TSR, SSA, TEDA, FFN)
        sw_wg_ref, sw_bg_ref, sw_wo_ref, sw_bo_ref, ln_g_ref, ln_b_ref,
        # FeedForward
        ffn_w1_ref, ffn_b1_ref, ffn_w2_ref, ffn_b2_ref,
        # output
        o_ref,
        *, num_heads, dk, n_pre, hid):
    H, HD = num_heads, num_heads * dk
    scale = 1.0 / math.sqrt(dk)
    x = x_ref[0]                                           # [M, D]
    dmodel = x.shape[-1]

    # ==================== 1) TemporalSelfRetention ====================
    qkv = _mm(x, tsr_wqkv_ref[...])                        # [M, 3*H*dk]
    heads = []
    for h in range(H):
        q = qkv[:, h * dk:(h + 1) * dk]
        k = qkv[:, HD + h * dk:HD + (h + 1) * dk]
        v = qkv[:, 2 * HD + h * dk:2 * HD + (h + 1) * dk]
        # retention weights (pos factor * decay * same-node block-diag) live in rmask[h]
        ret = (_nt(q, k) * scale) * rmask_ref[h]           # [M, M]
        rsum = jnp.maximum(jnp.abs(jnp.sum(ret, axis=-1, keepdims=True)), 1.0)
        out = _mm(ret, v) * _recip(rsum)                   # [M, dk]
        # custom GroupNorm over d_k features of each row (NaN -> 0), then 3*tanh
        mean = jnp.mean(out, axis=-1, keepdims=True)
        var = jnp.maximum(jnp.mean(out * out, axis=-1, keepdims=True) - mean * mean, 0.0)
        normed = jnp.where(
            var > 0.0,
            (out - mean) * jax.lax.rsqrt(jnp.where(var > 0.0, var, 1.0)),
            0.0)
        heads.append(3.0 * jnp.tanh(normed))
    g = _gdc_packed(jnp.concatenate(heads, axis=-1),
                    gdc_w1_ref[0], gdc_w2_ref[0], H, dmodel)
    x = _swish_ln(x, g, sw_wg_ref[0], sw_bg_ref[0], sw_wo_ref[0], sw_bo_ref[0],
                  ln_g_ref[0], ln_b_ref[0])

    # ==================== 2) SpatialSelfAttention ====================
    qkv_all = _mm(x, ssa_wqkv_ref[...])                    # [M, hid*3*H*dk]
    blk = blk_ref[...]                                     # [M, M] 0/1 same-timestep
    # adaptive graph [M, N] rows -> block-diagonal [M, M] via a tiny selector matmul
    ag_full = _mm(ag_ref[0], tilen_ref[...]) * blk
    graph_outs = []
    for j in range(hid):
        base = j * 3 * HD
        gmat = tm_full_ref[j] if j < n_pre else ag_full    # [M, M], zero off-block
        emask = (gmat != 0.0).astype(jnp.float32)
        head_outs = []
        for h in range(H):
            q = qkv_all[:, base + h * dk:base + (h + 1) * dk]
            k = qkv_all[:, base + HD + h * dk:base + HD + (h + 1) * dk]
            v = qkv_all[:, base + 2 * HD + h * dk:base + 2 * HD + (h + 1) * dk]
            s = (_nt(q, k) * scale) * emask                # zero at non-edges
            # nozero_softmax over the same-timestep block (torch fills non-edges with 0)
            mx = jnp.max(jnp.where(blk > 0.0, s, -1e30), axis=-1, keepdims=True)
            e = jnp.exp(s - mx) * (s != 0.0).astype(jnp.float32)
            alpha = e * _recip(jnp.sum(e, axis=-1, keepdims=True) + 1e-5)
            head_outs.append(_mm(alpha * gmat, v))
        graph_outs.append(_gdc_packed(jnp.concatenate(head_outs, axis=-1),
                                      gdc_w1_ref[1 + j], gdc_w2_ref[1 + j], H, dmodel))
    g = _gdc_packed(jnp.concatenate(graph_outs, axis=-1),
                    gdc2_w1_ref[...], gdc2_w2_ref[...], hid, dmodel)
    # dropout: identity (eval mode)
    x = _swish_ln(x, g, sw_wg_ref[1], sw_bg_ref[1], sw_wo_ref[1], sw_bo_ref[1],
                  ln_g_ref[1], ln_b_ref[1])

    # ============ 3) TemporalEncoderDecoderAttention + FeedForward ============
    ek = ek_ref[0]                                         # [Me, H*dk]
    ev = ev_ref[0]
    q_all = _mm(x, teda_wq_ref[...])                       # [M, H*dk]
    mb = mbias_ref[...]                                    # 0 same-node, -1e30 otherwise
    head_outs = []
    for h in range(H):
        qh = q_all[:, h * dk:(h + 1) * dk]
        kh = ek[:, h * dk:(h + 1) * dk]
        vh = ev[:, h * dk:(h + 1) * dk]
        s = _nt(qh, kh) * scale + mb                       # [M, Me]
        mx = jnp.max(s, axis=-1, keepdims=True)
        e = jnp.exp(s - mx)
        alpha = e * _recip(jnp.sum(e, axis=-1, keepdims=True))
        head_outs.append(_mm(alpha, vh))
    g = _gdc_packed(jnp.concatenate(head_outs, axis=-1),
                    gdc_w1_ref[1 + hid], gdc_w2_ref[1 + hid], H, dmodel)
    x = _swish_ln(x, g, sw_wg_ref[2], sw_bg_ref[2], sw_wo_ref[2], sw_bo_ref[2],
                  ln_g_ref[2], ln_b_ref[2])
    # FeedForward + LayerNorm
    h1 = jnp.maximum(_mm(x, ffn_w1_ref[...]) + ffn_b1_ref[...], 0.0)
    h2 = _mm(h1, ffn_w2_ref[...]) + ffn_b2_ref[...]
    o_ref[0] = _layer_norm(h2 + x, ln_g_ref[3], ln_b_ref[3]).astype(o_ref.dtype)


# ----------------------------- BlockSpec helpers -----------------------------
def _batch_spec(shape):
    nd = len(shape)
    return pl.BlockSpec((1,) + tuple(shape[1:]),
                        lambda b: (b,) + (0,) * (nd - 1))


def _const_spec(shape):
    nd = len(shape)
    return pl.BlockSpec(tuple(shape), lambda b: (0,) * nd)


# ----------------------------- forward wrapper -----------------------------
def decoder_layer_forward(params, inputs, enc_K, enc_V, c_targets,
                          tm_full, gen_graph_targets, num=None):
    """Fused DecoderLayer forward (noML=True, noGC=False, eval-mode dropout).

    inputs            : [B, P, N, d_model]
    enc_K, enc_V      : [B, P_enc, N, H, d_k]
    c_targets         : unused (noML=True)
    tm_full           : [n_pre, P*N, P*N]  (expand_transition_matrices, computed once)
    gen_graph_targets : [B, P, N, N]       adaptive graph
    """
    # TODO(synk): MetaLearner (noML=False) and the single-step recurrent retention
    #             path (T==1 with num) are not implemented; dropout is identity.
    del c_targets, num
    B, P, N, D = inputs.shape
    M = P * N
    H, dk = NUM_HEADS, D_K
    Pe = enc_K.shape[1]
    Me = Pe * N
    n_pre = sum(WHICH_TM)
    hid = n_pre + (0 if NO_AG else 1)

    x = inputs.reshape(B, M, D)
    ag = gen_graph_targets.reshape(B, M, N)
    ek = enc_K.reshape(B, Me, H * dk)
    ev = enc_V.reshape(B, Me, H * dk)

    p = params
    batch_args = [x, ag, ek, ev]
    const_args = [
        p['tsr_wqkv'], p['rmask'],
        p['ssa_wqkv'], tm_full, p['blk'], p['tilen'],
        p['teda_wq'], p['mbias'],
        p['gdc_w1'], p['gdc_w2'], p['gdc2_w1'], p['gdc2_w2'],
        p['sw_wg'], p['sw_bg'], p['sw_wo'], p['sw_bo'],
        p['ln_g'], p['ln_b'],
        p['ffn_w1'], p['ffn_b1'], p['ffn_w2'], p['ffn_b2'],
    ]
    kern = functools.partial(_decoder_layer_kernel,
                             num_heads=H, dk=dk, n_pre=n_pre, hid=hid)
    out = pl.pallas_call(
        kern,
        out_shape=jax.ShapeDtypeStruct((B, M, D), jnp.float32),
        grid=(B,),
        in_specs=[_batch_spec(a.shape) for a in batch_args]
        + [_const_spec(a.shape) for a in const_args],
        out_specs=_batch_spec((B, M, D)),
        compiler_params=pltpu.CompilerParams(dimension_semantics=("parallel",)),
    )(*batch_args, *const_args)
    return out.reshape(B, P, N, D)


# ----------------------------- static graph expansion (once, outside jit) ------------
def expand_transition_matrices(transition_matrices, P, N):
    # select graphs per WHICH_TM and kron-expand to block-diagonal over the P
    # decoder timesteps.  Static graph data -> computed once, outside the forward.
    sel = [i for i, u in enumerate(WHICH_TM) if u]
    tm_sel = jnp.stack([transition_matrices[i] for i in sel], axis=0).astype(jnp.float32)
    eyeP = jnp.eye(P, dtype=jnp.float32)
    return jnp.einsum('pq,gnm->gpnqm', eyeP, tm_sel).reshape(len(sel), P * N, P * N)


# ----------------------------- parameter / mask init -----------------------------
def init_params(key, P, N, P_enc):
    D, DK, H, DFF = D_MODEL, D_K, NUM_HEADS, D_HIDDEN_FF
    M, Me = P * N, P_enc * N
    n_pre = sum(WHICH_TM)
    hid = n_pre + (0 if NO_AG else 1)
    keys = iter(jax.random.split(key, 256))

    def w(din, dout):
        return jax.random.normal(next(keys), (din, dout), jnp.float32) / math.sqrt(din)

    def bias(dout):
        return jax.random.normal(next(keys), (1, dout), jnp.float32) * 0.02

    def gdc_blockdiag(num_gates, dk_g, dm):
        # xavier-normal per-gate [dk_g, dm] weights packed block-diagonally
        std = math.sqrt(2.0 / (dk_g + dm))
        out = jnp.zeros((num_gates * dk_g, num_gates * dm), jnp.float32)
        for g in range(num_gates):
            blkw = jax.random.normal(next(keys), (dk_g, dm), jnp.float32) * std
            out = out.at[g * dk_g:(g + 1) * dk_g, g * dm:(g + 1) * dm].set(blkw)
        return out

    # --- projections (Q/K/V concatenated into one wide weight per module) ---
    tsr_wqkv = jnp.concatenate([w(D, H * DK) for _ in range(3)], axis=1)
    ssa_wqkv = jnp.concatenate(
        [jnp.concatenate([w(D, H * DK) for _ in range(3)], axis=1) for _ in range(hid)],
        axis=1)                                            # [D, hid*3*H*dk]
    teda_wq = w(D, H * DK)

    # --- Gated_Dynamic_Connection packed block-diagonal weights ---
    # slot 0: TSR (heads), slots 1..hid: SSA gat1 per graph, slot 1+hid: TEDA (heads)
    gdc_w1 = jnp.stack([gdc_blockdiag(H, DK, D) for _ in range(hid + 2)], axis=0)
    gdc_w2 = jnp.stack([gdc_blockdiag(H, DK, D) for _ in range(hid + 2)], axis=0)
    gdc2_w1 = gdc_blockdiag(hid, D, D)                     # SSA gat2 over graphs
    gdc2_w2 = gdc_blockdiag(hid, D, D)

    # --- Swish / LayerNorm / FFN ---
    sw_wg = jnp.stack([w(D, D) for _ in range(3)], axis=0)
    sw_bg = jnp.stack([bias(D) for _ in range(3)], axis=0)
    sw_wo = jnp.stack([w(D, D) for _ in range(3)], axis=0)
    sw_bo = jnp.stack([bias(D) for _ in range(3)], axis=0)
    ln_g = jnp.ones((4, 1, D), jnp.float32)
    ln_b = jnp.zeros((4, 1, D), jnp.float32)
    ffn_w1, ffn_b1 = w(D, DFF), bias(DFF)
    ffn_w2, ffn_b2 = w(DFF, D), bias(D)

    # --- shape-static masks (hoisted out of the forward) ---
    # retention decay D and positional factor (D_and_pos, max_len=12, theta=1)
    r = 1.0 - 2.0 ** (-5.0 - jnp.arange(H, dtype=jnp.float32))
    n_idx = jnp.arange(MAX_LEN)
    diff = (n_idx[:, None] - n_idx[None, :]).astype(jnp.float32)
    Dmat = jnp.where(diff >= 0.0, r[:, None, None] ** jnp.maximum(diff, 0.0)[None], 0.0)
    Dmat = Dmat / jnp.sqrt(jnp.sum(Dmat, axis=-1, keepdims=True))
    nvec = jnp.arange(1, MAX_LEN + 1, dtype=jnp.float32)
    pos = jnp.stack([jnp.cos(nvec), jnp.sin(nvec)], axis=0)
    posfac = pos[0, :P, None] * pos[0, None, :P] + pos[1, :P, None] * pos[1, None, :P]
    pd = posfac[None] * Dmat[:, :P, :P]                    # [H, P, P]
    eyeN = jnp.eye(N, dtype=jnp.float32)
    rmask = jnp.einsum('hpq,nm->hpnqm', pd, eyeN).reshape(H, M, M)
    # same-timestep block mask + adaptive-graph column selector
    blk = jnp.einsum('pq,nm->pnqm', jnp.eye(P, dtype=jnp.float32),
                     jnp.ones((N, N), jnp.float32)).reshape(M, M)
    tilen = jnp.tile(eyeN, (1, P))                         # [N, M]
    # enc/dec attention: same-node mask bias
    valid = jnp.einsum('pq,nm->pnqm', jnp.ones((P, P_enc), jnp.float32),
                       eyeN).reshape(M, Me)
    mbias = jnp.where(valid > 0.0, 0.0, -1e30).astype(jnp.float32)

    return dict(tsr_wqkv=tsr_wqkv, rmask=rmask,
                ssa_wqkv=ssa_wqkv, blk=blk, tilen=tilen,
                teda_wq=teda_wq, mbias=mbias,
                gdc_w1=gdc_w1, gdc_w2=gdc_w2, gdc2_w1=gdc2_w1, gdc2_w2=gdc2_w2,
                sw_wg=sw_wg, sw_bg=sw_bg, sw_wo=sw_wo, sw_bo=sw_bo,
                ln_g=ln_g, ln_b=ln_b,
                ffn_w1=ffn_w1, ffn_b1=ffn_b1, ffn_w2=ffn_w2, ffn_b2=ffn_b2)


# ----------------------------- main -----------------------------
if __name__ == "__main__":
    B, P, P_ENC, N = 2, 4, 6, 8
    key = jax.random.PRNGKey(0)
    (k_in, k_ck, k_cv, k_ct, k_tm1, k_tm2, k_ag1, k_ag2, k_par) = jax.random.split(key, 9)

    inputs = jax.random.normal(k_in, (B, P, N, D_MODEL), jnp.float32)
    enc_K = jax.random.normal(k_ck, (B, P_ENC, N, NUM_HEADS, D_K), jnp.float32)
    enc_V = jax.random.normal(k_cv, (B, P_ENC, N, NUM_HEADS, D_K), jnp.float32)
    c_targets = jax.random.normal(k_ct, (B, P, N, D_MODEL), jnp.float32)
    tm_mask = (jax.random.uniform(k_tm1, (2, N, N)) > 0.4).astype(jnp.float32)
    transition_matrices = tm_mask * jax.random.uniform(k_tm2, (2, N, N))
    ag_mask = (jax.random.uniform(k_ag1, (B, P, N, N)) > 0.4).astype(jnp.float32)
    gen_graph_targets = ag_mask * jax.random.uniform(k_ag2, (B, P, N, N))

    params = init_params(k_par, P, N, P_ENC)
    # static graph data: kron-expanded once, outside the jitted forward
    tm_full = expand_transition_matrices(transition_matrices, P, N)

    fwd = jax.jit(decoder_layer_forward)
    out = fwd(params, inputs, enc_K, enc_V, c_targets, tm_full, gen_graph_targets)
    jax.block_until_ready(out)
    assert out.shape == (B, P, N, D_MODEL)
    assert bool(jnp.all(jnp.isfinite(out)))
    print("KERNEL_OK")
</pallas_src>

<mosaic_0001>
module attributes {stable_mosaic.version = 11 : i64} {
  func.func @_decoder_layer_kernel(%arg0: i32, %arg1: memref<1x32x32xf32, #tpu.memory_space<vmem>>, %arg2: memref<1x32x8xf32, #tpu.memory_space<vmem>>, %arg3: memref<1x48x32xf32, #tpu.memory_space<vmem>>, %arg4: memref<1x48x32xf32, #tpu.memory_space<vmem>>, %arg5: memref<32x96xf32, #tpu.memory_space<vmem>>, %arg6: memref<2x32x32xf32, #tpu.memory_space<vmem>>, %arg7: memref<32x192xf32, #tpu.memory_space<vmem>>, %arg8: memref<1x32x32xf32, #tpu.memory_space<vmem>>, %arg9: memref<32x32xf32, #tpu.memory_space<vmem>>, %arg10: memref<8x32xf32, #tpu.memory_space<vmem>>, %arg11: memref<32x32xf32, #tpu.memory_space<vmem>>, %arg12: memref<32x48xf32, #tpu.memory_space<vmem>>, %arg13: memref<4x32x64xf32, #tpu.memory_space<vmem>>, %arg14: memref<4x32x64xf32, #tpu.memory_space<vmem>>, %arg15: memref<64x64xf32, #tpu.memory_space<vmem>>, %arg16: memref<64x64xf32, #tpu.memory_space<vmem>>, %arg17: memref<3x32x32xf32, #tpu.memory_space<vmem>>, %arg18: memref<3x1x32xf32, #tpu.memory_space<vmem>>, %arg19: memref<3x32x32xf32, #tpu.memory_space<vmem>>, %arg20: memref<3x1x32xf32, #tpu.memory_space<vmem>>, %arg21: memref<4x1x32xf32, #tpu.memory_space<vmem>>, %arg22: memref<4x1x32xf32, #tpu.memory_space<vmem>>, %arg23: memref<32x64xf32, #tpu.memory_space<vmem>>, %arg24: memref<1x64xf32, #tpu.memory_space<vmem>>, %arg25: memref<64x32xf32, #tpu.memory_space<vmem>>, %arg26: memref<1x32xf32, #tpu.memory_space<vmem>>, %arg27: memref<1x32x32xf32, #tpu.memory_space<vmem>>) attributes {dimension_semantics = [#tpu.dimension_semantics<parallel>], iteration_bounds = array<i64: 2>, scalar_prefetch = 0 : i64, scratch_operands = 0 : i64, tpu.core_type = #tpu.core_type<tc>, window_params = [{transform_indices = @transform_0, window_bounds = array<i64: 1, 32, 32>}, {transform_indices = @transform_1, window_bounds = array<i64: 1, 32, 8>}, {transform_indices = @transform_2, window_bounds = array<i64: 1, 48, 32>}, {transform_indices = @transform_3, window_bounds = array<i64: 1, 48, 32>}, {pipeline_mode = #tpu.pipeline_mode<synchronous>, transform_indices = @transform_4, window_bounds = array<i64: 32, 96>}, {pipeline_mode = #tpu.pipeline_mode<synchronous>, transform_indices = @transform_5, window_bounds = array<i64: 2, 32, 32>}, {pipeline_mode = #tpu.pipeline_mode<synchronous>, transform_indices = @transform_6, window_bounds = array<i64: 32, 192>}, {pipeline_mode = #tpu.pipeline_mode<synchronous>, transform_indices = @transform_7, window_bounds = array<i64: 1, 32, 32>}, {pipeline_mode = #tpu.pipeline_mode<synchronous>, transform_indices = @transform_8, window_bounds = array<i64: 32, 32>}, {pipeline_mode = #tpu.pipeline_mode<synchronous>, transform_indices = @transform_9, window_bounds = array<i64: 8, 32>}, {pipeline_mode = #tpu.pipeline_mode<synchronous>, transform_indices = @transform_10, window_bounds = array<i64: 32, 32>}, {pipeline_mode = #tpu.pipeline_mode<synchronous>, transform_indices = @transform_11, window_bounds = array<i64: 32, 48>}, {pipeline_mode = #tpu.pipeline_mode<synchronous>, transform_indices = @transform_12, window_bounds = array<i64: 4, 32, 64>}, {pipeline_mode = #tpu.pipeline_mode<synchronous>, transform_indices = @transform_13, window_bounds = array<i64: 4, 32, 64>}, {pipeline_mode = #tpu.pipeline_mode<synchronous>, transform_indices = @transform_14, window_bounds = array<i64: 64, 64>}, {pipeline_mode = #tpu.pipeline_mode<synchronous>, transform_indices = @transform_15, window_bounds = array<i64: 64, 64>}, {pipeline_mode = #tpu.pipeline_mode<synchronous>, transform_indices = @transform_16, window_bounds = array<i64: 3, 32, 32>}, {pipeline_mode = #tpu.pipeline_mode<synchronous>, transform_indices = @transform_17, window_bounds = array<i64: 3, 1, 32>}, {pipeline_mode = #tpu.pipeline_mode<synchronous>, transform_indices = @transform_18, window_bounds = array<i64: 3, 32, 32>}, {pipeline_mode = #tpu.pipeline_mode<synchronous>, transform_indices = @transform_19, window_bounds = array<i64: 3, 1, 32>}, {pipeline_mode = #tpu.pipeline_mode<synchronous>, transform_indices = @transform_20, window_bounds = array<i64: 4, 1, 32>}, {pipeline_mode = #tpu.pipeline_mode<synchronous>, transform_indices = @transform_21, window_bounds = array<i64: 4, 1, 32>}, {pipeline_mode = #tpu.pipeline_mode<synchronous>, transform_indices = @transform_22, window_bounds = array<i64: 32, 64>}, {pipeline_mode = #tpu.pipeline_mode<synchronous>, transform_indices = @transform_23, window_bounds = array<i64: 1, 64>}, {pipeline_mode = #tpu.pipeline_mode<synchronous>, transform_indices = @transform_24, window_bounds = array<i64: 64, 32>}, {pipeline_mode = #tpu.pipeline_mode<synchronous>, transform_indices = @transform_25, window_bounds = array<i64: 1, 32>}, {transform_indices = @transform_26, window_bounds = array<i64: 1, 32, 32>}]} {
    %c0 = arith.constant 0 : index
    %c0_0 = arith.constant 0 : index
    %c0_1 = arith.constant 0 : index
    %0 = vector.load %arg1[%c0, %c0_0, %c0_1] : memref<1x32x32xf32, #tpu.memory_space<vmem>>, vector<1x32x32xf32>
    %1 = vector.shape_cast %0 : vector<1x32x32xf32> to vector<32x32xf32>
    %c0_2 = arith.constant 0 : index
    %c0_3 = arith.constant 0 : index
    %2 = vector.load %arg5[%c0_2, %c0_3] : memref<32x96xf32, #tpu.memory_space<vmem>>, vector<32x96xf32>
    %cst = arith.constant dense<0.000000e+00> : vector<32x96xf32>
    %3 = tpu.matmul %1, %2, %cst {dimension_numbers = #tpu.dot_dimension_numbers<[1], [0], [0], [1], [0, 0, 1, 1], [], []>} : vector<32x32xf32>, vector<32x96xf32>, vector<32x96xf32> -> vector<32x96xf32>
    %4 = vector.extract_strided_slice %3 {offsets = [0, 0], sizes = [32, 16], strides = [1, 1]} : vector<32x96xf32> to vector<32x16xf32>
    %5 = vector.extract_strided_slice %3 {offsets = [0, 32], sizes = [32, 16], strides = [1, 1]} : vector<32x96xf32> to vector<32x16xf32>
    %6 = vector.extract_strided_slice %3 {offsets = [0, 64], sizes = [32, 16], strides = [1, 1]} : vector<32x96xf32> to vector<32x16xf32>
    %cst_4 = arith.constant dense<0.000000e+00> : vector<32x32xf32>
    %7 = tpu.matmul %4, %5, %cst_4 {dimension_numbers = #tpu.dot_dimension_numbers<[1], [1], [0], [0], [0, 0, 1, 0], [], []>} : vector<32x16xf32>, vector<32x16xf32>, vector<32x32xf32> -> vector<32x32xf32>
    %cst_5 = arith.constant 2.500000e-01 : f32
    %8 = vector.broadcast %cst_5 : f32 to vector<32x32xf32>
    %9 = arith.mulf %7, %8 : vector<32x32xf32>
    %c0_6 = arith.constant 0 : index
    %c0_7 = arith.constant 0 : index
    %c0_8 = arith.constant 0 : index
    %10 = vector.load %arg6[%c0_6, %c0_7, %c0_8] : memref<2x32x32xf32, #tpu.memory_space<vmem>>, vector<1x32x32xf32>
    %11 = vector.shape_cast %10 : vector<1x32x32xf32> to vector<32x32xf32>
    %12 = arith.mulf %9, %11 : vector<32x32xf32>
    %cst_9 = arith.constant dense<0.000000e+00> : vector<32xf32>
    %13 = vector.multi_reduction <add>, %12, %cst_9 [1] : vector<32x32xf32> to vector<32xf32>
    %14 = vector.shape_cast %13 : vector<32xf32> to vector<32x1xf32>
    %15 = math.absf %14 : vector<32x1xf32>
    %cst_10 = arith.constant 1.000000e+00 : f32
    %16 = vector.broadcast %cst_10 : f32 to vector<32x1xf32>
    %17 = arith.maximumf %15, %16 : vector<32x1xf32>
    %cst_11 = arith.constant dense<0.000000e+00> : vector<32x16xf32>
    %18 = tpu.matmul %12, %6, %cst_11 {dimension_numbers = #tpu.dot_dimension_numbers<[1], [0], [0], [1], [0, 0, 1, 1], [], []>} : vector<32x32xf32>, vector<32x16xf32>, vector<32x16xf32> -> vector<32x16xf32>
    %19 = tpu.reciprocal %17 {approx = true} : vector<32x1xf32> -> vector<32x1xf32>
    %20 = vector.broadcast %19 : vector<32x1xf32> to vector<32x16xf32>
    %21 = arith.mulf %18, %20 : vector<32x16xf32>
    %cst_12 = arith.constant dense<0.000000e+00> : vector<32xf32>
    %22 = vector.multi_reduction <add>, %21, %cst_12 [1] : vector<32x16xf32> to vector<32xf32>
    %23 = vector.shape_cast %22 : vector<32xf32> to vector<32x1xf32>
    %cst_13 = arith.constant 1.600000e+01 : f32
    %24 = vector.broadcast %cst_13 : f32 to vector<32x1xf32>
    %25 = arith.divf %23, %24 : vector<32x1xf32>
    %26 = arith.mulf %21, %21 : vector<32x16xf32>
    %cst_14 = arith.constant dense<0.000000e+00> : vector<32xf32>
    %27 = vector.multi_reduction <add>, %26, %cst_14 [1] : vector<32x16xf32> to vector<32xf32>
    %28 = vector.shape_cast %27 : vector<32xf32> to vector<32x1xf32>
    %cst_15 = arith.constant 1.600000e+01 : f32
    %29 = vector.broadcast %cst_15 : f32 to vector<32x1xf32>
    %30 = arith.divf %28, %29 : vector<32x1xf32>
    %31 = arith.mulf %25, %25 : vector<32x1xf32>
    %32 = arith.subf %30, %31 : vector<32x1xf32>
    %cst_16 = arith.constant 0.000000e+00 : f32
    %33 = vector.broadcast %cst_16 : f32 to vector<32x1xf32>
    %34 = arith.maximumf %32, %33 : vector<32x1xf32>
    %cst_17 = arith.constant 0.000000e+00 : f32
    %35 = vector.broadcast %cst_17 : f32 to vector<32x1xf32>
    %36 = arith.cmpf ogt, %34, %35 : vector<32x1xf32>
    %37 = vector.broadcast %25 : vector<32x1xf32> to vector<32x16xf32>
    %38 = arith.subf %21, %37 : vector<32x16xf32>
    %cst_18 = arith.constant 0.000000e+00 : f32
    %39 = vector.broadcast %cst_18 : f32 to vector<32x1xf32>
    %40 = arith.cmpf ogt, %34, %39 : vector<32x1xf32>
    %cst_19 = arith.constant 1.000000e+00 : f32
    %41 = vector.broadcast %cst_19 : f32 to vector<32x1xf32>
    %42 = arith.select %40, %34, %41 : vector<32x1xi1>, vector<32x1xf32>
    %43 = math.rsqrt %42 : vector<32x1xf32>
    %44 = vector.broadcast %43 : vector<32x1xf32> to vector<32x16xf32>
    %45 = arith.mulf %38, %44 : vector<32x16xf32>
    %cst_20 = arith.constant 0.000000e+00 : f32
    %46 = vector.shape_cast %36 : vector<32x1xi1> to vector<32x1xi1>
    %47 = vector.broadcast %46 : vector<32x1xi1> to vector<32x16xi1>
    %48 = vector.broadcast %cst_20 : f32 to vector<32x16xf32>
    %49 = arith.select %47, %45, %48 : vector<32x16xi1>, vector<32x16xf32>
    %50 = math.tanh %49 : vector<32x16xf32>
    %cst_21 = arith.constant 3.000000e+00 : f32
    %51 = vector.broadcast %cst_21 : f32 to vector<32x16xf32>
    %52 = arith.mulf %51, %50 : vector<32x16xf32>
    %53 = vector.extract_strided_slice %3 {offsets = [0, 16], sizes = [32, 16], strides = [1, 1]} : vector<32x96xf32> to vector<32x16xf32>
    %54 = vector.extract_strided_slice %3 {offsets = [0, 48], sizes = [32, 16], strides = [1, 1]} : vector<32x96xf32> to vector<32x16xf32>
    %55 = vector.extract_strided_slice %3 {offsets = [0, 80], sizes = [32, 16], strides = [1, 1]} : vector<32x96xf32> to vector<32x16xf32>
    %cst_22 = arith.constant dense<0.000000e+00> : vector<32x32xf32>
    %56 = tpu.matmul %53, %54, %cst_22 {dimension_numbers = #tpu.dot_dimension_numbers<[1], [1], [0], [0], [0, 0, 1, 0], [], []>} : vector<32x16xf32>, vector<32x16xf32>, vector<32x32xf32> -> vector<32x32xf32>
    %cst_23 = arith.constant 2.500000e-01 : f32
    %57 = vector.broadcast %cst_23 : f32 to vector<32x32xf32>
    %58 = arith.mulf %56, %57 : vector<32x32xf32>
    %c1 = arith.constant 1 : index
    %c0_24 = arith.constant 0 : index
    %c0_25 = arith.constant 0 : index
    %59 = vector.load %arg6[%c1, %c0_24, %c0_25] : memref<2x32x32xf32, #tpu.memory_space<vmem>>, vector<1x32x32xf32>
    %60 = vector.shape_cast %59 : vector<1x32x32xf32> to vector<32x32xf32>
    %61 = arith.mulf %58, %60 : vector<32x32xf32>
    %cst_26 = arith.constant dense<0.000000e+00> : vector<32xf32>
    %62 = vector.multi_reduction <add>, %61, %cst_26 [1] : vector<32x32xf32> to vector<32xf32>
    %63 = vector.shape_cast %62 : vector<32xf32> to vector<32x1xf32>
    %64 = math.absf %63 : vector<32x1xf32>
    %cst_27 = arith.constant 1.000000e+00 : f32
    %65 = vector.broadcast %cst_27 : f32 to vector<32x1xf32>
    %66 = arith.maximumf %64, %65 : vector<32x1xf32>
    %cst_28 = arith.constant dense<0.000000e+00> : vector<32x16xf32>
    %67 = tpu.matmul %61, %55, %cst_28 {dimension_numbers = #tpu.dot_dimension_numbers<[1], [0], [0], [1], [0, 0, 1, 1], [], []>} : vector<32x32xf32>, vector<32x16xf32>, vector<32x16xf32> -> vector<32x16xf32>
    %68 = tpu.reciprocal %66 {approx = true} : vector<32x1xf32> -> vector<32x1xf32>
    %69 = vector.broadcast %68 : vector<32x1xf32> to vector<32x16xf32>
    %70 = arith.mulf %67, %69 : vector<32x16xf32>
    %cst_29 = arith.constant dense<0.000000e+00> : vector<32xf32>
    %71 = vector.multi_reduction <add>, %70, %cst_29 [1] : vector<32x16xf32> to vector<32xf32>
    %72 = vector.shape_cast %71 : vector<32xf32> to vector<32x1xf32>
    %cst_30 = arith.constant 1.600000e+01 : f32
    %73 = vector.broadcast %cst_30 : f32 to vector<32x1xf32>
    %74 = arith.divf %72, %73 : vector<32x1xf32>
    %75 = arith.mulf %70, %70 : vector<32x16xf32>
    %cst_31 = arith.constant dense<0.000000e+00> : vector<32xf32>
    %76 = vector.multi_reduction <add>, %75, %cst_31 [1] : vector<32x16xf32> to vector<32xf32>
    %77 = vector.shape_cast %76 : vector<32xf32> to vector<32x1xf32>
    %cst_32 = arith.constant 1.600000e+01 : f32
    %78 = vector.broadcast %cst_32 : f32 to vector<32x1xf32>
    %79 = arith.divf %77, %78 : vector<32x1xf32>
    %80 = arith.mulf %74, %74 : vector<32x1xf32>
    %81 = arith.subf %79, %80 : vector<32x1xf32>
    %cst_33 = arith.constant 0.000000e+00 : f32
    %82 = vector.broadcast %cst_33 : f32 to vector<32x1xf32>
    %83 = arith.maximumf %81, %82 : vector<32x1xf32>
    %cst_34 = arith.constant 0.000000e+00 : f32
    %84 = vector.broadcast %cst_34 : f32 to vector<32x1xf32>
    %85 = arith.cmpf ogt, %83, %84 : vector<32x1xf32>
    %86 = vector.broadcast %74 : vector<32x1xf32> to vector<32x16xf32>
    %87 = arith.subf %70, %86 : vector<32x16xf32>
    %cst_35 = arith.constant 0.000000e+00 : f32
    %88 = vector.broadcast %cst_35 : f32 to vector<32x1xf32>
    %89 = arith.cmpf ogt, %83, %88 : vector<32x1xf32>
    %cst_36 = arith.constant 1.000000e+00 : f32
    %90 = vector.broadcast %cst_36 : f32 to vector<32x1xf32>
    %91 = arith.select %89, %83, %90 : vector<32x1xi1>, vector<32x1xf32>
    %92 = math.rsqrt %91 : vector<32x1xf32>
    %93 = vector.broadcast %92 : vector<32x1xf32> to vector<32x16xf32>
    %94 = arith.mulf %87, %93 : vector<32x16xf32>
    %cst_37 = arith.constant 0.000000e+00 : f32
    %95 = vector.shape_cast %85 : vector<32x1xi1> to vector<32x1xi1>
    %96 = vector.broadcast %95 : vector<32x1xi1> to vector<32x16xi1>
    %97 = vector.broadcast %cst_37 : f32 to vector<32x16xf32>
    %98 = arith.select %96, %94, %97 : vector<32x16xi1>, vector<32x16xf32>
    %99 = math.tanh %98 : vector<32x16xf32>
    %cst_38 = arith.constant 3.000000e+00 : f32
    %100 = vector.broadcast %cst_38 : f32 to vector<32x16xf32>
    %101 = arith.mulf %100, %99 : vector<32x16xf32>
    %102 = tpu.concatenate %52, %101 in 1 : vector<32x16xf32>, vector<32x16xf32> -> vector<32x32xf32>
    %c0_39 = arith.constant 0 : index
    %c0_40 = arith.constant 0 : index
    %c0_41 = arith.constant 0 : index
    %103 = vector.load %arg13[%c0_39, %c0_40, %c0_41] : memref<4x32x64xf32, #tpu.memory_space<vmem>>, vector<1x32x64xf32>
    %104 = vector.shape_cast %103 : vector<1x32x64xf32> to vector<32x64xf32>
    %c0_42 = arith.constant 0 : index
    %c0_43 = arith.constant 0 : index
    %c0_44 = arith.constant 0 : index
    %105 = vector.load %arg14[%c0_42, %c0_43, %c0_44] : memref<4x32x64xf32, #tpu.memory_space<vmem>>, vector<1x32x64xf32>
    %106 = vector.shape_cast %105 : vector<1x32x64xf32> to vector<32x64xf32>
    %cst_45 = arith.constant dense<0.000000e+00> : vector<32x64xf32>
    %107 = tpu.matmul %102, %104, %cst_45 {dimension_numbers = #tpu.dot_dimension_numbers<[1], [0], [0], [1], [0, 0, 1, 1], [], []>} : vector<32x32xf32>, vector<32x64xf32>, vector<32x64xf32> -> vector<32x64xf32>
    %cst_46 = arith.constant dense<0.000000e+00> : vector<32x64xf32>
    %108 = tpu.matmul %102, %106, %cst_46 {dimension_numbers = #tpu.dot_dimension_numbers<[1], [0], [0], [1], [0, 0, 1, 1], [], []>} : vector<32x32xf32>, vector<32x64xf32>, vector<32x64xf32> -> vector<32x64xf32>
    %cst_47 = arith.constant 0.000000e+00 : f32
    %109 = vector.broadcast %cst_47 : f32 to vector<32x64xf32>
    %110 = arith.maximumf %108, %109 : vector<32x64xf32>
    %111 = vector.extract_strided_slice %107 {offsets = [0, 0], sizes = [32, 32], strides = [1, 1]} : vector<32x64xf32> to vector<32x32xf32>
    %112 = vector.extract_strided_slice %107 {offsets = [0, 32], sizes = [32, 32], strides = [1, 1]} : vector<32x64xf32> to vector<32x32xf32>
    %113 = vector.extract_strided_slice %110 {offsets = [0, 0], sizes = [32, 32], strides = [1, 1]} : vector<32x64xf32> to vector<32x32xf32>
    %114 = vector.extract_strided_slice %110 {offsets = [0, 32], sizes = [32, 32], strides = [1, 1]} : vector<32x64xf32> to vector<32x32xf32>
    %115 = arith.maximumf %113, %114 : vector<32x32xf32>
    %116 = arith.subf %113, %115 : vector<32x32xf32>
    %117 = math.exp %116 : vector<32x32xf32>
    %118 = arith.subf %114, %115 : vector<32x32xf32>
    %119 = math.exp %118 : vector<32x32xf32>
    %120 = arith.addf %117, %119 : vector<32x32xf32>
    %121 = arith.mulf %111, %117 : vector<32x32xf32>
    %122 = arith.mulf %112, %119 : vector<32x32xf32>
    %123 = arith.addf %121, %122 : vector<32x32xf32>
    %124 = tpu.reciprocal %120 {approx = true} : vector<32x32xf32> -> vector<32x32xf32>
    %125 = arith.mulf %123, %124 : vector<32x32xf32>
    %c0_48 = arith.constant 0 : index
    %c0_49 = arith.constant 0 : index
    %c0_50 = arith.constant 0 : index
    %126 = vector.load %arg17[%c0_48, %c0_49, %c0_50] : memref<3x32x32xf32, #tpu.memory_space<vmem>>, vector<1x32x32xf32>
    %127 = vector.shape_cast %126 : vector<1x32x32xf32> to vector<32x32xf32>
    %c0_51 = arith.constant 0 : index
    %c0_52 = arith.constant 0 : index
    %c0_53 = arith.constant 0 : index
    %128 = vector.load %arg18[%c0_51, %c0_52, %c0_53] : memref<3x1x32xf32, #tpu.memory_space<vmem>>, vector<1x1x32xf32>
    %129 = vector.shape_cast %128 : vector<1x1x32xf32> to vector<1x32xf32>
    %c0_54 = arith.constant 0 : index
    %c0_55 = arith.constant 0 : index
    %c0_56 = arith.constant 0 : index
    %130 = vector.load %arg19[%c0_54, %c0_55, %c0_56] : memref<3x32x32xf32, #tpu.memory_space<vmem>>, vector<1x32x32xf32>
    %131 = vector.shape_cast %130 : vector<1x32x32xf32> to vector<32x32xf32>
    %c0_57 = arith.constant 0 : index
    %c0_58 = arith.constant 0 : index
    %c0_59 = arith.constant 0 : index
    %132 = vector.load %arg20[%c0_57, %c0_58, %c0_59] : memref<3x1x32xf32, #tpu.memory_space<vmem>>, vector<1x1x32xf32>
    %133 = vector.shape_cast %132 : vector<1x1x32xf32> to vector<1x32xf32>
    %c0_60 = arith.constant 0 : index
    %c0_61 = arith.constant 0 : index
    %c0_62 = arith.constant 0 : index
    %134 = vector.load %arg21[%c0_60, %c0_61, %c0_62] : memref<4x1x32xf32, #tpu.memory_space<vmem>>, vector<1x1x32xf32>
    %135 = vector.shape_cast %134 : vector<1x1x32xf32> to vector<1x32xf32>
    %c0_63 = arith.constant 0 : index
    %c0_64 = arith.constant 0 : index
    %c0_65 = arith.constant 0 : index
    %136 = vector.load %arg22[%c0_63, %c0_64, %c0_65] : memref<4x1x32xf32, #tpu.memory_space<vmem>>, vector<1x1x32xf32>
    %137 = vector.shape_cast %136 : vector<1x1x32xf32> to vector<1x32xf32>
    %cst_66 = arith.constant dense<0.000000e+00> : vector<32x32xf32>
    %138 = tpu.matmul %1, %127, %cst_66 {dimension_numbers = #tpu.dot_dimension_numbers<[1], [0], [0], [1], [0, 0, 1, 1], [], []>} : vector<32x32xf32>, vector<32x32xf32>, vector<32x32xf32> -> vector<32x32xf32>
    %139 = vector.broadcast %129 : vector<1x32xf32> to vector<32x32xf32>
    %140 = arith.addf %138, %139 : vector<32x32xf32>
    %141 = arith.mulf %140, %125 : vector<32x32xf32>
    %142 = arith.negf %141 : vector<32x32xf32>
    %143 = math.exp %142 : vector<32x32xf32>
    %cst_67 = arith.constant 1.000000e+00 : f32
    %144 = vector.broadcast %cst_67 : f32 to vector<32x32xf32>
    %145 = arith.addf %144, %143 : vector<32x32xf32>
    %146 = arith.divf %144, %145 : vector<32x32xf32>
    %147 = arith.mulf %141, %146 : vector<32x32xf32>
    %cst_68 = arith.constant dense<0.000000e+00> : vector<32x32xf32>
    %148 = tpu.matmul %147, %131, %cst_68 {dimension_numbers = #tpu.dot_dimension_numbers<[1], [0], [0], [1], [0, 0, 1, 1], [], []>} : vector<32x32xf32>, vector<32x32xf32>, vector<32x32xf32> -> vector<32x32xf32>
    %149 = vector.broadcast %133 : vector<1x32xf32> to vector<32x32xf32>
    %150 = arith.addf %148, %149 : vector<32x32xf32>
    %151 = arith.addf %150, %1 : vector<32x32xf32>
    %cst_69 = arith.constant dense<0.000000e+00> : vector<32xf32>
    %152 = vector.multi_reduction <add>, %151, %cst_69 [1] : vector<32x32xf32> to vector<32xf32>
    %153 = vector.shape_cast %152 : vector<32xf32> to vector<32x1xf32>
    %cst_70 = arith.constant 3.200000e+01 : f32
    %154 = vector.broadcast %cst_70 : f32 to vector<32x1xf32>
    %155 = arith.divf %153, %154 : vector<32x1xf32>
    %156 = arith.mulf %151, %151 : vector<32x32xf32>
    %cst_71 = arith.constant dense<0.000000e+00> : vector<32xf32>
    %157 = vector.multi_reduction <add>, %156, %cst_71 [1] : vector<32x32xf32> to vector<32xf32>
    %158 = vector.shape_cast %157 : vector<32xf32> to vector<32x1xf32>
    %cst_72 = arith.constant 3.200000e+01 : f32
    %159 = vector.broadcast %cst_72 : f32 to vector<32x1xf32>
    %160 = arith.divf %158, %159 : vector<32x1xf32>
    %161 = arith.mulf %155, %155 : vector<32x1xf32>
    %162 = arith.subf %160, %161 : vector<32x1xf32>
    %cst_73 = arith.constant 0.000000e+00 : f32
    %163 = vector.broadcast %cst_73 : f32 to vector<32x1xf32>
    %164 = arith.maximumf %162, %163 : vector<32x1xf32>
    %165 = vector.broadcast %155 : vector<32x1xf32> to vector<32x32xf32>
    %166 = arith.subf %151, %165 : vector<32x32xf32>
    %cst_74 = arith.constant 9.99999974E-6 : f32
    %167 = vector.broadcast %cst_74 : f32 to vector<32x1xf32>
    %168 = arith.addf %164, %167 : vector<32x1xf32>
    %169 = math.rsqrt %168 : vector<32x1xf32>
    %170 = vector.broadcast %169 : vector<32x1xf32> to vector<32x32xf32>
    %171 = arith.mulf %166, %170 : vector<32x32xf32>
    %172 = vector.broadcast %135 : vector<1x32xf32> to vector<32x32xf32>
    %173 = arith.mulf %171, %172 : vector<32x32xf32>
    %174 = vector.broadcast %137 : vector<1x32xf32> to vector<32x32xf32>
    %175 = arith.addf %173, %174 : vector<32x32xf32>
    %c0_75 = arith.constant 0 : index
    %c0_76 = arith.constant 0 : index
    %176 = vector.load %arg7[%c0_75, %c0_76] : memref<32x192xf32, #tpu.memory_space<vmem>>, vector<32x192xf32>
    %cst_77 = arith.constant dense<0.000000e+00> : vector<32x192xf32>
    %177 = tpu.matmul %175, %176, %cst_77 {dimension_numbers = #tpu.dot_dimension_numbers<[1], [0], [0], [1], [0, 0, 1, 1], [], []>} : vector<32x32xf32>, vector<32x192xf32>, vector<32x192xf32> -> vector<32x192xf32>
    %c0_78 = arith.constant 0 : index
    %c0_79 = arith.constant 0 : index
    %178 = vector.load %arg9[%c0_78, %c0_79] : memref<32x32xf32, #tpu.memory_space<vmem>>, vector<32x32xf32>
    %c0_80 = arith.constant 0 : index
    %c0_81 = arith.constant 0 : index
    %c0_82 = arith.constant 0 : index
    %179 = vector.load %arg2[%c0_80, %c0_81, %c0_82] : memref<1x32x8xf32, #tpu.memory_space<vmem>>, vector<1x32x8xf32>
    %180 = vector.shape_cast %179 : vector<1x32x8xf32> to vector<32x8xf32>
    %c0_83 = arith.constant 0 : index
    %c0_84 = arith.constant 0 : index
    %181 = vector.load %arg10[%c0_83, %c0_84] : memref<8x32xf32, #tpu.memory_space<vmem>>, vector<8x32xf32>
    %cst_85 = arith.constant dense<0.000000e+00> : vector<32x32xf32>
    %182 = tpu.matmul %180, %181, %cst_85 {dimension_numbers = #tpu.dot_dimension_numbers<[1], [0], [0], [1], [0, 0, 1, 1], [], []>} : vector<32x8xf32>, vector<8x32xf32>, vector<32x32xf32> -> vector<32x32xf32>
    %183 = arith.mulf %182, %178 : vector<32x32xf32>
    %c0_86 = arith.constant 0 : index
    %c0_87 = arith.constant 0 : index
    %c0_88 = arith.constant 0 : index
    %184 = vector.load %arg8[%c0_86, %c0_87, %c0_88] : memref<1x32x32xf32, #tpu.memory_space<vmem>>, vector<1x32x32xf32>
    %185 = vector.shape_cast %184 : vector<1x32x32xf32> to vector<32x32xf32>
    %cst_89 = arith.constant 0.000000e+00 : f32
    %186 = vector.broadcast %cst_89 : f32 to vector<32x32xf32>
    %187 = arith.cmpf one, %185, %186 : vector<32x32xf32>
    %188 = arith.extui %187 : vector<32x32xi1> to vector<32x32xi32>
    %189 = arith.sitofp %188 : vector<32x32xi32> to vector<32x32xf32>
    %190 = vector.extract_strided_slice %177 {offsets = [0, 0], sizes = [32, 16], strides = [1, 1]} : vector<32x192xf32> to vector<32x16xf32>
    %191 = vector.extract_strided_slice %177 {offsets = [0, 32], sizes = [32, 16], strides = [1, 1]} : vector<32x192xf32> to vector<32x16xf32>
    %192 = vector.extract_strided_slice %177 {offsets = [0, 64], sizes = [32, 16], strides = [1, 1]} : vector<32x192xf32> to vector<32x16xf32>
    %cst_90 = arith.constant dense<0.000000e+00> : vector<32x32xf32>
    %193 = tpu.matmul %190, %191, %cst_90 {dimension_numbers = #tpu.dot_dimension_numbers<[1], [1], [0], [0], [0, 0, 1, 0], [], []>} : vector<32x16xf32>, vector<32x16xf32>, vector<32x32xf32> -> vector<32x32xf32>
    %cst_91 = arith.constant 2.500000e-01 : f32
    %194 = vector.broadcast %cst_91 : f32 to vector<32x32xf32>
    %195 = arith.mulf %193, %194 : vector<32x32xf32>
    %196 = arith.mulf %195, %189 : vector<32x32xf32>
    %cst_92 = arith.constant 0.000000e+00 : f32
    %197 = vector.broadcast %cst_92 : f32 to vector<32x32xf32>
    %198 = arith.cmpf ogt, %178, %197 : vector<32x32xf32>
    %cst_93 = arith.constant -1.000000e+30 : f32
    %199 = vector.broadcast %cst_93 : f32 to vector<32x32xf32>
    %200 = arith.select %198, %196, %199 : vector<32x32xi1>, vector<32x32xf32>
    %cst_94 = arith.constant dense<0xFF800000> : vector<32xf32>
    %201 = vector.multi_reduction <maximumf>, %200, %cst_94 [1] : vector<32x32xf32> to vector<32xf32>
    %202 = vector.shape_cast %201 : vector<32xf32> to vector<32x1xf32>
    %203 = vector.broadcast %202 : vector<32x1xf32> to vector<32x32xf32>
    %204 = arith.subf %196, %203 : vector<32x32xf32>
    %205 = math.exp %204 : vector<32x32xf32>
    %cst_95 = arith.constant 0.000000e+00 : f32
    %206 = vector.broadcast %cst_95 : f32 to vector<32x32xf32>
    %207 = arith.cmpf one, %196, %206 : vector<32x32xf32>
    %208 = arith.extui %207 : vector<32x32xi1> to vector<32x32xi32>
    %209 = arith.sitofp %208 : vector<32x32xi32> to vector<32x32xf32>
    %210 = arith.mulf %205, %209 : vector<32x32xf32>
    %cst_96 = arith.constant dense<0.000000e+00> : vector<32xf32>
    %211 = vector.multi_reduction <add>, %210, %cst_96 [1] : vector<32x32xf32> to vector<32xf32>
    %212 = vector.shape_cast %211 : vector<32xf32> to vector<32x1xf32>
    %cst_97 = arith.constant 9.99999974E-6 : f32
    %213 = vector.broadcast %cst_97 : f32 to vector<32x1xf32>
    %214 = arith.addf %212, %213 : vector<32x1xf32>
    %215 = tpu.reciprocal %214 {approx = true} : vector<32x1xf32> -> vector<32x1xf32>
    %216 = vector.broadcast %215 : vector<32x1xf32> to vector<32x32xf32>
    %217 = arith.mulf %210, %216 : vector<32x32xf32>
    %218 = arith.mulf %217, %185 : vector<32x32xf32>
    %cst_98 = arith.constant dense<0.000000e+00> : vector<32x16xf32>
    %219 = tpu.matmul %218, %192, %cst_98 {dimension_numbers = #tpu.dot_dimension_numbers<[1], [0], [0], [1], [0, 0, 1, 1], [], []>} : vector<32x32xf32>, vector<32x16xf32>, vector<32x16xf32> -> vector<32x16xf32>
    %220 = vector.extract_strided_slice %177 {offsets = [0, 16], sizes = [32, 16], strides = [1, 1]} : vector<32x192xf32> to vector<32x16xf32>
    %221 = vector.extract_strided_slice %177 {offsets = [0, 48], sizes = [32, 16], strides = [1, 1]} : vector<32x192xf32> to vector<32x16xf32>
    %222 = vector.extract_strided_slice %177 {offsets = [0, 80], sizes = [32, 16], strides = [1, 1]} : vector<32x192xf32> to vector<32x16xf32>
    %cst_99 = arith.constant dense<0.000000e+00> : vector<32x32xf32>
    %223 = tpu.matmul %220, %221, %cst_99 {dimension_numbers = #tpu.dot_dimension_numbers<[1], [1], [0], [0], [0, 0, 1, 0], [], []>} : vector<32x16xf32>, vector<32x16xf32>, vector<32x32xf32> -> vector<32x32xf32>
    %cst_100 = arith.constant 2.500000e-01 : f32
    %224 = vector.broadcast %cst_100 : f32 to vector<32x32xf32>
    %225 = arith.mulf %223, %224 : vector<32x32xf32>
    %226 = arith.mulf %225, %189 : vector<32x32xf32>
    %cst_101 = arith.constant 0.000000e+00 : f32
    %227 = vector.broadcast %cst_101 : f32 to vector<32x32xf32>
    %228 = arith.cmpf ogt, %178, %227 : vector<32x32xf32>
    %cst_102 = arith.constant -1.000000e+30 : f32
    %229 = vector.broadcast %cst_102 : f32 to vector<32x32xf32>
    %230 = arith.select %228, %226, %229 : vector<32x32xi1>, vector<32x32xf32>
    %cst_103 = arith.constant dense<0xFF800000> : vector<32xf32>
    %231 = vector.multi_reduction <maximumf>, %230, %cst_103 [1] : vector<32x32xf32> to vector<32xf32>
    %232 = vector.shape_cast %231 : vector<32xf32> to vector<32x1xf32>
    %233 = vector.broadcast %232 : vector<32x1xf32> to vector<32x32xf32>
    %234 = arith.subf %226, %233 : vector<32x32xf32>
    %235 = math.exp %234 : vector<32x32xf32>
    %cst_104 = arith.constant 0.000000e+00 : f32
    %236 = vector.broadcast %cst_104 : f32 to vector<32x32xf32>
    %237 = arith.cmpf one, %226, %236 : vector<32x32xf32>
    %238 = arith.extui %237 : vector<32x32xi1> to vector<32x32xi32>
    %239 = arith.sitofp %238 : vector<32x32xi32> to vector<32x32xf32>
    %240 = arith.mulf %235, %239 : vector<32x32xf32>
    %cst_105 = arith.constant dense<0.000000e+00> : vector<32xf32>
    %241 = vector.multi_reduction <add>, %240, %cst_105 [1] : vector<32x32xf32> to vector<32xf32>
    %242 = vector.shape_cast %241 : vector<32xf32> to vector<32x1xf32>
    %cst_106 = arith.constant 9.99999974E-6 : f32
    %243 = vector.broadcast %cst_106 : f32 to vector<32x1xf32>
    %244 = arith.addf %242, %243 : vector<32x1xf32>
    %245 = tpu.reciprocal %244 {approx = true} : vector<32x1xf32> -> vector<32x1xf32>
    %246 = vector.broadcast %245 : vector<32x1xf32> to vector<32x32xf32>
    %247 = arith.mulf %240, %246 : vector<32x32xf32>
    %248 = arith.mulf %247, %185 : vector<32x32xf32>
    %cst_107 = arith.constant dense<0.000000e+00> : vector<32x16xf32>
    %249 = tpu.matmul %248, %222, %cst_107 {dimension_numbers = #tpu.dot_dimension_numbers<[1], [0], [0], [1], [0, 0, 1, 1], [], []>} : vector<32x32xf32>, vector<32x16xf32>, vector<32x16xf32> -> vector<32x16xf32>
    %250 = tpu.concatenate %219, %249 in 1 : vector<32x16xf32>, vector<32x16xf32> -> vector<32x32xf32>
    %c1_108 = arith.constant 1 : index
    %c0_109 = arith.constant 0 : index
    %c0_110 = arith.constant 0 : index
    %251 = vector.load %arg13[%c1_108, %c0_109, %c0_110] : memref<4x32x64xf32, #tpu.memory_space<vmem>>, vector<1x32x64xf32>
    %252 = vector.shape_cast %251 : vector<1x32x64xf32> to vector<32x64xf32>
    %c1_111 = arith.constant 1 : index
    %c0_112 = arith.constant 0 : index
    %c0_113 = arith.constant 0 : index
    %253 = vector.load %arg14[%c1_111, %c0_112, %c0_113] : memref<4x32x64xf32, #tpu.memory_space<vmem>>, vector<1x32x64xf32>
    %254 = vector.shape_cast %253 : vector<1x32x64xf32> to vector<32x64xf32>
    %cst_114 = arith.constant dense<0.000000e+00> : vector<32x64xf32>
    %255 = tpu.matmul %250, %252, %cst_114 {dimension_numbers = #tpu.dot_dimension_numbers<[1], [0], [0], [1], [0, 0, 1, 1], [], []>} : vector<32x32xf32>, vector<32x64xf32>, vector<32x64xf32> -> vector<32x64xf32>
    %cst_115 = arith.constant dense<0.000000e+00> : vector<32x64xf32>
    %256 = tpu.matmul %250, %254, %cst_115 {dimension_numbers = #tpu.dot_dimension_numbers<[1], [0], [0], [1], [0, 0, 1, 1], [], []>} : vector<32x32xf32>, vector<32x64xf32>, vector<32x64xf32> -> vector<32x64xf32>
    %cst_116 = arith.constant 0.000000e+00 : f32
    %257 = vector.broadcast %cst_116 : f32 to vector<32x64xf32>
    %258 = arith.maximumf %256, %257 : vector<32x64xf32>
    %259 = vector.extract_strided_slice %255 {offsets = [0, 0], sizes = [32, 32], strides = [1, 1]} : vector<32x64xf32> to vector<32x32xf32>
    %260 = vector.extract_strided_slice %255 {offsets = [0, 32], sizes = [32, 32], strides = [1, 1]} : vector<32x64xf32> to vector<32x32xf32>
    %261 = vector.extract_strided_slice %258 {offsets = [0, 0], sizes = [32, 32], strides = [1, 1]} : vector<32x64xf32> to vector<32x32xf32>
    %262 = vector.extract_strided_slice %258 {offsets = [0, 32], sizes = [32, 32], strides = [1, 1]} : vector<32x64xf32> to vector<32x32xf32>
    %263 = arith.maximumf %261, %262 : vector<32x32xf32>
    %264 = arith.subf %261, %263 : vector<32x32xf32>
    %265 = math.exp %264 : vector<32x32xf32>
    %266 = arith.subf %262, %263 : vector<32x32xf32>
    %267 = math.exp %266 : vector<32x32xf32>
    %268 = arith.addf %265, %267 : vector<32x32xf32>
    %269 = arith.mulf %259, %265 : vector<32x32xf32>
    %270 = arith.mulf %260, %267 : vector<32x32xf32>
    %271 = arith.addf %269, %270 : vector<32x32xf32>
    %272 = tpu.reciprocal %268 {approx = true} : vector<32x32xf32> -> vector<32x32xf32>
    %273 = arith.mulf %271, %272 : vector<32x32xf32>
    %cst_117 = arith.constant 0.000000e+00 : f32
    %274 = vector.broadcast %cst_117 : f32 to vector<32x32xf32>
    %275 = arith.cmpf one, %183, %274 : vector<32x32xf32>
    %276 = arith.extui %275 : vector<32x32xi1> to vector<32x32xi32>
    %277 = arith.sitofp %276 : vector<32x32xi32> to vector<32x32xf32>
    %278 = vector.extract_strided_slice %177 {offsets = [0, 96], sizes = [32, 16], strides = [1, 1]} : vector<32x192xf32> to vector<32x16xf32>
    %279 = vector.extract_strided_slice %177 {offsets = [0, 128], sizes = [32, 16], strides = [1, 1]} : vector<32x192xf32> to vector<32x16xf32>
    %280 = vector.extract_strided_slice %177 {offsets = [0, 160], sizes = [32, 16], strides = [1, 1]} : vector<32x192xf32> to vector<32x16xf32>
    %cst_118 = arith.constant dense<0.000000e+00> : vector<32x32xf32>
    %281 = tpu.matmul %278, %279, %cst_118 {dimension_numbers = #tpu.dot_dimension_numbers<[1], [1], [0], [0], [0, 0, 1, 0], [], []>} : vector<32x16xf32>, vector<32x16xf32>, vector<32x32xf32> -> vector<32x32xf32>
    %cst_119 = arith.constant 2.500000e-01 : f32
    %282 = vector.broadcast %cst_119 : f32 to vector<32x32xf32>
    %283 = arith.mulf %281, %282 : vector<32x32xf32>
    %284 = arith.mulf %283, %277 : vector<32x32xf32>
    %cst_120 = arith.constant 0.000000e+00 : f32
    %285 = vector.broadcast %cst_120 : f32 to vector<32x32xf32>
    %286 = arith.cmpf ogt, %178, %285 : vector<32x32xf32>
    %cst_121 = arith.constant -1.000000e+30 : f32
    %287 = vector.broadcast %cst_121 : f32 to vector<32x32xf32>
    %288 = arith.select %286, %284, %287 : vector<32x32xi1>, vector<32x32xf32>
    %cst_122 = arith.constant dense<0xFF800000> : vector<32xf32>
    %289 = vector.multi_reduction <maximumf>, %288, %cst_122 [1] : vector<32x32xf32> to vector<32xf32>
    %290 = vector.shape_cast %289 : vector<32xf32> to vector<32x1xf32>
    %291 = vector.broadcast %290 : vector<32x1xf32> to vector<32x32xf32>
    %292 = arith.subf %284, %291 : vector<32x32xf32>
    %293 = math.exp %292 : vector<32x32xf32>
    %cst_123 = arith.constant 0.000000e+00 : f32
    %294 = vector.broadcast %cst_123 : f32 to vector<32x32xf32>
    %295 = arith.cmpf one, %284, %294 : vector<32x32xf32>
    %296 = arith.extui %295 : vector<32x32xi1> to vector<32x32xi32>
    %297 = arith.sitofp %296 : vector<32x32xi32> to vector<32x32xf32>
    %298 = arith.mulf %293, %297 : vector<32x32xf32>
    %cst_124 = arith.constant dense<0.000000e+00> : vector<32xf32>
    %299 = vector.multi_reduction <add>, %298, %cst_124 [1] : vector<32x32xf32> to vector<32xf32>
    %300 = vector.shape_cast %299 : vector<32xf32> to vector<32x1xf32>
    %cst_125 = arith.constant 9.99999974E-6 : f32
    %301 = vector.broadcast %cst_125 : f32 to vector<32x1xf32>
    %302 = arith.addf %300, %301 : vector<32x1xf32>
    %303 = tpu.reciprocal %302 {approx = true} : vector<32x1xf32> -> vector<32x1xf32>
    %304 = vector.broadcast %303 : vector<32x1xf32> to vector<32x32xf32>
    %305 = arith.mulf %298, %304 : vector<32x32xf32>
    %306 = arith.mulf %305, %183 : vector<32x32xf32>
    %cst_126 = arith.constant dense<0.000000e+00> : vector<32x16xf32>
    %307 = tpu.matmul %306, %280, %cst_126 {dimension_numbers = #tpu.dot_dimension_numbers<[1], [0], [0], [1], [0, 0, 1, 1], [], []>} : vector<32x32xf32>, vector<32x16xf32>, vector<32x16xf32> -> vector<32x16xf32>
    %308 = vector.extract_strided_slice %177 {offsets = [0, 112], sizes = [32, 16], strides = [1, 1]} : vector<32x192xf32> to vector<32x16xf32>
    %309 = vector.extract_strided_slice %177 {offsets = [0, 144], sizes = [32, 16], strides = [1, 1]} : vector<32x192xf32> to vector<32x16xf32>
    %310 = vector.extract_strided_slice %177 {offsets = [0, 176], sizes = [32, 16], strides = [1, 1]} : vector<32x192xf32> to vector<32x16xf32>
    %cst_127 = arith.constant dense<0.000000e+00> : vector<32x32xf32>
    %311 = tpu.matmul %308, %309, %cst_127 {dimension_numbers = #tpu.dot_dimension_numbers<[1], [1], [0], [0], [0, 0, 1, 0], [], []>} : vector<32x16xf32>, vector<32x16xf32>, vector<32x32xf32> -> vector<32x32xf32>
    %cst_128 = arith.constant 2.500000e-01 : f32
    %312 = vector.broadcast %cst_128 : f32 to vector<32x32xf32>
    %313 = arith.mulf %311, %312 : vector<32x32xf32>
    %314 = arith.mulf %313, %277 : vector<32x32xf32>
    %cst_129 = arith.constant 0.000000e+00 : f32
    %315 = vector.broadcast %cst_129 : f32 to vector<32x32xf32>
    %316 = arith.cmpf ogt, %178, %315 : vector<32x32xf32>
    %cst_130 = arith.constant -1.000000e+30 : f32
    %317 = vector.broadcast %cst_130 : f32 to vector<32x32xf32>
    %318 = arith.select %316, %314, %317 : vector<32x32xi1>, vector<32x32xf32>
    %cst_131 = arith.constant dense<0xFF800000> : vector<32xf32>
    %319 = vector.multi_reduction <maximumf>, %318, %cst_131 [1] : vector<32x32xf32> to vector<32xf32>
    %320 = vector.shape_cast %319 : vector<32xf32> to vector<32x1xf32>
    %321 = vector.broadcast %320 : vector<32x1xf32> to vector<32x32xf32>
    %322 = arith.subf %314, %321 : vector<32x32xf32>
    %323 = math.exp %322 : vector<32x32xf32>
    %cst_132 = arith.constant 0.000000e+00 : f32
    %324 = vector.broadcast %cst_132 : f32 to vector<32x32xf32>
    %325 = arith.cmpf one, %314, %324 : vector<32x32xf32>
    %326 = arith.extui %325 : vector<32x32xi1> to vector<32x32xi32>
    %327 = arith.sitofp %326 : vector<32x32xi32> to vector<32x32xf32>
    %328 = arith.mulf %323, %327 : vector<32x32xf32>
    %cst_133 = arith.constant dense<0.000000e+00> : vector<32xf32>
    %329 = vector.multi_reduction <add>, %328, %cst_133 [1] : vector<32x32xf32> to vector<32xf32>
    %330 = vector.shape_cast %329 : vector<32xf32> to vector<32x1xf32>
    %cst_134 = arith.constant 9.99999974E-6 : f32
    %331 = vector.broadcast %cst_134 : f32 to vector<32x1xf32>
    %332 = arith.addf %330, %331 : vector<32x1xf32>
    %333 = tpu.reciprocal %332 {approx = true} : vector<32x1xf32> -> vector<32x1xf32>
    %334 = vector.broadcast %333 : vector<32x1xf32> to vector<32x32xf32>
    %335 = arith.mulf %328, %334 : vector<32x32xf32>
    %336 = arith.mulf %335, %183 : vector<32x32xf32>
    %cst_135 = arith.constant dense<0.000000e+00> : vector<32x16xf32>
    %337 = tpu.matmul %336, %310, %cst_135 {dimension_numbers = #tpu.dot_dimension_numbers<[1], [0], [0], [1], [0, 0, 1, 1], [], []>} : vector<32x32xf32>, vector<32x16xf32>, vector<32x16xf32> -> vector<32x16xf32>
    %338 = tpu.concatenate %307, %337 in 1 : vector<32x16xf32>, vector<32x16xf32> -> vector<32x32xf32>
    %c2 = arith.constant 2 : index
    %c0_136 = arith.constant 0 : index
    %c0_137 = arith.constant 0 : index
    %339 = vector.load %arg13[%c2, %c0_136, %c0_137] : memref<4x32x64xf32, #tpu.memory_space<vmem>>, vector<1x32x64xf32>
    %340 = vector.shape_cast %339 : vector<1x32x64xf32> to vector<32x64xf32>
    %c2_138 = arith.constant 2 : index
    %c0_139 = arith.constant 0 : index
    %c0_140 = arith.constant 0 : index
    %341 = vector.load %arg14[%c2_138, %c0_139, %c0_140] : memref<4x32x64xf32, #tpu.memory_space<vmem>>, vector<1x32x64xf32>
    %342 = vector.shape_cast %341 : vector<1x32x64xf32> to vector<32x64xf32>
    %cst_141 = arith.constant dense<0.000000e+00> : vector<32x64xf32>
    %343 = tpu.matmul %338, %340, %cst_141 {dimension_numbers = #tpu.dot_dimension_numbers<[1], [0], [0], [1], [0, 0, 1, 1], [], []>} : vector<32x32xf32>, vector<32x64xf32>, vector<32x64xf32> -> vector<32x64xf32>
    %cst_142 = arith.constant dense<0.000000e+00> : vector<32x64xf32>
    %344 = tpu.matmul %338, %342, %cst_142 {dimension_numbers = #tpu.dot_dimension_numbers<[1], [0], [0], [1], [0, 0, 1, 1], [], []>} : vector<32x32xf32>, vector<32x64xf32>, vector<32x64xf32> -> vector<32x64xf32>
    %cst_143 = arith.constant 0.000000e+00 : f32
    %345 = vector.broadcast %cst_143 : f32 to vector<32x64xf32>
    %346 = arith.maximumf %344, %345 : vector<32x64xf32>
    %347 = vector.extract_strided_slice %343 {offsets = [0, 0], sizes = [32, 32], strides = [1, 1]} : vector<32x64xf32> to vector<32x32xf32>
    %348 = vector.extract_strided_slice %343 {offsets = [0, 32], sizes = [32, 32], strides = [1, 1]} : vector<32x64xf32> to vector<32x32xf32>
    %349 = vector.extract_strided_slice %346 {offsets = [0, 0], sizes = [32, 32], strides = [1, 1]} : vector<32x64xf32> to vector<32x32xf32>
    %350 = vector.extract_strided_slice %346 {offsets = [0, 32], sizes = [32, 32], strides = [1, 1]} : vector<32x64xf32> to vector<32x32xf32>
    %351 = arith.maximumf %349, %350 : vector<32x32xf32>
    %352 = arith.subf %349, %351 : vector<32x32xf32>
    %353 = math.exp %352 : vector<32x32xf32>
    %354 = arith.subf %350, %351 : vector<32x32xf32>
    %355 = math.exp %354 : vector<32x32xf32>
    %356 = arith.addf %353, %355 : vector<32x32xf32>
    %357 = arith.mulf %347, %353 : vector<32x32xf32>
    %358 = arith.mulf %348, %355 : vector<32x32xf32>
    %359 = arith.addf %357, %358 : vector<32x32xf32>
    %360 = tpu.reciprocal %356 {approx = true} : vector<32x32xf32> -> vector<32x32xf32>
    %361 = arith.mulf %359, %360 : vector<32x32xf32>
    %362 = tpu.concatenate %273, %361 in 1 : vector<32x32xf32>, vector<32x32xf32> -> vector<32x64xf32>
    %c0_144 = arith.constant 0 : index
    %c0_145 = arith.constant 0 : index
    %363 = vector.load %arg15[%c0_144, %c0_145] : memref<64x64xf32, #tpu.memory_space<vmem>>, vector<64x64xf32>
    %c0_146 = arith.constant 0 : index
    %c0_147 = arith.constant 0 : index
    %364 = vector.load %arg16[%c0_146, %c0_147] : memref<64x64xf32, #tpu.memory_space<vmem>>, vector<64x64xf32>
    %cst_148 = arith.constant dense<0.000000e+00> : vector<32x64xf32>
    %365 = tpu.matmul %362, %363, %cst_148 {dimension_numbers = #tpu.dot_dimension_numbers<[1], [0], [0], [1], [0, 0, 1, 1], [], []>} : vector<32x64xf32>, vector<64x64xf32>, vector<32x64xf32> -> vector<32x64xf32>
    %cst_149 = arith.constant dense<0.000000e+00> : vector<32x64xf32>
    %366 = tpu.matmul %362, %364, %cst_149 {dimension_numbers = #tpu.dot_dimension_numbers<[1], [0], [0], [1], [0, 0, 1, 1], [], []>} : vector<32x64xf32>, vector<64x64xf32>, vector<32x64xf32> -> vector<32x64xf32>
    %cst_150 = arith.constant 0.000000e+00 : f32
    %367 = vector.broadcast %cst_150 : f32 to vector<32x64xf32>
    %368 = arith.maximumf %366, %367 : vector<32x64xf32>
    %369 = vector.extract_strided_slice %365 {offsets = [0, 0], sizes = [32, 32], strides = [1, 1]} : vector<32x64xf32> to vector<32x32xf32>
    %370 = vector.extract_strided_slice %365 {offsets = [0, 32], sizes = [32, 32], strides = [1, 1]} : vector<32x64xf32> to vector<32x32xf32>
    %371 = vector.extract_strided_slice %368 {offsets = [0, 0], sizes = [32, 32], strides = [1, 1]} : vector<32x64xf32> to vector<32x32xf32>
    %372 = vector.extract_strided_slice %368 {offsets = [0, 32], sizes = [32, 32], strides = [1, 1]} : vector<32x64xf32> to vector<32x32xf32>
    %373 = arith.maximumf %371, %372 : vector<32x32xf32>
    %374 = arith.subf %371, %373 : vector<32x32xf32>
    %375 = math.exp %374 : vector<32x32xf32>
    %376 = arith.subf %372, %373 : vector<32x32xf32>
    %377 = math.exp %376 : vector<32x32xf32>
    %378 = arith.addf %375, %377 : vector<32x32xf32>
    %379 = arith.mulf %369, %375 : vector<32x32xf32>
    %380 = arith.mulf %370, %377 : vector<32x32xf32>
    %381 = arith.addf %379, %380 : vector<32x32xf32>
    %382 = tpu.reciprocal %378 {approx = true} : vector<32x32xf32> -> vector<32x32xf32>
    %383 = arith.mulf %381, %382 : vector<32x32xf32>
    %c1_151 = arith.constant 1 : index
    %c0_152 = arith.constant 0 : index
    %c0_153 = arith.constant 0 : index
    %384 = vector.load %arg17[%c1_151, %c0_152, %c0_153] : memref<3x32x32xf32, #tpu.memory_space<vmem>>, vector<1x32x32xf32>
    %385 = vector.shape_cast %384 : vector<1x32x32xf32> to vector<32x32xf32>
    %c1_154 = arith.constant 1 : index
    %c0_155 = arith.constant 0 : index
    %c0_156 = arith.constant 0 : index
    %386 = vector.load %arg18[%c1_154, %c0_155, %c0_156] : memref<3x1x32xf32, #tpu.memory_space<vmem>>, vector<1x1x32xf32>
    %387 = vector.shape_cast %386 : vector<1x1x32xf32> to vector<1x32xf32>
    %c1_157 = arith.constant 1 : index
    %c0_158 = arith.constant 0 : index
    %c0_159 = arith.constant 0 : index
    %388 = vector.load %arg19[%c1_157, %c0_158, %c0_159] : memref<3x32x32xf32, #tpu.memory_space<vmem>>, vector<1x32x32xf32>
    %389 = vector.shape_cast %388 : vector<1x32x32xf32> to vector<32x32xf32>
    %c1_160 = arith.constant 1 : index
    %c0_161 = arith.constant 0 : index
    %c0_162 = arith.constant 0 : index
    %390 = vector.load %arg20[%c1_160, %c0_161, %c0_162] : memref<3x1x32xf32, #tpu.memory_space<vmem>>, vector<1x1x32xf32>
    %391 = vector.shape_cast %390 : vector<1x1x32xf32> to vector<1x32xf32>
    %c1_163 = arith.constant 1 : index
    %c0_164 = arith.constant 0 : index
    %c0_165 = arith.constant 0 : index
    %392 = vector.load %arg21[%c1_163, %c0_164, %c0_165] : memref<4x1x32xf32, #tpu.memory_space<vmem>>, vector<1x1x32xf32>
    %393 = vector.shape_cast %392 : vector<1x1x32xf32> to vector<1x32xf32>
    %c1_166 = arith.constant 1 : index
    %c0_167 = arith.constant 0 : index
    %c0_168 = arith.constant 0 : index
    %394 = vector.load %arg22[%c1_166, %c0_167, %c0_168] : memref<4x1x32xf32, #tpu.memory_space<vmem>>, vector<1x1x32xf32>
    %395 = vector.shape_cast %394 : vector<1x1x32xf32> to vector<1x32xf32>
    %cst_169 = arith.constant dense<0.000000e+00> : vector<32x32xf32>
    %396 = tpu.matmul %175, %385, %cst_169 {dimension_numbers = #tpu.dot_dimension_numbers<[1], [0], [0], [1], [0, 0, 1, 1], [], []>} : vector<32x32xf32>, vector<32x32xf32>, vector<32x32xf32> -> vector<32x32xf32>
    %397 = vector.broadcast %387 : vector<1x32xf32> to vector<32x32xf32>
    %398 = arith.addf %396, %397 : vector<32x32xf32>
    %399 = arith.mulf %398, %383 : vector<32x32xf32>
    %400 = arith.negf %399 : vector<32x32xf32>
    %401 = math.exp %400 : vector<32x32xf32>
    %cst_170 = arith.constant 1.000000e+00 : f32
    %402 = vector.broadcast %cst_170 : f32 to vector<32x32xf32>
    %403 = arith.addf %402, %401 : vector<32x32xf32>
    %404 = arith.divf %402, %403 : vector<32x32xf32>
    %405 = arith.mulf %399, %404 : vector<32x32xf32>
    %cst_171 = arith.constant dense<0.000000e+00> : vector<32x32xf32>
    %406 = tpu.matmul %405, %389, %cst_171 {dimension_numbers = #tpu.dot_dimension_numbers<[1], [0], [0], [1], [0, 0, 1, 1], [], []>} : vector<32x32xf32>, vector<32x32xf32>, vector<32x32xf32> -> vector<32x32xf32>
    %407 = vector.broadcast %391 : vector<1x32xf32> to vector<32x32xf32>
    %408 = arith.addf %406, %407 : vector<32x32xf32>
    %409 = arith.addf %408, %175 : vector<32x32xf32>
    %cst_172 = arith.constant dense<0.000000e+00> : vector<32xf32>
    %410 = vector.multi_reduction <add>, %409, %cst_172 [1] : vector<32x32xf32> to vector<32xf32>
    %411 = vector.shape_cast %410 : vector<32xf32> to vector<32x1xf32>
    %cst_173 = arith.constant 3.200000e+01 : f32
    %412 = vector.broadcast %cst_173 : f32 to vector<32x1xf32>
    %413 = arith.divf %411, %412 : vector<32x1xf32>
    %414 = arith.mulf %409, %409 : vector<32x32xf32>
    %cst_174 = arith.constant dense<0.000000e+00> : vector<32xf32>
    %415 = vector.multi_reduction <add>, %414, %cst_174 [1] : vector<32x32xf32> to vector<32xf32>
    %416 = vector.shape_cast %415 : vector<32xf32> to vector<32x1xf32>
    %cst_175 = arith.constant 3.200000e+01 : f32
    %417 = vector.broadcast %cst_175 : f32 to vector<32x1xf32>
    %418 = arith.divf %416, %417 : vector<32x1xf32>
    %419 = arith.mulf %413, %413 : vector<32x1xf32>
    %420 = arith.subf %418, %419 : vector<32x1xf32>
    %cst_176 = arith.constant 0.000000e+00 : f32
    %421 = vector.broadcast %cst_176 : f32 to vector<32x1xf32>
    %422 = arith.maximumf %420, %421 : vector<32x1xf32>
    %423 = vector.broadcast %413 : vector<32x1xf32> to vector<32x32xf32>
    %424 = arith.subf %409, %423 : vector<32x32xf32>
    %cst_177 = arith.constant 9.99999974E-6 : f32
    %425 = vector.broadcast %cst_177 : f32 to vector<32x1xf32>
    %426 = arith.addf %422, %425 : vector<32x1xf32>
    %427 = math.rsqrt %426 : vector<32x1xf32>
    %428 = vector.broadcast %427 : vector<32x1xf32> to vector<32x32xf32>
    %429 = arith.mulf %424, %428 : vector<32x32xf32>
    %430 = vector.broadcast %393 : vector<1x32xf32> to vector<32x32xf32>
    %431 = arith.mulf %429, %430 : vector<32x32xf32>
    %432 = vector.broadcast %395 : vector<1x32xf32> to vector<32x32xf32>
    %433 = arith.addf %431, %432 : vector<32x32xf32>
    %c0_178 = arith.constant 0 : index
    %c0_179 = arith.constant 0 : index
    %c0_180 = arith.constant 0 : index
    %434 = vector.load %arg3[%c0_178, %c0_179, %c0_180] : memref<1x48x32xf32, #tpu.memory_space<vmem>>, vector<1x48x32xf32>
    %435 = vector.shape_cast %434 : vector<1x48x32xf32> to vector<48x32xf32>
    %c0_181 = arith.constant 0 : index
    %c0_182 = arith.constant 0 : index
    %c0_183 = arith.constant 0 : index
    %436 = vector.load %arg4[%c0_181, %c0_182, %c0_183] : memref<1x48x32xf32, #tpu.memory_space<vmem>>, vector<1x48x32xf32>
    %437 = vector.shape_cast %436 : vector<1x48x32xf32> to vector<48x32xf32>
    %c0_184 = arith.constant 0 : index
    %c0_185 = arith.constant 0 : index
    %438 = vector.load %arg11[%c0_184, %c0_185] : memref<32x32xf32, #tpu.memory_space<vmem>>, vector<32x32xf32>
    %cst_186 = arith.constant dense<0.000000e+00> : vector<32x32xf32>
    %439 = tpu.matmul %433, %438, %cst_186 {dimension_numbers = #tpu.dot_dimension_numbers<[1], [0], [0], [1], [0, 0, 1, 1], [], []>} : vector<32x32xf32>, vector<32x32xf32>, vector<32x32xf32> -> vector<32x32xf32>
    %c0_187 = arith.constant 0 : index
    %c0_188 = arith.constant 0 : index
    %440 = vector.load %arg12[%c0_187, %c0_188] : memref<32x48xf32, #tpu.memory_space<vmem>>, vector<32x48xf32>
    %441 = vector.extract_strided_slice %439 {offsets = [0, 0], sizes = [32, 16], strides = [1, 1]} : vector<32x32xf32> to vector<32x16xf32>
    %442 = vector.extract_strided_slice %435 {offsets = [0, 0], sizes = [48, 16], strides = [1, 1]} : vector<48x32xf32> to vector<48x16xf32>
    %443 = vector.extract_strided_slice %437 {offsets = [0, 0], sizes = [48, 16], strides = [1, 1]} : vector<48x32xf32> to vector<48x16xf32>
    %cst_189 = arith.constant dense<0.000000e+00> : vector<32x48xf32>
    %444 = tpu.matmul %441, %442, %cst_189 {dimension_numbers = #tpu.dot_dimension_numbers<[1], [1], [0], [0], [0, 0, 1, 0], [], []>} : vector<32x16xf32>, vector<48x16xf32>, vector<32x48xf32> -> vector<32x48xf32>
    %cst_190 = arith.constant 2.500000e-01 : f32
    %445 = vector.broadcast %cst_190 : f32 to vector<32x48xf32>
    %446 = arith.mulf %444, %445 : vector<32x48xf32>
    %447 = arith.addf %446, %440 : vector<32x48xf32>
    %cst_191 = arith.constant dense<0xFF800000> : vector<32xf32>
    %448 = vector.multi_reduction <maximumf>, %447, %cst_191 [1] : vector<32x48xf32> to vector<32xf32>
    %449 = vector.shape_cast %448 : vector<32xf32> to vector<32x1xf32>
    %450 = vector.broadcast %449 : vector<32x1xf32> to vector<32x48xf32>
    %451 = arith.subf %447, %450 : vector<32x48xf32>
    %452 = math.exp %451 : vector<32x48xf32>
    %cst_192 = arith.constant dense<0.000000e+00> : vector<32xf32>
    %453 = vector.multi_reduction <add>, %452, %cst_192 [1] : vector<32x48xf32> to vector<32xf32>
    %454 = vector.shape_cast %453 : vector<32xf32> to vector<32x1xf32>
    %455 = tpu.reciprocal %454 {approx = true} : vector<32x1xf32> -> vector<32x1xf32>
    %456 = vector.broadcast %455 : vector<32x1xf32> to vector<32x48xf32>
    %457 = arith.mulf %452, %456 : vector<32x48xf32>
    %cst_193 = arith.constant dense<0.000000e+00> : vector<32x16xf32>
    %458 = tpu.matmul %457, %443, %cst_193 {dimension_numbers = #tpu.dot_dimension_numbers<[1], [0], [0], [1], [0, 0, 1, 1], [], []>} : vector<32x48xf32>, vector<48x16xf32>, vector<32x16xf32> -> vector<32x16xf32>
    %459 = vector.extract_strided_slice %439 {offsets = [0, 16], sizes = [32, 16], strides = [1, 1]} : vector<32x32xf32> to vector<32x16xf32>
    %460 = vector.extract_strided_slice %435 {offsets = [0, 16], sizes = [48, 16], strides = [1, 1]} : vector<48x32xf32> to vector<48x16xf32>
    %461 = vector.extract_strided_slice %437 {offsets = [0, 16], sizes = [48, 16], strides = [1, 1]} : vector<48x32xf32> to vector<48x16xf32>
    %cst_194 = arith.constant dense<0.000000e+00> : vector<32x48xf32>
    %462 = tpu.matmul %459, %460, %cst_194 {dimension_numbers = #tpu.dot_dimension_numbers<[1], [1], [0], [0], [0, 0, 1, 0], [], []>} : vector<32x16xf32>, vector<48x16xf32>, vector<32x48xf32> -> vector<32x48xf32>
    %cst_195 = arith.constant 2.500000e-01 : f32
    %463 = vector.broadcast %cst_195 : f32 to vector<32x48xf32>
    %464 = arith.mulf %462, %463 : vector<32x48xf32>
    %465 = arith.addf %464, %440 : vector<32x48xf32>
    %cst_196 = arith.constant dense<0xFF800000> : vector<32xf32>
    %466 = vector.multi_reduction <maximumf>, %465, %cst_196 [1] : vector<32x48xf32> to vector<32xf32>
    %467 = vector.shape_cast %466 : vector<32xf32> to vector<32x1xf32>
    %468 = vector.broadcast %467 : vector<32x1xf32> to vector<32x48xf32>
    %469 = arith.subf %465, %468 : vector<32x48xf32>
    %470 = math.exp %469 : vector<32x48xf32>
    %cst_197 = arith.constant dense<0.000000e+00> : vector<32xf32>
    %471 = vector.multi_reduction <add>, %470, %cst_197 [1] : vector<32x48xf32> to vector<32xf32>
    %472 = vector.shape_cast %471 : vector<32xf32> to vector<32x1xf32>
    %473 = tpu.reciprocal %472 {approx = true} : vector<32x1xf32> -> vector<32x1xf32>
    %474 = vector.broadcast %473 : vector<32x1xf32> to vector<32x48xf32>
    %475 = arith.mulf %470, %474 : vector<32x48xf32>
    %cst_198 = arith.constant dense<0.000000e+00> : vector<32x16xf32>
    %476 = tpu.matmul %475, %461, %cst_198 {dimension_numbers = #tpu.dot_dimension_numbers<[1], [0], [0], [1], [0, 0, 1, 1], [], []>} : vector<32x48xf32>, vector<48x16xf32>, vector<32x16xf32> -> vector<32x16xf32>
    %477 = tpu.concatenate %458, %476 in 1 : vector<32x16xf32>, vector<32x16xf32> -> vector<32x32xf32>
    %c3 = arith.constant 3 : index
    %c0_199 = arith.constant 0 : index
    %c0_200 = arith.constant 0 : index
    %478 = vector.load %arg13[%c3, %c0_199, %c0_200] : memref<4x32x64xf32, #tpu.memory_space<vmem>>, vector<1x32x64xf32>
    %479 = vector.shape_cast %478 : vector<1x32x64xf32> to vector<32x64xf32>
    %c3_201 = arith.constant 3 : index
    %c0_202 = arith.constant 0 : index
    %c0_203 = arith.constant 0 : index
    %480 = vector.load %arg14[%c3_201, %c0_202, %c0_203] : memref<4x32x64xf32, #tpu.memory_space<vmem>>, vector<1x32x64xf32>
    %481 = vector.shape_cast %480 : vector<1x32x64xf32> to vector<32x64xf32>
    %cst_204 = arith.constant dense<0.000000e+00> : vector<32x64xf32>
    %482 = tpu.matmul %477, %479, %cst_204 {dimension_numbers = #tpu.dot_dimension_numbers<[1], [0], [0], [1], [0, 0, 1, 1], [], []>} : vector<32x32xf32>, vector<32x64xf32>, vector<32x64xf32> -> vector<32x64xf32>
    %cst_205 = arith.constant dense<0.000000e+00> : vector<32x64xf32>
    %483 = tpu.matmul %477, %481, %cst_205 {dimension_numbers = #tpu.dot_dimension_numbers<[1], [0], [0], [1], [0, 0, 1, 1], [], []>} : vector<32x32xf32>, vector<32x64xf32>, vector<32x64xf32> -> vector<32x64xf32>
    %cst_206 = arith.constant 0.000000e+00 : f32
    %484 = vector.broadcast %cst_206 : f32 to vector<32x64xf32>
    %485 = arith.maximumf %483, %484 : vector<32x64xf32>
    %486 = vector.extract_strided_slice %482 {offsets = [0, 0], sizes = [32, 32], strides = [1, 1]} : vector<32x64xf32> to vector<32x32xf32>
    %487 = vector.extract_strided_slice %482 {offsets = [0, 32], sizes = [32, 32], strides = [1, 1]} : vector<32x64xf32> to vector<32x32xf32>
    %488 = vector.extract_strided_slice %485 {offsets = [0, 0], sizes = [32, 32], strides = [1, 1]} : vector<32x64xf32> to vector<32x32xf32>
    %489 = vector.extract_strided_slice %485 {offsets = [0, 32], sizes = [32, 32], strides = [1, 1]} : vector<32x64xf32> to vector<32x32xf32>
    %490 = arith.maximumf %488, %489 : vector<32x32xf32>
    %491 = arith.subf %488, %490 : vector<32x32xf32>
    %492 = math.exp %491 : vector<32x32xf32>
    %493 = arith.subf %489, %490 : vector<32x32xf32>
    %494 = math.exp %493 : vector<32x32xf32>
    %495 = arith.addf %492, %494 : vector<32x32xf32>
    %496 = arith.mulf %486, %492 : vector<32x32xf32>
    %497 = arith.mulf %487, %494 : vector<32x32xf32>
    %498 = arith.addf %496, %497 : vector<32x32xf32>
    %499 = tpu.reciprocal %495 {approx = true} : vector<32x32xf32> -> vector<32x32xf32>
    %500 = arith.mulf %498, %499 : vector<32x32xf32>
    %c2_207 = arith.constant 2 : index
    %c0_208 = arith.constant 0 : index
    %c0_209 = arith.constant 0 : index
    %501 = vector.load %arg17[%c2_207, %c0_208, %c0_209] : memref<3x32x32xf32, #tpu.memory_space<vmem>>, vector<1x32x32xf32>
    %502 = vector.shape_cast %501 : vector<1x32x32xf32> to vector<32x32xf32>
    %c2_210 = arith.constant 2 : index
    %c0_211 = arith.constant 0 : index
    %c0_212 = arith.constant 0 : index
    %503 = vector.load %arg18[%c2_210, %c0_211, %c0_212] : memref<3x1x32xf32, #tpu.memory_space<vmem>>, vector<1x1x32xf32>
    %504 = vector.shape_cast %503 : vector<1x1x32xf32> to vector<1x32xf32>
    %c2_213 = arith.constant 2 : index
    %c0_214 = arith.constant 0 : index
    %c0_215 = arith.constant 0 : index
    %505 = vector.load %arg19[%c2_213, %c0_214, %c0_215] : memref<3x32x32xf32, #tpu.memory_space<vmem>>, vector<1x32x32xf32>
    %506 = vector.shape_cast %505 : vector<1x32x32xf32> to vector<32x32xf32>
    %c2_216 = arith.constant 2 : index
    %c0_217 = arith.constant 0 : index
    %c0_218 = arith.constant 0 : index
    %507 = vector.load %arg20[%c2_216, %c0_217, %c0_218] : memref<3x1x32xf32, #tpu.memory_space<vmem>>, vector<1x1x32xf32>
    %508 = vector.shape_cast %507 : vector<1x1x32xf32> to vector<1x32xf32>
    %c2_219 = arith.constant 2 : index
    %c0_220 = arith.constant 0 : index
    %c0_221 = arith.constant 0 : index
    %509 = vector.load %arg21[%c2_219, %c0_220, %c0_221] : memref<4x1x32xf32, #tpu.memory_space<vmem>>, vector<1x1x32xf32>
    %510 = vector.shape_cast %509 : vector<1x1x32xf32> to vector<1x32xf32>
    %c2_222 = arith.constant 2 : index
    %c0_223 = arith.constant 0 : index
    %c0_224 = arith.constant 0 : index
    %511 = vector.load %arg22[%c2_222, %c0_223, %c0_224] : memref<4x1x32xf32, #tpu.memory_space<vmem>>, vector<1x1x32xf32>
    %512 = vector.shape_cast %511 : vector<1x1x32xf32> to vector<1x32xf32>
    %cst_225 = arith.constant dense<0.000000e+00> : vector<32x32xf32>
    %513 = tpu.matmul %433, %502, %cst_225 {dimension_numbers = #tpu.dot_dimension_numbers<[1], [0], [0], [1], [0, 0, 1, 1], [], []>} : vector<32x32xf32>, vector<32x32xf32>, vector<32x32xf32> -> vector<32x32xf32>
    %514 = vector.broadcast %504 : vector<1x32xf32> to vector<32x32xf32>
    %515 = arith.addf %513, %514 : vector<32x32xf32>
    %516 = arith.mulf %515, %500 : vector<32x32xf32>
    %517 = arith.negf %516 : vector<32x32xf32>
    %518 = math.exp %517 : vector<32x32xf32>
    %cst_226 = arith.constant 1.000000e+00 : f32
    %519 = vector.broadcast %cst_226 : f32 to vector<32x32xf32>
    %520 = arith.addf %519, %518 : vector<32x32xf32>
    %521 = arith.divf %519, %520 : vector<32x32xf32>
    %522 = arith.mulf %516, %521 : vector<32x32xf32>
    %cst_227 = arith.constant dense<0.000000e+00> : vector<32x32xf32>
    %523 = tpu.matmul %522, %506, %cst_227 {dimension_numbers = #tpu.dot_dimension_numbers<[1], [0], [0], [1], [0, 0, 1, 1], [], []>} : vector<32x32xf32>, vector<32x32xf32>, vector<32x32xf32> -> vector<32x32xf32>
    %524 = vector.broadcast %508 : vector<1x32xf32> to vector<32x32xf32>
    %525 = arith.addf %523, %524 : vector<32x32xf32>
    %526 = arith.addf %525, %433 : vector<32x32xf32>
    %cst_228 = arith.constant dense<0.000000e+00> : vector<32xf32>
    %527 = vector.multi_reduction <add>, %526, %cst_228 [1] : vector<32x32xf32> to vector<32xf32>
    %528 = vector.shape_cast %527 : vector<32xf32> to vector<32x1xf32>
    %cst_229 = arith.constant 3.200000e+01 : f32
    %529 = vector.broadcast %cst_229 : f32 to vector<32x1xf32>
    %530 = arith.divf %528, %529 : vector<32x1xf32>
    %531 = arith.mulf %526, %526 : vector<32x32xf32>
    %cst_230 = arith.constant dense<0.000000e+00> : vector<32xf32>
    %532 = vector.multi_reduction <add>, %531, %cst_230 [1] : vector<32x32xf32> to vector<32xf32>
    %533 = vector.shape_cast %532 : vector<32xf32> to vector<32x1xf32>
    %cst_231 = arith.constant 3.200000e+01 : f32
    %534 = vector.broadcast %cst_231 : f32 to vector<32x1xf32>
    %535 = arith.divf %533, %534 : vector<32x1xf32>
    %536 = arith.mulf %530, %530 : vector<32x1xf32>
    %537 = arith.subf %535, %536 : vector<32x1xf32>
    %cst_232 = arith.constant 0.000000e+00 : f32
    %538 = vector.broadcast %cst_232 : f32 to vector<32x1xf32>
    %539 = arith.maximumf %537, %538 : vector<32x1xf32>
    %540 = vector.broadcast %530 : vector<32x1xf32> to vector<32x32xf32>
    %541 = arith.subf %526, %540 : vector<32x32xf32>
    %cst_233 = arith.constant 9.99999974E-6 : f32
    %542 = vector.broadcast %cst_233 : f32 to vector<32x1xf32>
    %543 = arith.addf %539, %542 : vector<32x1xf32>
    %544 = math.rsqrt %543 : vector<32x1xf32>
    %545 = vector.broadcast %544 : vector<32x1xf32> to vector<32x32xf32>
    %546 = arith.mulf %541, %545 : vector<32x32xf32>
    %547 = vector.broadcast %510 : vector<1x32xf32> to vector<32x32xf32>
    %548 = arith.mulf %546, %547 : vector<32x32xf32>
    %549 = vector.broadcast %512 : vector<1x32xf32> to vector<32x32xf32>
    %550 = arith.addf %548, %549 : vector<32x32xf32>
    %c0_234 = arith.constant 0 : index
    %c0_235 = arith.constant 0 : index
    %551 = vector.load %arg23[%c0_234, %c0_235] : memref<32x64xf32, #tpu.memory_space<vmem>>, vector<32x64xf32>
    %cst_236 = arith.constant dense<0.000000e+00> : vector<32x64xf32>
    %552 = tpu.matmul %550, %551, %cst_236 {dimension_numbers = #tpu.dot_dimension_numbers<[1], [0], [0], [1], [0, 0, 1, 1], [], []>} : vector<32x32xf32>, vector<32x64xf32>, vector<32x64xf32> -> vector<32x64xf32>
    %c0_237 = arith.constant 0 : index
    %c0_238 = arith.constant 0 : index
    %553 = vector.load %arg24[%c0_237, %c0_238] : memref<1x64xf32, #tpu.memory_space<vmem>>, vector<1x64xf32>
    %554 = vector.broadcast %553 : vector<1x64xf32> to vector<32x64xf32>
    %555 = arith.addf %552, %554 : vector<32x64xf32>
    %cst_239 = arith.constant 0.000000e+00 : f32
    %556 = vector.broadcast %cst_239 : f32 to vector<32x64xf32>
    %557 = arith.maximumf %555, %556 : vector<32x64xf32>
    %c0_240 = arith.constant 0 : index
    %c0_241 = arith.constant 0 : index
    %558 = vector.load %arg25[%c0_240, %c0_241] : memref<64x32xf32, #tpu.memory_space<vmem>>, vector<64x32xf32>
    %cst_242 = arith.constant dense<0.000000e+00> : vector<32x32xf32>
    %559 = tpu.matmul %557, %558, %cst_242 {dimension_numbers = #tpu.dot_dimension_numbers<[1], [0], [0], [1], [0, 0, 1, 1], [], []>} : vector<32x64xf32>, vector<64x32xf32>, vector<32x32xf32> -> vector<32x32xf32>
    %c0_243 = arith.constant 0 : index
    %c0_244 = arith.constant 0 : index
    %560 = vector.load %arg26[%c0_243, %c0_244] : memref<1x32xf32, #tpu.memory_space<vmem>>, vector<1x32xf32>
    %561 = vector.broadcast %560 : vector<1x32xf32> to vector<32x32xf32>
    %562 = arith.addf %559, %561 : vector<32x32xf32>
    %563 = arith.addf %562, %550 : vector<32x32xf32>
    %c3_245 = arith.constant 3 : index
    %c0_246 = arith.constant 0 : index
    %c0_247 = arith.constant 0 : index
    %564 = vector.load %arg21[%c3_245, %c0_246, %c0_247] : memref<4x1x32xf32, #tpu.memory_space<vmem>>, vector<1x1x32xf32>
    %565 = vector.shape_cast %564 : vector<1x1x32xf32> to vector<1x32xf32>
    %c3_248 = arith.constant 3 : index
    %c0_249 = arith.constant 0 : index
    %c0_250 = arith.constant 0 : index
    %566 = vector.load %arg22[%c3_248, %c0_249, %c0_250] : memref<4x1x32xf32, #tpu.memory_space<vmem>>, vector<1x1x32xf32>
    %567 = vector.shape_cast %566 : vector<1x1x32xf32> to vector<1x32xf32>
    %cst_251 = arith.constant dense<0.000000e+00> : vector<32xf32>
    %568 = vector.multi_reduction <add>, %563, %cst_251 [1] : vector<32x32xf32> to vector<32xf32>
    %569 = vector.shape_cast %568 : vector<32xf32> to vector<32x1xf32>
    %cst_252 = arith.constant 3.200000e+01 : f32
    %570 = vector.broadcast %cst_252 : f32 to vector<32x1xf32>
    %571 = arith.divf %569, %570 : vector<32x1xf32>
    %572 = arith.mulf %563, %563 : vector<32x32xf32>
    %cst_253 = arith.constant dense<0.000000e+00> : vector<32xf32>
    %573 = vector.multi_reduction <add>, %572, %cst_253 [1] : vector<32x32xf32> to vector<32xf32>
    %574 = vector.shape_cast %573 : vector<32xf32> to vector<32x1xf32>
    %cst_254 = arith.constant 3.200000e+01 : f32
    %575 = vector.broadcast %cst_254 : f32 to vector<32x1xf32>
    %576 = arith.divf %574, %575 : vector<32x1xf32>
    %577 = arith.mulf %571, %571 : vector<32x1xf32>
    %578 = arith.subf %576, %577 : vector<32x1xf32>
    %cst_255 = arith.constant 0.000000e+00 : f32
    %579 = vector.broadcast %cst_255 : f32 to vector<32x1xf32>
    %580 = arith.maximumf %578, %579 : vector<32x1xf32>
    %581 = vector.broadcast %571 : vector<32x1xf32> to vector<32x32xf32>
    %582 = arith.subf %563, %581 : vector<32x32xf32>
    %cst_256 = arith.constant 9.99999974E-6 : f32
    %583 = vector.broadcast %cst_256 : f32 to vector<32x1xf32>
    %584 = arith.addf %580, %583 : vector<32x1xf32>
    %585 = math.rsqrt %584 : vector<32x1xf32>
    %586 = vector.broadcast %585 : vector<32x1xf32> to vector<32x32xf32>
    %587 = arith.mulf %582, %586 : vector<32x32xf32>
    %588 = vector.broadcast %565 : vector<1x32xf32> to vector<32x32xf32>
    %589 = arith.mulf %587, %588 : vector<32x32xf32>
    %590 = vector.broadcast %567 : vector<1x32xf32> to vector<32x32xf32>
    %591 = arith.addf %589, %590 : vector<32x32xf32>
    %c0_257 = arith.constant 0 : index
    %c0_258 = arith.constant 0 : index
    %c0_259 = arith.constant 0 : index
    %592 = vector.load %arg27[%c0_257, %c0_258, %c0_259] : memref<1x32x32xf32, #tpu.memory_space<vmem>>, vector<1x32x32xf32>
    %593 = vector.shape_cast %592 : vector<1x32x32xf32> to vector<32x32xf32>
    %594 = vector.shape_cast %591 : vector<32x32xf32> to vector<1x32x32xf32>
    tpu.vector_store %arg27[%c0_257, %c0_258, %c0_259], %594 {strides = array<i32>} : memref<1x32x32xf32, #tpu.memory_space<vmem>>, vector<1x32x32xf32>,
    return
  }
  func.func @transform_0(%arg0: i32) -> (i32, i32, i32) {
    %c0_i32 = arith.constant 0 : i32
    %c0_i32_0 = arith.constant 0 : i32
    %c0_i32_1 = arith.constant 0 : i32
    return %arg0, %c0_i32, %c0_i32_0 : i32, i32, i32
  }
  func.func @transform_1(%arg0: i32) -> (i32, i32, i32) {
    %c0_i32 = arith.constant 0 : i32
    %c0_i32_0 = arith.constant 0 : i32
    %c0_i32_1 = arith.constant 0 : i32
    return %arg0, %c0_i32, %c0_i32_0 : i32, i32, i32
  }
  func.func @transform_2(%arg0: i32) -> (i32, i32, i32) {
    %c0_i32 = arith.constant 0 : i32
    %c0_i32_0 = arith.constant 0 : i32
    %c0_i32_1 = arith.constant 0 : i32
    return %arg0, %c0_i32, %c0_i32_0 : i32, i32, i32
  }
  func.func @transform_3(%arg0: i32) -> (i32, i32, i32) {
    %c0_i32 = arith.constant 0 : i32
    %c0_i32_0 = arith.constant 0 : i32
    %c0_i32_1 = arith.constant 0 : i32
    return %arg0, %c0_i32, %c0_i32_0 : i32, i32, i32
  }
  func.func @transform_4(%arg0: i32) -> (i32, i32) {
    %c0_i32 = arith.constant 0 : i32
    %c0_i32_0 = arith.constant 0 : i32
    %c0_i32_1 = arith.constant 0 : i32
    return %c0_i32, %c0_i32_0 : i32, i32
  }
  func.func @transform_5(%arg0: i32) -> (i32, i32, i32) {
    %c0_i32 = arith.constant 0 : i32
    %c0_i32_0 = arith.constant 0 : i32
    %c0_i32_1 = arith.constant 0 : i32
    %c0_i32_2 = arith.constant 0 : i32
    return %c0_i32, %c0_i32_0, %c0_i32_1 : i32, i32, i32
  }
  func.func @transform_6(%arg0: i32) -> (i32, i32) {
    %c0_i32 = arith.constant 0 : i32
    %c0_i32_0 = arith.constant 0 : i32
    %c0_i32_1 = arith.constant 0 : i32
    return %c0_i32, %c0_i32_0 : i32, i32
  }
  func.func @transform_7(%arg0: i32) -> (i32, i32, i32) {
    %c0_i32 = arith.constant 0 : i32
    %c0_i32_0 = arith.constant 0 : i32
    %c0_i32_1 = arith.constant 0 : i32
    %c0_i32_2 = arith.constant 0 : i32
    return %c0_i32, %c0_i32_0, %c0_i32_1 : i32, i32, i32
  }
  func.func @transform_8(%arg0: i32) -> (i32, i32) {
    %c0_i32 = arith.constant 0 : i32
    %c0_i32_0 = arith.constant 0 : i32
    %c0_i32_1 = arith.constant 0 : i32
    return %c0_i32, %c0_i32_0 : i32, i32
  }
  func.func @transform_9(%arg0: i32) -> (i32, i32) {
    %c0_i32 = arith.constant 0 : i32
    %c0_i32_0 = arith.constant 0 : i32
    %c0_i32_1 = arith.constant 0 : i32
    return %c0_i32, %c0_i32_0 : i32, i32
  }
  func.func @transform_10(%arg0: i32) -> (i32, i32) {
    %c0_i32 = arith.constant 0 : i32
    %c0_i32_0 = arith.constant 0 : i32
    %c0_i32_1 = arith.constant 0 : i32
    return %c0_i32, %c0_i32_0 : i32, i32
  }
  func.func @transform_11(%arg0: i32) -> (i32, i32) {
    %c0_i32 = arith.constant 0 : i32
    %c0_i32_0 = arith.constant 0 : i32
    %c0_i32_1 = arith.constant 0 : i32
    return %c0_i32, %c0_i32_0 : i32, i32
  }
  func.func @transform_12(%arg0: i32) -> (i32, i32, i32) {
    %c0_i32 = arith.constant 0 : i32
    %c0_i32_0 = arith.constant 0 : i32
    %c0_i32_1 = arith.constant 0 : i32
    %c0_i32_2 = arith.constant 0 : i32
    return %c0_i32, %c0_i32_0, %c0_i32_1 : i32, i32, i32
  }
  func.func @transform_13(%arg0: i32) -> (i32, i32, i32) {
    %c0_i32 = arith.constant 0 : i32
    %c0_i32_0 = arith.constant 0 : i32
    %c0_i32_1 = arith.constant 0 : i32
    %c0_i32_2 = arith.constant 0 : i32
    return %c0_i32, %c0_i32_0, %c0_i32_1 : i32, i32, i32
  }
  func.func @transform_14(%arg0: i32) -> (i32, i32) {
    %c0_i32 = arith.constant 0 : i32
    %c0_i32_0 = arith.constant 0 : i32
    %c0_i32_1 = arith.constant 0 : i32
    return %c0_i32, %c0_i32_0 : i32, i32
  }
  func.func @transform_15(%arg0: i32) -> (i32, i32) {
    %c0_i32 = arith.constant 0 : i32
    %c0_i32_0 = arith.constant 0 : i32
    %c0_i32_1 = arith.constant 0 : i32
    return %c0_i32, %c0_i32_0 : i32, i32
  }
  func.func @transform_16(%arg0: i32) -> (i32, i32, i32) {
    %c0_i32 = arith.constant 0 : i32
    %c0_i32_0 = arith.constant 0 : i32
    %c0_i32_1 = arith.constant 0 : i32
    %c0_i32_2 = arith.constant 0 : i32
    return %c0_i32, %c0_i32_0, %c0_i32_1 : i32, i32, i32
  }
  func.func @transform_17(%arg0: i32) -> (i32, i32, i32) {
    %c0_i32 = arith.constant 0 : i32
    %c0_i32_0 = arith.constant 0 : i32
    %c0_i32_1 = arith.constant 0 : i32
    %c0_i32_2 = arith.constant 0 : i32
    return %c0_i32, %c0_i32_0, %c0_i32_1 : i32, i32, i32
  }
  func.func @transform_18(%arg0: i32) -> (i32, i32, i32) {
    %c0_i32 = arith.constant 0 : i32
    %c0_i32_0 = arith.constant 0 : i32
    %c0_i32_1 = arith.constant 0 : i32
    %c0_i32_2 = arith.constant 0 : i32
    return %c0_i32, %c0_i32_0, %c0_i32_1 : i32, i32, i32
  }
  func.func @transform_19(%arg0: i32) -> (i32, i32, i32) {
    %c0_i32 = arith.constant 0 : i32
    %c0_i32_0 = arith.constant 0 : i32
    %c0_i32_1 = arith.constant 0 : i32
    %c0_i32_2 = arith.constant 0 : i32
    return %c0_i32, %c0_i32_0, %c0_i32_1 : i32, i32, i32
  }
  func.func @transform_20(%arg0: i32) -> (i32, i32, i32) {
    %c0_i32 = arith.constant 0 : i32
    %c0_i32_0 = arith.constant 0 : i32
    %c0_i32_1 = arith.constant 0 : i32
    %c0_i32_2 = arith.constant 0 : i32
    return %c0_i32, %c0_i32_0, %c0_i32_1 : i32, i32, i32
  }
  func.func @transform_21(%arg0: i32) -> (i32, i32, i32) {
    %c0_i32 = arith.constant 0 : i32
    %c0_i32_0 = arith.constant 0 : i32
    %c0_i32_1 = arith.constant 0 : i32
    %c0_i32_2 = arith.constant 0 : i32
    return %c0_i32, %c0_i32_0, %c0_i32_1 : i32, i32, i32
  }
  func.func @transform_22(%arg0: i32) -> (i32, i32) {
    %c0_i32 = arith.constant 0 : i32
    %c0_i32_0 = arith.constant 0 : i32
    %c0_i32_1 = arith.constant 0 : i32
    return %c0_i32, %c0_i32_0 : i32, i32
  }
  func.func @transform_23(%arg0: i32) -> (i32, i32) {
    %c0_i32 = arith.constant 0 : i32
    %c0_i32_0 = arith.constant 0 : i32
    %c0_i32_1 = arith.constant 0 : i32
    return %c0_i32, %c0_i32_0 : i32, i32
  }
  func.func @transform_24(%arg0: i32) -> (i32, i32) {
    %c0_i32 = arith.constant 0 : i32
    %c0_i32_0 = arith.constant 0 : i32
    %c0_i32_1 = arith.constant 0 : i32
    return %c0_i32, %c0_i32_0 : i32, i32
  }
  func.func @transform_25(%arg0: i32) -> (i32, i32) {
    %c0_i32 = arith.constant 0 : i32
    %c0_i32_0 = arith.constant 0 : i32
    %c0_i32_1 = arith.constant 0 : i32
    return %c0_i32, %c0_i32_0 : i32, i32
  }
  func.func @transform_26(%arg0: i32) -> (i32, i32, i32) {
    %c0_i32 = arith.constant 0 : i32
    %c0_i32_0 = arith.constant 0 : i32
    %c0_i32_1 = arith.constant 0 : i32
    return %arg0, %c0_i32, %c0_i32_0 : i32, i32, i32
  }
}

</mosaic_0001>

<bundles_post_ra>
// kernel: decoder_layer_forward.1
= control target key start
LH: loop header
LB: loop body
LE: loop exit
PB: predicated region body
PF: predicated region fallthrough
CT: control target
= control target key end

     0   :  { %s12331_s0 = inlined_call_operand.vmem [shape: f32[2,32,32], index: 0, kind: input, shape index: {}]   ;;  %s12332_s1 = inlined_call_operand.vmem [shape: f32[2,32,8], index: 1, kind: input, shape index: {}]   ;;  %s12333_s2 = inlined_call_operand.vmem [shape: f32[2,48,32], index: 2, kind: input, shape index: {}]   ;;  %s12334_s3 = inlined_call_operand.vmem [shape: f32[2,48,32], index: 3, kind: input, shape index: {}]   ;;  %s12335_s4 = inlined_call_operand.hbm [shape: f32[32,96], index: 4, kind: input, shape index: {}]   ;;  %s12336_s5 = inlined_call_operand.hbm [shape: f32[2,32,32], index: 5, kind: input, shape index: {}]   ;;  %s12337_s6 = inlined_call_operand.hbm [shape: f32[32,192], index: 6, kind: input, shape index: {}]   ;;  %s12338_s7 = inlined_call_operand.hbm [shape: f32[1,32,32], index: 7, kind: input, shape index: {}]   ;;  %s12339_s8 = inlined_call_operand.hbm [shape: f32[32,32], index: 8, kind: input, shape index: {}]   ;;  %s12340_s9 = inlined_call_operand.hbm [shape: f32[8,32], index: 9, kind: input, shape index: {}]   ;;  %s12341_s10 = inlined_call_operand.hbm [shape: f32[32,32], index: 10, kind: input, shape index: {}]   ;;  %s12342_s11 = inlined_call_operand.hbm [shape: f32[32,48], index: 11, kind: input, shape index: {}]   ;;  %s12343_s12 = inlined_call_operand.vmem [shape: f32[4,32,64], index: 12, kind: input, shape index: {}]   ;;  %s12344_s13 = inlined_call_operand.vmem [shape: f32[4,32,64], index: 13, kind: input, shape index: {}]   ;;  %s12345_s14 = inlined_call_operand.hbm [shape: f32[64,64], index: 14, kind: input, shape index: {}]   ;;  %s12346_s15 = inlined_call_operand.hbm [shape: f32[64,64], index: 15, kind: input, shape index: {}]   ;;  %s12347_s16 = inlined_call_operand.vmem [shape: f32[3,32,32], index: 16, kind: input, shape index: {}]   ;;  %s12348_s17 = inlined_call_operand.hbm [shape: f32[3,1,32], index: 17, kind: input, shape index: {}]   ;;  %s12349_s18 = inlined_call_operand.vmem [shape: f32[3,32,32], index: 18, kind: input, shape index: {}]   ;;  %s12350_s19 = inlined_call_operand.hbm [shape: f32[3,1,32], index: 19, kind: input, shape index: {}]   ;;  %s12351_s20 = inlined_call_operand.vmem [shape: f32[4,1,32], index: 20, kind: input, shape index: {}]   ;;  %s12352_s21 = inlined_call_operand.hbm [shape: f32[4,1,32], index: 21, kind: input, shape index: {}]   ;;  %s12353_s22 = inlined_call_operand.hbm [shape: f32[32,64], index: 22, kind: input, shape index: {}]   ;;  %s12354_s23 = inlined_call_operand.vmem [shape: f32[1,64], index: 23, kind: input, shape index: {}]   ;;  %s12355_s24 = inlined_call_operand.vmem [shape: f32[64,32], index: 24, kind: input, shape index: {}]   ;;  %s12356_s25 = inlined_call_operand.hbm [shape: f32[1,32], index: 25, kind: input, shape index: {}]   ;;  %s12357_s26 = inlined_call_operand.hbm [shape: f32[2,32,32], index: 26, kind: output, shape index: {}]  }
   0x1   :  { %12394 = sst [smem:[#allocation44_spill]] %s12331_s0 }
   0x2   :  { %12395 = sst [smem:[#allocation45_spill]] %s12332_s1 }
   0x3   :  { %12396 = sst [smem:[#allocation46_spill]] %s12333_s2 }
   0x4   :  { %12397 = sst [smem:[#allocation47_spill]] %s12334_s3 }
   0x5   :  { %12398 = sst [smem:[#allocation48_spill]] %s12335_s4 }
   0x6   :  { %12399 = sst [smem:[#allocation49_spill]] %s12336_s5 }
   0x7   :  { %12400 = sst [smem:[#allocation50_spill]] %s12337_s6 }
   0x8   :  { %12401 = sst [smem:[#allocation51_spill]] %s12338_s7 }
   0x9   :  { %12402 = sst [smem:[#allocation52_spill]] %s12339_s8 }
   0xa   :  { %12403 = sst [smem:[#allocation53_spill]] %s12340_s9 }
   0xb   :  { %12404 = sst [smem:[#allocation54_spill]] %s12341_s10 }
   0xc   :  { %12405 = sst [smem:[#allocation55_spill]] %s12342_s11 }
   0xd   :  { %12406 = sst [smem:[#allocation56_spill]] %s12346_s15 }
   0xe   :  { %12407 = sst [smem:[#allocation57_spill]] %s12349_s18 }
   0xf   :  { %12408 = sst [smem:[#allocation58_spill]] %s12350_s19 }
  0x10   :  { %12409 = sst [smem:[#allocation59_spill]] %s12351_s20 }
  0x11   :  { %12410 = sst [smem:[#allocation60_spill]] %s12353_s22 }
  0x12   :  { %12411 = sst [smem:[#allocation61_spill]] %s12354_s23 }
  0x13   :  { %12412 = sst [smem:[#allocation62_spill]] %s12355_s24 }
  0x14   :  { %12413 = sst [smem:[#allocation63_spill]] %s12357_s26 }
  0x15   :  { %31 = vsyncpa [#allocation3], 0 }
  0x16   :  { %32 = vsyncpa [#allocation6], 0 }
  0x17   :  { %33 = vsyncpa [#allocation9], 0 }
  0x18   :  { %34 = vsyncpa [#allocation12], 0 }
  0x19   :  { %35 = vsyncpa [#allocation15], 0 }
  0x1a   :  { %36 = vsyncpa [#allocation18], 0 }
  0x1b   :  { %37 = vsyncpa [#allocation21], 0 }
  0x1c   :  { %38 = vsyncpa [#allocation24], 0 }
  0x1d   :  { %39 = vsyncpa [#allocation4], 0 }
  0x1e   :  { %41 = vsyncpa [#allocation4 + $0x1], 0  ;;  %s10203_s27 = smov 0   ;;  %s10205_s3 = smov 0  }
  0x1f   :  { %s10207_s7 = smov 0   ;;  %s10209_s28 = smov 0  }
  0x20 LB: > { %12414 = sst [smem:[#allocation36_spill]] %s10023_s27  ;;  %s10224_s8 = sadd.s32 4294967295, %s10035_s28   ;;  %s10035_s28 = sphi %s10209_s28, %s12479_s28   ;;  %s10031_s7 = sphi %s10207_s7, %s12482_s7   ;;  %s10027_s3 = sphi %s10205_s3, %s12481_s3   ;;  %s10023_s27 = sphi %s10203_s27, %s12480_s27  }
  0x21   : > { %12415 = sst [smem:[#allocation37_spill]] %s10027_s3  ;;  %s7258_s4 = sadd.s32 4294967294, %s10035_s28  }
  0x22   : > { %12416 = sst [smem:[#allocation38_spill]] %s10031_s7  ;;  %s10228_s29 = sadd.s32 1, %s10035_s28  }
  0x23   : > { %12417 = sst [smem:[#allocation39_spill]] %s10035_s28  ;;  %s620_s0 = sadd.s32 1, %s10031_s7 }
  0x24   : > { %12418 = sst [smem:[#allocation40_spill]] %s10228_s29  ;;  %s617_s9 = ssub.s32 %s10035_s28, %s10228_s29 }
  0x25   : > { %p630_p0 = scmp.ne.s32.totalorder %s10031_s7, %s10027_s3  ;;  %p618_p1 = scmp.eq.s32.totalorder %s617_s9, 0 }
  0x26   : > { %p631_p2 = scmp.eq.s32.totalorder %s10224_s8, 1  ;;  %p636_p3 = scmp.ne.s32.totalorder %s10027_s3, %s10023_s27 }
  0x27   : > { %p637_p4 = scmp.eq.s32.totalorder %s7258_s4, 1  ;;  %p7259_p7 = scmp.ge.s32.totalorder %s10035_s28, 1 }
  0x28   : > { %s10239_s30 = scalar_select %p618_p1, %s10031_s7, %s620_s0  }
  0x29   : > { %p10241_p5 = por %p631_p2, %p630_p0  ;;  %p10245_p6 = por %p637_p4, %p636_p3 }
  0x2a   : > { %12419 = sst [smem:[#allocation41_spill]] %s10239_s30  ;;  %p644_p8 = scmp.lt.s32.totalorder %s10035_s28, 3 }
  0x2b   : > { %s12420_s2 = scalar_select %p10241_p5, 1, 0 }
  0x2c   : > { %s12422_s5 = scalar_select %p10245_p6, 1, 0 }
  0x2d   : > { %12421 = sst [smem:[#allocation42_spill]] %s12420_s2  ;;  %p12376_p9 = scmp.eq.s32.totalorder %s10224_s8, 0 }
  0x2e   : > { %12423 = sst [smem:[#allocation43_spill]] %s12422_s5  ;;  %p10252_p10 = pnand %p7259_p7, %p644_p8 }
  0x2f   : > { %s10037_s6 = smov [#allocation5]   ;;  %s10038_s0 = smov [#allocation8]  }
  0x30   : > { %s12424_s10 = scalar_select %p10252_p10, 1, 0 }
  0x31   : > { %p8890_p11 = pneg %p10252_p10  ;;  %s669_s1 = sshll.u32 %s10037_s6, 4  ;;  %s10258_s1 = int_to_ptr.vmem [resolvable:$true] %s669_s1 }
  0x32   : > { %s695_s9 = sshll.u32 %s10038_s0, 4  ;;  %s10039_s30 = smov [#allocation11]   ;;  %s10266_s9 = int_to_ptr.vmem [resolvable:$true] %s695_s9 }
  0x33   : > { %p10262_p12 = pnand %p12376_p9, %p8890_p11  ;;  %s10268_s7 = sshll.u32 %s10039_s30, 4  ;;  %s723_s7 = int_to_ptr.vmem [resolvable:$true] %s10268_s7 }
  0x34   : > { %s12426_s27 = sld [smem:[#allocation49_spill]] }
  0x35   : > { %p10278_p0 = pneg %p10262_p12 }
  0x3a   : > { %s12427_s26 = smov %s12426_s27  ;;  %s9521_s28 = scalar_lea.hbm %s12426_s27, 1024 }
  0x3b   : > { %p9522_p13 = scmp.ne.s32.totalorder %s12427_s26, %s9521_s28  ;;  %p9528_p3 = scmp.lt.u32.totalorder %s9521_s28, %s12427_s26 }
  0x3d   : > { %p9524_p1 = pnand %p10278_p0, %p9522_p13 }
  0x3f   : > { %p9525_p2 = pneg %p9524_p1 }
  0x41   : > { %p9530_p4 = pnand %p9528_p3, %p9525_p2 }
  0x43   : > { %9533 = shalt.err (!%p9530_p4)
}
  0x44   : > { %s9534_s27 = scalar_lea.vmem %s10258_s1, 1024  ;;  %p9542_p9 = scmp.lt.s32.totalorder %s10258_s1, %s10258_s1 }
  0x45   : > { %p9535_p7 = scmp.ne.s32.totalorder %s10258_s1, %s9534_s27  ;;  %p9543_p6 = scmp.lt.s32.totalorder %s9534_s27, %s9534_s27 }
  0x47   : > { %p9537_p8 = pnand %p9535_p7, %p10278_p0  ;;  %p9544_p13 = por %p9543_p6, %p9542_p9 }
  0x49   : > { %p9538_p11 = pneg %p9537_p8 }
  0x4b   : > { %p9545_p1 = pnand %p9544_p13, %p9538_p11 }
  0x4d   : > { %9548 = shalt.err (!%p9545_p1)
}
  0x4e   : > { %s12382_s29 = smov 128   ;;  %s12384_s28 = smov 8  }
  0x4f   : > { %8896 = dma.hbm_to_vmem [thread:$0]  (!%p10262_p12), %s12427_s26, 1024, %s10258_s1, [#allocation6], %s12382_s29, %s12382_s29, %s12384_s28  }
  0x50   : > { %s12429_s30 = sld [smem:[#allocation51_spill]] }
  0x56   : > { %s9549_s27 = scalar_lea.hbm %s12429_s30, 512 }
  0x57   : > { %p9550_p6 = scmp.ne.s32.totalorder %s12429_s30, %s9549_s27  ;;  %p9556_p3 = scmp.lt.u32.totalorder %s9549_s27, %s12429_s30 }
  0x59   : > { %p9552_p9 = pnand %p9550_p6, %p10278_p0 }
  0x5b   : > { %p9553_p2 = pneg %p9552_p9 }
  0x5d   : > { %p9558_p4 = pnand %p9556_p3, %p9553_p2 }
  0x5f   : > { %9561 = shalt.err (!%p9558_p4)
}
  0x60   : > { %s9562_s1 = scalar_lea.vmem %s10266_s9, 512  ;;  %p9570_p13 = scmp.lt.s32.totalorder %s10266_s9, %s10266_s9 }
  0x61   : > { %p9563_p7 = scmp.ne.s32.totalorder %s10266_s9, %s9562_s1  ;;  %p9571_p1 = scmp.lt.s32.totalorder %s9562_s1, %s9562_s1 }
  0x63   : > { %p9565_p8 = pnand %p9563_p7, %p10278_p0  ;;  %p9572_p6 = por %p9571_p1, %p9570_p13 }
  0x65   : > { %p9566_p11 = pneg %p9565_p8 }
  0x67   : > { %p9573_p9 = pnand %p9572_p6, %p9566_p11 }
  0x69   : > { %9576 = shalt.err (!%p9573_p9)
}
  0x6a   : > { %8902 = dma.hbm_to_vmem [thread:$0]  (!%p10262_p12), %s12429_s30, 512, %s10266_s9, [#allocation9], %s12382_s29, %s12382_s29, %s12384_s28  }
  0x6b   : > { %s12430_s2 = sld [smem:[#allocation53_spill]] }
  0x71   : > { %s9577_s5 = scalar_lea.hbm %s12430_s2, 128 }
  0x72   : > { %p9578_p2 = scmp.ne.s32.totalorder %s12430_s2, %s9577_s5  ;;  %p9584_p7 = scmp.lt.u32.totalorder %s9577_s5, %s12430_s2 }
  0x74   : > { %p9580_p3 = pnand %p9578_p2, %p10278_p0 }
  0x76   : > { %p9581_p4 = pneg %p9580_p3 }
  0x78   : > { %p9586_p8 = pnand %p9584_p7, %p9581_p4 }
  0x7a   : > { %9589 = shalt.err (!%p9586_p8)
}
  0x7b   : > { %s9590_s18 = scalar_lea.vmem %s723_s7, 128  ;;  %p9598_p6 = scmp.lt.s32.totalorder %s723_s7, %s723_s7 }
  0x7c   : > { %p9591_p11 = scmp.ne.s32.totalorder %s723_s7, %s9590_s18  ;;  %p9599_p9 = scmp.lt.s32.totalorder %s9590_s18, %s9590_s18 }
  0x7e   : > { %p9593_p13 = pnand %p9591_p11, %p10278_p0  ;;  %p9600_p5 = por %p9599_p9, %p9598_p6 }
  0x80   : > { %p9594_p1 = pneg %p9593_p13 }
  0x82   : > { %p9601_p10 = pnand %p9600_p5, %p9594_p1 }
  0x84   : > { %9604 = shalt.err (!%p9601_p10)
}
  0x85   : > { %8908 = dma.hbm_to_vmem [thread:$0]  (!%p10262_p12), %s12430_s2, 128, %s723_s7, [#allocation12]  }
  0x86   : > { %s10042_s23 = smov [#allocation14]   ;;  %s10043_s5 = smov [#allocation17]  }
  0x87   : > { %s745_s24 = sshll.u32 %s10042_s23, 4  ;;  %s777_s6 = sshll.u32 %s10043_s5, 4  ;;  %s746_s24 = int_to_ptr.vmem [resolvable:$true] %s745_s24  ;;  %s778_s6 = int_to_ptr.vmem [resolvable:$true] %s777_s6 }
  0x88   : > { %s12431_s11 = sld [smem:[#allocation55_spill]] }
  0x8e   : > { %s9605_s1 = scalar_lea.hbm %s12431_s11, 512 }
  0x8f   : > { %p9606_p5 = scmp.ne.s32.totalorder %s12431_s11, %s9605_s1  ;;  %p9612_p3 = scmp.lt.u32.totalorder %s9605_s1, %s12431_s11 }
  0x91   : > { %p9608_p10 = pnand %p9606_p5, %p10278_p0 }
  0x93   : > { %p9609_p2 = pneg %p9608_p10 }
  0x95   : > { %p9614_p4 = pnand %p9612_p3, %p9609_p2 }
  0x97   : > { %9617 = shalt.err (!%p9614_p4)
}
  0x98   : > { %s9618_s7 = scalar_lea.vmem %s746_s24, 512  ;;  %p9626_p13 = scmp.lt.s32.totalorder %s746_s24, %s746_s24 }
  0x99   : > { %p9619_p7 = scmp.ne.s32.totalorder %s746_s24, %s9618_s7  ;;  %p9627_p1 = scmp.lt.s32.totalorder %s9618_s7, %s9618_s7 }
  0x9b   : > { %p9621_p8 = pnand %p9619_p7, %p10278_p0  ;;  %p9628_p6 = por %p9627_p1, %p9626_p13 }
  0x9d   : > { %p9622_p11 = pneg %p9621_p8 }
  0x9f   : > { %p9629_p9 = pnand %p9628_p6, %p9622_p11 }
  0xa1   : > { %9632 = shalt.err (!%p9629_p9)
}
  0xa2   : > { %s12432_s29 = smov 8   ;;  %s12433_s20 = smov 128  }
  0xa3   : > { %8914 = dma.hbm_to_vmem [thread:$0]  (!%p10262_p12), %s12431_s11, 512, %s746_s24, [#allocation15], %s12433_s20, %s12433_s20, %s12432_s29  }
  0xa4   : > { %s12434_s15 = sld [smem:[#allocation56_spill]] }
  0xaa   : > { %s9633_s27 = scalar_lea.hbm %s12434_s15, 1024 }
  0xab   : > { %p9634_p5 = scmp.ne.s32.totalorder %s12434_s15, %s9633_s27  ;;  %p9640_p3 = scmp.lt.u32.totalorder %s9633_s27, %s12434_s15 }
  0xad   : > { %p9636_p10 = pnand %p9634_p5, %p10278_p0 }
  0xaf   : > { %p9637_p2 = pneg %p9636_p10 }
  0xb1   : > { %p9642_p4 = pnand %p9640_p3, %p9637_p2 }
  0xb3   : > { %9645 = shalt.err (!%p9642_p4)
}
  0xb4   : > { %s9646_s28 = scalar_lea.vmem %s778_s6, 1024  ;;  %p9654_p13 = scmp.lt.s32.totalorder %s778_s6, %s778_s6 }
  0xb5   : > { %p9647_p7 = scmp.ne.s32.totalorder %s778_s6, %s9646_s28  ;;  %p9655_p1 = scmp.lt.s32.totalorder %s9646_s28, %s9646_s28 }
  0xb7   : > { %p9649_p8 = pnand %p9647_p7, %p10278_p0  ;;  %p9656_p6 = por %p9655_p1, %p9654_p13 }
  0xb9   : > { %p9650_p11 = pneg %p9649_p8 }
  0xbb   : > { %p9657_p9 = pnand %p9656_p6, %p9650_p11 }
  0xbd   : > { %9660 = shalt.err (!%p9657_p9)
}
  0xbe   : > { %8920 = dma.hbm_to_vmem [thread:$0]  (!%p10262_p12), %s12434_s15, 1024, %s778_s6, [#allocation18], %s12433_s20, %s12433_s20, %s12432_s29  }
  0xbf   : > { %s10044_s5 = smov [#allocation20]   ;;  %s10045_s27 = smov [#allocation23]  }
  0xc0   : > { %s809_s0 = sshll.u32 %s10044_s5, 4  ;;  %s838_s1 = sshll.u32 %s10045_s27, 4  ;;  %s810_s0 = int_to_ptr.vmem [resolvable:$true] %s809_s0  ;;  %s839_s1 = int_to_ptr.vmem [resolvable:$true] %s838_s1 }
  0xc1   : > { %s12435_s19 = sld [smem:[#allocation58_spill]] }
  0xc7   : > { %s9661_s7 = scalar_lea.hbm %s12435_s19, 48 }
  0xc8   : > { %p9662_p5 = scmp.ne.s32.totalorder %s12435_s19, %s9661_s7  ;;  %p9668_p3 = scmp.lt.u32.totalorder %s9661_s7, %s12435_s19 }
  0xca   : > { %p9664_p10 = pnand %p9662_p5, %p10278_p0 }
  0xcc   : > { %p9665_p2 = pneg %p9664_p10 }
  0xce   : > { %p9670_p4 = pnand %p9668_p3, %p9665_p2 }
  0xd0   : > { %9673 = shalt.err (!%p9670_p4)
}
  0xd1   : > { %s9674_s6 = scalar_lea.vmem %s810_s0, 48  ;;  %s9681_s23 = scalar_lea.vmem %s810_s0, 64 }
  0xd2   : > { %p9675_p7 = scmp.ne.s32.totalorder %s810_s0, %s9674_s6  ;;  %p9682_p13 = scmp.lt.s32.totalorder %s810_s0, %s810_s0 }
  0xd3   : > { %p9683_p1 = scmp.lt.s32.totalorder %s9681_s23, %s9674_s6 }
  0xd4   : > { %p9677_p8 = pnand %p9675_p7, %p10278_p0 }
  0xd5   : > { %p9684_p6 = por %p9683_p1, %p9682_p13 }
  0xd6   : > { %p9678_p11 = pneg %p9677_p8 }
  0xd8   : > { %p9685_p9 = pnand %p9684_p6, %p9678_p11 }
  0xda   : > { %9688 = shalt.err (!%p9685_p9)
}
  0xdb   : > { %s12389_s2 = smov 16   ;;  %s12387_s5 = smov 1  }
  0xdc   : > { %8926 = dma.hbm_to_vmem [thread:$0]  (!%p10262_p12), %s12435_s19, 48, %s810_s0, [#allocation21], %s12389_s2, %s12389_s2, %s12387_s5  }
  0xdd   : > { %s12436_s22 = sld [smem:[#allocation60_spill]] }
  0xe3   : > { %s9689_s7 = scalar_lea.hbm %s12436_s22, 512 }
  0xe4   : > { %p9690_p5 = scmp.ne.s32.totalorder %s12436_s22, %s9689_s7  ;;  %p9696_p3 = scmp.lt.u32.totalorder %s9689_s7, %s12436_s22 }
  0xe6   : > { %p9692_p10 = pnand %p9690_p5, %p10278_p0 }
  0xe8   : > { %p9693_p2 = pneg %p9692_p10 }
  0xea   : > { %p9698_p4 = pnand %p9696_p3, %p9693_p2 }
  0xec   : > { %9701 = shalt.err (!%p9698_p4)
}
  0xed   : > { %s9702_s11 = scalar_lea.vmem %s839_s1, 512  ;;  %p9710_p13 = scmp.lt.s32.totalorder %s839_s1, %s839_s1 }
  0xee   : > { %p9703_p7 = scmp.ne.s32.totalorder %s839_s1, %s9702_s11  ;;  %p9711_p1 = scmp.lt.s32.totalorder %s9702_s11, %s9702_s11 }
  0xf0   : > { %p9705_p8 = pnand %p9703_p7, %p10278_p0  ;;  %p9712_p6 = por %p9711_p1, %p9710_p13 }
  0xf2   : > { %p9706_p11 = pneg %p9705_p8 }
  0xf4   : > { %p9713_p9 = pnand %p9712_p6, %p9706_p11 }
  0xf6   : > { %9716 = shalt.err (!%p9713_p9)
}
  0xf7   : > { %8932 = dma.hbm_to_vmem [thread:$0]  (!%p10262_p12), %s12436_s22, 512, %s839_s1, [#allocation24], %s12433_s20, %s12433_s20, %s12432_s29  }
  0xf8   : > { %s10048_s18 = smov [#allocation2]   ;;  %s10049_s7 = smov [#allocation7]  }
  0xf9   : > { %s656_s9 = sshll.u32 %s10048_s18, 4  ;;  %s682_s28 = sshll.u32 %s10049_s7, 4  ;;  %s657_s9 = int_to_ptr.vmem [resolvable:$true] %s656_s9  ;;  %s683_s28 = int_to_ptr.vmem [resolvable:$true] %s682_s28 }
  0xfa   : > { %s12437_s23 = sld [smem:[#allocation48_spill]] }
 0x100   : > { %s9717_s11 = scalar_lea.hbm %s12437_s23, 512 }
 0x101   : > { %p9718_p5 = scmp.ne.s32.totalorder %s12437_s23, %s9717_s11  ;;  %p9724_p3 = scmp.lt.u32.totalorder %s9717_s11, %s12437_s23 }
 0x103   : > { %p9720_p10 = pnand %p9718_p5, %p10278_p0 }
 0x105   : > { %p9721_p2 = pneg %p9720_p10 }
 0x107   : > { %p9726_p4 = pnand %p9724_p3, %p9721_p2 }
 0x109   : > { %9729 = shalt.err (!%p9726_p4)
}
 0x10a   : > { %s9730_s1 = scalar_lea.vmem %s657_s9, 512  ;;  %p9738_p13 = scmp.lt.s32.totalorder %s657_s9, %s657_s9 }
 0x10b   : > { %p9731_p7 = scmp.ne.s32.totalorder %s657_s9, %s9730_s1  ;;  %p9739_p1 = scmp.lt.s32.totalorder %s9730_s1, %s9730_s1 }
 0x10d   : > { %p9733_p8 = pnand %p9731_p7, %p10278_p0  ;;  %p9740_p6 = por %p9739_p1, %p9738_p13 }
 0x10f   : > { %p9734_p11 = pneg %p9733_p8 }
 0x111   : > { %p9741_p9 = pnand %p9740_p6, %p9734_p11 }
 0x113   : > { %9744 = shalt.err (!%p9741_p9)
}
 0x114   : > { %8893 = dma.hbm_to_vmem [thread:$0]  (!%p10262_p12), %s12437_s23, 512, %s657_s9, [#allocation3], %s12433_s20, %s12433_s20, %s12432_s29  }
 0x115   : > { %s12438_s18 = sld [smem:[#allocation50_spill]] }
 0x11b   : > { %s9745_s7 = scalar_lea.hbm %s12438_s18, 1024 }
 0x11c   : > { %p9746_p5 = scmp.ne.s32.totalorder %s12438_s18, %s9745_s7  ;;  %p9752_p3 = scmp.lt.u32.totalorder %s9745_s7, %s12438_s18 }
 0x11e   : > { %p9748_p10 = pnand %p9746_p5, %p10278_p0 }
 0x120   : > { %p9749_p2 = pneg %p9748_p10 }
 0x122   : > { %p9754_p4 = pnand %p9752_p3, %p9749_p2 }
 0x124   : > { %9757 = shalt.err (!%p9754_p4)
}
 0x125   : > { %s9758_s1 = scalar_lea.vmem %s683_s28, 1024  ;;  %p9766_p13 = scmp.lt.s32.totalorder %s683_s28, %s683_s28 }
 0x126   : > { %p9759_p7 = scmp.ne.s32.totalorder %s683_s28, %s9758_s1  ;;  %p9767_p1 = scmp.lt.s32.totalorder %s9758_s1, %s9758_s1 }
 0x128   : > { %p9761_p8 = pnand %p9759_p7, %p10278_p0  ;;  %p9768_p6 = por %p9767_p1, %p9766_p13 }
 0x12a   : > { %p9762_p11 = pneg %p9761_p8 }
 0x12c   : > { %p9769_p9 = pnand %p9768_p6, %p9762_p11 }
 0x12e   : > { %9772 = shalt.err (!%p9769_p9)
}
 0x12f   : > { %s10050_s9 = smov 256   ;;  %s12439_s15 = smov 16  }
 0x130   : > { %8899 = dma.hbm_to_vmem [thread:$0]  (!%p10262_p12), %s12438_s18, 1024, %s683_s28, [#allocation6], %s10050_s9, %s10050_s9, %s12439_s15  }
 0x131   : > { %s10051_s27 = smov [#allocation10]   ;;  %s10052_s24 = smov [#allocation13]  }
 0x132   : > { %s708_s7 = sshll.u32 %s10051_s27, 4  ;;  %s732_s6 = sshll.u32 %s10052_s24, 4  ;;  %s709_s7 = int_to_ptr.vmem [resolvable:$true] %s708_s7  ;;  %s10471_s6 = int_to_ptr.vmem [resolvable:$true] %s732_s6 }
 0x133   : > { %s12440_s1 = sld [smem:[#allocation52_spill]] }
 0x139   : > { %s9773_s19 = scalar_lea.hbm %s12440_s1, 512 }
 0x13a   : > { %p9774_p5 = scmp.ne.s32.totalorder %s12440_s1, %s9773_s19  ;;  %p9780_p3 = scmp.lt.u32.totalorder %s9773_s19, %s12440_s1 }
 0x13c   : > { %p9776_p10 = pnand %p9774_p5, %p10278_p0 }
 0x13e   : > { %p9777_p2 = pneg %p9776_p10 }
 0x140   : > { %p9782_p4 = pnand %p9780_p3, %p9777_p2 }
 0x142   : > { %9785 = shalt.err (!%p9782_p4)
}
 0x143   : > { %s9786_s9 = scalar_lea.vmem %s709_s7, 512  ;;  %p9794_p13 = scmp.lt.s32.totalorder %s709_s7, %s709_s7 }
 0x144   : > { %p9787_p7 = scmp.ne.s32.totalorder %s709_s7, %s9786_s9  ;;  %p9795_p1 = scmp.lt.s32.totalorder %s9786_s9, %s9786_s9 }
 0x146   : > { %p9789_p8 = pnand %p9787_p7, %p10278_p0  ;;  %p9796_p6 = por %p9795_p1, %p9794_p13 }
 0x148   : > { %p9790_p11 = pneg %p9789_p8 }
 0x14a   : > { %p9797_p9 = pnand %p9796_p6, %p9790_p11 }
 0x14c   : > { %9800 = shalt.err (!%p9797_p9)
}
 0x14d   : > { %8905 = dma.hbm_to_vmem [thread:$0]  (!%p10262_p12), %s12440_s1, 512, %s709_s7, [#allocation9], %s12433_s20, %s12433_s20, %s12432_s29  }
 0x14e   : > { %s12441_s27 = sld [smem:[#allocation54_spill]] }
 0x154   : > { %s12442_s24 = smov %s12441_s27  ;;  %s9801_s11 = scalar_lea.hbm %s12441_s27, 512 }
 0x155   : > { %p9802_p5 = scmp.ne.s32.totalorder %s12442_s24, %s9801_s11  ;;  %p9808_p3 = scmp.lt.u32.totalorder %s9801_s11, %s12442_s24 }
 0x157   : > { %p9804_p10 = pnand %p9802_p5, %p10278_p0 }
 0x159   : > { %p9805_p2 = pneg %p9804_p10 }
 0x15b   : > { %p9810_p4 = pnand %p9808_p3, %p9805_p2 }
 0x15d   : > { %9813 = shalt.err (!%p9810_p4)
}
 0x15e   : > { %s9814_s7 = scalar_lea.vmem %s10471_s6, 512  ;;  %p9822_p13 = scmp.lt.s32.totalorder %s10471_s6, %s10471_s6 }
 0x15f   : > { %p9815_p7 = scmp.ne.s32.totalorder %s10471_s6, %s9814_s7  ;;  %p9823_p1 = scmp.lt.s32.totalorder %s9814_s7, %s9814_s7 }
 0x161   : > { %p9817_p8 = pnand %p9815_p7, %p10278_p0  ;;  %p9824_p6 = por %p9823_p1, %p9822_p13 }
 0x163   : > { %p9818_p11 = pneg %p9817_p8 }
 0x165   : > { %p9825_p9 = pnand %p9824_p6, %p9818_p11 }
 0x167   : > { %9828 = shalt.err (!%p9825_p9)
}
 0x168   : > { %8911 = dma.hbm_to_vmem [thread:$0]  (!%p10262_p12), %s12442_s24, 512, %s10471_s6, [#allocation12], %s12433_s20, %s12433_s20, %s12432_s29  }
 0x169   : > { %s10053_s23 = smov [#allocation16]   ;;  %s10054_s27 = smov [#allocation19]  }
 0x16a   : > { %s764_s5 = sshll.u32 %s10053_s23, 4  ;;  %s793_s11 = sshll.u32 %s10054_s27, 4  ;;  %s765_s5 = int_to_ptr.vmem [resolvable:$true] %s764_s5  ;;  %s10520_s11 = int_to_ptr.vmem [resolvable:$true] %s793_s11 }
 0x16b   : > { %s9829_s28 = scalar_lea.hbm %s12345_s14, 1024 }
 0x16c   : > { %p9830_p5 = scmp.ne.s32.totalorder %s12345_s14, %s9829_s28  ;;  %p9836_p3 = scmp.lt.u32.totalorder %s9829_s28, %s12345_s14 }
 0x16e   : > { %p9832_p10 = pnand %p9830_p5, %p10278_p0 }
 0x170   : > { %p9833_p2 = pneg %p9832_p10 }
 0x172   : > { %p9838_p4 = pnand %p9836_p3, %p9833_p2 }
 0x174   : > { %9841 = shalt.err (!%p9838_p4)
}
 0x175   : > { %s9842_s19 = scalar_lea.vmem %s765_s5, 1024  ;;  %p9850_p13 = scmp.lt.s32.totalorder %s765_s5, %s765_s5 }
 0x176   : > { %p9843_p7 = scmp.ne.s32.totalorder %s765_s5, %s9842_s19  ;;  %p9851_p1 = scmp.lt.s32.totalorder %s9842_s19, %s9842_s19 }
 0x178   : > { %p9845_p8 = pnand %p9843_p7, %p10278_p0  ;;  %p9852_p6 = por %p9851_p1, %p9850_p13 }
 0x17a   : > { %p9846_p11 = pneg %p9845_p8 }
 0x17c   : > { %p9853_p9 = pnand %p9852_p6, %p9846_p11 }
 0x17e   : > { %9856 = shalt.err (!%p9853_p9)
}
 0x17f   : > { %8917 = dma.hbm_to_vmem [thread:$0]  (!%p10262_p12), %s12345_s14, 1024, %s765_s5, [#allocation15], %s12433_s20, %s12433_s20, %s12432_s29  }
 0x180   : > { %s9857_s28 = scalar_lea.hbm %s12348_s17, 48 }
 0x181   : > { %p9858_p5 = scmp.ne.s32.totalorder %s12348_s17, %s9857_s28  ;;  %p9864_p3 = scmp.lt.u32.totalorder %s9857_s28, %s12348_s17 }
 0x183   : > { %p9860_p10 = pnand %p9858_p5, %p10278_p0 }
 0x185   : > { %p9861_p2 = pneg %p9860_p10 }
 0x187   : > { %p9866_p4 = pnand %p9864_p3, %p9861_p2 }
 0x189   : > { %9869 = shalt.err (!%p9866_p4)
}
 0x18a   : > { %s9870_s29 = scalar_lea.vmem %s10520_s11, 48  ;;  %s9877_s20 = scalar_lea.vmem %s10520_s11, 64 }
 0x18b   : > { %p9871_p7 = scmp.ne.s32.totalorder %s10520_s11, %s9870_s29  ;;  %p9878_p13 = scmp.lt.s32.totalorder %s10520_s11, %s10520_s11 }
 0x18c   : > { %p9879_p1 = scmp.lt.s32.totalorder %s9877_s20, %s9870_s29 }
 0x18d   : > { %p9873_p8 = pnand %p9871_p7, %p10278_p0 }
 0x18e   : > { %p9880_p6 = por %p9879_p1, %p9878_p13 }
 0x18f   : > { %p9874_p11 = pneg %p9873_p8 }
 0x191   : > { %p9881_p9 = pnand %p9880_p6, %p9874_p11 }
 0x193   : > { %9884 = shalt.err (!%p9881_p9)
}
 0x194   : > { %s12443_s5 = smov 1   ;;  %s10055_s27 = smov [#allocation22]  }
 0x195   : > { %8923 = dma.hbm_to_vmem [thread:$0]  (!%p10262_p12), %s12348_s17, 48, %s10520_s11, [#allocation18], %s12439_s15, %s12439_s15, %s12443_s5  }
 0x196   : > { %s825_s0 = sshll.u32 %s10055_s27, 4  ;;  %s10056_s2 = smov [#allocation25]   ;;  %s826_s0 = int_to_ptr.vmem [resolvable:$true] %s825_s0 }
 0x197   : > { %s858_s28 = sshll.u32 %s10056_s2, 4  ;;  %s9885_s22 = scalar_lea.hbm %s12352_s21, 64  ;;  %s10570_s28 = int_to_ptr.vmem [resolvable:$true] %s858_s28 }
 0x198   : > { %p9886_p5 = scmp.ne.s32.totalorder %s12352_s21, %s9885_s22  ;;  %p9892_p3 = scmp.lt.u32.totalorder %s9885_s22, %s12352_s21 }
 0x19a   : > { %p9888_p10 = pnand %p9886_p5, %p10278_p0 }
 0x19c   : > { %p9889_p2 = pneg %p9888_p10 }
 0x19e   : > { %p9894_p4 = pnand %p9892_p3, %p9889_p2 }
 0x1a0   : > { %9897 = shalt.err (!%p9894_p4)
}
 0x1a1   : > { %s9898_s19 = scalar_lea.vmem %s826_s0, 64  ;;  %p9906_p13 = scmp.lt.s32.totalorder %s826_s0, %s826_s0 }
 0x1a2   : > { %p9899_p7 = scmp.ne.s32.totalorder %s826_s0, %s9898_s19  ;;  %p9907_p1 = scmp.lt.s32.totalorder %s9898_s19, %s9898_s19 }
 0x1a4   : > { %p9901_p8 = pnand %p9899_p7, %p10278_p0  ;;  %p9908_p6 = por %p9907_p1, %p9906_p13 }
 0x1a6   : > { %p9902_p11 = pneg %p9901_p8 }
 0x1a8   : > { %p9909_p9 = pnand %p9908_p6, %p9902_p11 }
 0x1aa   : > { %9912 = shalt.err (!%p9909_p9)
}
 0x1ab   : > { %8929 = dma.hbm_to_vmem [thread:$0]  (!%p10262_p12), %s12352_s21, 64, %s826_s0, [#allocation21], %s12439_s15, %s12439_s15, %s12443_s5  }
 0x1ac   : > { %s9913_s7 = scalar_lea.hbm %s12356_s25, 16 }
 0x1ad   : > { %p9914_p5 = scmp.ne.s32.totalorder %s12356_s25, %s9913_s7  ;;  %p9920_p3 = scmp.lt.u32.totalorder %s9913_s7, %s12356_s25 }
 0x1af   : > { %p9916_p10 = pnand %p9914_p5, %p10278_p0 }
 0x1b1   : > { %p9917_p2 = pneg %p9916_p10 }
 0x1b3   : > { %p9922_p4 = pnand %p9920_p3, %p9917_p2 }
 0x1b5   : > { %9925 = shalt.err (!%p9922_p4)
}
 0x1b6   : > { %s9926_s15 = scalar_lea.vmem %s10570_s28, 16  ;;  %s9933_s5 = scalar_lea.vmem %s10570_s28, 32 }
 0x1b7   : > { %p9927_p7 = scmp.ne.s32.totalorder %s10570_s28, %s9926_s15  ;;  %p9934_p13 = scmp.lt.s32.totalorder %s10570_s28, %s10570_s28 }
 0x1b8   : > { %p9935_p1 = scmp.lt.s32.totalorder %s9933_s5, %s9926_s15 }
 0x1b9   : > { %p9929_p8 = pnand %p9927_p7, %p10278_p0 }
 0x1ba   : > { %p9936_p6 = por %p9935_p1, %p9934_p13 }
 0x1bb   : > { %p9930_p11 = pneg %p9929_p8 }
 0x1bd   : > { %p9937_p9 = pnand %p9936_p6, %p9930_p11 }
 0x1bf   : > { %9940 = shalt.err (!%p9937_p9)
}
 0x1c0   : > { %8935 = dma.hbm_to_vmem [thread:$0]  (!%p10262_p12), %s12356_s25, 16, %s10570_s28, [#allocation24]  }
 0x1c1   : > { %p12444_p5 = scmp.ne.s32.totalorder %s12424_s10, 0 }
 0x1c2   : > { %p12445_p0 = scmp.eq.s32.totalorder (!%p12444_p5), %s10224_s8, 0 }
 0x1c3   : > { %903 = sbr.rel (%p12444_p5) target bundleno = 11188 (0x2bb4), region = 124 }
 0x1ca   : > { %9986 = dma.done.wait (%p12445_p0), [#allocation3], 512   ;;  %p12446_p10 = pmov %p12445_p0 }
 0x1cb   : > { %p12447_p2 = pmov %p12445_p0 }
 0x1cc   : > { %9988 = vsyncadd (%p12446_p10), [#allocation3], 4294966784 }
 0x1cd   : > { %9990 = dma.done.wait (%p12447_p2), [#allocation6], 2048   ;;  %p12448_p3 = pmov %p12445_p0 }
 0x1ce   : > { %p12449_p4 = pmov %p12445_p0 }
 0x1cf   : > { %9992 = vsyncadd (%p12448_p3), [#allocation6], 4294965248 }
 0x1d0   : > { %9994 = dma.done.wait (%p12449_p4), [#allocation9], 1024   ;;  %p12450_p12 = pmov %p12445_p0 }
 0x1d1   : > { %p12451_p7 = pmov %p12445_p0 }
 0x1d2   : > { %9996 = vsyncadd (%p12450_p12), [#allocation9], 4294966272 }
 0x1d3   : > { %9998 = dma.done.wait (%p12451_p7), [#allocation12], 640   ;;  %p12452_p8 = pmov %p12445_p0 }
 0x1d4   : > { %p12453_p11 = pmov %p12445_p0 }
 0x1d5   : > { %10000 = vsyncadd (%p12452_p8), [#allocation12], 4294966656 }
 0x1d6   : > { %10002 = dma.done.wait (%p12453_p11), [#allocation15], 1536   ;;  %p12454_p13 = pmov %p12445_p0 }
 0x1d7   : > { %p12455_p1 = pmov %p12445_p0 }
 0x1d8   : > { %10004 = vsyncadd (%p12454_p13), [#allocation15], 4294965760 }
 0x1d9   : > { %10006 = dma.done.wait (%p12455_p1), [#allocation18], 1072   ;;  %p12456_p6 = pmov %p12445_p0 }
 0x1da   : > { %p12457_p9 = pmov %p12445_p0 }
 0x1db   : > { %10008 = vsyncadd (%p12456_p6), [#allocation18], 4294966224 }
 0x1dc   : > { %10010 = dma.done.wait (%p12457_p9), [#allocation21], 112   ;;  %p12458_p5 = pmov %p12445_p0 }
 0x1de   : > { %10012 = vsyncadd (%p12458_p5), [#allocation21], 4294967184 }
 0x1df   : > { %10014 = dma.done.wait (%p12445_p0), [#allocation24], 528   ;;  %p12459_p10 = pmov %p12445_p0 }
 0x1e0   : > { %p1044_p2 = scmp.lt.s32.totalorder %s10224_s8, 1  ;;  %s12460_s19 = sld [smem:[#allocation44_spill]]  ;;  %vm1072_vm0 = vcmask 261120   ;;  %v1068_v0 = vld [vmem:[#allocation2] sm:$0xff]  ;;  %v1069_v1 = vld [vmem:[#allocation2 + $0x8] sm:$0xff]  ;;  %v1070_v2 = vld [vmem:[#allocation2 + $0x10] sm:$0xff] }
 0x1e1   : > { %10016 = vsyncadd (%p12459_p10), [#allocation24], 4294966768  ;;  %v8455_v3 = vpack.c.bf16 %v1069_v1, %v1068_v0  ;;  %v1071_v4 = vld [vmem:[#allocation2 + $0x18] sm:$0xff]  ;;  %vm1182_vm1 = vcmask 130048   ;;  %s10057_s27 = smov 64   ;;  %s10058_s2 = smov 96  }
 0x1e2   : > { %s10653_s3 = scalar_select %p1044_p2, %s10224_s8, 1  ;;  %v8459_v6 = vpack.c.bf16 %v1071_v4, %v1070_v2  ;;  %vm10702_vm2 = vmpackc.low %vm1182_vm1, %vm1182_vm1  ;;  %v1288_v53 = vld [vmem:[#allocation5] sm:$0xff]  ;;  %v1289_v54 = vld [vmem:[#allocation5 + $0x8] sm:$0xff] }
 0x1e3   : > { %8456 = vmatprep.subr.bf16.mxu0 %v8455_v3  ;;  %s10059_s9 = smov 80   ;;  %s10060_s7 = smov 112   ;;  %v1290_v63 = vld [vmem:[#allocation5 + $0x10] sm:$0xff]  ;;  %v1291_v0 = vld [vmem:[#allocation5 + $0x18] sm:$0xff] }
 0x1e4   : > { %s7587_s10 = sshll.u32 %s10653_s3, 5  ;;  %8458 = vmatpush3.bf16.msra.mxu0 %v8455_v3  ;;  %s12392_s22 = smov 48  }
 0x1e5   : > { %8460 = vmatprep.subr.bf16.mxu0 %v8459_v6  ;;  %s10063_s15 = smov 32   ;;  %s12463_s11 = sld [smem:[#allocation57_spill]] }
 0x1e6   : > { %s10661_s23 = scalar_lea.vmem %s12460_s19, %s7587_s10  ;;  %s12464_s0 = sld [smem:[#allocation59_spill]] }
 0x1e7   : > { %v10664_v5 = vld [vmem:[%s10661_s23] sm:$0xff]  ;;  %v10669_v7 = vld [vmem:[%s10661_s23 + $0x8] sm:$0xff]  ;;  %v10672_v8 = vld [vmem:[%s10661_s23 + $0x10] sm:$0xff]  ;;  %s12465_s19 = sld [smem:[#allocation45_spill]]  ;;  %s8827_s4 = smul.u32 48, %s10653_s3 }
 0x1e8   : > { %7911 = vmatprep.mubr.msk.f32.mxu0 %vm1072_vm0, %v10664_v5  ;;  %8462 = vmatpush3.bf16.msra.mxu0 %v8459_v6  ;;  %v10679_v9 = vld [vmem:[%s10661_s23 + $0x18] sm:$0xff]  ;;  %s12470_s29 = sld [smem:[#allocation61_spill]]  ;;  %s12471_s20 = sld [smem:[#allocation37_spill]] }
 0x1eb   : > { %7912 = vmatmul.mubr.msk.f32.vlgmr.msra.gmra.mrb[0].mxu0 %vm1072_vm0, %v10669_v7 }
 0x1ec   : > { %7914 = vmatprep.mubr.msk.f32.mxu0 %vm1072_vm0, %v10672_v8 }
 0x1ed   : > { %s11129_s6 = scalar_lea.vmem %s12465_s19, %s7587_s10  ;;  %s12466_s10 = smov 48  }
 0x1ee   : > { %s12467_s19 = sld [smem:[#allocation46_spill]] }
 0x1ef   : > { %7915 = vmatmul.mubr.msk.f32.gmra.mrb[2].mxu0 %vm1072_vm0, %v10679_v9 }
 0x2be   : > { %v10683_v10 = vpop.f32.mrb[0].mxu0 }
 0x2bf   : > { %v1151_v11 = vpop.f32.mrb[1].mxu0 }
 0x2c0   : > { %7925 = vmatprep.mubr.msk.f32.mxu1 %vm1182_vm1, %v1151_v11  ;;  %v9043_v12 = vpack.i.bf16 %v10683_v10, %v1151_v11 }
 0x2c2   : > { %9044 = vrot.lane.b32.xlu1 %v9043_v12, %s10057_s27  ;;  %9034 = vrot.lane.b32.xlu0 %v9043_v12, %s10058_s2  ;;  %v7916_v13 = vpop.f32.mrb[2].mxu0 }
 0x2c3   : > { %v1161_v14 = vpop.f32.mrb[3].mxu0 }
 0x2c4   : > { %v9048_v15 = vpack.i.bf16 %v7916_v13, %v1161_v14 }
 0x2c6   : > { %9049 = vrot.lane.b32.xlu1 %v9048_v15, %s10057_s27  ;;  %9039 = vrot.lane.b32.xlu0 %v9048_v15, %s10058_s2 }
 0x2ca   : > { %9059 = vrot.lane.b32.xlu1 %v9048_v15, %s10059_s9  ;;  %9054 = vrot.lane.b32.xlu0 %v9043_v12, %s10059_s9 }
 0x2ce   : > { %1524 = vrot.lane.b32.xlu1 %v10683_v10, %s10060_s7  ;;  %1522 = vrot.lane.b32.xlu0 %v1151_v11, %s10060_s7 }
 0x2d2   : > { %1528 = vrot.lane.b32.xlu1 %v7916_v13, %s10060_s7  ;;  %1526 = vrot.lane.b32.xlu0 %v1161_v14, %s10060_s7 }
 0x2d6   : > { %9069 = vrot.lane.b32.xlu1 %v9048_v15, %s12392_s22  ;;  %9064 = vrot.lane.b32.xlu0 %v9043_v12, %s12392_s22  ;;  %s10062_s22 = smov 16  }
 0x334   : > { %v9045_v16 = vpop.permute.xlu1 %9044  ;;  %v9035_v17 = vpop.permute.xlu0 %9034 }
 0x335   : > { %v9047_v18 = vunpack.i.h.bf16 %v9045_v16  ;;  %v9046_v19 = vunpack.i.l.bf16 %v9045_v16  ;;  %v9037_v20 = vunpack.i.h.bf16 %v9035_v17  ;;  %v9036_v21 = vunpack.i.l.bf16 %v9035_v17  ;;  %v1644_v17 = vld [vmem:[#allocation5 + $0x20] sm:$0xff] }
 0x337   : > { %v8463_v23 = vpack.c.bf16 %v9037_v20, %v9036_v21  ;;  %v8475_v24 = vpack.c.bf16 %v9047_v18, %v9046_v19 }
 0x338   : > { %v9050_v25 = vpop.permute.xlu1 %9049  ;;  %v9040_v26 = vpop.permute.xlu0 %9039 }
 0x339   : > { %v9052_v27 = vunpack.i.h.bf16 %v9050_v25  ;;  %v9051_v28 = vunpack.i.l.bf16 %v9050_v25  ;;  %v9042_v29 = vunpack.i.h.bf16 %v9040_v26  ;;  %v9041_v30 = vunpack.i.l.bf16 %v9040_v26  ;;  %8465 = vmatprep.subr.msk.bf16.mxu1 %vm10702_vm2, %v8463_v23  ;;  %8476 = vmatprep.subr.bf16.mxu0 %v8475_v24  ;;  %v1646_v25 = vld [vmem:[#allocation5 + $0x30] sm:$0xff] }
 0x33a   : > { %8468 = vmatpush3.bf16.xpose.msk.msra.mxu1 %vm10702_vm2, %v8463_v23  ;;  %8478 = vmatpush3.bf16.msra.mxu0 %v8475_v24 }
 0x33b   : > { %v8469_v31 = vpack.c.bf16 %v9042_v29, %v9041_v30  ;;  %v8479_v32 = vpack.c.bf16 %v9052_v27, %v9051_v28  ;;  %v1647_v27 = vld [vmem:[#allocation5 + $0x38] sm:$0xff] }
 0x33c   : > { %v9060_v33 = vpop.permute.xlu1 %9059  ;;  %v9055_v34 = vpop.permute.xlu0 %9054 }
 0x33d   : > { %v9057_v35 = vunpack.i.h.bf16 %v9055_v34  ;;  %v9056_v36 = vunpack.i.l.bf16 %v9055_v34  ;;  %8480 = vmatprep.subr.bf16.mxu0 %v8479_v32  ;;  %8471 = vmatprep.subr.msk.bf16.mxu1 %vm10702_vm2, %v8469_v31  ;;  %v9062_v56 = vunpack.i.h.bf16 %v9060_v33  ;;  %v9061_v57 = vunpack.i.l.bf16 %v9060_v33 }
 0x33e   : > { %8482 = vmatpush3.bf16.msra.mxu0 %v8479_v32 }
 0x33f   : > { %v8483_v37 = vpack.c.bf16 %v9057_v35, %v9056_v36  ;;  %v8489_v2 = vpack.c.bf16 %v9062_v56, %v9061_v57 }
 0x340   : > { %v1525_v38 = vpop.permute.xlu1 %1524  ;;  %v1523_v39 = vpop.permute.xlu0 %1522 }
 0x341   : > { %8485 = vmatprep.subr.msk.bf16.mxu0 %vm10702_vm2, %v8483_v37 }
 0x342   : > { %8474 = vmatpush3.bf16.xpose.msk.msra.mxu1 %vm10702_vm2, %v8469_v31 }
 0x344   : > { %v1529_v40 = vpop.permute.xlu1 %1528  ;;  %v1527_v41 = vpop.permute.xlu0 %1526 }
 0x348   : > { %v9070_v42 = vpop.permute.xlu1 %9069  ;;  %v9065_v43 = vpop.permute.xlu0 %9064 }
 0x349   : > { %v9072_v44 = vunpack.i.h.bf16 %v9070_v42  ;;  %v9071_v45 = vunpack.i.l.bf16 %v9070_v42  ;;  %v9067_v46 = vunpack.i.h.bf16 %v9065_v43  ;;  %v9066_v47 = vunpack.i.l.bf16 %v9065_v43  ;;  %7926 = vmatmul.mubr.msk.f32.vlgmr.msra.gmra.mrb[0].mxu1 %vm1182_vm1, %v10683_v10 }
 0x34a   : > { %7928 = vmatprep.mubr.msk.f32.mxu1 %vm1182_vm1, %v1161_v14  ;;  %v1645_v14 = vld [vmem:[#allocation5 + $0x28] sm:$0xff] }
 0x34b   : > { %v8495_v48 = vpack.c.bf16 %v9067_v46, %v9066_v47  ;;  %v8499_v49 = vpack.c.bf16 %v9072_v44, %v9071_v45 }
 0x34d   : > { %7929 = vmatmul.mubr.msk.f32.gmra.mrb[2].mxu1 %vm1182_vm1, %v7916_v13  ;;  %8496 = vmatprep.subr.bf16.mxu1 %v8495_v48 }
 0x34e   : > { %8498 = vmatpush3.bf16.msra.mxu1 %v8495_v48 }
 0x34f   : > { %8500 = vmatprep.subr.bf16.mxu1 %v8499_v49 }
 0x352   : > { %8502 = vmatpush3.bf16.msra.mxu1 %v8499_v49 }
 0x41c   : > { %v7927_v50 = vpop.f32.mrb[0].mxu1 }
 0x41d   : > { %v1285_v51 = vmul.f32 0.25, %v7927_v50  ;;  %v1265_v52 = vpop.f32.mrb[1].mxu1 }
 0x41e   : > { %v1284_v55 = vmul.f32 0.25, %v1265_v52 }
 0x41f   : > { %v1293_v60 = vmul.f32 %v1289_v54, %v1285_v51 }
 0x420   : > { %v1292_v58 = vmul.f32 %v1288_v53, %v1284_v55  ;;  %v7930_v59 = vpop.f32.mrb[2].mxu1 }
 0x421   : > { %v1287_v61 = vmul.f32 0.25, %v7930_v59  ;;  %v1275_v62 = vpop.f32.mrb[3].mxu1  ;;  %v1299_v36 = vsel %vm1072_vm0, %v1293_v60, 0.0 }
 0x422   : > { %v1286_v1 = vmul.f32 0.25, %v1275_v62  ;;  %7939 = vmatprep.mubr.msk.f32.mxu0 %vm1072_vm0, %v1292_v58  ;;  %v1296_v32 = vsel %vm1072_vm0, %v1292_v58, 0.0 }
 0x423   : > { %7940 = vmatmul.mubr.msk.f32.vlgmr.msra.gmra.mrb[4].mxu0 %vm1072_vm0, %v1293_v60  ;;  %v1295_v4 = vmul.f32 %v1291_v0, %v1287_v61 }
 0x424   : > { %v1294_v3 = vmul.f32 %v1290_v63, %v1286_v1  ;;  %8488 = vmatpush3.bf16.xpose.msk.msra.mxu0 %vm10702_vm2, %v8483_v37 }
 0x425   : > { %8491 = vmatprep.subr.msk.bf16.mxu0 %vm10702_vm2, %v8489_v2  ;;  %v1305_v37 = vsel %vm1072_vm0, %v1295_v4, 0.0 }
 0x426   : > { %7942 = vmatprep.mubr.msk.f32.mxu0 %vm1072_vm0, %v1294_v3  ;;  %v1302_v34 = vsel %vm1072_vm0, %v1294_v3, 0.0 }
 0x427   : > { %7943 = vmatmul.mubr.msk.f32.gmra.mrb[6].mxu0 %vm1072_vm0, %v1295_v4 }
 0x428   : > { %7953 = vmatprep.mubr.msk.f32.mxu0 %vm1182_vm1, %v1523_v39 }
 0x42c   : > { %8494 = vmatpush3.bf16.xpose.msk.msra.mxu0 %vm10702_vm2, %v8489_v2 }
 0x433   : > { %7954 = vmatmul.mubr.msk.f32.vlgmr.msra.gmra.mrb[8].mxu0 %vm1182_vm1, %v1525_v38 }
 0x434   : > { %7956 = vmatprep.mubr.msk.f32.mxu0 %vm1182_vm1, %v1527_v41 }
 0x437   : > { %7957 = vmatmul.mubr.msk.f32.gmra.mrb[10].mxu0 %vm1182_vm1, %v1529_v40 }
 0x4f6   : > { %v10734_v6 = vpop.f32.mrb[4].mxu0 }
 0x4f7   : > { %v10736_v10 = vpop.f32.mrb[5].mxu0 }
 0x4fa   : > { %v10738_v11 = vpop.f32.mrb[6].mxu0 }
 0x4fb   : > { %v10740_v12 = vpop.f32.mrb[7].mxu0 }
 0x506   : > { %v7955_v13 = vpop.f32.mrb[8].mxu0 }
 0x507   : > { %v1640_v15 = vmul.f32 0.25, %v7955_v13  ;;  %v1620_v16 = vpop.f32.mrb[9].mxu0 }
 0x508   : > { %v1639_v18 = vmul.f32 0.25, %v1620_v16 }
 0x509   : > { %v1649_v19 = vmul.f32 %v1645_v14, %v1640_v15 }
 0x50a   : > { %v1648_v20 = vmul.f32 %v1644_v17, %v1639_v18  ;;  %v7958_v21 = vpop.f32.mrb[10].mxu0 }
 0x50b   : > { %v1642_v23 = vmul.f32 0.25, %v7958_v21  ;;  %v1630_v24 = vpop.f32.mrb[11].mxu0  ;;  %v1655_v26 = vsel %vm1072_vm0, %v1649_v19, 0.0 }
 0x50c   : > { %v1641_v28 = vmul.f32 0.25, %v1630_v24  ;;  %1656 = vadd.xlane.f32.xlu1 %v1655_v26  ;;  %7967 = vmatprep.mubr.msk.f32.mxu1 %vm1072_vm0, %v1648_v20  ;;  %v1652_v29 = vsel %vm1072_vm0, %v1648_v20, 0.0 }
 0x50d   : > { %7968 = vmatmul.mubr.msk.f32.vlgmr.msra.gmra.mrb[4].mxu1 %vm1072_vm0, %v1649_v19  ;;  %1653 = vadd.xlane.f32.xlu0 %v1652_v29  ;;  %v1651_v31 = vmul.f32 %v1647_v27, %v1642_v23 }
 0x50e   : > { %v1650_v30 = vmul.f32 %v1646_v25, %v1641_v28 }
 0x50f   : > { %v1661_v35 = vsel %vm1072_vm0, %v1651_v31, 0.0 }
 0x510   : > { %1297 = vadd.xlane.f32.xlu1 %v1296_v32  ;;  %7970 = vmatprep.mubr.msk.f32.mxu1 %vm1072_vm0, %v1650_v30  ;;  %v1658_v33 = vsel %vm1072_vm0, %v1650_v30, 0.0 }
 0x511   : > { %7971 = vmatmul.mubr.msk.f32.gmra.mrb[6].mxu1 %vm1072_vm0, %v1651_v31  ;;  %1659 = vadd.xlane.f32.xlu0 %v1658_v33 }
 0x514   : > { %1303 = vadd.xlane.f32.xlu1 %v1302_v34 }
 0x515   : > { %1662 = vadd.xlane.f32.xlu0 %v1661_v35 }
 0x519   : > { %1300 = vadd.xlane.f32.xlu0 %v1299_v36 }
 0x51d   : > { %1306 = vadd.xlane.f32.xlu0 %v1305_v37 }
 0x599   : > { %v1657_v39 = vpop.xlane.xlu1 %1656 }
 0x59a   : > { %v1654_v38 = vpop.xlane.xlu0 %1653  ;;  %v1665_v41 = vand.u32 2147483647, %v1657_v39 }
 0x59b   : > { %v1664_v42 = vand.u32 2147483647, %v1654_v38 }
 0x59c   : > { %v1669_v44 = vmax.f32 %v1665_v41, 1.0 }
 0x59d   : > { %v1668_v45 = vmax.f32 %v1664_v42, 1.0  ;;  %v1298_v49 = vpop.xlane.xlu1 %1297 }
 0x59e   : > { %v1660_v40 = vpop.xlane.xlu0 %1659  ;;  %9173 = vrcp.f32 %v1669_v44  ;;  %v1308_v53 = vand.u32 2147483647, %v1298_v49  ;;  %v1901_v49 = vld [vmem:[%s12344_s13] sm:$0xff] }
 0x59f   : > { %v1666_v47 = vand.u32 2147483647, %v1660_v40  ;;  %9175 = vrcp.f32 %v1668_v45 }
 0x5a0   : > { %v1312_v55 = vmax.f32 %v1308_v53, 1.0  ;;  %v1900_v53 = vld [vmem:[%s12343_s12 + $0x18] sm:$0xff] }
 0x5a1   : > { %v1670_v51 = vmax.f32 %v1666_v47, 1.0  ;;  %v1304_v58 = vpop.xlane.xlu1 %1303  ;;  %v1897_v47 = vld [vmem:[%s12343_s12] sm:$0xff] }
 0x5a2   : > { %v1663_v43 = vpop.xlane.xlu0 %1662  ;;  %v1310_v1 = vand.u32 2147483647, %v1304_v58 }
 0x5a3   : > { %v1667_v46 = vand.u32 2147483647, %v1663_v43 }
 0x5a4   : > { %v1314_v19 = vmax.f32 %v1310_v1, 1.0 }
 0x5a5   : > { %v1671_v50 = vmax.f32 %v1667_v46, 1.0 }
 0x5a6   : > { %v1301_v48 = vpop.xlane.xlu0 %1300 }
 0x5a7   : > { %v1309_v52 = vand.u32 2147483647, %v1301_v48  ;;  %9177 = vrcp.f32 %v1671_v50  ;;  %v1898_v48 = vld [vmem:[%s12343_s12 + $0x8] sm:$0xff] }
 0x5a8   : > { %9179 = vrcp.f32 %v1670_v51  ;;  %v9174_v57 = vpop.eup %9173  ;;  %v8503_v50 = vpack.c.bf16 %v1898_v48, %v1897_v47  ;;  %v1902_v51 = vld [vmem:[%s12344_s13 + $0x8] sm:$0xff] }
 0x5a9   : > { %v1313_v54 = vmax.f32 %v1309_v52, 1.0  ;;  %v9176_v60 = vpop.eup %9175  ;;  %v1899_v52 = vld [vmem:[%s12343_s12 + $0x10] sm:$0xff] }
 0x5aa   : > { %v1307_v56 = vpop.xlane.xlu0 %1306  ;;  %8504 = vmatprep.subr.bf16.mxu1 %v8503_v50 }
 0x5ab   : > { %9181 = vrcp.f32 %v1313_v54  ;;  %v1311_v63 = vand.u32 2147483647, %v1307_v56  ;;  %v8511_v54 = vpack.c.bf16 %v1902_v51, %v1901_v49  ;;  %v1903_v56 = vld [vmem:[%s12344_s13 + $0x10] sm:$0xff]  ;;  %8506 = vmatpush3.bf16.msra.mxu1 %v8503_v50 }
 0x5ac   : > { %9183 = vrcp.f32 %v1312_v55  ;;  %v8507_v55 = vpack.c.bf16 %v1900_v53, %v1899_v52 }
 0x5ad   : > { %v1315_v17 = vmax.f32 %v1311_v63, 1.0  ;;  %8512 = vmatprep.subr.bf16.mxu0 %v8511_v54 }
 0x5ae   : > { %8514 = vmatpush3.bf16.msra.mxu0 %v8511_v54  ;;  %8508 = vmatprep.subr.bf16.mxu1 %v8507_v55 }
 0x5af   : > { %9185 = vrcp.f32 %v1315_v17  ;;  %8510 = vmatpush3.bf16.msra.mxu1 %v8507_v55 }
 0x5b0   : > { %9187 = vrcp.f32 %v1314_v19 }
 0x5b1   : > { %v9178_v16 = vpop.eup %9177 }
 0x5b2   : > { %v9180_v18 = vpop.eup %9179 }
 0x5b5   : > { %v9182_v27 = vpop.eup %9181 }
 0x5b6   : > { %v9184_v30 = vpop.eup %9183  ;;  %v10782_v32 = vmul.f32 %v9182_v27, %v10734_v6 }
 0x5b7   : > { %v10786_v34 = vmul.f32 %v9184_v30, %v10736_v10 }
 0x5b8   : > { %v1436_v35 = vsel %vm1182_vm1, %v10782_v32, 0.0  ;;  %v1451_v36 = vmul.f32 %v10782_v32, %v10782_v32 }
 0x5b9   : > { %v9186_v37 = vpop.eup %9185  ;;  %v1433_v38 = vsel %vm1182_vm1, %v10786_v34, 0.0  ;;  %v1450_v6 = vmul.f32 %v10786_v34, %v10786_v34 }
 0x5ba   : > { %v9188_v39 = vpop.eup %9187  ;;  %v1457_v10 = vsel %vm1182_vm1, %v1451_v36, 0.0  ;;  %v10798_v40 = vmul.f32 %v9186_v37, %v10738_v11 }
 0x5bb   : > { %v1454_v41 = vsel %vm1182_vm1, %v1450_v6, 0.0  ;;  %v10802_v42 = vmul.f32 %v9188_v39, %v10740_v12 }
 0x5bc   : > { %v1442_v43 = vsel %vm1182_vm1, %v10798_v40, 0.0  ;;  %v1453_v44 = vmul.f32 %v10798_v40, %v10798_v40 }
 0x5bd   : > { %v1439_v45 = vsel %vm1182_vm1, %v10802_v42, 0.0  ;;  %v1452_v11 = vmul.f32 %v10802_v42, %v10802_v42 }
 0x5be   : > { %v1463_v46 = vsel %vm1182_vm1, %v1453_v44, 0.0 }
 0x5bf   : > { %v1460_v12 = vsel %vm1182_vm1, %v1452_v11, 0.0 }
 0x5e0   : > { %v7969_v59 = vpop.f32.mrb[4].mxu1 }
 0x5e1   : > { %v10754_v61 = vmul.f32 %v9174_v57, %v7969_v59  ;;  %v1762_v62 = vpop.f32.mrb[5].mxu1  ;;  %v1904_v57 = vld [vmem:[%s12344_s13 + $0x18] sm:$0xff] }
 0x5e2   : > { %v10756_v0 = vmul.f32 %v9176_v60, %v1762_v62  ;;  %v8515_v58 = vpack.c.bf16 %v1904_v57, %v1903_v56 }
 0x5e3   : > { %v1792_v2 = vsel %vm1182_vm1, %v10754_v61, 0.0  ;;  %v1806_v3 = vmul.f32 %v10754_v61, %v10754_v61 }
 0x5e4   : > { %v7972_v4 = vpop.f32.mrb[6].mxu1  ;;  %1793 = vadd.xlane.f32.xlu0 %v1792_v2  ;;  %v1789_v13 = vsel %vm1182_vm1, %v10756_v0, 0.0  ;;  %v1805_v14 = vmul.f32 %v10756_v0, %v10756_v0  ;;  %8516 = vmatprep.subr.bf16.mxu0 %v8515_v58 }
 0x5e5   : > { %v1772_v15 = vpop.f32.mrb[7].mxu1  ;;  %1790 = vadd.xlane.f32.xlu1 %v1789_v13  ;;  %v10766_v20 = vmul.f32 %v9178_v16, %v7972_v4  ;;  %v1812_v21 = vsel %vm1182_vm1, %v1806_v3, 0.0  ;;  %8518 = vmatpush3.bf16.msra.mxu0 %v8515_v58 }
 0x5e6   : > { %v10769_v23 = vmul.f32 %v9180_v18, %v1772_v15  ;;  %v1809_v24 = vsel %vm1182_vm1, %v1805_v14, 0.0 }
 0x5e7   : > { %v1798_v25 = vsel %vm1182_vm1, %v10766_v20, 0.0  ;;  %v1808_v26 = vmul.f32 %v10766_v20, %v10766_v20 }
 0x5e8   : > { %1813 = vadd.xlane.f32.xlu0 %v1812_v21  ;;  %v1795_v28 = vsel %vm1182_vm1, %v10769_v23, 0.0  ;;  %v1807_v29 = vmul.f32 %v10769_v23, %v10769_v23 }
 0x5e9   : > { %1810 = vadd.xlane.f32.xlu1 %v1809_v24  ;;  %v1818_v31 = vsel %vm1182_vm1, %v1808_v26, 0.0 }
 0x5ea   : > { %v1815_v33 = vsel %vm1182_vm1, %v1807_v29, 0.0 }
 0x5ec   : > { %1799 = vadd.xlane.f32.xlu0 %v1798_v25 }
 0x5ed   : > { %1796 = vadd.xlane.f32.xlu1 %v1795_v28 }
 0x5f0   : > { %1819 = vadd.xlane.f32.xlu0 %v1818_v31 }
 0x5f1   : > { %1816 = vadd.xlane.f32.xlu1 %v1815_v33 }
 0x5f4   : > { %1437 = vadd.xlane.f32.xlu0 %v1436_v35 }
 0x5f5   : > { %1434 = vadd.xlane.f32.xlu1 %v1433_v38 }
 0x5f8   : > { %1458 = vadd.xlane.f32.xlu0 %v1457_v10 }
 0x5f9   : > { %1455 = vadd.xlane.f32.xlu1 %v1454_v41 }
 0x5fc   : > { %1443 = vadd.xlane.f32.xlu0 %v1442_v43 }
 0x5fd   : > { %1440 = vadd.xlane.f32.xlu1 %v1439_v45 }
 0x600   : > { %1464 = vadd.xlane.f32.xlu0 %v1463_v46 }
 0x601   : > { %1461 = vadd.xlane.f32.xlu1 %v1460_v12 }
 0x671   : > { %v1794_v59 = vpop.xlane.xlu0 %1793 }
 0x672   : > { %v1802_v60 = vmul.f32 0.0625, %v1794_v59  ;;  %v1791_v62 = vpop.xlane.xlu1 %1790 }
 0x673   : > { %v1801_v63 = vmul.f32 0.0625, %v1791_v62 }
 0x674   : > { %v1826_v2 = vmul.f32 %v1802_v60, %v1802_v60  ;;  %v1842_v41 = vsub.f32 %v10754_v61, %v1802_v60 }
 0x675   : > { %v1814_v1 = vpop.xlane.xlu0 %1813  ;;  %v1825_v13 = vmul.f32 %v1801_v63, %v1801_v63  ;;  %v1841_v44 = vsub.f32 %v10756_v0, %v1801_v63 }
 0x676   : > { %v1822_v3 = vmul.f32 0.0625, %v1814_v1  ;;  %v1811_v4 = vpop.xlane.xlu1 %1810 }
 0x677   : > { %v1821_v14 = vmul.f32 0.0625, %v1811_v4 }
 0x678   : > { %v1830_v15 = vsub.f32 %v1822_v3, %v1826_v2 }
 0x679   : > { %v1829_v16 = vsub.f32 %v1821_v14, %v1825_v13  ;;  %v1800_v17 = vpop.xlane.xlu0 %1799 }
 0x67a   : > { %v1834_v18 = vmax.f32 %v1830_v15, 0.0  ;;  %v1804_v19 = vmul.f32 0.0625, %v1800_v17  ;;  %v1797_v21 = vpop.xlane.xlu1 %1796 }
 0x67b   : > { %v1833_v24 = vmax.f32 %v1829_v16, 0.0  ;;  %v1803_v25 = vmul.f32 0.0625, %v1797_v21 }
 0x67c   : > { %vm1838_vm3 = vcmp.gt.f32.partialorder %v1834_v18, 0.0  ;;  %v1828_v29 = vmul.f32 %v1804_v19, %v1804_v19  ;;  %v1844_v48 = vsub.f32 %v10766_v20, %v1804_v19 }
 0x67d   : > { %v1846_v26 = vsel %vm1838_vm3, %v1834_v18, 1.0  ;;  %vm1837_vm4 = vcmp.gt.f32.partialorder %v1833_v24, 0.0  ;;  %v1820_v27 = vpop.xlane.xlu0 %1819  ;;  %v1827_v33 = vmul.f32 %v1803_v25, %v1803_v25  ;;  %v1843_v50 = vsub.f32 %v10769_v23, %v1803_v25 }
 0x67e   : > { %9189 = vrsqrt.f32 %v1846_v26  ;;  %v1845_v28 = vsel %vm1837_vm4, %v1833_v24, 1.0  ;;  %v1824_v30 = vmul.f32 0.0625, %v1820_v27  ;;  %v1817_v31 = vpop.xlane.xlu1 %1816 }
 0x67f   : > { %9191 = vrsqrt.f32 %v1845_v28  ;;  %v1823_v35 = vmul.f32 0.0625, %v1817_v31 }
 0x680   : > { %v1832_v36 = vsub.f32 %v1824_v30, %v1828_v29 }
 0x681   : > { %v1831_v37 = vsub.f32 %v1823_v35, %v1827_v33  ;;  %v1438_v62 = vpop.xlane.xlu0 %1437 }
 0x682   : > { %v1836_v38 = vmax.f32 %v1832_v36, 0.0  ;;  %v1435_v60 = vpop.xlane.xlu1 %1434  ;;  %v1447_v4 = vmul.f32 0.0625, %v1438_v62 }
 0x683   : > { %v1835_v6 = vmax.f32 %v1831_v37, 0.0  ;;  %v1446_v3 = vmul.f32 0.0625, %v1435_v60 }
 0x684   : > { %vm1840_vm5 = vcmp.gt.f32.partialorder %v1836_v38, 0.0  ;;  %v1471_v18 = vmul.f32 %v1447_v4, %v1447_v4 }
 0x685   : > { %v1848_v39 = vsel %vm1840_vm5, %v1836_v38, 1.0  ;;  %vm1839_vm6 = vcmp.gt.f32.partialorder %v1835_v6, 0.0  ;;  %v1459_v1 = vpop.xlane.xlu0 %1458  ;;  %v1470_v16 = vmul.f32 %v1446_v3, %v1446_v3 }
 0x686   : > { %9193 = vrsqrt.f32 %v1848_v39  ;;  %v1847_v10 = vsel %vm1839_vm6, %v1835_v6, 1.0  ;;  %v1456_v63 = vpop.xlane.xlu1 %1455  ;;  %v1467_v15 = vmul.f32 0.0625, %v1459_v1 }
 0x687   : > { %9195 = vrsqrt.f32 %v1847_v10  ;;  %v1466_v13 = vmul.f32 0.0625, %v1456_v63 }
 0x688   : > { %v9190_v43 = vpop.eup %9189  ;;  %v1475_v24 = vsub.f32 %v1467_v15, %v1471_v18  ;;  %v2209_v18 = vld [vmem:[%s12347_s16 + $0x10] sm:$0xff] }
 0x689   : > { %v9192_v45 = vpop.eup %9191  ;;  %v1854_v11 = vmul.f32 %v9190_v43, %v1842_v41  ;;  %v1444_v14 = vpop.xlane.xlu0 %1443  ;;  %v1474_v21 = vsub.f32 %v1466_v13, %v1470_v16 }
 0x68a   : > { %v1853_v46 = vmul.f32 %v9192_v45, %v1841_v44  ;;  %v1441_v2 = vpop.xlane.xlu1 %1440  ;;  %v1449_v27 = vmul.f32 0.0625, %v1444_v14  ;;  %v1479_v30 = vmax.f32 %v1475_v24, 0.0  ;;  %v1486_v45 = vsub.f32 %v10786_v34, %v1446_v3 }
 0x68b   : > { %v1866_v12 = vsel %vm1838_vm3, %v1854_v11, 0.0  ;;  %v1448_v19 = vmul.f32 0.0625, %v1441_v2  ;;  %v1478_v29 = vmax.f32 %v1474_v21, 0.0  ;;  %v1487_v11 = vsub.f32 %v10782_v32, %v1447_v4  ;;  %v2210_v21 = vld [vmem:[%s12347_s16 + $0x18] sm:$0xff] }
 0x68c   : > { %9197 = vtanh.f32 %v1866_v12  ;;  %v1865_v47 = vsel %vm1837_vm4, %v1853_v46, 0.0  ;;  %v1473_v35 = vmul.f32 %v1449_v27, %v1449_v27  ;;  %vm1483_vm8 = vcmp.gt.f32.partialorder %v1479_v30, 0.0 }
 0x68d   : > { %9199 = vtanh.f32 %v1865_v47  ;;  %v1465_v26 = vpop.xlane.xlu0 %1464  ;;  %v1472_v28 = vmul.f32 %v1448_v19, %v1448_v19  ;;  %vm1482_vm7 = vcmp.gt.f32.partialorder %v1478_v29, 0.0  ;;  %v1491_v6 = vsel %vm1483_vm8, %v1479_v30, 1.0 }
 0x68e   : > { %v1462_v17 = vpop.xlane.xlu1 %1461  ;;  %v1469_v31 = vmul.f32 0.0625, %v1465_v26  ;;  %v1490_v38 = vsel %vm1482_vm7, %v1478_v29, 1.0  ;;  %v8523_v24 = vpack.c.bf16 %v2210_v21, %v2209_v18 }
 0x68f   : > { %v1468_v25 = vmul.f32 0.0625, %v1462_v17  ;;  %v2207_v17 = vld [vmem:[%s12347_s16] sm:$0xff] }
 0x690   : > { %v9194_v49 = vpop.eup %9193  ;;  %v1477_v36 = vsub.f32 %v1469_v31, %v1473_v35 }
 0x691   : > { %v9196_v51 = vpop.eup %9195  ;;  %v1856_v61 = vmul.f32 %v9194_v49, %v1844_v48  ;;  %v1476_v33 = vsub.f32 %v1468_v25, %v1472_v28  ;;  %v1488_v48 = vsub.f32 %v10802_v42, %v1448_v19 }
 0x692   : > { %v1855_v52 = vmul.f32 %v9196_v51, %v1843_v50  ;;  %v1481_v39 = vmax.f32 %v1477_v36, 0.0 }
 0x693   : > { %v1868_v0 = vsel %vm1840_vm5, %v1856_v61, 0.0  ;;  %v1480_v37 = vmax.f32 %v1476_v33, 0.0 }
 0x694   : > { %v1867_v53 = vsel %vm1839_vm6, %v1855_v52, 0.0  ;;  %vm1485_vm10 = vcmp.gt.f32.partialorder %v1481_v39, 0.0  ;;  %v1489_v52 = vsub.f32 %v10798_v40, %v1449_v27  ;;  %vm2652_vm6 = vcmask 64512  }
 0x695   : > { %9201 = vtanh.f32 %v1867_v53  ;;  %vm1484_vm9 = vcmp.gt.f32.partialorder %v1480_v37, 0.0  ;;  %v1493_v41 = vsel %vm1485_vm10, %v1481_v39, 1.0 }
 0x696   : > { %v9198_v54 = vpop.eup %9197  ;;  %9203 = vtanh.f32 %v1868_v0  ;;  %v1492_v10 = vsel %vm1484_vm9, %v1480_v37, 1.0 }
 0x697   : > { %v1874_v55 = vmul.f32 3.0, %v9198_v54  ;;  %v9200_v56 = vpop.eup %9199  ;;  %9205 = vrsqrt.f32 %v1490_v38 }
 0x698   : > { %v1873_v20 = vmul.f32 3.0, %v9200_v56  ;;  %9207 = vrsqrt.f32 %v1491_v6 }
 0x699   : > { %1883 = vrot.lane.b32.xlu0 %v1874_v55, %s10062_s22  ;;  %9209 = vrsqrt.f32 %v1492_v10 }
 0x69a   : > { %1881 = vrot.lane.b32.xlu1 %v1873_v20, %s10062_s22  ;;  %9211 = vrsqrt.f32 %v1493_v41 }
 0x69f   : > { %v9202_v23 = vpop.eup %9201 }
 0x6a0   : > { %v1875_v57 = vmul.f32 3.0, %v9202_v23  ;;  %v9204_v58 = vpop.eup %9203 }
 0x6a1   : > { %v1876_v59 = vmul.f32 3.0, %v9204_v58  ;;  %v9206_v43 = vpop.eup %9205 }
 0x6a2   : > { %1885 = vrot.lane.b32.xlu1 %v1875_v57, %s10062_s22  ;;  %v9208_v44 = vpop.eup %9207  ;;  %v1498_v46 = vmul.f32 %v9206_v43, %v1486_v45 }
 0x6a3   : > { %v1499_v12 = vmul.f32 %v9208_v44, %v1487_v11  ;;  %v9210_v47 = vpop.eup %9209 }
 0x6a4   : > { %v1510_v49 = vsel %vm1482_vm7, %v1498_v46, 0.0  ;;  %v1500_v51 = vmul.f32 %v9210_v47, %v1488_v48  ;;  %v9212_v61 = vpop.eup %9211 }
 0x6a5   : > { %v1511_v50 = vsel %vm1483_vm8, %v1499_v12, 0.0  ;;  %9213 = vtanh.f32 %v1510_v49  ;;  %v1501_v53 = vmul.f32 %v9212_v61, %v1489_v52 }
 0x6a6   : > { %1887 = vrot.lane.b32.xlu1 %v1876_v59, %s10062_s22  ;;  %9215 = vtanh.f32 %v1511_v50  ;;  %v1512_v34 = vsel %vm1484_vm9, %v1500_v51, 0.0 }
 0x6a7   : > { %9217 = vtanh.f32 %v1512_v34  ;;  %v1513_v32 = vsel %vm1485_vm10, %v1501_v53, 0.0 }
 0x6a8   : > { %9219 = vtanh.f32 %v1513_v32 }
 0x6af   : > { %v9214_v0 = vpop.eup %9213 }
 0x6b0   : > { %v9216_v54 = vpop.eup %9215  ;;  %v1518_v55 = vmul.f32 3.0, %v9214_v0 }
 0x6b1   : > { %v1519_v56 = vmul.f32 3.0, %v9216_v54  ;;  %v9218_v23 = vpop.eup %9217 }
 0x6b2   : > { %v1520_v40 = vmul.f32 3.0, %v9218_v23  ;;  %v9220_v59 = vpop.eup %9219 }
 0x6b3   : > { %v1521_v63 = vmul.f32 3.0, %v9220_v59 }
 0x70b   : > { %v1884_v42 = vpop.permute.xlu0 %1883 }
 0x70c   : > { %v1882_v20 = vpop.permute.xlu1 %1881  ;;  %v1894_v58 = vsel %vm1182_vm1, %v1519_v56, %v1884_v42 }
 0x70d   : > { %v1893_v57 = vsel %vm1182_vm1, %v1518_v55, %v1882_v20 }
 0x70e   : > { %7981 = vmatprep.mubr.msk.f32.mxu1 %vm1072_vm0, %v1893_v57  ;;  %7995 = vmatprep.mubr.msk.f32.mxu0 %vm1072_vm0, %v1893_v57 }
 0x70f   : > { %7982 = vmatmul.mubr.msk.f32.vlgmr.msra.gmra.mrb[8].mxu1 %vm1072_vm0, %v1894_v58  ;;  %7996 = vmatmul.mubr.msk.f32.vlgmr.msra.gmra.mrb[12].mxu0 %vm1072_vm0, %v1894_v58 }
 0x714   : > { %v1886_v60 = vpop.permute.xlu1 %1885 }
 0x715   : > { %v1895_v62 = vsel %vm1182_vm1, %v1520_v40, %v1886_v60 }
 0x716   : > { %7984 = vmatprep.mubr.msk.f32.mxu1 %vm1072_vm0, %v1895_v62  ;;  %7998 = vmatprep.mubr.msk.f32.mxu0 %vm1072_vm0, %v1895_v62 }
 0x718   : > { %v1888_v1 = vpop.permute.xlu1 %1887 }
 0x719   : > { %v1896_v2 = vsel %vm1182_vm1, %v1521_v63, %v1888_v1 }
 0x71a   : > { %7985 = vmatmul.mubr.msk.f32.gmra.mrb[10].mxu1 %vm1072_vm0, %v1896_v2  ;;  %7999 = vmatmul.mubr.msk.f32.gmra.mrb[14].mxu0 %vm1072_vm0, %v1896_v2 }
 0x71b   : > { %8009 = vmatprep.mubr.msk.f32.mxu1 %vm1072_vm0, %v10664_v5  ;;  %v2208_v5 = vld [vmem:[%s12347_s16 + $0x8] sm:$0xff] }
 0x71c   : > { %v8519_v19 = vpack.c.bf16 %v2208_v5, %v2207_v17  ;;  %v2214_v17 = vld [vmem:[%s12463_s11 + $0x10] sm:$0xff]  ;;  %v2215_v5 = vld [vmem:[%s12463_s11 + $0x18] sm:$0xff] }
 0x71d   : > { %v8531_v18 = vpack.c.bf16 %v2215_v5, %v2214_v17  ;;  %v9518_v17 = vld [vmem:[%s10661_s23 + $0x8] sm:$0xff] }
 0x71e   : > { %8520 = vmatprep.subr.bf16.mxu1 %v8519_v19 }
 0x71f   : > { %8522 = vmatpush3.bf16.msra.mxu1 %v8519_v19 }
 0x720   : > { %8524 = vmatprep.subr.bf16.mxu1 %v8523_v24 }
 0x723   : > { %8526 = vmatpush3.bf16.msra.mxu1 %v8523_v24 }
 0x726   : > { %8010 = vmatmul.mubr.msk.f32.vlgmr.msra.gmra.mrb[12].mxu1 %vm1072_vm0, %v10669_v7 }
 0x727   : > { %8012 = vmatprep.mubr.msk.f32.mxu1 %vm1072_vm0, %v10672_v8 }
 0x72a   : > { %8013 = vmatmul.mubr.msk.f32.gmra.mrb[14].mxu1 %vm1072_vm0, %v10679_v9 }
 0x7e2   : > { %v10880_v3 = vpop.f32.mrb[8].mxu1  ;;  %v7997_v4 = vpop.f32.mrb[12].mxu0 }
 0x7e3   : > { %v10882_v13 = vmax.f32 %v7997_v4, 0.0  ;;  %v10884_v14 = vpop.f32.mrb[9].mxu1  ;;  %v2068_v15 = vpop.f32.mrb[13].mxu0 }
 0x7e4   : > { %v2087_v16 = vmax.f32 %v2068_v15, 0.0 }
 0x7e5   : > { %2097 = vrot.lane.b32.xlu1 %v10882_v13, %s10058_s2 }
 0x7e6   : > { %2095 = vrot.lane.b32.xlu0 %v2087_v16, %s10058_s2 }
 0x7ed   : > { %v10901_v25 = vpop.f32.mrb[10].mxu1  ;;  %v8000_v26 = vpop.f32.mrb[14].mxu0 }
 0x7ee   : > { %v2090_v27 = vmax.f32 %v8000_v26, 0.0  ;;  %v10903_v28 = vpop.f32.mrb[11].mxu1  ;;  %v2078_v29 = vpop.f32.mrb[15].mxu0 }
 0x7ef   : > { %v2089_v30 = vmax.f32 %v2078_v29, 0.0 }
 0x7f0   : > { %2101 = vrot.lane.b32.xlu1 %v2090_v27, %s10058_s2 }
 0x7f1   : > { %2099 = vrot.lane.b32.xlu0 %v2089_v30, %s10058_s2 }
 0x7f9   : > { %v8011_v40 = vpop.f32.mrb[12].mxu1 }
 0x7fa   : > { %v2291_v59 = vpop.f32.mrb[13].mxu1 }
 0x7fd   : > { %v8014_v1 = vpop.f32.mrb[14].mxu1 }
 0x7fe   : > { %v2301_v4 = vpop.f32.mrb[15].mxu1 }
 0x857   : > { %v2098_v31 = vpop.permute.xlu1 %2097 }
 0x858   : > { %v2108_v33 = vmax.f32 %v10882_v13, %v2098_v31  ;;  %v2096_v35 = vpop.permute.xlu0 %2095 }
 0x859   : > { %v2107_v36 = vmax.f32 %v2087_v16, %v2096_v35 }
 0x85a   : > { %v2112_v37 = vsub.f32 %v10882_v13, %v2108_v33  ;;  %2129 = vrot.lane.b32.xlu1 %v2108_v33, %s10063_s15 }
 0x85b   : > { %v2111_v38 = vsub.f32 %v2087_v16, %v2107_v36  ;;  %2127 = vrot.lane.b32.xlu0 %v2107_v36, %s10063_s15 }
 0x85c   : > { %v2117_v7 = vmul.f32 1.442695, %v2112_v37 }
 0x85d   : > { %v2115_v6 = vmul.f32 1.442695, %v2111_v38 }
 0x85e   : > { %9221 = vpow2.f32 %v2117_v7 }
 0x85f   : > { %9223 = vpow2.f32 %v2115_v6 }
 0x862   : > { %v2102_v8 = vpop.permute.xlu1 %2101 }
 0x863   : > { %v2110_v39 = vmax.f32 %v2090_v27, %v2102_v8  ;;  %v2100_v9 = vpop.permute.xlu0 %2099 }
 0x864   : > { %v2109_v10 = vmax.f32 %v2089_v30, %v2100_v9 }
 0x865   : > { %v2114_v41 = vsub.f32 %v2090_v27, %v2110_v39  ;;  %2133 = vrot.lane.b32.xlu1 %v2110_v39, %s10063_s15 }
 0x866   : > { %v2113_v43 = vsub.f32 %v2089_v30, %v2109_v10  ;;  %2131 = vrot.lane.b32.xlu0 %v2109_v10, %s10063_s15 }
 0x867   : > { %v2121_v44 = vmul.f32 1.442695, %v2114_v41 }
 0x868   : > { %v2119_v45 = vmul.f32 1.442695, %v2113_v43  ;;  %v9222_v11 = vpop.eup %9221 }
 0x869   : > { %9225 = vpow2.f32 %v2121_v44  ;;  %v9224_v46 = vpop.eup %9223  ;;  %v10920_v12 = vmul.f32 %v9222_v11, %v10880_v3 }
 0x86a   : > { %9227 = vpow2.f32 %v2119_v45  ;;  %v10923_v47 = vmul.f32 %v9224_v46, %v10884_v14 }
 0x873   : > { %v9226_v48 = vpop.eup %9225 }
 0x874   : > { %v9228_v49 = vpop.eup %9227  ;;  %v10926_v50 = vmul.f32 %v9226_v48, %v10901_v25 }
 0x875   : > { %v10929_v51 = vmul.f32 %v9228_v49, %v10903_v28 }
 0x8cc   : > { %v2130_v61 = vpop.permute.xlu1 %2129 }
 0x8cd   : > { %v2140_v52 = vsub.f32 %v10882_v13, %v2130_v61  ;;  %v2128_v53 = vpop.permute.xlu0 %2127 }
 0x8ce   : > { %v2139_v34 = vsub.f32 %v2087_v16, %v2128_v53 }
 0x8cf   : > { %v2145_v32 = vmul.f32 1.442695, %v2140_v52 }
 0x8d0   : > { %v2143_v0 = vmul.f32 1.442695, %v2139_v34 }
 0x8d1   : > { %9229 = vpow2.f32 %v2145_v32 }
 0x8d2   : > { %9231 = vpow2.f32 %v2143_v0 }
 0x8d7   : > { %v2134_v54 = vpop.permute.xlu1 %2133 }
 0x8d8   : > { %v2142_v42 = vsub.f32 %v2090_v27, %v2134_v54  ;;  %v2132_v55 = vpop.permute.xlu0 %2131 }
 0x8d9   : > { %v2141_v56 = vsub.f32 %v2089_v30, %v2132_v55  ;;  %v7335_v30 = vld [vmem:[#allocation19] ss:$0 sm:$0xff] }
 0x8da   : > { %v2149_v20 = vmul.f32 1.442695, %v2142_v42  ;;  %v2297_v36 = vadd.f32 %v8011_v40, %v7335_v30  ;;  %v2292_v7 = vadd.f32 %v7335_v30, %v2291_v59 }
 0x8db   : > { %v2147_v23 = vmul.f32 1.442695, %v2141_v56  ;;  %v9230_v57 = vpop.eup %9229 }
 0x8dc   : > { %9233 = vpow2.f32 %v2149_v20  ;;  %v9232_v58 = vpop.eup %9231  ;;  %2157 = vrot.lane.b32.xlu1 %v9230_v57, %s10058_s2  ;;  %v2176_v63 = vmul.f32 %v9230_v57, %v10880_v3  ;;  %v2212_v3 = vld [vmem:[%s12463_s11] sm:$0xff] }
 0x8dd   : > { %9235 = vpow2.f32 %v2147_v23  ;;  %2155 = vrot.lane.b32.xlu0 %v9232_v58, %s10058_s2  ;;  %v2175_v2 = vmul.f32 %v9232_v58, %v10884_v14  ;;  %v2213_v14 = vld [vmem:[%s12463_s11 + $0x8] sm:$0xff] }
 0x8de   : > { %v8527_v16 = vpack.c.bf16 %v2213_v14, %v2212_v3  ;;  %v9517_v14 = vld [vmem:[%s10661_s23] sm:$0xff] }
 0x8e0   : > { %8528 = vmatprep.subr.bf16.mxu0 %v8527_v16 }
 0x8e1   : > { %8530 = vmatpush3.bf16.msra.mxu0 %v8527_v16 }
 0x8e2   : > { %8532 = vmatprep.subr.bf16.mxu0 %v8531_v18 }
 0x8e5   : > { %8534 = vmatpush3.bf16.msra.mxu0 %v8531_v18 }
 0x8e6   : > { %v9234_v60 = vpop.eup %9233 }
 0x8e7   : > { %v9236_v62 = vpop.eup %9235  ;;  %2161 = vrot.lane.b32.xlu1 %v9234_v60, %s10058_s2  ;;  %v2178_v13 = vmul.f32 %v9234_v60, %v10901_v25 }
 0x8e8   : > { %2159 = vrot.lane.b32.xlu0 %v9236_v62, %s10058_s2  ;;  %v2177_v15 = vmul.f32 %v9236_v62, %v10903_v28 }
 0x8eb   : > { %2185 = vrot.lane.b32.xlu1 %v2176_v63, %s10058_s2 }
 0x8ec   : > { %2183 = vrot.lane.b32.xlu0 %v2175_v2, %s10058_s2  ;;  %v7344_v2 = vld [vmem:[#allocation20] ss:$0 sm:$0xff] }
 0x8ef   : > { %2189 = vrot.lane.b32.xlu1 %v2178_v13, %s10058_s2 }
 0x8f0   : > { %2187 = vrot.lane.b32.xlu0 %v2177_v15, %s10058_s2 }
 0x94e   : > { %v2158_v19 = vpop.permute.xlu1 %2157 }
 0x94f   : > { %v2168_v21 = vadd.f32 %v9222_v11, %v2158_v19  ;;  %v2156_v24 = vpop.permute.xlu0 %2155 }
 0x950   : > { %v2167_v25 = vadd.f32 %v9224_v46, %v2156_v24  ;;  %v2307_v46 = vadd.f32 %v8014_v1, %v7335_v30 }
 0x951   : > { %9237 = vrcp.f32 %v2168_v21 }
 0x952   : > { %9239 = vrcp.f32 %v2167_v25 }
 0x959   : > { %v2162_v26 = vpop.permute.xlu1 %2161 }
 0x95a   : > { %v2170_v27 = vadd.f32 %v9226_v48, %v2162_v26  ;;  %v2160_v28 = vpop.permute.xlu0 %2159 }
 0x95b   : > { %v2169_v29 = vadd.f32 %v9228_v49, %v2160_v28  ;;  %v9238_v37 = vpop.eup %9237  ;;  %v2302_v49 = vadd.f32 %v7335_v30, %v2301_v4  ;;  %v9519_v30 = vld [vmem:[%s10661_s23 + $0x10] sm:$0xff] }
 0x95c   : > { %9241 = vrcp.f32 %v2170_v27  ;;  %v9240_v6 = vpop.eup %9239 }
 0x95d   : > { %9243 = vrcp.f32 %v2169_v29  ;;  %v2186_v31 = vpop.permute.xlu1 %2185 }
 0x95e   : > { %v2196_v33 = vadd.f32 %v2186_v31, %v10920_v12  ;;  %v2184_v35 = vpop.permute.xlu0 %2183 }
 0x95f   : > { %v2195_v38 = vadd.f32 %v2184_v35, %v10923_v47 }
 0x960   : > { %v2204_v8 = vmul.f32 %v9238_v37, %v2196_v33  ;;  %v9520_v33 = vld [vmem:[%s10661_s23 + $0x18] sm:$0xff]  ;;  %s12468_s23 = sld [smem:[#allocation47_spill]] }
 0x961   : > { %v2203_v39 = vmul.f32 %v9240_v6, %v2195_v38  ;;  %v2190_v10 = vpop.permute.xlu1 %2189 }
 0x962   : > { %v2311_v9 = vmul.f32 %v2297_v36, %v2204_v8  ;;  %v2188_v43 = vpop.permute.xlu0 %2187  ;;  %v2198_v11 = vadd.f32 %v2190_v10, %v10926_v50  ;;  %v2537_v10 = vld [vmem:[#allocation7 + $0x18] sm:$0xff] }
 0x963   : > { %v2310_v41 = vmul.f32 %v2292_v7, %v2203_v39  ;;  %v2197_v12 = vadd.f32 %v2188_v43, %v10929_v51  ;;  %v2534_v43 = vld [vmem:[#allocation7] sm:$0xff] }
 0x964   : > { %v7341_v44 = vmul.f32 -1.442695, %v2311_v9 }
 0x965   : > { %v7340_v45 = vmul.f32 -1.442695, %v2310_v41 }
 0x966   : > { %v9242_v48 = vpop.eup %9241  ;;  %9245 = vpow2.f32 %v7341_v44  ;;  %v2536_v44 = vld [vmem:[#allocation7 + $0x10] sm:$0xff]  ;;  %s11903_s5 = scalar_lea.vmem %s12468_s23, %s8827_s4 }
 0x967   : > { %v9244_v61 = vpop.eup %9243  ;;  %9247 = vpow2.f32 %v7340_v45  ;;  %v2206_v47 = vmul.f32 %v9242_v48, %v2198_v11  ;;  %v8537_v45 = vpack.c.bf16 %v2536_v44, %v2534_v43  ;;  %v2539_v11 = vld [vmem:[#allocation7 + $0x28] sm:$0xff] }
 0x968   : > { %v2205_v52 = vmul.f32 %v9244_v61, %v2197_v12  ;;  %v2538_v12 = vld [vmem:[#allocation7 + $0x20] sm:$0xff] }
 0x969   : > { %v2313_v53 = vmul.f32 %v2307_v46, %v2206_v47  ;;  %v2541_v46 = vld [vmem:[#allocation7 + $0x38] sm:$0xff]  ;;  %v10064_v47 = vmov 0.0  }
 0x96a   : > { %v2312_v34 = vmul.f32 %v2302_v49, %v2205_v52  ;;  %v8539_v48 = vpack.c.bf16 %v2541_v46, %v2539_v11  ;;  %v2540_v49 = vld [vmem:[#allocation7 + $0x30] sm:$0xff]  ;;  %2618 = vmatprep.mubr.f32.mxu1 %v10064_v47 }
 0x96b   : > { %v7343_v32 = vmul.f32 -1.442695, %v2313_v53  ;;  %v8541_v61 = vpack.c.bf16 %v2540_v49, %v2538_v12 }
 0x96c   : > { %v7342_v0 = vmul.f32 -1.442695, %v2312_v34 }
 0x96d   : > { %9249 = vpow2.f32 %v7343_v32 }
 0x96e   : > { %9251 = vpow2.f32 %v7342_v0 }
 0x970   : > { %v9246_v54 = vpop.eup %9245 }
 0x971   : > { %v9248_v42 = vpop.eup %9247  ;;  %v2327_v55 = vadd.f32 1.0, %v9246_v54 }
 0x972   : > { %v2326_v50 = vadd.f32 1.0, %v9248_v42 }
 0x973   : > { %9253 = vrcp.f32 %v2327_v55 }
 0x974   : > { %9255 = vrcp.f32 %v2326_v50 }
 0x977   : > { %v9250_v56 = vpop.eup %9249 }
 0x978   : > { %v9252_v20 = vpop.eup %9251  ;;  %v2329_v51 = vadd.f32 1.0, %v9250_v56 }
 0x979   : > { %v2328_v23 = vadd.f32 1.0, %v9252_v20 }
 0x97a   : > { %9257 = vrcp.f32 %v2329_v51 }
 0x97b   : > { %9259 = vrcp.f32 %v2328_v23 }
 0x97d   : > { %v9254_v57 = vpop.eup %9253 }
 0x97e   : > { %v9256_v58 = vpop.eup %9255  ;;  %v2339_v59 = vmul.f32 %v9254_v57, %v2311_v9  ;;  %v2535_v9 = vld [vmem:[#allocation7 + $0x8] sm:$0xff] }
 0x97f   : > { %v2338_v40 = vmul.f32 %v9256_v58, %v2310_v41  ;;  %v8535_v41 = vpack.c.bf16 %v2537_v10, %v2535_v9 }
 0x981   : > { %8023 = vmatprep.mubr.msk.f32.mxu0 %vm1072_vm0, %v2338_v40  ;;  %8536 = vmatprep.subr.bf16.mxu1 %v8535_v41 }
 0x982   : > { %8024 = vmatmul.mubr.msk.f32.vlgmr.msra.gmra.mrb[16].mxu0 %vm1072_vm0, %v2339_v59  ;;  %8538 = vmatpush1.bf16.msra.mxu1 %v8537_v45 }
 0x983   : > { %8540 = vmatprep.subr.bf16.mxu1 %v8539_v48 }
 0x984   : > { %v9258_v60 = vpop.eup %9257 }
 0x985   : > { %v9260_v62 = vpop.eup %9259  ;;  %v2341_v1 = vmul.f32 %v9258_v60, %v2313_v53 }
 0x986   : > { %v2340_v63 = vmul.f32 %v9260_v62, %v2312_v34  ;;  %8542 = vmatpush1.bf16.msra.mxu1 %v8541_v61 }
 0x988   : > { %8026 = vmatprep.mubr.msk.f32.mxu0 %vm1072_vm0, %v2340_v63 }
 0x989   : > { %8027 = vmatmul.mubr.msk.f32.gmra.mrb[18].mxu0 %vm1072_vm0, %v2341_v1 }
 0xa55   : > { %v8025_v4 = vpop.f32.mrb[16].mxu0 }
 0xa56   : > { %v2426_v13 = vpop.f32.mrb[17].mxu0  ;;  %v2432_v15 = vadd.f32 %v8025_v4, %v7344_v2 }
 0xa57   : > { %v2427_v3 = vadd.f32 %v7344_v2, %v2426_v13 }
 0xa58   : > { %v10968_v5 = vadd.f32 %v9518_v17, %v2432_v15 }
 0xa59   : > { %v10965_v16 = vadd.f32 %v9517_v14, %v2427_v3 }
 0xa5a   : > { %v2452_v28 = vsel %vm1072_vm0, %v10968_v5, 0.0  ;;  %v2467_v29 = vmul.f32 %v10968_v5, %v10968_v5 }
 0xa5b   : > { %v2449_v18 = vsel %vm1072_vm0, %v10965_v16, 0.0  ;;  %v2466_v19 = vmul.f32 %v10965_v16, %v10965_v16 }
 0xa5c   : > { %2450 = vadd.xlane.f32.xlu0 %v2449_v18  ;;  %v8028_v21 = vpop.f32.mrb[18].mxu0  ;;  %v2473_v37 = vsel %vm1072_vm0, %v2467_v29, 0.0  ;;  %v7350_v29 = vld [vmem:[#allocation22] ss:$0 sm:$0xff] }
 0xa5d   : > { %v2436_v24 = vpop.f32.mrb[19].mxu0  ;;  %v2470_v25 = vsel %vm1072_vm0, %v2466_v19, 0.0  ;;  %v2442_v26 = vadd.f32 %v8028_v21, %v7344_v2 }
 0xa5e   : > { %v2437_v27 = vadd.f32 %v7344_v2, %v2436_v24  ;;  %2471 = vadd.xlane.f32.xlu1 %v2470_v25  ;;  %v7349_v25 = vld [vmem:[%s12464_s0] ss:$0 sm:$0xff] }
 0xa5f   : > { %v10983_v35 = vadd.f32 %v9520_v33, %v2442_v26 }
 0xa60   : > { %v10980_v31 = vadd.f32 %v9519_v30, %v2437_v27  ;;  %2453 = vadd.xlane.f32.xlu0 %v2452_v28 }
 0xa61   : > { %v2458_v7 = vsel %vm1072_vm0, %v10983_v35, 0.0  ;;  %v2469_v8 = vmul.f32 %v10983_v35, %v10983_v35 }
 0xa62   : > { %v2455_v36 = vsel %vm1072_vm0, %v10980_v31, 0.0  ;;  %v2468_v38 = vmul.f32 %v10980_v31, %v10980_v31 }
 0xa63   : > { %2456 = vadd.xlane.f32.xlu1 %v2455_v36  ;;  %v2479_v39 = vsel %vm1072_vm0, %v2469_v8, 0.0 }
 0xa64   : > { %2474 = vadd.xlane.f32.xlu0 %v2473_v37  ;;  %v2476_v6 = vsel %vm1072_vm0, %v2468_v38, 0.0 }
 0xa67   : > { %2459 = vadd.xlane.f32.xlu1 %v2458_v7 }
 0xa68   : > { %2477 = vadd.xlane.f32.xlu0 %v2476_v6 }
 0xa6c   : > { %2480 = vadd.xlane.f32.xlu0 %v2479_v39 }
 0xae9   : > { %v2451_v52 = vpop.xlane.xlu0 %2450 }
 0xaea   : > { %v2462_v53 = vmul.f32 0.03125, %v2451_v52 }
 0xaeb   : > { %v2472_v34 = vpop.xlane.xlu1 %2471 }
 0xaec   : > { %v2486_v32 = vmul.f32 %v2462_v53, %v2462_v53  ;;  %v2482_v0 = vmul.f32 0.03125, %v2472_v34  ;;  %v2498_v21 = vsub.f32 %v10965_v16, %v2462_v53 }
 0xaed   : > { %v2454_v54 = vpop.xlane.xlu0 %2453 }
 0xaee   : > { %v2490_v42 = vsub.f32 %v2482_v0, %v2486_v32  ;;  %v2463_v55 = vmul.f32 0.03125, %v2454_v54 }
 0xaf0   : > { %v2494_v50 = vmax.f32 %v2490_v42, 0.0  ;;  %v2457_v56 = vpop.xlane.xlu1 %2456  ;;  %v2487_v23 = vmul.f32 %v2463_v55, %v2463_v55  ;;  %v2499_v33 = vsub.f32 %v10968_v5, %v2463_v55 }
 0xaf1   : > { %v2475_v20 = vpop.xlane.xlu0 %2474  ;;  %v2464_v57 = vmul.f32 0.03125, %v2457_v56 }
 0xaf2   : > { %v2502_v51 = vadd.f32 1e-05, %v2494_v50  ;;  %v2483_v58 = vmul.f32 0.03125, %v2475_v20 }
 0xaf3   : > { %v2488_v62 = vmul.f32 %v2464_v57, %v2464_v57  ;;  %v2500_v38 = vsub.f32 %v10980_v31, %v2464_v57 }
 0xaf4   : > { %9261 = vrsqrt.f32 %v2502_v51  ;;  %v2491_v40 = vsub.f32 %v2483_v58, %v2487_v23  ;;  %v2460_v59 = vpop.xlane.xlu1 %2459  ;;  %v11067_v58 = vld [vmem:[#allocation8 + $0x8] sm:$0xff] }
 0xaf5   : > { %v2478_v60 = vpop.xlane.xlu0 %2477  ;;  %v2465_v1 = vmul.f32 0.03125, %v2460_v59  ;;  %vm2759_vm11 = vcmp.ne.f32.partialorder %v11067_v58, 0.0  ;;  %v11073_v59 = vld [vmem:[#allocation8 + $0x18] sm:$0xff] }
 0xaf6   : > { %v2495_v63 = vmax.f32 %v2491_v40, 0.0  ;;  %v2484_v2 = vmul.f32 0.03125, %v2478_v60  ;;  %v11069_v40 = vld [vmem:[#allocation8] sm:$0xff]  ;;  %v11075_v60 = vld [vmem:[#allocation8 + $0x10] sm:$0xff]  ;;  %vm2761_vm13 = vcmp.ne.f32.partialorder %v11073_v59, 0.0 }
 0xaf7   : > { %v2489_v3 = vmul.f32 %v2465_v1, %v2465_v1  ;;  %v2501_v9 = vsub.f32 %v10983_v35, %v2465_v1  ;;  %vm2758_vm12 = vcmp.ne.f32.partialorder %v11069_v40, 0.0  ;;  %vm2760_vm14 = vcmp.ne.f32.partialorder %v11075_v60, 0.0 }
 0xaf8   : > { %v2503_v4 = vadd.f32 1e-05, %v2495_v63  ;;  %v2492_v13 = vsub.f32 %v2484_v2, %v2488_v62  ;;  %v11077_v62 = vld [vmem:[#allocation10 + $0x8] sm:$0xff]  ;;  %v11080_v63 = vsel %vm2759_vm11, 1.0, %v10064_v47  ;;  %v11082_v2 = vld [vmem:[#allocation10] sm:$0xff] }
 0xaf9   : > { %v2481_v15 = vpop.xlane.xlu0 %2480  ;;  %vm2892_vm15 = vcmp.gt.f32.partialorder %v11077_v62, 0.0  ;;  %vm2891_vm3 = vcmp.gt.f32.partialorder %v11082_v2, 0.0 }
 0xafa   : > { %9263 = vrsqrt.f32 %v2503_v4  ;;  %v2496_v14 = vmax.f32 %v2492_v13, 0.0  ;;  %v2485_v17 = vmul.f32 0.03125, %v2481_v15  ;;  %v11085_v13 = vsel %vm2758_vm12, 1.0, %v10064_v47 }
 0xafc   : > { %v2504_v18 = vadd.f32 1e-05, %v2496_v14  ;;  %v2493_v19 = vsub.f32 %v2485_v17, %v2489_v3  ;;  %v11092_v17 = vld [vmem:[#allocation10 + $0x18] sm:$0xff] }
 0xafd   : > { %vm2894_vm4 = vcmp.gt.f32.partialorder %v11092_v17, 0.0 }
 0xafe   : > { %v9262_v24 = vpop.eup %9261  ;;  %9265 = vrsqrt.f32 %v2504_v18  ;;  %v2497_v26 = vmax.f32 %v2493_v19, 0.0  ;;  %v11096_v19 = vsel %vm2761_vm13, 1.0, %v10064_v47 }
 0xaff   : > { %v2510_v27 = vmul.f32 %v9262_v24, %v2498_v21  ;;  %v11098_v24 = vld [vmem:[#allocation10 + $0x10] sm:$0xff] }
 0xb00   : > { %v2505_v28 = vadd.f32 1e-05, %v2497_v26  ;;  %v11101_v26 = vsel %vm2760_vm14, 1.0, %v10064_v47  ;;  %vm2893_vm5 = vcmp.gt.f32.partialorder %v11098_v24, 0.0 }
 0xb01   : > { %v2520_v30 = vmul.f32 %v7349_v25, %v2510_v27 }
 0xb02   : > { %9267 = vrsqrt.f32 %v2505_v28 }
 0xb03   : > { %v11002_v36 = vadd.f32 %v7350_v29, %v2520_v30 }
 0xb04   : > { %v9264_v37 = vpop.eup %9263 }
 0xb05   : > { %7351 = vmatmul.mubr.msk.f32.vlgmr.msra.gmra.mrb[16].mxu1 %vm1072_vm0, %v11002_v36  ;;  %v2511_v16 = vmul.f32 %v9264_v37, %v2499_v33 }
 0xb06   : > { %2624 = vmatprep.mubr.f32.mxu1 %v10064_v47 }
 0xb07   : > { %v2521_v7 = vmul.f32 %v7349_v25, %v2511_v16 }
 0xb08   : > { %v9266_v6 = vpop.eup %9265 }
 0xb09   : > { %v11008_v8 = vadd.f32 %v7350_v29, %v2521_v7  ;;  %v2512_v39 = vmul.f32 %v9266_v6, %v2500_v38 }
 0xb0b   : > { %7352 = vmatmul.mubr.msk.f32.gmra.mrb[18].mxu1 %vm1072_vm0, %v11008_v8  ;;  %v2522_v5 = vmul.f32 %v7349_v25, %v2512_v39 }
 0xb0c   : > { %v9268_v10 = vpop.eup %9267  ;;  %2630 = vmatprep.mubr.f32.mxu1 %v10064_v47 }
 0xb0d   : > { %v11014_v41 = vadd.f32 %v7350_v29, %v2522_v5  ;;  %v2513_v43 = vmul.f32 %v9268_v10, %v2501_v9  ;;  %v2651_v5 = vld [vmem:[#allocation11] sm:$0xff] }
 0xb0e   : > { %8029 = vmatprep.subr.mxu0 %v2651_v5  ;;  %v2647_v10 = vld [vmem:[%s11129_s6] sm:$0xff] }
 0xb0f   : > { %7353 = vmatmul.mubr.msk.f32.gmra.mrb[20].mxu1 %vm1072_vm0, %v11014_v41  ;;  %v2523_v31 = vmul.f32 %v7349_v25, %v2513_v43  ;;  %8030 = vmatpush3.msra.mxu0 %v2651_v5  ;;  %v2648_v43 = vld [vmem:[%s11129_s6 + $0x8] sm:$0xff] }
 0xb10   : > { %2636 = vmatprep.mubr.f32.mxu1 %v10064_v47  ;;  %8031 = vmatprep.mubr.msk.f32.mxu0 %vm2652_vm6, %v2647_v10 }
 0xb11   : > { %v11019_v44 = vadd.f32 %v7350_v29, %v2523_v31  ;;  %8032 = vmatmul.mubr.msk.f32.vlgmr.msra.gmra.mrb[20].mxu0 %vm2652_vm6, %v2648_v43 }
 0xb13   : > { %7354 = vmatmul.mubr.msk.f32.gmra.mrb[22].mxu1 %vm1072_vm0, %v11019_v44 }
 0xbd8   : > { %v11023_v35 = vpop.f32.mrb[16].mxu1 }
 0xbd9   : > { %v2622_v45 = vpop.f32.mrb[17].mxu1  ;;  %8045 = vmatprep.mubr.msk.f32.mxu1 %vm1182_vm1, %v11023_v35 }
 0xbde   : > { %v11027_v11 = vpop.f32.mrb[18].mxu1 }
 0xbdf   : > { %v2628_v46 = vpop.f32.mrb[19].mxu1  ;;  %v11031_v48 = vpack.i.bf16 %v11027_v11, %v11023_v35 }
 0xbe0   : > { %v11033_v12 = vpack.i.bf16 %v2628_v46, %v2622_v45  ;;  %v11035_v49 = vpack.c.bf16 %v2628_v46, %v2622_v45 }
 0xbe1   : > { %9074 = vrot.lane.b32.xlu1 %v11031_v48, %s10058_s2 }
 0xbe2   : > { %v11039_v61 = vpop.f32.mrb[20].mxu1 }
 0xbe3   : > { %v2634_v52 = vpop.f32.mrb[21].mxu1 }
 0xbe4   : > { %v11166_v43 = vpop.f32.mrb[20].mxu0 }
 0xbe6   : > { %v11041_v53 = vpop.f32.mrb[22].mxu1 }
 0xbe7   : > { %v2640_v34 = vpop.f32.mrb[23].mxu1  ;;  %v11045_v32 = vpack.i.bf16 %v11041_v53, %v11039_v61 }
 0xbe8   : > { %v11047_v0 = vpack.i.bf16 %v2640_v34, %v2634_v52  ;;  %v11049_v54 = vpack.c.bf16 %v2640_v34, %v2634_v52 }
 0xbe9   : > { %9079 = vrot.lane.b32.xlu0 %v11045_v32, %s10058_s2 }
 0xc53   : > { %v9075_v42 = vpop.permute.xlu1 %9074 }
 0xc54   : > { %v9077_v55 = vunpack.i.h.bf16 %v9075_v42  ;;  %v9076_v50 = vunpack.i.l.bf16 %v9075_v42 }
 0xc56   : > { %v8543_v56 = vpack.c.bf16 %v9077_v55, %v9076_v50 }
 0xc58   : > { %8545 = vmatprep.subr.msk.bf16.mxu1 %vm10702_vm2, %v8543_v56 }
 0xc59   : > { %8548 = vmatpush3.bf16.xpose.msk.msra.mxu1 %vm10702_vm2, %v8543_v56 }
 0xc5b   : > { %v9080_v20 = vpop.permute.xlu0 %9079 }
 0xc5c   : > { %v9082_v51 = vunpack.i.h.bf16 %v9080_v20  ;;  %v9081_v23 = vunpack.i.l.bf16 %v9080_v20 }
 0xc5e   : > { %v8549_v57 = vpack.c.bf16 %v9082_v51, %v9081_v23 }
 0xc60   : > { %8551 = vmatprep.subr.msk.bf16.mxu1 %vm10702_vm2, %v8549_v57 }
 0xc61   : > { %8554 = vmatpush3.bf16.xpose.msk.msra.mxu1 %vm10702_vm2, %v8549_v57 }
 0xc68   : > { %8046 = vmatmul.mubr.msk.f32.vlgmr.msra.gmra.mrb[24].mxu1 %vm1182_vm1, %v11027_v11 }
 0xc69   : > { %8048 = vmatprep.mubr.msk.f32.mxu1 %vm1182_vm1, %v11039_v61 }
 0xc6c   : > { %8049 = vmatmul.mubr.msk.f32.gmra.mrb[26].mxu1 %vm1182_vm1, %v11041_v53 }
 0xd3b   : > { %v8047_v1 = vpop.f32.mrb[24].mxu1 }
 0xd3c   : > { %v2884_v4 = vmul.f32 0.25, %v8047_v1  ;;  %v2864_v15 = vpop.f32.mrb[25].mxu1 }
 0xd3d   : > { %v2883_v3 = vmul.f32 0.25, %v2864_v15 }
 0xd3e   : > { %v2888_v14 = vmul.f32 %v11080_v63, %v2884_v4 }
 0xd3f   : > { %v2887_v18 = vmul.f32 %v11085_v13, %v2883_v3  ;;  %v8050_v21 = vpop.f32.mrb[26].mxu1 }
 0xd40   : > { %v2886_v25 = vmul.f32 0.25, %v8050_v21  ;;  %v2874_v27 = vpop.f32.mrb[27].mxu1  ;;  %v2896_v28 = vsel %vm2892_vm15, %v2888_v14, -1e+30  ;;  %vm2924_vm7 = vcmp.ne.f32.partialorder %v2888_v14, 0.0 }
 0xd41   : > { %v2885_v29 = vmul.f32 0.25, %v2874_v27  ;;  %v2902_v30 = vsel %vm1072_vm0, %v2896_v28, -inf  ;;  %v2895_v33 = vsel %vm2891_vm3, %v2887_v18, -1e+30  ;;  %vm2923_vm8 = vcmp.ne.f32.partialorder %v2887_v18, 0.0 }
 0xd42   : > { %v2890_v37 = vmul.f32 %v11096_v19, %v2886_v25  ;;  %2903 = vmax.xlane.f32.xlu0 %v2902_v30  ;;  %v2899_v16 = vsel %vm1072_vm0, %v2895_v33, -inf  ;;  %v7372_v15 = vsel %vm2924_vm7, 1.0, %v10064_v47  ;;  %v7371_v25 = vsel %vm2923_vm8, 1.0, %v10064_v47 }
 0xd43   : > { %v11113_v38 = vmul.f32 %v11101_v26, %v2885_v29  ;;  %2900 = vmax.xlane.f32.xlu1 %v2899_v16  ;;  %v2650_v16 = vld [vmem:[%s11129_s6 + $0x18] sm:$0xff] }
 0xd44   : > { %v2898_v7 = vsel %vm2894_vm4, %v2890_v37, -1e+30  ;;  %vm2926_vm9 = vcmp.ne.f32.partialorder %v2890_v37, 0.0 }
 0xd45   : > { %v2908_v6 = vsel %vm1072_vm0, %v2898_v7, -inf  ;;  %v2897_v39 = vsel %vm2893_vm5, %v11113_v38, -1e+30  ;;  %vm2925_vm10 = vcmp.ne.f32.partialorder %v11113_v38, 0.0 }
 0xd46   : > { %2909 = vmax.xlane.f32.xlu0 %v2908_v6  ;;  %v2905_v9 = vsel %vm1072_vm0, %v2897_v39, -inf }
 0xd47   : > { %2906 = vmax.xlane.f32.xlu1 %v2905_v9  ;;  %v7373_v9 = vsel %vm2925_vm10, 1.0, %v10064_v47 }
 0xd58   : > { %9084 = vrot.lane.b32.xlu1 %v11031_v48, %s10057_s27 }
 0xdcf   : > { %v2904_v31 = vpop.xlane.xlu0 %2903 }
 0xdd0   : > { %v2912_v45 = vsub.f32 %v2888_v14, %v2904_v31  ;;  %v2901_v46 = vpop.xlane.xlu1 %2900  ;;  %v11168_v31 = vpop.f32.mrb[21].mxu0 }
 0xdd1   : > { %v2911_v52 = vsub.f32 %v2887_v18, %v2901_v46  ;;  %v7374_v18 = vsel %vm2926_vm9, 1.0, %v10064_v47 }
 0xdd2   : > { %v2917_v34 = vmul.f32 1.442695, %v2912_v45 }
 0xdd3   : > { %v2915_v42 = vmul.f32 1.442695, %v2911_v52  ;;  %v2910_v55 = vpop.xlane.xlu0 %2909 }
 0xdd4   : > { %9269 = vpow2.f32 %v2917_v34  ;;  %v2914_v50 = vsub.f32 %v2890_v37, %v2910_v55  ;;  %v2907_v56 = vpop.xlane.xlu1 %2906  ;;  %v2649_v37 = vld [vmem:[%s11129_s6 + $0x10] sm:$0xff]  ;;  %s1058_s6 = scalar_lea.vmem %s12467_s19, %s8827_s4  ;;  %s12469_s19 = sld [smem:[#allocation62_spill]] }
 0xdd5   : > { %9271 = vpow2.f32 %v2915_v42  ;;  %8034 = vmatprep.mubr.msk.f32.mxu0 %vm2652_vm6, %v2649_v37  ;;  %v2913_v7 = vsub.f32 %v11113_v38, %v2907_v56  ;;  %s7589_s4 = sshll.u32 %s10224_s8, 9 }
 0xdd6   : > { %v2921_v20 = vmul.f32 1.442695, %v2914_v50  ;;  %8035 = vmatmul.mubr.msk.f32.gmra.mrb[22].mxu0 %vm2652_vm6, %v2650_v16 }
 0xdd7   : > { %v2919_v6 = vmul.f32 1.442695, %v2913_v7 }
 0xdd8   : > { %9273 = vpow2.f32 %v2921_v20  ;;  %v9085_v51 = vpop.permute.xlu1 %9084 }
 0xdd9   : > { %v9087_v23 = vunpack.i.h.bf16 %v9085_v51  ;;  %v9086_v57 = vunpack.i.l.bf16 %v9085_v51  ;;  %9275 = vpow2.f32 %v2919_v6 }
 0xddb   : > { %v8555_v1 = vpack.c.bf16 %v9087_v23, %v9086_v57 }
 0xddd   : > { %8556 = vmatprep.subr.bf16.mxu0 %v8555_v1 }
 0xdde   : > { %v9270_v4 = vpop.eup %9269  ;;  %8558 = vmatpush3.bf16.msra.mxu0 %v8555_v1 }
 0xddf   : > { %v9272_v3 = vpop.eup %9271  ;;  %v2936_v21 = vmul.f32 %v9270_v4, %v7372_v15 }
 0xde0   : > { %v2935_v27 = vmul.f32 %v9272_v3, %v7371_v25 }
 0xde1   : > { %v2942_v28 = vsel %vm1072_vm0, %v2936_v21, 0.0 }
 0xde2   : > { %v9274_v29 = vpop.eup %9273  ;;  %2943 = vadd.xlane.f32.xlu0 %v2942_v28  ;;  %v2939_v14 = vsel %vm1072_vm0, %v2935_v27, 0.0 }
 0xde3   : > { %2940 = vadd.xlane.f32.xlu1 %v2939_v14  ;;  %v11140_v30 = vmul.f32 %v9274_v29, %v7374_v18  ;;  %v9276_v39 = vpop.eup %9275 }
 0xde4   : > { %v2937_v5 = vmul.f32 %v9276_v39, %v7373_v9 }
 0xde5   : > { %v2948_v33 = vsel %vm1072_vm0, %v11140_v30, 0.0 }
 0xde6   : > { %2949 = vadd.xlane.f32.xlu0 %v2948_v33  ;;  %v2945_v10 = vsel %vm1072_vm0, %v2937_v5, 0.0 }
 0xdf4   : > { %9094 = vrot.lane.b32.xlu1 %v11031_v48, %s10059_s9 }
 0xdf8   : > { %9099 = vrot.lane.b32.xlu1 %v11045_v32, %s10059_s9 }
 0xdfc   : > { %9089 = vrot.lane.b32.xlu0 %v11045_v32, %s10057_s27 }
 0xe00   : > { %3076 = vrot.lane.b32.xlu0 %v11023_v35, %s10060_s7 }
 0xe04   : > { %3080 = vrot.lane.b32.xlu0 %v11039_v61, %s10060_s7 }
 0xe1c   : > { %2946 = vadd.xlane.f32.xlu1 %v2945_v10 }
 0xe2d   : > { %3078 = vrot.lane.b32.xlu1 %v11027_v11, %s10060_s7 }
 0xe31   : > { %3082 = vrot.lane.b32.xlu1 %v11041_v53, %s10060_s7 }
 0xe6f   : > { %v2944_v45 = vpop.xlane.xlu0 %2943 }
 0xe70   : > { %v2952_v46 = vadd.f32 1e-05, %v2944_v45  ;;  %v2941_v38 = vpop.xlane.xlu1 %2940 }
 0xe71   : > { %v2951_v52 = vadd.f32 1e-05, %v2941_v38 }
 0xe72   : > { %9277 = vrcp.f32 %v2952_v46 }
 0xe73   : > { %9279 = vrcp.f32 %v2951_v52  ;;  %v2950_v34 = vpop.xlane.xlu0 %2949 }
 0xe74   : > { %v9095_v42 = vpop.permute.xlu1 %9094 }
 0xe75   : > { %v9097_v50 = vunpack.i.h.bf16 %v9095_v42  ;;  %v9096_v56 = vunpack.i.l.bf16 %v9095_v42 }
 0xe77   : > { %v9090_v55 = vpop.permute.xlu0 %9089  ;;  %v8563_v1 = vpack.c.bf16 %v9097_v50, %v9096_v56 }
 0xe78   : > { %v9092_v20 = vunpack.i.h.bf16 %v9090_v55  ;;  %v9091_v51 = vunpack.i.l.bf16 %v9090_v55  ;;  %v9100_v3 = vpop.permute.xlu1 %9099 }
 0xe79   : > { %v9102_v14 = vunpack.i.h.bf16 %v9100_v3  ;;  %v9101_v18 = vunpack.i.l.bf16 %v9100_v3 }
 0xe7a   : > { %v8559_v23 = vpack.c.bf16 %v9092_v20, %v9091_v51 }
 0xe7b   : > { %v8569_v33 = vpack.c.bf16 %v9102_v14, %v9101_v18  ;;  %v3077_v10 = vpop.permute.xlu0 %3076 }
 0xe7c   : > { %v9278_v57 = vpop.eup %9277  ;;  %8560 = vmatprep.subr.bf16.mxu0 %v8559_v23 }
 0xe7d   : > { %v9280_v4 = vpop.eup %9279  ;;  %v2960_v15 = vmul.f32 %v9278_v57, %v2936_v21  ;;  %8562 = vmatpush3.bf16.msra.mxu0 %v8559_v23  ;;  %v2954_v21 = vadd.f32 1e-05, %v2950_v34 }
 0xe7e   : > { %8565 = vmatprep.subr.msk.bf16.mxu0 %vm10702_vm2, %v8563_v1  ;;  %v2959_v25 = vmul.f32 %v9280_v4, %v2935_v27 }
 0xe7f   : > { %v2964_v29 = vmul.f32 %v2960_v15, %v11067_v58  ;;  %9281 = vrcp.f32 %v2954_v21  ;;  %v3081_v38 = vpop.permute.xlu0 %3080 }
 0xe80   : > { %v2963_v28 = vmul.f32 %v2959_v25, %v11069_v40 }
 0xe82   : > { %8059 = vmatprep.mubr.msk.f32.mxu0 %vm1072_vm0, %v2963_v28 }
 0xe83   : > { %8060 = vmatmul.mubr.msk.f32.vlgmr.msra.gmra.mrb[24].mxu0 %vm1072_vm0, %v2964_v29 }
 0xe86   : > { %8568 = vmatpush3.bf16.xpose.msk.msra.mxu0 %vm10702_vm2, %v8563_v1 }
 0xe87   : > { %8571 = vmatprep.subr.msk.bf16.mxu0 %vm10702_vm2, %v8569_v33 }
 0xe89   : > { %v9282_v16 = vpop.eup %9281 }
 0xe8a   : > { %v2962_v6 = vmul.f32 %v9282_v16, %v11140_v30 }
 0xe8c   : > { %v2966_v45 = vmul.f32 %v2962_v6, %v11073_v59 }
 0xe8e   : > { %8574 = vmatpush3.bf16.xpose.msk.msra.mxu0 %vm10702_vm2, %v8569_v33 }
 0xea9   : > { %v2947_v27 = vpop.xlane.xlu1 %2946  ;;  %v11191_v30 = vpop.f32.mrb[22].mxu0 }
 0xeaa   : > { %v2953_v37 = vadd.f32 1e-05, %v2947_v27 }
 0xeac   : > { %9283 = vrcp.f32 %v2953_v37 }
 0xead   : > { %v3079_v46 = vpop.permute.xlu1 %3078 }
 0xeb1   : > { %v3083_v52 = vpop.permute.xlu1 %3082 }
 0xeb6   : > { %v9284_v7 = vpop.eup %9283 }
 0xeb7   : > { %v2961_v39 = vmul.f32 %v9284_v7, %v2937_v5  ;;  %v11193_v5 = vpop.f32.mrb[23].mxu0 }
 0xeb9   : > { %v2965_v9 = vmul.f32 %v2961_v39, %v11075_v60 }
 0xebb   : > { %8062 = vmatprep.mubr.msk.f32.mxu0 %vm1072_vm0, %v2965_v9 }
 0xebc   : > { %8063 = vmatmul.mubr.msk.f32.gmra.mrb[26].mxu0 %vm1072_vm0, %v2966_v45 }
 0xebd   : > { %8073 = vmatprep.mubr.msk.f32.mxu0 %vm1182_vm1, %v3077_v10 }
 0xec0   : > { %8074 = vmatmul.mubr.msk.f32.vlgmr.msra.gmra.mrb[28].mxu0 %vm1182_vm1, %v3079_v46 }
 0xec1   : > { %8076 = vmatprep.mubr.msk.f32.mxu0 %vm1182_vm1, %v3081_v38 }
 0xec4   : > { %8077 = vmatmul.mubr.msk.f32.gmra.mrb[30].mxu0 %vm1182_vm1, %v3083_v52 }
 0xf56   : > { %v11195_v34 = vpop.f32.mrb[24].mxu0 }
 0xf57   : > { %v11197_v42 = vpop.f32.mrb[25].mxu0 }
 0xf8f   : > { %v11199_v55 = vpop.f32.mrb[26].mxu0 }
 0xf90   : > { %v11201_v50 = vpop.f32.mrb[27].mxu0 }
 0xf93   : > { %v8075_v56 = vpop.f32.mrb[28].mxu0 }
 0xf94   : > { %v3194_v20 = vmul.f32 0.25, %v8075_v56  ;;  %v3174_v51 = vpop.f32.mrb[29].mxu0 }
 0xf95   : > { %v3193_v23 = vmul.f32 0.25, %v3174_v51 }
 0xf96   : > { %v3198_v57 = vmul.f32 %v11080_v63, %v3194_v20 }
 0xf97   : > { %v3197_v1 = vmul.f32 %v11085_v13, %v3193_v23  ;;  %v8078_v4 = vpop.f32.mrb[30].mxu0 }
 0xf98   : > { %v3196_v15 = vmul.f32 0.25, %v8078_v4  ;;  %v3184_v3 = vpop.f32.mrb[31].mxu0  ;;  %v3202_v25 = vsel %vm2892_vm15, %v3198_v57, -1e+30  ;;  %vm3230_vm11 = vcmp.ne.f32.partialorder %v3198_v57, 0.0 }
 0xf99   : > { %v3195_v28 = vmul.f32 0.25, %v3184_v3  ;;  %v3208_v29 = vsel %vm1072_vm0, %v3202_v25, -inf  ;;  %v3201_v14 = vsel %vm2891_vm3, %v3197_v1, -1e+30  ;;  %vm3229_vm12 = vcmp.ne.f32.partialorder %v3197_v1, 0.0 }
 0xf9a   : > { %3209 = vmax.xlane.f32.xlu1 %v3208_v29  ;;  %v3205_v18 = vsel %vm1072_vm0, %v3201_v14, -inf  ;;  %v3200_v33 = vmul.f32 %v11096_v19, %v3196_v15  ;;  %v7388_v20 = vsel %vm3230_vm11, 1.0, %v10064_v47  ;;  %v7387_v4 = vsel %vm3229_vm12, 1.0, %v10064_v47 }
 0xf9b   : > { %v3199_v63 = vmul.f32 %v11101_v26, %v3195_v28  ;;  %3206 = vmax.xlane.f32.xlu0 %v3205_v18 }
 0xf9c   : > { %v3204_v27 = vsel %vm2894_vm4, %v3200_v33, -1e+30  ;;  %vm3232_vm14 = vcmp.ne.f32.partialorder %v3200_v33, 0.0 }
 0xf9d   : > { %v3203_v13 = vsel %vm2893_vm5, %v3199_v63, -1e+30  ;;  %v3214_v37 = vsel %vm1072_vm0, %v3204_v27, -inf  ;;  %vm3231_vm13 = vcmp.ne.f32.partialorder %v3199_v63, 0.0  ;;  %v7390_v18 = vsel %vm3232_vm14, 1.0, %v10064_v47 }
 0xf9e   : > { %v3211_v21 = vsel %vm1072_vm0, %v3203_v13, -inf  ;;  %vm4702_vm14 = vcmask 523264  }
 0xf9f   : > { %3212 = vmax.xlane.f32.xlu0 %v3211_v21 }
 0xfa3   : > { %3215 = vmax.xlane.f32.xlu0 %v3214_v37 }
0x1027   : > { %v3210_v16 = vpop.xlane.xlu1 %3209 }
0x1028   : > { %v3218_v7 = vsub.f32 %v3198_v57, %v3210_v16  ;;  %v3207_v6 = vpop.xlane.xlu0 %3206  ;;  %v7389_v57 = vsel %vm3231_vm13, 1.0, %v10064_v47 }
0x1029   : > { %v3217_v39 = vsub.f32 %v3197_v1, %v3207_v6 }
0x102a   : > { %v3223_v19 = vmul.f32 1.442695, %v3218_v7 }
0x102b   : > { %v3221_v9 = vmul.f32 1.442695, %v3217_v39 }
0x102c   : > { %9285 = vpow2.f32 %v3223_v19  ;;  %v3213_v26 = vpop.xlane.xlu0 %3212 }
0x102d   : > { %9287 = vpow2.f32 %v3221_v9  ;;  %v3219_v10 = vsub.f32 %v3199_v63, %v3213_v26 }
0x102f   : > { %v3225_v45 = vmul.f32 1.442695, %v3219_v10 }
0x1030   : > { %v3216_v46 = vpop.xlane.xlu0 %3215 }
0x1031   : > { %9289 = vpow2.f32 %v3225_v45  ;;  %v3220_v38 = vsub.f32 %v3200_v33, %v3216_v46  ;;  %v7396_v46 = vld [vmem:[%s12343_s12 + $0x28] sm:$0xff] }
0x1033   : > { %v3227_v52 = vmul.f32 1.442695, %v3220_v38 }
0x1035   : > { %9291 = vpow2.f32 %v3227_v52 }
0x1036   : > { %v9286_v56 = vpop.eup %9285 }
0x1037   : > { %v9288_v51 = vpop.eup %9287  ;;  %v3242_v23 = vmul.f32 %v9286_v56, %v7388_v20 }
0x1038   : > { %v3241_v15 = vmul.f32 %v9288_v51, %v7387_v4 }
0x1039   : > { %v3248_v3 = vsel %vm1072_vm0, %v3242_v23, 0.0 }
0x103a   : > { %3249 = vadd.xlane.f32.xlu0 %v3248_v3  ;;  %v3245_v25 = vsel %vm1072_vm0, %v3241_v15, 0.0 }
0x103b   : > { %v9290_v28 = vpop.eup %9289  ;;  %3246 = vadd.xlane.f32.xlu1 %v3245_v25 }
0x103c   : > { %v3243_v1 = vmul.f32 %v9290_v28, %v7389_v57  ;;  %v7397_v28 = vld [vmem:[%s12343_s12 + $0x30] sm:$0xff]  ;;  %v7398_v57 = vld [vmem:[%s12343_s12 + $0x38] sm:$0xff] }
0x103e   : > { %v3251_v29 = vsel %vm1072_vm0, %v3243_v1, 0.0 }
0x103f   : > { %v9292_v14 = vpop.eup %9291  ;;  %3252 = vadd.xlane.f32.xlu1 %v3251_v29 }
0x1040   : > { %v3244_v13 = vmul.f32 %v9292_v14, %v7390_v18 }
0x1042   : > { %v3254_v63 = vsel %vm1072_vm0, %v3244_v13, 0.0 }
0x1043   : > { %3255 = vadd.xlane.f32.xlu0 %v3254_v63 }
0x1050   : > { %9104 = vrot.lane.b32.xlu1 %v11031_v48, %s12466_s10 }
0x1059   : > { %9109 = vrot.lane.b32.xlu0 %v11045_v32, %s12466_s10  ;;  %v7395_v32 = vld [vmem:[%s12343_s12 + $0x20] sm:$0xff] }
0x105a   : > { %v8583_v3 = vpack.c.bf16 %v7396_v46, %v7395_v32 }
0x10c7   : > { %v3250_v21 = vpop.xlane.xlu0 %3249 }
0x10c8   : > { %v3258_v27 = vadd.f32 1e-05, %v3250_v21  ;;  %v3247_v37 = vpop.xlane.xlu1 %3246 }
0x10c9   : > { %v3257_v33 = vadd.f32 1e-05, %v3247_v37 }
0x10ca   : > { %9293 = vrcp.f32 %v3258_v27 }
0x10cb   : > { %9295 = vrcp.f32 %v3257_v33 }
0x10cc   : > { %v3253_v16 = vpop.xlane.xlu1 %3252 }
0x10cd   : > { %v3259_v7 = vadd.f32 1e-05, %v3253_v16 }
0x10cf   : > { %9297 = vrcp.f32 %v3259_v7 }
0x10d0   : > { %v9105_v6 = vpop.permute.xlu1 %9104  ;;  %v3256_v39 = vpop.xlane.xlu0 %3255 }
0x10d1   : > { %v9107_v19 = vunpack.i.h.bf16 %v9105_v6  ;;  %v9106_v9 = vunpack.i.l.bf16 %v9105_v6  ;;  %v3260_v26 = vadd.f32 1e-05, %v3256_v39 }
0x10d3   : > { %9299 = vrcp.f32 %v3260_v26  ;;  %v8575_v10 = vpack.c.bf16 %v9107_v19, %v9106_v9 }
0x10d4   : > { %v9294_v48 = vpop.eup %9293  ;;  %v9110_v45 = vpop.permute.xlu0 %9109 }
0x10d5   : > { %v9296_v38 = vpop.eup %9295  ;;  %v9112_v52 = vunpack.i.h.bf16 %v9110_v45  ;;  %v9111_v56 = vunpack.i.l.bf16 %v9110_v45  ;;  %8576 = vmatprep.subr.bf16.mxu1 %v8575_v10  ;;  %v3266_v51 = vmul.f32 %v9294_v48, %v3242_v23 }
0x10d6   : > { %8578 = vmatpush3.bf16.msra.mxu1 %v8575_v10  ;;  %v3265_v20 = vmul.f32 %v9296_v38, %v3241_v15  ;;  %v8587_v15 = vpack.c.bf16 %v7398_v57, %v7397_v28 }
0x10d7   : > { %v8579_v4 = vpack.c.bf16 %v9112_v52, %v9111_v56  ;;  %v3270_v23 = vmul.f32 %v3266_v51, %v11067_v58  ;;  %v7399_v58 = vld [vmem:[%s12344_s13 + $0x20] sm:$0xff]  ;;  %v11325_v51 = vmul.f32 %v11166_v43, %v11077_v62 }
0x10d8   : > { %v3269_v25 = vmul.f32 %v3265_v20, %v11069_v40 }
0x10d9   : > { %v9298_v29 = vpop.eup %9297  ;;  %8580 = vmatprep.subr.bf16.mxu1 %v8579_v4  ;;  %vm3715_vm6 = vcmp.ne.f32.partialorder %v11325_v51, 0.0 }
0x10da   : > { %8582 = vmatpush3.bf16.msra.mxu1 %v8579_v4  ;;  %8087 = vmatprep.mubr.msk.f32.mxu1 %vm1072_vm0, %v3269_v25  ;;  %v3267_v14 = vmul.f32 %v9298_v29, %v3243_v1  ;;  %v11329_v4 = vmul.f32 %v11168_v31, %v11082_v2  ;;  %v11338_v25 = vmul.f32 %v11193_v5, %v11098_v24  ;;  %v11342_v29 = vsel %vm3715_vm6, 1.0, %v10064_v47 }
0x10db   : > { %8584 = vmatprep.subr.bf16.mxu1 %v8583_v3  ;;  %vm5577_vm6 = vcmask 392192  }
0x10dc   : > { %v3271_v40 = vmul.f32 %v3267_v14, %v11075_v60  ;;  %v7400_v60 = vld [vmem:[%s12344_s13 + $0x28] sm:$0xff]  ;;  %vm3714_vm7 = vcmp.ne.f32.partialorder %v11329_v4, 0.0  ;;  %vm3716_vm9 = vcmp.ne.f32.partialorder %v11338_v25, 0.0 }
0x10dd   : > { %v9300_v18 = vpop.eup %9299  ;;  %8088 = vmatmul.mubr.msk.f32.vlgmr.msra.gmra.mrb[28].mxu1 %vm1072_vm0, %v3270_v23  ;;  %v8591_v1 = vpack.c.bf16 %v7400_v60, %v7399_v58  ;;  %v11346_v23 = vsel %vm3714_vm7, 1.0, %v10064_v47 }
0x10de   : > { %8090 = vmatprep.mubr.msk.f32.mxu1 %vm1072_vm0, %v3271_v40  ;;  %8586 = vmatpush3.bf16.msra.mxu1 %v8583_v3  ;;  %v3268_v63 = vmul.f32 %v9300_v18, %v3244_v13  ;;  %v7402_v13 = vld [vmem:[%s12344_s13 + $0x38] sm:$0xff]  ;;  %v11334_v3 = vmul.f32 %v11191_v30, %v11092_v17 }
0x10df   : > { %8588 = vmatprep.subr.bf16.mxu1 %v8587_v15  ;;  %8592 = vmatprep.subr.bf16.mxu0 %v8591_v1 }
0x10e0   : > { %v3272_v21 = vmul.f32 %v3268_v63, %v11073_v59  ;;  %8594 = vmatpush3.bf16.msra.mxu0 %v8591_v1  ;;  %v7401_v59 = vld [vmem:[%s12344_s13 + $0x30] sm:$0xff]  ;;  %vm3717_vm8 = vcmp.ne.f32.partialorder %v11334_v3, 0.0  ;;  %v11360_v1 = vsel %vm3716_vm9, 1.0, %v10064_v47 }
0x10e1   : > { %v8595_v27 = vpack.c.bf16 %v7402_v13, %v7401_v59  ;;  %v11357_v60 = vsel %vm3717_vm8, 1.0, %v10064_v47 }
0x10e2   : > { %8091 = vmatmul.mubr.msk.f32.gmra.mrb[30].mxu1 %vm1072_vm0, %v3272_v21 }
0x10e3   : > { %8590 = vmatpush3.bf16.msra.mxu1 %v8587_v15  ;;  %8596 = vmatprep.subr.bf16.mxu0 %v8595_v27 }
0x10e4   : > { %8601 = vmatprep.subr.msk.bf16.mxu1 %vm10702_vm2, %v11035_v49  ;;  %8598 = vmatpush3.bf16.msra.mxu0 %v8595_v27 }
0x11b0   : > { %v8089_v37 = vpop.f32.mrb[28].mxu1 }
0x11b1   : > { %v3363_v33 = vpop.f32.mrb[29].mxu1 }
0x11b2   : > { %3386 = vrot.lane.b32.xlu1 %v3363_v33, %s10062_s22 }
0x11b5   : > { %v8092_v16 = vpop.f32.mrb[30].mxu1 }
0x11b6   : > { %3388 = vrot.lane.b32.xlu1 %v8089_v37, %s10062_s22  ;;  %v3373_v7 = vpop.f32.mrb[31].mxu1 }
0x11b7   : > { %3390 = vrot.lane.b32.xlu0 %v3373_v7, %s10062_s22 }
0x11ba   : > { %3392 = vrot.lane.b32.xlu1 %v8092_v16, %s10062_s22 }
0x11bb   : > { %3726 = vrot.lane.b32.xlu0 %v11023_v35, %s10063_s15 }
0x11be   : > { %3728 = vrot.lane.b32.xlu1 %v11027_v11, %s10063_s15 }
0x11bf   : > { %3730 = vrot.lane.b32.xlu0 %v11039_v61, %s10063_s15 }
0x11c2   : > { %3732 = vrot.lane.b32.xlu1 %v11041_v53, %s10063_s15 }
0x1224   : > { %v3387_v6 = vpop.permute.xlu1 %3386 }
0x1225   : > { %v3398_v39 = vsel %vm1182_vm1, %v11197_v42, %v3387_v6 }
0x1226   : > { %8101 = vmatprep.mubr.msk.f32.mxu1 %vm1072_vm0, %v3398_v39  ;;  %8115 = vmatprep.mubr.msk.f32.mxu0 %vm1072_vm0, %v3398_v39 }
0x1228   : > { %v3389_v19 = vpop.permute.xlu1 %3388 }
0x1229   : > { %v3399_v9 = vsel %vm1182_vm1, %v11195_v34, %v3389_v19  ;;  %v3391_v26 = vpop.permute.xlu0 %3390 }
0x122a   : > { %v3400_v10 = vsel %vm1182_vm1, %v11201_v50, %v3391_v26  ;;  %8102 = vmatmul.mubr.msk.f32.vlgmr.msra.gmra.mrb[32].mxu1 %vm1072_vm0, %v3399_v9  ;;  %8116 = vmatmul.mubr.msk.f32.vlgmr.msra.gmra.mrb[32].mxu0 %vm1072_vm0, %v3399_v9 }
0x122b   : > { %8604 = vmatpush3.bf16.xpose.msk.msra.mxu1 %vm10702_vm2, %v11035_v49  ;;  %8104 = vmatprep.mubr.msk.f32.mxu1 %vm1072_vm0, %v3400_v10 }
0x122c   : > { %8118 = vmatprep.mubr.msk.f32.mxu0 %vm1072_vm0, %v3400_v10  ;;  %8607 = vmatprep.subr.msk.bf16.mxu1 %vm10702_vm2, %v11049_v54  ;;  %v3393_v34 = vpop.permute.xlu1 %3392 }
0x122d   : > { %v3401_v42 = vsel %vm1182_vm1, %v11199_v55, %v3393_v34  ;;  %v3727_v50 = vpop.permute.xlu0 %3726 }
0x122e   : > { %8105 = vmatmul.mubr.msk.f32.gmra.mrb[34].mxu1 %vm1072_vm0, %v3401_v42  ;;  %8119 = vmatmul.mubr.msk.f32.gmra.mrb[34].mxu0 %vm1072_vm0, %v3401_v42 }
0x122f   : > { %8129 = vmatprep.mubr.msk.f32.mxu1 %vm1182_vm1, %v3727_v50 }
0x1230   : > { %v3729_v49 = vpop.permute.xlu1 %3728 }
0x1231   : > { %v3731_v48 = vpop.permute.xlu0 %3730 }
0x1233   : > { %8610 = vmatpush3.bf16.xpose.msk.msra.mxu1 %vm10702_vm2, %v11049_v54 }
0x1234   : > { %v3733_v45 = vpop.permute.xlu1 %3732 }
0x123a   : > { %8130 = vmatmul.mubr.msk.f32.vlgmr.msra.gmra.mrb[36].mxu1 %vm1182_vm1, %v3729_v49 }
0x123b   : > { %8132 = vmatprep.mubr.msk.f32.mxu1 %vm1182_vm1, %v3731_v48 }
0x123e   : > { %8133 = vmatmul.mubr.msk.f32.gmra.mrb[38].mxu1 %vm1182_vm1, %v3733_v45 }
0x12fd   : > { %v11307_v55 = vpop.f32.mrb[32].mxu1  ;;  %v11309_v32 = vpop.f32.mrb[32].mxu0 }
0x12fe   : > { %v11311_v46 = vpop.f32.mrb[33].mxu1  ;;  %v11313_v38 = vpop.f32.mrb[33].mxu0 }
0x1301   : > { %v11315_v52 = vpop.f32.mrb[34].mxu1  ;;  %v11317_v54 = vpop.f32.mrb[34].mxu0 }
0x1302   : > { %v11319_v56 = vpop.f32.mrb[35].mxu1  ;;  %v11321_v20 = vpop.f32.mrb[35].mxu0 }
0x130d   : > { %v8131_v28 = vpop.f32.mrb[36].mxu1 }
0x130e   : > { %v3840_v57 = vmul.f32 0.25, %v8131_v28  ;;  %v3820_v43 = vpop.f32.mrb[37].mxu1 }
0x130f   : > { %v3839_v31 = vmul.f32 0.25, %v3820_v43 }
0x1310   : > { %v3844_v14 = vmul.f32 %v11342_v29, %v3840_v57 }
0x1311   : > { %v3843_v30 = vmul.f32 %v11346_v23, %v3839_v31  ;;  %v8134_v5 = vpop.f32.mrb[38].mxu1 }
0x1312   : > { %v3842_v15 = vmul.f32 0.25, %v8134_v5  ;;  %v3830_v40 = vpop.f32.mrb[39].mxu1  ;;  %v3848_v18 = vsel %vm2892_vm15, %v3844_v14, -1e+30  ;;  %vm3876_vm10 = vcmp.ne.f32.partialorder %v3844_v14, 0.0 }
0x1313   : > { %v3841_v63 = vmul.f32 0.25, %v3830_v40  ;;  %v3854_v21 = vsel %vm1072_vm0, %v3848_v18, -inf  ;;  %v3847_v58 = vsel %vm2891_vm3, %v3843_v30, -1e+30  ;;  %vm3875_vm11 = vcmp.ne.f32.partialorder %v3843_v30, 0.0 }
0x1314   : > { %3855 = vmax.xlane.f32.xlu1 %v3854_v21  ;;  %v3851_v59 = vsel %vm1072_vm0, %v3847_v58, -inf  ;;  %v3846_v13 = vmul.f32 %v11357_v60, %v3842_v15  ;;  %v7424_v31 = vsel %vm3876_vm10, 1.0, %v10064_v47  ;;  %v7423_v40 = vsel %vm3875_vm11, 1.0, %v10064_v47 }
0x1315   : > { %v3845_v27 = vmul.f32 %v11360_v1, %v3841_v63  ;;  %3852 = vmax.xlane.f32.xlu0 %v3851_v59 }
0x1316   : > { %v3850_v16 = vsel %vm2894_vm4, %v3846_v13, -1e+30  ;;  %vm3878_vm12 = vcmp.ne.f32.partialorder %v3846_v13, 0.0 }
0x1317   : > { %v3849_v37 = vsel %vm2893_vm5, %v3845_v27, -1e+30  ;;  %v3860_v7 = vsel %vm1072_vm0, %v3850_v16, -inf  ;;  %vm3877_vm13 = vcmp.ne.f32.partialorder %v3845_v27, 0.0 }
0x1318   : > { %v3857_v33 = vsel %vm1072_vm0, %v3849_v37, -inf  ;;  %v7425_v16 = vsel %vm3877_vm13, 1.0, %v10064_v47 }
0x1319   : > { %3858 = vmax.xlane.f32.xlu0 %v3857_v33 }
0x131d   : > { %3861 = vmax.xlane.f32.xlu0 %v3860_v7 }
0x1325   : > { %9114 = vrot.lane.b32.xlu1 %v11033_v12, %s10058_s2 }
0x13a1   : > { %v3856_v6 = vpop.xlane.xlu1 %3855 }
0x13a2   : > { %v3864_v39 = vsub.f32 %v3844_v14, %v3856_v6  ;;  %v3853_v19 = vpop.xlane.xlu0 %3852  ;;  %v7426_v14 = vsel %vm3878_vm12, 1.0, %v10064_v47 }
0x13a3   : > { %v3863_v9 = vsub.f32 %v3843_v30, %v3853_v19 }
0x13a4   : > { %v3869_v26 = vmul.f32 1.442695, %v3864_v39 }
0x13a5   : > { %v3867_v10 = vmul.f32 1.442695, %v3863_v9  ;;  %v9115_v34 = vpop.permute.xlu1 %9114 }
0x13a6   : > { %9301 = vpow2.f32 %v3869_v26  ;;  %v9117_v42 = vunpack.i.h.bf16 %v9115_v34  ;;  %v9116_v50 = vunpack.i.l.bf16 %v9115_v34  ;;  %v3859_v49 = vpop.xlane.xlu0 %3858 }
0x13a7   : > { %9303 = vpow2.f32 %v3867_v10  ;;  %v3865_v37 = vsub.f32 %v3845_v27, %v3859_v49 }
0x13a8   : > { %v8611_v48 = vpack.c.bf16 %v9117_v42, %v9116_v50 }
0x13aa   : > { %8612 = vmatprep.subr.bf16.mxu0 %v8611_v48  ;;  %v3862_v45 = vpop.xlane.xlu0 %3861 }
0x13ab   : > { %v3866_v28 = vsub.f32 %v3846_v13, %v3862_v45  ;;  %8614 = vmatpush3.bf16.msra.mxu0 %v8611_v48  ;;  %v3871_v13 = vmul.f32 1.442695, %v3865_v37 }
0x13ad   : > { %v3873_v57 = vmul.f32 1.442695, %v3866_v28 }
0x13af   : > { %9305 = vpow2.f32 %v3873_v57 }
0x13b0   : > { %v9302_v43 = vpop.eup %9301  ;;  %9307 = vpow2.f32 %v3871_v13 }
0x13b1   : > { %v9304_v5 = vpop.eup %9303  ;;  %v3888_v15 = vmul.f32 %v9302_v43, %v7424_v31 }
0x13b2   : > { %v3887_v18 = vmul.f32 %v9304_v5, %v7423_v40 }
0x13b3   : > { %v3894_v63 = vsel %vm1072_vm0, %v3888_v15, 0.0 }
0x13b4   : > { %3895 = vadd.xlane.f32.xlu0 %v3894_v63  ;;  %v3891_v21 = vsel %vm1072_vm0, %v3887_v18, 0.0 }
0x13b5   : > { %3892 = vadd.xlane.f32.xlu1 %v3891_v21 }
0x13b9   : > { %v9306_v58 = vpop.eup %9305 }
0x13ba   : > { %v3890_v30 = vmul.f32 %v9306_v58, %v7426_v14  ;;  %v9308_v33 = vpop.eup %9307 }
0x13bb   : > { %v3889_v7 = vmul.f32 %v9308_v33, %v7425_v16 }
0x13bc   : > { %v3900_v59 = vsel %vm1072_vm0, %v3890_v30, 0.0 }
0x13bd   : > { %3901 = vadd.xlane.f32.xlu0 %v3900_v59  ;;  %v3897_v6 = vsel %vm1072_vm0, %v3889_v7, 0.0 }
0x13c6   : > { %9124 = vrot.lane.b32.xlu1 %v11033_v12, %s10060_s7 }
0x13ca   : > { %9129 = vrot.lane.b32.xlu1 %v11047_v0, %s10060_s7 }
0x13d3   : > { %9119 = vrot.lane.b32.xlu0 %v11047_v0, %s10058_s2 }
0x13d7   : > { %4028 = vrot.lane.b32.xlu0 %v11023_v35, %s10062_s22 }
0x13db   : > { %4032 = vrot.lane.b32.xlu0 %v11039_v61, %s10062_s22 }
0x13ee   : > { %3898 = vadd.xlane.f32.xlu1 %v3897_v6 }
0x13ff   : > { %4030 = vrot.lane.b32.xlu1 %v11027_v11, %s10062_s22 }
0x1403   : > { %4034 = vrot.lane.b32.xlu1 %v11041_v53, %s10062_s22 }
0x1441   : > { %v3896_v35 = vpop.xlane.xlu0 %3895 }
0x1442   : > { %v3904_v39 = vadd.f32 1e-05, %v3896_v35  ;;  %v3893_v19 = vpop.xlane.xlu1 %3892 }
0x1443   : > { %v3903_v9 = vadd.f32 1e-05, %v3893_v19 }
0x1444   : > { %9309 = vrcp.f32 %v3904_v39 }
0x1445   : > { %9311 = vrcp.f32 %v3903_v9 }
0x1446   : > { %v9125_v27 = vpop.permute.xlu1 %9124 }
0x1447   : > { %v9127_v42 = vunpack.i.h.bf16 %v9125_v27  ;;  %v9126_v50 = vunpack.i.l.bf16 %v9125_v27 }
0x1449   : > { %v8619_v57 = vpack.c.bf16 %v9127_v42, %v9126_v50 }
0x144a   : > { %v3902_v61 = vpop.xlane.xlu0 %3901  ;;  %v9130_v31 = vpop.permute.xlu1 %9129 }
0x144b   : > { %v9132_v5 = vunpack.i.h.bf16 %v9130_v31  ;;  %v9131_v40 = vunpack.i.l.bf16 %v9130_v31 }
0x144e   : > { %v9310_v26 = vpop.eup %9309  ;;  %v9120_v10 = vpop.permute.xlu0 %9119 }
0x144f   : > { %v9312_v34 = vpop.eup %9311  ;;  %v9122_v49 = vunpack.i.h.bf16 %v9120_v10  ;;  %v9121_v48 = vunpack.i.l.bf16 %v9120_v10  ;;  %v3912_v11 = vmul.f32 %v9310_v26, %v3888_v15  ;;  %v3906_v15 = vadd.f32 1e-05, %v3902_v61 }
0x1450   : > { %v3911_v45 = vmul.f32 %v9312_v34, %v3887_v18  ;;  %v8625_v18 = vpack.c.bf16 %v9132_v5, %v9131_v40 }
0x1451   : > { %v8615_v28 = vpack.c.bf16 %v9122_v49, %v9121_v48  ;;  %v3916_v43 = vmul.f32 %v3912_v11, %v11325_v51  ;;  %9313 = vrcp.f32 %v3906_v15 }
0x1452   : > { %v3915_v53 = vmul.f32 %v3911_v45, %v11329_v4  ;;  %v4029_v33 = vpop.permute.xlu0 %4028 }
0x1453   : > { %8616 = vmatprep.subr.bf16.mxu0 %v8615_v28 }
0x1454   : > { %8618 = vmatpush3.bf16.msra.mxu0 %v8615_v28  ;;  %8143 = vmatprep.mubr.msk.f32.mxu0 %vm1072_vm0, %v3915_v53 }
0x1455   : > { %8621 = vmatprep.subr.msk.bf16.mxu0 %vm10702_vm2, %v8619_v57 }
0x1456   : > { %v4033_v35 = vpop.permute.xlu0 %4032 }
0x1457   : > { %8144 = vmatmul.mubr.msk.f32.vlgmr.msra.gmra.mrb[36].mxu0 %vm1072_vm0, %v3916_v43 }
0x145b   : > { %v9314_v58 = vpop.eup %9313 }
0x145c   : > { %v3914_v59 = vmul.f32 %v9314_v58, %v3890_v30 }
0x145d   : > { %8624 = vmatpush3.bf16.xpose.msk.msra.mxu0 %vm10702_vm2, %v8619_v57 }
0x145e   : > { %8627 = vmatprep.subr.msk.bf16.mxu0 %vm10702_vm2, %v8625_v18  ;;  %v3918_v16 = vmul.f32 %v3914_v59, %v11334_v3 }
0x1465   : > { %8630 = vmatpush3.bf16.xpose.msk.msra.mxu0 %vm10702_vm2, %v8625_v18 }
0x147b   : > { %v3899_v63 = vpop.xlane.xlu1 %3898 }
0x147c   : > { %v3905_v21 = vadd.f32 1e-05, %v3899_v63 }
0x147e   : > { %9315 = vrcp.f32 %v3905_v21 }
0x147f   : > { %v4031_v6 = vpop.permute.xlu1 %4030 }
0x1483   : > { %v4035_v39 = vpop.permute.xlu1 %4034 }
0x1488   : > { %v9316_v14 = vpop.eup %9315 }
0x1489   : > { %v3913_v37 = vmul.f32 %v9316_v14, %v3889_v7 }
0x148b   : > { %v3917_v13 = vmul.f32 %v3913_v37, %v11338_v25 }
0x148d   : > { %8146 = vmatprep.mubr.msk.f32.mxu0 %vm1072_vm0, %v3917_v13 }
0x148e   : > { %8147 = vmatmul.mubr.msk.f32.gmra.mrb[38].mxu0 %vm1072_vm0, %v3918_v16 }
0x148f   : > { %8157 = vmatprep.mubr.msk.f32.mxu0 %vm1182_vm1, %v4029_v33 }
0x1492   : > { %8158 = vmatmul.mubr.msk.f32.vlgmr.msra.gmra.mrb[40].mxu0 %vm1182_vm1, %v4031_v6 }
0x1493   : > { %8160 = vmatprep.mubr.msk.f32.mxu0 %vm1182_vm1, %v4033_v35 }
0x1496   : > { %8161 = vmatmul.mubr.msk.f32.gmra.mrb[42].mxu0 %vm1182_vm1, %v4035_v39 }
0x152a   : > { %v11415_v30 = vpop.f32.mrb[36].mxu0 }
0x152b   : > { %v11417_v7 = vpop.f32.mrb[37].mxu0 }
0x1561   : > { %v11419_v19 = vpop.f32.mrb[38].mxu0 }
0x1562   : > { %v11421_v9 = vpop.f32.mrb[39].mxu0 }
0x1565   : > { %v8159_v61 = vpop.f32.mrb[40].mxu0 }
0x1566   : > { %v4146_v27 = vmul.f32 0.25, %v8159_v61  ;;  %v4126_v26 = vpop.f32.mrb[41].mxu0 }
0x1567   : > { %v4145_v10 = vmul.f32 0.25, %v4126_v26 }
0x1568   : > { %v4150_v34 = vmul.f32 %v11342_v29, %v4146_v27 }
0x1569   : > { %v4149_v42 = vmul.f32 %v11346_v23, %v4145_v10  ;;  %v8162_v50 = vpop.f32.mrb[42].mxu0 }
0x156a   : > { %v4148_v49 = vmul.f32 0.25, %v8162_v50  ;;  %v4136_v48 = vpop.f32.mrb[43].mxu0  ;;  %v4154_v45 = vsel %vm2892_vm15, %v4150_v34, -1e+30  ;;  %vm4182_vm15 = vcmp.ne.f32.partialorder %v4150_v34, 0.0 }
0x156b   : > { %v4147_v11 = vmul.f32 0.25, %v4136_v48  ;;  %v4160_v28 = vsel %vm1072_vm0, %v4154_v45, -inf  ;;  %v4153_v53 = vsel %vm2891_vm3, %v4149_v42, -1e+30  ;;  %vm4181_vm3 = vcmp.ne.f32.partialorder %v4149_v42, 0.0 }
0x156c   : > { %4161 = vmax.xlane.f32.xlu1 %v4160_v28  ;;  %v4157_v57 = vsel %vm1072_vm0, %v4153_v53, -inf  ;;  %v4152_v43 = vmul.f32 %v11357_v60, %v4148_v49  ;;  %v7440_v37 = vsel %vm4182_vm15, 1.0, %v10064_v47  ;;  %v7439_v16 = vsel %vm4181_vm3, 1.0, %v10064_v47 }
0x156d   : > { %v4151_v29 = vmul.f32 %v11360_v1, %v4147_v11  ;;  %4158 = vmax.xlane.f32.xlu0 %v4157_v57 }
0x156e   : > { %v4156_v31 = vsel %vm2894_vm4, %v4152_v43, -1e+30 }
0x156f   : > { %v4155_v23 = vsel %vm2893_vm5, %v4151_v29, -1e+30  ;;  %v4166_v2 = vsel %vm1072_vm0, %v4156_v31, -inf  ;;  %vm4183_vm4 = vcmp.ne.f32.partialorder %v4151_v29, 0.0  ;;  %vm4184_vm5 = vcmp.ne.f32.partialorder %v4152_v43, 0.0 }
0x1570   : > { %v4163_v62 = vsel %vm1072_vm0, %v4155_v23, -inf  ;;  %v7441_v27 = vsel %vm4183_vm4, 1.0, %v10064_v47 }
0x1571   : > { %4164 = vmax.xlane.f32.xlu0 %v4163_v62 }
0x1575   : > { %4167 = vmax.xlane.f32.xlu0 %v4166_v2 }
0x15f9   : > { %v4162_v5 = vpop.xlane.xlu1 %4161 }
0x15fa   : > { %v4170_v40 = vsub.f32 %v4150_v34, %v4162_v5  ;;  %v4159_v18 = vpop.xlane.xlu0 %4158 }
0x15fb   : > { %v4169_v15 = vsub.f32 %v4149_v42, %v4159_v18  ;;  %v7442_v42 = vsel %vm4184_vm5, 1.0, %v10064_v47 }
0x15fc   : > { %v4175_v60 = vmul.f32 1.442695, %v4170_v40 }
0x15fd   : > { %v4173_v63 = vmul.f32 1.442695, %v4169_v15 }
0x15fe   : > { %9317 = vpow2.f32 %v4175_v60  ;;  %v4165_v1 = vpop.xlane.xlu0 %4164 }
0x15ff   : > { %9319 = vpow2.f32 %v4173_v63  ;;  %v4171_v24 = vsub.f32 %v4151_v29, %v4165_v1 }
0x1601   : > { %v4177_v21 = vmul.f32 1.442695, %v4171_v24 }
0x1602   : > { %v4168_v58 = vpop.xlane.xlu0 %4167 }
0x1603   : > { %9321 = vpow2.f32 %v4177_v21  ;;  %v4172_v14 = vsub.f32 %v4152_v43, %v4168_v58 }
0x1605   : > { %v4179_v59 = vmul.f32 1.442695, %v4172_v14 }
0x1607   : > { %9323 = vpow2.f32 %v4179_v59 }
0x1608   : > { %v9318_v17 = vpop.eup %9317 }
0x1609   : > { %v9320_v13 = vpop.eup %9319  ;;  %v4194_v33 = vmul.f32 %v9318_v17, %v7440_v37 }
0x160a   : > { %v4193_v6 = vmul.f32 %v9320_v13, %v7439_v16  ;;  %v7452_v13 = vld [vmem:[%s12344_s13 + $0x48] sm:$0xff]  ;;  %v7450_v16 = vld [vmem:[%s12343_s12 + $0x58] sm:$0xff] }
0x160b   : > { %v4200_v35 = vsel %vm1072_vm0, %v4194_v33, 0.0 }
0x160c   : > { %4201 = vadd.xlane.f32.xlu0 %v4200_v35  ;;  %v4197_v39 = vsel %vm1072_vm0, %v4193_v6, 0.0 }
0x160d   : > { %v9322_v61 = vpop.eup %9321  ;;  %4198 = vadd.xlane.f32.xlu1 %v4197_v39  ;;  %v7454_v39 = vld [vmem:[%s12344_s13 + $0x58] sm:$0xff] }
0x160e   : > { %v4195_v26 = vmul.f32 %v9322_v61, %v7441_v27 }
0x1610   : > { %v4203_v10 = vsel %vm1072_vm0, %v4195_v26, 0.0 }
0x1611   : > { %v9324_v34 = vpop.eup %9323  ;;  %4204 = vadd.xlane.f32.xlu1 %v4203_v10 }
0x1612   : > { %v4196_v50 = vmul.f32 %v9324_v34, %v7442_v42 }
0x1614   : > { %v4206_v49 = vsel %vm1072_vm0, %v4196_v50, 0.0 }
0x1615   : > { %4207 = vadd.xlane.f32.xlu0 %v4206_v49 }
0x1622   : > { %9134 = vrot.lane.b32.xlu1 %v11033_v12, %s10059_s9 }
0x162b   : > { %9139 = vrot.lane.b32.xlu0 %v11047_v0, %s10059_s9 }
0x1699   : > { %v4202_v48 = vpop.xlane.xlu0 %4201 }
0x169a   : > { %v4210_v45 = vadd.f32 1e-05, %v4202_v48  ;;  %v4199_v11 = vpop.xlane.xlu1 %4198 }
0x169b   : > { %v4209_v28 = vadd.f32 1e-05, %v4199_v11 }
0x169c   : > { %9325 = vrcp.f32 %v4210_v45 }
0x169d   : > { %9327 = vrcp.f32 %v4209_v28 }
0x169e   : > { %v4205_v53 = vpop.xlane.xlu1 %4204 }
0x169f   : > { %v4211_v57 = vadd.f32 1e-05, %v4205_v53 }
0x16a1   : > { %9329 = vrcp.f32 %v4211_v57 }
0x16a2   : > { %v9135_v47 = vpop.permute.xlu1 %9134  ;;  %v4208_v43 = vpop.xlane.xlu0 %4207 }
0x16a3   : > { %v9137_v29 = vunpack.i.h.bf16 %v9135_v47  ;;  %v9136_v23 = vunpack.i.l.bf16 %v9135_v47  ;;  %v4212_v62 = vadd.f32 1e-05, %v4208_v43 }
0x16a5   : > { %9331 = vrcp.f32 %v4212_v62  ;;  %v8631_v31 = vpack.c.bf16 %v9137_v29, %v9136_v23 }
0x16a6   : > { %v9326_v12 = vpop.eup %9325  ;;  %v9140_v2 = vpop.permute.xlu0 %9139 }
0x16a7   : > { %v9328_v5 = vpop.eup %9327  ;;  %v9142_v0 = vunpack.i.h.bf16 %v9140_v2  ;;  %v9141_v40 = vunpack.i.l.bf16 %v9140_v2  ;;  %8632 = vmatprep.subr.bf16.mxu1 %v8631_v31  ;;  %v4218_v15 = vmul.f32 %v9326_v12, %v4194_v33  ;;  %v7449_v33 = vld [vmem:[%s12343_s12 + $0x50] sm:$0xff]  ;;  %v11528_v2 = vmax.f32 %v11309_v32, 0.0 }
0x16a8   : > { %8634 = vmatpush3.bf16.msra.mxu1 %v8631_v31  ;;  %v4217_v18 = vmul.f32 %v9328_v5, %v4193_v6  ;;  %v7453_v6 = vld [vmem:[%s12344_s13 + $0x50] sm:$0xff]  ;;  %v8643_v35 = vpack.c.bf16 %v7450_v16, %v7449_v33  ;;  %v11531_v5 = vmax.f32 %v11313_v38, 0.0 }
0x16a9   : > { %v8635_v60 = vpack.c.bf16 %v9142_v0, %v9141_v40  ;;  %v4222_v21 = vmul.f32 %v4218_v15, %v11325_v51  ;;  %v7448_v51 = vld [vmem:[%s12343_s12 + $0x48] sm:$0xff]  ;;  %v8651_v61 = vpack.c.bf16 %v7454_v39, %v7453_v6 }
0x16aa   : > { %v4221_v63 = vmul.f32 %v4217_v18, %v11329_v4  ;;  %v7447_v4 = vld [vmem:[%s12343_s12 + $0x40] sm:$0xff] }
0x16ab   : > { %v9330_v1 = vpop.eup %9329  ;;  %8636 = vmatprep.subr.bf16.mxu1 %v8635_v60  ;;  %v8639_v37 = vpack.c.bf16 %v7448_v51, %v7447_v4 }
0x16ac   : > { %8638 = vmatpush3.bf16.msra.mxu1 %v8635_v60  ;;  %8171 = vmatprep.mubr.msk.f32.mxu1 %vm1072_vm0, %v4221_v63  ;;  %v4219_v24 = vmul.f32 %v9330_v1, %v4195_v26  ;;  %v11544_v63 = vmax.f32 %v11317_v54, 0.0 }
0x16ad   : > { %8640 = vmatprep.subr.bf16.mxu1 %v8639_v37 }
0x16ae   : > { %v4223_v58 = vmul.f32 %v4219_v24, %v11338_v25  ;;  %v7451_v25 = vld [vmem:[%s12344_s13 + $0x40] sm:$0xff] }
0x16af   : > { %v9332_v14 = vpop.eup %9331  ;;  %8172 = vmatmul.mubr.msk.f32.vlgmr.msra.gmra.mrb[40].mxu1 %vm1072_vm0, %v4222_v21 }
0x16b0   : > { %8174 = vmatprep.mubr.msk.f32.mxu1 %vm1072_vm0, %v4223_v58  ;;  %v4220_v59 = vmul.f32 %v9332_v14, %v4196_v50  ;;  %8642 = vmatpush3.bf16.msra.mxu1 %v8639_v37  ;;  %v11548_v58 = vmax.f32 %v11321_v20, 0.0 }
0x16b1   : > { %8644 = vmatprep.subr.bf16.mxu1 %v8643_v35 }
0x16b2   : > { %v4224_v17 = vmul.f32 %v4220_v59, %v11334_v3  ;;  %v8647_v3 = vpack.c.bf16 %v7452_v13, %v7451_v25 }
0x16b4   : > { %8175 = vmatmul.mubr.msk.f32.gmra.mrb[42].mxu1 %vm1072_vm0, %v4224_v17  ;;  %8648 = vmatprep.subr.bf16.mxu0 %v8647_v3 }
0x16b5   : > { %8650 = vmatpush3.bf16.msra.mxu0 %v8647_v3  ;;  %8646 = vmatpush3.bf16.msra.mxu1 %v8643_v35 }
0x16b6   : > { %8652 = vmatprep.subr.bf16.mxu0 %v8651_v61 }
0x16b9   : > { %8654 = vmatpush3.bf16.msra.mxu0 %v8651_v61 }
0x1782   : > { %v8173_v27 = vpop.f32.mrb[40].mxu1 }
0x1783   : > { %v4315_v26 = vpop.f32.mrb[41].mxu1 }
0x1784   : > { %4338 = vrot.lane.b32.xlu1 %v4315_v26, %s10062_s22 }
0x1787   : > { %v8176_v10 = vpop.f32.mrb[42].mxu1 }
0x1788   : > { %4340 = vrot.lane.b32.xlu1 %v8173_v27, %s10062_s22  ;;  %v4325_v34 = vpop.f32.mrb[43].mxu1 }
0x1789   : > { %4342 = vrot.lane.b32.xlu0 %v4325_v34, %s10062_s22 }
0x178c   : > { %4344 = vrot.lane.b32.xlu1 %v8176_v10, %s10062_s22 }
0x17f6   : > { %v4339_v42 = vpop.permute.xlu1 %4338 }
0x17f7   : > { %v4350_v50 = vsel %vm1182_vm1, %v11417_v7, %v4339_v42 }
0x17f8   : > { %8185 = vmatprep.mubr.msk.f32.mxu1 %vm1072_vm0, %v4350_v50  ;;  %8199 = vmatprep.mubr.msk.f32.mxu0 %vm1072_vm0, %v4350_v50 }
0x17fa   : > { %v4341_v49 = vpop.permute.xlu1 %4340 }
0x17fb   : > { %v4351_v48 = vsel %vm1182_vm1, %v11415_v30, %v4341_v49  ;;  %v4343_v45 = vpop.permute.xlu0 %4342 }
0x17fc   : > { %v4352_v11 = vsel %vm1182_vm1, %v11421_v9, %v4343_v45  ;;  %8186 = vmatmul.mubr.msk.f32.vlgmr.msra.gmra.mrb[44].mxu1 %vm1072_vm0, %v4351_v48  ;;  %8200 = vmatmul.mubr.msk.f32.vlgmr.msra.gmra.mrb[44].mxu0 %vm1072_vm0, %v4351_v48 }
0x17fd   : > { %8188 = vmatprep.mubr.msk.f32.mxu1 %vm1072_vm0, %v4352_v11  ;;  %8202 = vmatprep.mubr.msk.f32.mxu0 %vm1072_vm0, %v4352_v11 }
0x17fe   : > { %v4345_v7 = vpop.permute.xlu1 %4344 }
0x17ff   : > { %v4353_v28 = vsel %vm1182_vm1, %v11419_v19, %v4345_v7 }
0x1800   : > { %8189 = vmatmul.mubr.msk.f32.gmra.mrb[46].mxu1 %vm1072_vm0, %v4353_v28  ;;  %8203 = vmatmul.mubr.msk.f32.gmra.mrb[46].mxu0 %vm1072_vm0, %v4353_v28 }
0x18cf   : > { %v11503_v30 = vpop.f32.mrb[44].mxu1  ;;  %v8201_v53 = vpop.f32.mrb[44].mxu0 }
0x18d0   : > { %v11505_v9 = vmax.f32 %v8201_v53, 0.0  ;;  %v11507_v57 = vpop.f32.mrb[45].mxu1  ;;  %v4527_v47 = vpop.f32.mrb[45].mxu0 }
0x18d1   : > { %v11509_v43 = vmax.f32 %v4527_v47, 0.0 }
0x18d2   : > { %4556 = vrot.lane.b32.xlu1 %v11505_v9, %s10058_s2 }
0x18d3   : > { %4554 = vrot.lane.b32.xlu0 %v11509_v43, %s10058_s2  ;;  %v11515_v19 = vpop.f32.mrb[46].mxu1  ;;  %v8204_v29 = vpop.f32.mrb[46].mxu0 }
0x18d4   : > { %v11517_v23 = vmax.f32 %v8204_v29, 0.0  ;;  %v11519_v62 = vpop.f32.mrb[47].mxu1  ;;  %v4537_v31 = vpop.f32.mrb[47].mxu0 }
0x18d5   : > { %v11521_v12 = vmax.f32 %v4537_v31, 0.0 }
0x18d6   : > { %4560 = vrot.lane.b32.xlu1 %v11517_v23, %s10058_s2 }
0x18d7   : > { %4558 = vrot.lane.b32.xlu0 %v11521_v12, %s10058_s2 }
0x18da   : > { %3604 = vrot.lane.b32.xlu1 %v11528_v2, %s10058_s2 }
0x18db   : > { %3602 = vrot.lane.b32.xlu0 %v11531_v5, %s10058_s2 }
0x1944   : > { %v4557_v0 = vpop.permute.xlu1 %4556 }
0x1945   : > { %v4567_v40 = vmax.f32 %v11505_v9, %v4557_v0  ;;  %v4555_v18 = vpop.permute.xlu0 %4554 }
0x1946   : > { %v4566_v15 = vmax.f32 %v11509_v43, %v4555_v18 }
0x1947   : > { %v4571_v60 = vsub.f32 %v11505_v9, %v4567_v40  ;;  %4588 = vrot.lane.b32.xlu1 %v4567_v40, %s10063_s15 }
0x1948   : > { %v4570_v32 = vsub.f32 %v11509_v43, %v4566_v15  ;;  %v4561_v38 = vpop.permute.xlu1 %4560  ;;  %4586 = vrot.lane.b32.xlu0 %v4566_v15, %s10063_s15 }
0x1949   : > { %v4576_v1 = vmul.f32 1.442695, %v4571_v60  ;;  %v4569_v24 = vmax.f32 %v11517_v23, %v4561_v38  ;;  %v4559_v21 = vpop.permute.xlu0 %4558 }
0x194a   : > { %v4574_v14 = vmul.f32 1.442695, %v4570_v32  ;;  %v4568_v59 = vmax.f32 %v11521_v12, %v4559_v21 }
0x194b   : > { %9333 = vpow2.f32 %v4576_v1  ;;  %v4573_v17 = vsub.f32 %v11517_v23, %v4569_v24  ;;  %3608 = vrot.lane.b32.xlu1 %v11544_v63, %s10058_s2 }
0x194c   : > { %9335 = vpow2.f32 %v4574_v14  ;;  %v4572_v54 = vsub.f32 %v11521_v12, %v4568_v59  ;;  %v3605_v4 = vpop.permute.xlu1 %3604  ;;  %3606 = vrot.lane.b32.xlu0 %v11548_v58, %s10058_s2 }
0x194d   : > { %v4580_v51 = vmul.f32 1.442695, %v4573_v17  ;;  %v3615_v20 = vmax.f32 %v11528_v2, %v3605_v4  ;;  %v3603_v25 = vpop.permute.xlu0 %3602 }
0x194e   : > { %v4578_v37 = vmul.f32 1.442695, %v4572_v54  ;;  %v3614_v13 = vmax.f32 %v11531_v5, %v3603_v25 }
0x194f   : > { %9337 = vpow2.f32 %v4580_v51  ;;  %v3619_v3 = vsub.f32 %v11528_v2, %v3615_v20  ;;  %4592 = vrot.lane.b32.xlu1 %v4569_v24, %s10063_s15 }
0x1950   : > { %9339 = vpow2.f32 %v4578_v37  ;;  %v3618_v33 = vsub.f32 %v11531_v5, %v3614_v13  ;;  %4590 = vrot.lane.b32.xlu0 %v4568_v59, %s10063_s15 }
0x1951   : > { %v3624_v16 = vmul.f32 1.442695, %v3619_v3 }
0x1952   : > { %v3622_v6 = vmul.f32 1.442695, %v3618_v33 }
0x1953   : > { %9341 = vpow2.f32 %v3624_v16  ;;  %3636 = vrot.lane.b32.xlu1 %v3615_v20, %s10063_s15 }
0x1954   : > { %9343 = vpow2.f32 %v3622_v6  ;;  %3634 = vrot.lane.b32.xlu0 %v3614_v13, %s10063_s15 }
0x1955   : > { %v11565_v35 = vpop.eup %9333 }
0x1956   : > { %v11567_v39 = vpop.eup %9335  ;;  %v11571_v61 = vmul.f32 %v11565_v35, %v11503_v30 }
0x1957   : > { %v11575_v27 = vmul.f32 %v11567_v39, %v11507_v57 }
0x1959   : > { %v11577_v26 = vpop.eup %9337 }
0x195a   : > { %v11579_v10 = vpop.eup %9339  ;;  %v11583_v34 = vmul.f32 %v11577_v26, %v11515_v19 }
0x195b   : > { %v11587_v42 = vmul.f32 %v11579_v10, %v11519_v62 }
0x195d   : > { %v11589_v50 = vpop.eup %9341 }
0x195e   : > { %v11591_v49 = vpop.eup %9343  ;;  %v11595_v48 = vmul.f32 %v11589_v50, %v11307_v55 }
0x195f   : > { %v11599_v45 = vmul.f32 %v11591_v49, %v11311_v46 }
0x19b9   : > { %v4589_v11 = vpop.permute.xlu1 %4588 }
0x19ba   : > { %v4599_v7 = vsub.f32 %v11505_v9, %v4589_v11  ;;  %v4587_v28 = vpop.permute.xlu0 %4586 }
0x19bb   : > { %v4598_v53 = vsub.f32 %v11509_v43, %v4587_v28  ;;  %v4687_v28 = vld [vmem:[#allocation16 + $0x8] sm:$0xff] }
0x19bc   : > { %v4604_v47 = vmul.f32 1.442695, %v4599_v7  ;;  %v4686_v7 = vld [vmem:[#allocation16] sm:$0xff] }
0x19bd   : > { %v4602_v29 = vmul.f32 1.442695, %v4598_v53  ;;  %v3609_v31 = vpop.permute.xlu1 %3608  ;;  %v4694_v53 = vld [vmem:[#allocation17] sm:$0xff] }
0x19be   : > { %9345 = vpow2.f32 %v4604_v47  ;;  %v3617_v0 = vmax.f32 %v11544_v63, %v3609_v31  ;;  %v3607_v40 = vpop.permute.xlu0 %3606  ;;  %v4695_v31 = vld [vmem:[#allocation17 + $0x8] sm:$0xff] }
0x19bf   : > { %9347 = vpow2.f32 %v4602_v29  ;;  %v3616_v18 = vmax.f32 %v11548_v58, %v3607_v40  ;;  %v8655_v29 = vpack.c.bf16 %v4687_v28, %v4686_v7  ;;  %v8671_v40 = vpack.c.bf16 %v4695_v31, %v4694_v53 }
0x19c0   : > { %v3621_v15 = vsub.f32 %v11544_v63, %v3617_v0 }
0x19c1   : > { %v3620_v60 = vsub.f32 %v11548_v58, %v3616_v18  ;;  %v4593_v32 = vpop.permute.xlu1 %4592  ;;  %8656 = vmatprep.subr.bf16.mxu1 %v8655_v29  ;;  %8672 = vmatprep.subr.bf16.mxu0 %v8671_v40 }
0x19c2   : > { %v3628_v38 = vmul.f32 1.442695, %v3621_v15  ;;  %v4601_v9 = vsub.f32 %v11517_v23, %v4593_v32  ;;  %v4591_v1 = vpop.permute.xlu0 %4590  ;;  %v4696_v15 = vld [vmem:[#allocation17 + $0x10] sm:$0xff]  ;;  %v4690_v32 = vld [vmem:[#allocation16 + $0x20] sm:$0xff]  ;;  %8658 = vmatpush3.bf16.msra.mxu1 %v8655_v29  ;;  %8674 = vmatpush3.bf16.msra.mxu0 %v8671_v40 }
0x19c3   : > { %v3626_v43 = vmul.f32 1.442695, %v3620_v60  ;;  %v4600_v24 = vsub.f32 %v11521_v12, %v4591_v1  ;;  %v4697_v60 = vld [vmem:[#allocation17 + $0x18] sm:$0xff]  ;;  %v4698_v1 = vld [vmem:[#allocation17 + $0x20] sm:$0xff] }
0x19c4   : > { %9349 = vpow2.f32 %v3628_v38  ;;  %v4608_v21 = vmul.f32 1.442695, %v4601_v9  ;;  %v8675_v38 = vpack.c.bf16 %v4697_v60, %v4696_v15  ;;  %v4691_v9 = vld [vmem:[#allocation16 + $0x28] sm:$0xff] }
0x19c5   : > { %9351 = vpow2.f32 %v3626_v43  ;;  %v4606_v14 = vmul.f32 1.442695, %v4600_v24  ;;  %v3637_v59 = vpop.permute.xlu1 %3636  ;;  %v4699_v43 = vld [vmem:[#allocation17 + $0x28] sm:$0xff]  ;;  %v4692_v24 = vld [vmem:[#allocation16 + $0x30] sm:$0xff] }
0x19c6   : > { %v3635_v54 = vpop.permute.xlu0 %3634  ;;  %9353 = vpow2.f32 %v4608_v21  ;;  %v3647_v51 = vsub.f32 %v11528_v2, %v3637_v59  ;;  %8676 = vmatprep.subr.bf16.mxu0 %v8675_v38  ;;  %v4693_v21 = vld [vmem:[#allocation16 + $0x38] sm:$0xff] }
0x19c7   : > { %9355 = vpow2.f32 %v4606_v14  ;;  %v3646_v23 = vsub.f32 %v11531_v5, %v3635_v54  ;;  %v4700_v14 = vld [vmem:[#allocation17 + $0x30] sm:$0xff]  ;;  %v4701_v59 = vld [vmem:[#allocation17 + $0x38] sm:$0xff]  ;;  %8678 = vmatpush3.bf16.msra.mxu0 %v8675_v38 }
0x19c8   : > { %v9346_v17 = vpop.eup %9345  ;;  %v3652_v20 = vmul.f32 1.442695, %v3647_v51  ;;  %v8683_v54 = vpack.c.bf16 %v4701_v59, %v4700_v14  ;;  %v7474_v59 = vld [vmem:[%s12347_s16 + $0x38] sm:$0xff] }
0x19c9   : > { %v9348_v4 = vpop.eup %9347  ;;  %4616 = vrot.lane.b32.xlu1 %v9346_v17, %s10058_s2  ;;  %v3650_v37 = vmul.f32 1.442695, %v3646_v23  ;;  %v4635_v13 = vmul.f32 %v9346_v17, %v11503_v30  ;;  %v8667_v17 = vpack.c.bf16 %v4693_v21, %v4692_v24 }
0x19ca   : > { %4614 = vrot.lane.b32.xlu0 %v9348_v4, %s10058_s2  ;;  %v4634_v3 = vmul.f32 %v9348_v4, %v11507_v57  ;;  %9357 = vpow2.f32 %v3652_v20 }
0x19cb   : > { %9359 = vpow2.f32 %v3650_v37 }
0x19cd   : > { %3640 = vrot.lane.b32.xlu1 %v3617_v0, %s10063_s15  ;;  %v4689_v0 = vld [vmem:[#allocation16 + $0x18] sm:$0xff] }
0x19ce   : > { %v11614_v12 = vpop.eup %9349  ;;  %3638 = vrot.lane.b32.xlu0 %v3616_v18, %s10063_s15 }
0x19cf   : > { %v11617_v25 = vpop.eup %9351  ;;  %v11622_v2 = vmul.f32 %v11614_v12, %v11315_v52 }
0x19d0   : > { %v11627_v5 = vmul.f32 %v11617_v25, %v11319_v56  ;;  %v9354_v33 = vpop.eup %9353 }
0x19d1   : > { %4644 = vrot.lane.b32.xlu1 %v4635_v13, %s10058_s2  ;;  %v9356_v16 = vpop.eup %9355  ;;  %v4637_v30 = vmul.f32 %v9354_v33, %v11515_v19  ;;  %v4688_v19 = vld [vmem:[#allocation16 + $0x10] sm:$0xff] }
0x19d2   : > { %4642 = vrot.lane.b32.xlu0 %v4634_v3, %s10058_s2  ;;  %v4636_v57 = vmul.f32 %v9356_v16, %v11519_v62  ;;  %v8659_v18 = vpack.c.bf16 %v4689_v0, %v4688_v19 }
0x19d4   : > { %v9358_v6 = vpop.eup %9357  ;;  %8660 = vmatprep.subr.bf16.mxu1 %v8659_v18 }
0x19d5   : > { %4620 = vrot.lane.b32.xlu1 %v9354_v33, %s10058_s2  ;;  %v9360_v11 = vpop.eup %9359  ;;  %v3683_v47 = vmul.f32 %v9358_v6, %v11307_v55  ;;  %v8663_v55 = vpack.c.bf16 %v4691_v9, %v4690_v32  ;;  %8662 = vmatpush3.bf16.msra.mxu1 %v8659_v18 }
0x19d6   : > { %4618 = vrot.lane.b32.xlu0 %v9356_v16, %s10058_s2  ;;  %v3682_v62 = vmul.f32 %v9360_v11, %v11311_v46  ;;  %v8679_v46 = vpack.c.bf16 %v4699_v43, %v4698_v1 }
0x19d7   : > { %8664 = vmatprep.subr.bf16.mxu1 %v8663_v55 }
0x19d8   : > { %8680 = vmatprep.subr.bf16.mxu0 %v8679_v46 }
0x19d9   : > { %4648 = vrot.lane.b32.xlu1 %v4637_v30, %s10058_s2  ;;  %8666 = vmatpush3.bf16.msra.mxu1 %v8663_v55 }
0x19da   : > { %4646 = vrot.lane.b32.xlu0 %v4636_v57, %s10058_s2  ;;  %8682 = vmatpush3.bf16.msra.mxu0 %v8679_v46 }
0x19db   : > { %8668 = vmatprep.subr.bf16.mxu1 %v8667_v17  ;;  %8684 = vmatprep.subr.bf16.mxu0 %v8683_v54 }
0x19dd   : > { %3664 = vrot.lane.b32.xlu1 %v9358_v6, %s10058_s2  ;;  %8670 = vmatpush3.bf16.msra.mxu1 %v8667_v17 }
0x19de   : > { %3662 = vrot.lane.b32.xlu0 %v9360_v11, %s10058_s2  ;;  %8686 = vmatpush3.bf16.msra.mxu0 %v8683_v54 }
0x19e1   : > { %3692 = vrot.lane.b32.xlu1 %v3683_v47, %s10058_s2 }
0x19e2   : > { %3690 = vrot.lane.b32.xlu0 %v3682_v62, %s10058_s2 }
0x1a3b   : > { %v4617_v4 = vpop.permute.xlu1 %4616 }
0x1a3c   : > { %v4627_v51 = vadd.f32 %v11565_v35, %v4617_v4  ;;  %v4615_v23 = vpop.permute.xlu0 %4614 }
0x1a3d   : > { %v4626_v20 = vadd.f32 %v11567_v39, %v4615_v23 }
0x1a3e   : > { %9361 = vrcp.f32 %v4627_v51 }
0x1a3f   : > { %9363 = vrcp.f32 %v4626_v20  ;;  %v3641_v37 = vpop.permute.xlu1 %3640 }
0x1a40   : > { %v3649_v13 = vsub.f32 %v11544_v63, %v3641_v37  ;;  %v3639_v3 = vpop.permute.xlu0 %3638 }
0x1a41   : > { %v3648_v33 = vsub.f32 %v11548_v58, %v3639_v3 }
0x1a42   : > { %v3656_v16 = vmul.f32 1.442695, %v3649_v13 }
0x1a43   : > { %v3654_v30 = vmul.f32 1.442695, %v3648_v33  ;;  %v4645_v57 = vpop.permute.xlu1 %4644 }
0x1a44   : > { %9365 = vpow2.f32 %v3656_v16  ;;  %v4643_v6 = vpop.permute.xlu0 %4642  ;;  %v4655_v11 = vadd.f32 %v4645_v57, %v11571_v61 }
0x1a45   : > { %9367 = vpow2.f32 %v3654_v30  ;;  %v4654_v39 = vadd.f32 %v4643_v6, %v11575_v27 }
0x1a47   : > { %v4621_v35 = vpop.permute.xlu1 %4620 }
0x1a48   : > { %v9362_v7 = vpop.eup %9361  ;;  %v4629_v28 = vadd.f32 %v11577_v26, %v4621_v35  ;;  %v4619_v53 = vpop.permute.xlu0 %4618  ;;  %v7471_v26 = vld [vmem:[%s12347_s16 + $0x20] sm:$0xff] }
0x1a49   : > { %v9364_v47 = vpop.eup %9363  ;;  %v4663_v63 = vmul.f32 %v9362_v7, %v4655_v11  ;;  %v4628_v29 = vadd.f32 %v11579_v10, %v4619_v53  ;;  %v7472_v10 = vld [vmem:[%s12347_s16 + $0x28] sm:$0xff] }
0x1a4a   : > { %v4662_v58 = vmul.f32 %v9364_v47, %v4654_v39  ;;  %9369 = vrcp.f32 %v4629_v28  ;;  %v8687_v18 = vpack.c.bf16 %v7472_v10, %v7471_v26 }
0x1a4b   : > { %9371 = vrcp.f32 %v4628_v29  ;;  %4672 = vrot.lane.b32.xlu1 %v4663_v63, %s10063_s15  ;;  %v4649_v31 = vpop.permute.xlu1 %4648 }
0x1a4c   : > { %4670 = vrot.lane.b32.xlu0 %v4662_v58, %s10063_s15  ;;  %v4647_v61 = vpop.permute.xlu0 %4646  ;;  %8688 = vmatprep.subr.bf16.mxu1 %v8687_v18  ;;  %v4657_v38 = vadd.f32 %v4649_v31, %v11583_v34 }
0x1a4e   : > { %v9366_v19 = vpop.eup %9365 }
0x1a4f   : > { %v9368_v0 = vpop.eup %9367  ;;  %3668 = vrot.lane.b32.xlu1 %v9366_v19, %s10058_s2  ;;  %v3665_v27 = vpop.permute.xlu1 %3664  ;;  %v3685_v60 = vmul.f32 %v9366_v19, %v11315_v52 }
0x1a50   : > { %v3675_v62 = vadd.f32 %v11589_v50, %v3665_v27  ;;  %3666 = vrot.lane.b32.xlu0 %v9368_v0, %s10058_s2  ;;  %v3663_v40 = vpop.permute.xlu0 %3662  ;;  %v3684_v32 = vmul.f32 %v9368_v0, %v11319_v56  ;;  %v4656_v50 = vadd.f32 %v4647_v61, %v11587_v42  ;;  %v7473_v42 = vld [vmem:[%s12347_s16 + $0x30] sm:$0xff] }
0x1a51   : > { %v3674_v15 = vadd.f32 %v11591_v49, %v3663_v40 }
0x1a52   : > { %9373 = vrcp.f32 %v3675_v62 }
0x1a53   : > { %9375 = vrcp.f32 %v3674_v15  ;;  %3696 = vrot.lane.b32.xlu1 %v3685_v60, %s10058_s2  ;;  %v3693_v52 = vpop.permute.xlu1 %3692 }
0x1a54   : > { %v9370_v9 = vpop.eup %9369  ;;  %3694 = vrot.lane.b32.xlu0 %v3684_v32, %s10058_s2  ;;  %v3691_v56 = vpop.permute.xlu0 %3690  ;;  %v3703_v49 = vadd.f32 %v3693_v52, %v11595_v48  ;;  %v8691_v48 = vpack.c.bf16 %v7474_v59, %v7473_v42 }
0x1a55   : > { %v9372_v1 = vpop.eup %9371  ;;  %v4665_v43 = vmul.f32 %v9370_v9, %v4657_v38  ;;  %v3702_v46 = vadd.f32 %v3691_v56, %v11599_v45 }
0x1a56   : > { %v4664_v55 = vmul.f32 %v9372_v1, %v4656_v50 }
0x1a57   : > { %4676 = vrot.lane.b32.xlu1 %v4665_v43, %s10063_s15 }
0x1a58   : > { %4674 = vrot.lane.b32.xlu0 %v4664_v55, %s10063_s15 }
0x1a5c   : > { %v9374_v34 = vpop.eup %9373 }
0x1a5d   : > { %v9376_v24 = vpop.eup %9375  ;;  %v3711_v21 = vmul.f32 %v9374_v34, %v3703_v49 }
0x1a5e   : > { %v3710_v14 = vmul.f32 %v9376_v24, %v3702_v46 }
0x1abd   : > { %v4673_v17 = vpop.permute.xlu1 %4672 }
0x1abe   : > { %v4671_v54 = vpop.permute.xlu0 %4670  ;;  %v4683_v51 = vsel %vm1072_vm0, %v3711_v21, %v4673_v17 }
0x1abf   : > { %v4682_v4 = vsel %vm1072_vm0, %v3710_v14, %v4671_v54 }
0x1ac0   : > { %8221 = vmatprep.mubr.msk.f32.mxu1 %vm4702_vm14, %v4682_v4  ;;  %8243 = vmatprep.mubr.msk.f32.mxu0 %vm4702_vm14, %v4682_v4 }
0x1ac1   : > { %v3669_v45 = vpop.permute.xlu1 %3668  ;;  %8222 = vmatmul.mubr.msk.f32.vlgmr.msra.gmra.mrb[48].mxu1 %vm4702_vm14, %v4683_v51  ;;  %8244 = vmatmul.mubr.msk.f32.vlgmr.msra.gmra.mrb[48].mxu0 %vm4702_vm14, %v4683_v51 }
0x1ac2   : > { %v3677_v23 = vadd.f32 %v11614_v12, %v3669_v45  ;;  %v3667_v20 = vpop.permute.xlu0 %3666  ;;  %8690 = vmatpush3.bf16.msra.mxu1 %v8687_v18 }
0x1ac3   : > { %v3676_v37 = vadd.f32 %v11617_v25, %v3667_v20  ;;  %8692 = vmatprep.subr.bf16.mxu1 %v8691_v48 }
0x1ac4   : > { %9377 = vrcp.f32 %v3677_v23 }
0x1ac5   : > { %9379 = vrcp.f32 %v3676_v37  ;;  %v3697_v13 = vpop.permute.xlu1 %3696 }
0x1ac6   : > { %8694 = vmatpush3.bf16.msra.mxu1 %v8691_v48  ;;  %v3695_v3 = vpop.permute.xlu0 %3694  ;;  %v3705_v33 = vadd.f32 %v3697_v13, %v11622_v2 }
0x1ac7   : > { %v3704_v30 = vadd.f32 %v3695_v3, %v11627_v5 }
0x1ac9   : > { %v4677_v12 = vpop.permute.xlu1 %4676 }
0x1aca   : > { %v4675_v35 = vpop.permute.xlu0 %4674 }
0x1ace   : > { %v9378_v16 = vpop.eup %9377 }
0x1acf   : > { %v9380_v57 = vpop.eup %9379  ;;  %v3713_v6 = vmul.f32 %v9378_v16, %v3705_v33 }
0x1ad0   : > { %v3712_v11 = vmul.f32 %v9380_v57, %v3704_v30 }
0x1ad1   : > { %v4685_v25 = vsel %vm1072_vm0, %v3713_v6, %v4677_v12 }
0x1ad2   : > { %v4684_v7 = vsel %vm1072_vm0, %v3712_v11, %v4675_v35 }
0x1ad3   : > { %8224 = vmatprep.mubr.msk.f32.mxu1 %vm4702_vm14, %v4684_v7  ;;  %8246 = vmatprep.mubr.msk.f32.mxu0 %vm4702_vm14, %v4684_v7 }
0x1ad4   : > { %8225 = vmatmul.mubr.msk.f32.gmra.mrb[50].mxu1 %vm4702_vm14, %v4685_v25  ;;  %8247 = vmatmul.mubr.msk.f32.gmra.mrb[50].mxu0 %vm4702_vm14, %v4685_v25 }
0x1ad5   : > { %8257 = vmatprep.mubr.msk.f32.mxu1 %vm1072_vm0, %v11002_v36 }
0x1ad8   : > { %8258 = vmatmul.mubr.msk.f32.vlgmr.msra.gmra.mrb[52].mxu1 %vm1072_vm0, %v11008_v8 }
0x1ad9   : > { %8260 = vmatprep.mubr.msk.f32.mxu1 %vm1072_vm0, %v11014_v41 }
0x1adc   : > { %8261 = vmatmul.mubr.msk.f32.gmra.mrb[54].mxu1 %vm1072_vm0, %v11019_v44 }
0x1b94   : > { %v11703_v2 = vpop.f32.mrb[48].mxu1  ;;  %v8245_v5 = vpop.f32.mrb[48].mxu0 }
0x1b95   : > { %v4886_v39 = vmax.f32 %v8245_v5, 0.0  ;;  %v11705_v28 = vpop.f32.mrb[49].mxu1  ;;  %v4866_v53 = vpop.f32.mrb[49].mxu0  ;;  %v7475_v5 = vld [vmem:[%s12463_s11 + $0x20] sm:$0xff] }
0x1b96   : > { %v4885_v47 = vmax.f32 %v4866_v53, 0.0  ;;  %v7477_v53 = vld [vmem:[%s12463_s11 + $0x30] sm:$0xff] }
0x1b97   : > { %4895 = vrot.lane.b32.xlu1 %v4886_v39, %s10058_s2 }
0x1b98   : > { %4893 = vrot.lane.b32.xlu0 %v4885_v47, %s10058_s2 }
0x1ba7   : > { %v11709_v63 = vpop.f32.mrb[50].mxu1  ;;  %v8248_v29 = vpop.f32.mrb[50].mxu0 }
0x1ba8   : > { %v4888_v58 = vmax.f32 %v8248_v29, 0.0  ;;  %v11711_v31 = vpop.f32.mrb[51].mxu1  ;;  %v4876_v61 = vpop.f32.mrb[51].mxu0 }
0x1ba9   : > { %v4887_v19 = vmax.f32 %v4876_v61, 0.0 }
0x1baa   : > { %4899 = vrot.lane.b32.xlu1 %v4888_v58, %s10058_s2 }
0x1bab   : > { %4897 = vrot.lane.b32.xlu0 %v4887_v19, %s10058_s2  ;;  %v11715_v0 = vpop.f32.mrb[52].mxu1 }
0x1bac   : > { %v11717_v27 = vpop.f32.mrb[53].mxu1 }
0x1baf   : > { %v11719_v26 = vpop.f32.mrb[54].mxu1 }
0x1bb0   : > { %v11721_v10 = vpop.f32.mrb[55].mxu1 }
0x1c09   : > { %v4896_v62 = vpop.permute.xlu1 %4895 }
0x1c0a   : > { %v4906_v40 = vmax.f32 %v4886_v39, %v4896_v62  ;;  %v4894_v18 = vpop.permute.xlu0 %4893 }
0x1c0b   : > { %v4905_v15 = vmax.f32 %v4885_v47, %v4894_v18 }
0x1c0c   : > { %v4910_v60 = vsub.f32 %v4886_v39, %v4906_v40  ;;  %4927 = vrot.lane.b32.xlu1 %v4906_v40, %s10063_s15  ;;  %v7480_v40 = vld [vmem:[#allocation19 + $0x1] ss:$0 sm:$0xff] }
0x1c0d   : > { %v4909_v32 = vsub.f32 %v4885_v47, %v4905_v15  ;;  %4925 = vrot.lane.b32.xlu0 %v4905_v15, %s10063_s15 }
0x1c0e   : > { %v4915_v38 = vmul.f32 1.442695, %v4910_v60 }
0x1c0f   : > { %v4913_v9 = vmul.f32 1.442695, %v4909_v32 }
0x1c10   : > { %9381 = vpow2.f32 %v4915_v38  ;;  %v5101_v38 = vadd.f32 %v11715_v0, %v7480_v40 }
0x1c11   : > { %9383 = vpow2.f32 %v4913_v9 }
0x1c1a   : > { %v11725_v50 = vpop.eup %9381 }
0x1c1b   : > { %v11727_v1 = vpop.eup %9383  ;;  %v11731_v43 = vmul.f32 %v11725_v50, %v11703_v2 }
0x1c1c   : > { %v4900_v55 = vpop.permute.xlu1 %4899  ;;  %v11735_v52 = vmul.f32 %v11727_v1, %v11705_v28 }
0x1c1d   : > { %v4908_v56 = vmax.f32 %v4888_v58, %v4900_v55  ;;  %v4898_v49 = vpop.permute.xlu0 %4897  ;;  %v5096_v55 = vadd.f32 %v7480_v40, %v11717_v27 }
0x1c1e   : > { %v4907_v34 = vmax.f32 %v4887_v19, %v4898_v49 }
0x1c1f   : > { %v4912_v46 = vsub.f32 %v4888_v58, %v4908_v56  ;;  %4931 = vrot.lane.b32.xlu1 %v4908_v56, %s10063_s15 }
0x1c20   : > { %v4911_v24 = vsub.f32 %v4887_v19, %v4907_v34  ;;  %4929 = vrot.lane.b32.xlu0 %v4907_v34, %s10063_s15 }
0x1c21   : > { %v4919_v21 = vmul.f32 1.442695, %v4912_v46 }
0x1c22   : > { %v4917_v14 = vmul.f32 1.442695, %v4911_v24 }
0x1c23   : > { %9385 = vpow2.f32 %v4919_v21 }
0x1c24   : > { %9387 = vpow2.f32 %v4917_v14 }
0x1c2d   : > { %v11739_v42 = vpop.eup %9385 }
0x1c2e   : > { %v11741_v59 = vpop.eup %9387  ;;  %v11745_v17 = vmul.f32 %v11739_v42, %v11709_v63 }
0x1c2f   : > { %v11749_v54 = vmul.f32 %v11741_v59, %v11711_v31 }
0x1c7e   : > { %v4928_v4 = vpop.permute.xlu1 %4927 }
0x1c7f   : > { %v4938_v48 = vsub.f32 %v4886_v39, %v4928_v4  ;;  %v4926_v51 = vpop.permute.xlu0 %4925  ;;  %v7476_v39 = vld [vmem:[%s12463_s11 + $0x28] sm:$0xff] }
0x1c80   : > { %v4937_v45 = vsub.f32 %v4885_v47, %v4926_v51  ;;  %v7478_v47 = vld [vmem:[%s12463_s11 + $0x38] sm:$0xff] }
0x1c81   : > { %v4943_v23 = vmul.f32 1.442695, %v4938_v48 }
0x1c82   : > { %v4941_v20 = vmul.f32 1.442695, %v4937_v45 }
0x1c83   : > { %9389 = vpow2.f32 %v4943_v23 }
0x1c84   : > { %9391 = vpow2.f32 %v4941_v20 }
0x1c8d   : > { %v9390_v37 = vpop.eup %9389 }
0x1c8e   : > { %v9392_v13 = vpop.eup %9391  ;;  %4955 = vrot.lane.b32.xlu1 %v9390_v37, %s10058_s2  ;;  %v4974_v3 = vmul.f32 %v9390_v37, %v11703_v2 }
0x1c8f   : > { %4953 = vrot.lane.b32.xlu0 %v9392_v13, %s10058_s2  ;;  %v4973_v16 = vmul.f32 %v9392_v13, %v11705_v28  ;;  %v8695_v28 = vpack.c.bf16 %v7476_v39, %v7475_v5  ;;  %v7489_v5 = vld [vmem:[#allocation20 + $0x1] ss:$0 sm:$0xff] }
0x1c91   : > { %v4932_v33 = vpop.permute.xlu1 %4931  ;;  %8696 = vmatprep.subr.bf16.mxu0 %v8695_v28 }
0x1c92   : > { %v4940_v30 = vsub.f32 %v4888_v58, %v4932_v33  ;;  %4983 = vrot.lane.b32.xlu1 %v4974_v3, %s10058_s2  ;;  %v4930_v57 = vpop.permute.xlu0 %4929  ;;  %8698 = vmatpush3.bf16.msra.mxu0 %v8695_v28 }
0x1c93   : > { %v4939_v6 = vsub.f32 %v4887_v19, %v4930_v57  ;;  %4981 = vrot.lane.b32.xlu0 %v4973_v16, %s10058_s2 }
0x1c94   : > { %v4947_v11 = vmul.f32 1.442695, %v4940_v30 }
0x1c95   : > { %v4945_v35 = vmul.f32 1.442695, %v4939_v6 }
0x1c96   : > { %9393 = vpow2.f32 %v4947_v11 }
0x1c97   : > { %9395 = vpow2.f32 %v4945_v35 }
0x1ca0   : > { %v9394_v12 = vpop.eup %9393 }
0x1ca1   : > { %v9396_v7 = vpop.eup %9395  ;;  %4959 = vrot.lane.b32.xlu1 %v9394_v12, %s10058_s2  ;;  %v4976_v25 = vmul.f32 %v9394_v12, %v11709_v63  ;;  %v8699_v63 = vpack.c.bf16 %v7478_v47, %v7477_v53 }
0x1ca2   : > { %4957 = vrot.lane.b32.xlu0 %v9396_v7, %s10058_s2  ;;  %v4975_v2 = vmul.f32 %v9396_v7, %v11711_v31 }
0x1ca3   : > { %8700 = vmatprep.subr.bf16.mxu0 %v8699_v63 }
0x1ca4   : > { %8702 = vmatpush3.bf16.msra.mxu0 %v8699_v63 }
0x1ca5   : > { %4987 = vrot.lane.b32.xlu1 %v4976_v25, %s10058_s2 }
0x1ca6   : > { %4985 = vrot.lane.b32.xlu0 %v4975_v2, %s10058_s2 }
0x1d00   : > { %v4956_v29 = vpop.permute.xlu1 %4955 }
0x1d01   : > { %v4966_v58 = vadd.f32 %v11725_v50, %v4956_v29  ;;  %v4954_v31 = vpop.permute.xlu0 %4953 }
0x1d02   : > { %v4965_v61 = vadd.f32 %v11727_v1, %v4954_v31 }
0x1d03   : > { %9397 = vrcp.f32 %v4966_v58 }
0x1d04   : > { %9399 = vrcp.f32 %v4965_v61  ;;  %v4984_v19 = vpop.permute.xlu1 %4983 }
0x1d05   : > { %v4982_v62 = vpop.permute.xlu0 %4981  ;;  %v4994_v18 = vadd.f32 %v4984_v19, %v11731_v43 }
0x1d06   : > { %v4993_v60 = vadd.f32 %v4982_v62, %v11735_v52 }
0x1d0d   : > { %v9398_v15 = vpop.eup %9397 }
0x1d0e   : > { %v9400_v32 = vpop.eup %9399  ;;  %v5002_v9 = vmul.f32 %v9398_v15, %v4994_v18 }
0x1d0f   : > { %v5001_v50 = vmul.f32 %v9400_v32, %v4993_v60 }
0x1d10   : > { %v5115_v56 = vmul.f32 %v5101_v38, %v5002_v9 }
0x1d11   : > { %v5114_v49 = vmul.f32 %v5096_v55, %v5001_v50 }
0x1d12   : > { %v7486_v1 = vmul.f32 -1.442695, %v5115_v56 }
0x1d13   : > { %v7485_v34 = vmul.f32 -1.442695, %v5114_v49  ;;  %v4960_v46 = vpop.permute.xlu1 %4959 }
0x1d14   : > { %9401 = vpow2.f32 %v7486_v1  ;;  %v4968_v24 = vadd.f32 %v11739_v42, %v4960_v46  ;;  %v4958_v21 = vpop.permute.xlu0 %4957  ;;  %v5111_v42 = vadd.f32 %v11719_v26, %v7480_v40  ;;  %v5352_v46 = vld [vmem:[#allocation13 + $0x18] sm:$0xff] }
0x1d15   : > { %9403 = vpow2.f32 %v7485_v34  ;;  %v4967_v43 = vadd.f32 %v11741_v59, %v4958_v21  ;;  %v5106_v59 = vadd.f32 %v7480_v40, %v11721_v10  ;;  %v5351_v34 = vld [vmem:[#allocation13 + $0x10] sm:$0xff]  ;;  %v11829_v21 = vld [vmem:[%s1058_s6] sm:$0xff] }
0x1d16   : > { %9405 = vrcp.f32 %v4968_v24  ;;  %v8707_v24 = vpack.c.bf16 %v5352_v46, %v5351_v34 }
0x1d17   : > { %9407 = vrcp.f32 %v4967_v43  ;;  %v4988_v52 = vpop.permute.xlu1 %4987  ;;  %v11831_v43 = vld [vmem:[%s1058_s6 + $0x8] sm:$0xff] }
0x1d18   : > { %v4986_v0 = vpop.permute.xlu0 %4985  ;;  %v4996_v48 = vadd.f32 %v4988_v52, %v11745_v17  ;;  %v11833_v52 = vld [vmem:[%s1058_s6 + $0x10] sm:$0xff] }
0x1d19   : > { %v4995_v23 = vadd.f32 %v4986_v0, %v11749_v54  ;;  %v8711_v0 = vpack.c.bf16 %v11831_v43, %v11829_v21 }
0x1d1b   : > { %8713 = vmatprep.subr.msk.bf16.mxu0 %vm10702_vm2, %v8711_v0 }
0x1d1e   : > { %v9402_v14 = vpop.eup %9401 }
0x1d1f   : > { %v9404_v4 = vpop.eup %9403  ;;  %v5131_v27 = vadd.f32 1.0, %v9402_v14  ;;  %v11837_v14 = vld [vmem:[%s1058_s6 + $0x18] sm:$0xff] }
0x1d20   : > { %v9406_v51 = vpop.eup %9405  ;;  %v5130_v45 = vadd.f32 1.0, %v9404_v4  ;;  %v8717_v4 = vpack.c.bf16 %v11837_v14, %v11833_v52 }
0x1d21   : > { %v9408_v20 = vpop.eup %9407  ;;  %9409 = vrcp.f32 %v5131_v27  ;;  %v5004_v37 = vmul.f32 %v9406_v51, %v4996_v48  ;;  %v11847_v27 = vld [vmem:[%s1058_s6 + $0x20] sm:$0xff]  ;;  %v11849_v48 = vld [vmem:[%s1058_s6 + $0x28] sm:$0xff]  ;;  %s12473_s6 = sld [smem:[#allocation63_spill]] }
0x1d22   : > { %9411 = vrcp.f32 %v5130_v45  ;;  %v5003_v13 = vmul.f32 %v9408_v20, %v4995_v23  ;;  %v8723_v51 = vpack.c.bf16 %v11849_v48, %v11847_v27 }
0x1d23   : > { %v5117_v3 = vmul.f32 %v5111_v42, %v5004_v37 }
0x1d24   : > { %v5116_v33 = vmul.f32 %v5106_v59, %v5003_v13 }
0x1d25   : > { %v7488_v16 = vmul.f32 -1.442695, %v5117_v3 }
0x1d26   : > { %v7487_v30 = vmul.f32 -1.442695, %v5116_v33 }
0x1d27   : > { %9413 = vpow2.f32 %v7488_v16  ;;  %s12282_s10 = scalar_lea.hbm %s12473_s6, %s7589_s4 }
0x1d28   : > { %9415 = vpow2.f32 %v7487_v30 }
0x1d2b   : > { %v9410_v17 = vpop.eup %9409 }
0x1d2c   : > { %v9412_v57 = vpop.eup %9411  ;;  %v5143_v11 = vmul.f32 %v9410_v17, %v5115_v56  ;;  %v5349_v56 = vld [vmem:[#allocation13] sm:$0xff] }
0x1d2d   : > { %v5142_v6 = vmul.f32 %v9412_v57, %v5114_v49  ;;  %v5350_v49 = vld [vmem:[#allocation13 + $0x8] sm:$0xff] }
0x1d2e   : > { %v8703_v1 = vpack.c.bf16 %v5350_v49, %v5349_v56 }
0x1d2f   : > { %8271 = vmatprep.mubr.msk.f32.mxu0 %vm1072_vm0, %v5142_v6 }
0x1d30   : > { %8272 = vmatmul.mubr.msk.f32.vlgmr.msra.gmra.mrb[52].mxu0 %vm1072_vm0, %v5143_v11  ;;  %8704 = vmatprep.subr.bf16.mxu1 %v8703_v1 }
0x1d31   : > { %v9414_v26 = vpop.eup %9413  ;;  %8706 = vmatpush3.bf16.msra.mxu1 %v8703_v1  ;;  %8716 = vmatpush3.bf16.xpose.msk.msra.mxu0 %vm10702_vm2, %v8711_v0 }
0x1d32   : > { %v9416_v54 = vpop.eup %9415  ;;  %v5133_v35 = vadd.f32 1.0, %v9414_v26  ;;  %8708 = vmatprep.subr.bf16.mxu1 %v8707_v24  ;;  %8719 = vmatprep.subr.msk.bf16.mxu0 %vm10702_vm2, %v8717_v4 }
0x1d33   : > { %v5132_v10 = vadd.f32 1.0, %v9416_v54 }
0x1d34   : > { %9417 = vrcp.f32 %v5133_v35 }
0x1d35   : > { %9419 = vrcp.f32 %v5132_v10  ;;  %8710 = vmatpush3.bf16.msra.mxu1 %v8707_v24 }
0x1d39   : > { %8722 = vmatpush3.bf16.xpose.msk.msra.mxu0 %vm10702_vm2, %v8717_v4 }
0x1d3a   : > { %8725 = vmatprep.subr.msk.bf16.mxu0 %vm10702_vm2, %v8723_v51 }
0x1d3e   : > { %v9418_v12 = vpop.eup %9417 }
0x1d3f   : > { %v9420_v7 = vpop.eup %9419  ;;  %v5145_v2 = vmul.f32 %v9418_v12, %v5117_v3 }
0x1d40   : > { %v5144_v25 = vmul.f32 %v9420_v7, %v5116_v33 }
0x1d41   : > { %8728 = vmatpush3.bf16.xpose.msk.msra.mxu0 %vm10702_vm2, %v8723_v51 }
0x1d42   : > { %8274 = vmatprep.mubr.msk.f32.mxu0 %vm1072_vm0, %v5144_v25 }
0x1d43   : > { %8275 = vmatmul.mubr.msk.f32.gmra.mrb[54].mxu0 %vm1072_vm0, %v5145_v2 }
0x1e03   : > { %v8273_v39 = vpop.f32.mrb[52].mxu0 }
0x1e04   : > { %v5236_v28 = vadd.f32 %v8273_v39, %v7489_v5  ;;  %v5230_v53 = vpop.f32.mrb[53].mxu0 }
0x1e05   : > { %v5231_v47 = vadd.f32 %v7489_v5, %v5230_v53  ;;  %v7494_v53 = vld [vmem:[%s12464_s0 + $0x1] ss:$0 sm:$0xff] }
0x1e06   : > { %v11792_v63 = vadd.f32 %v5236_v28, %v11008_v8 }
0x1e07   : > { %v11795_v29 = vadd.f32 %v5231_v47, %v11002_v36 }
0x1e08   : > { %v5256_v58 = vsel %vm1072_vm0, %v11792_v63, 0.0  ;;  %v5270_v8 = vmul.f32 %v11792_v63, %v11792_v63 }
0x1e09   : > { %5257 = vadd.xlane.f32.xlu1 %v5256_v58  ;;  %v5253_v31 = vsel %vm1072_vm0, %v11795_v29, 0.0  ;;  %v5269_v61 = vmul.f32 %v11795_v29, %v11795_v29 }
0x1e0a   : > { %5254 = vadd.xlane.f32.xlu0 %v5253_v31  ;;  %v5276_v36 = vsel %vm1072_vm0, %v5270_v8, 0.0 }
0x1e0b   : > { %v5273_v19 = vsel %vm1072_vm0, %v5269_v61, 0.0 }
0x1e0e   : > { %5274 = vadd.xlane.f32.xlu0 %v5273_v19  ;;  %v7495_v19 = vld [vmem:[#allocation22 + $0x1] ss:$0 sm:$0xff] }
0x1e12   : > { %5277 = vadd.xlane.f32.xlu0 %v5276_v36 }
0x1e16   : > { %v8276_v62 = vpop.f32.mrb[54].mxu0 }
0x1e17   : > { %v5246_v40 = vadd.f32 %v8276_v62, %v7489_v5  ;;  %v5240_v18 = vpop.f32.mrb[55].mxu0 }
0x1e18   : > { %v5241_v15 = vadd.f32 %v7489_v5, %v5240_v18 }
0x1e19   : > { %v11808_v60 = vadd.f32 %v5246_v40, %v11019_v44 }
0x1e1a   : > { %v11811_v32 = vadd.f32 %v5241_v15, %v11014_v41 }
0x1e1b   : > { %v5262_v38 = vsel %vm1072_vm0, %v11808_v60, 0.0  ;;  %v5272_v9 = vmul.f32 %v11808_v60, %v11808_v60 }
0x1e1c   : > { %5263 = vadd.xlane.f32.xlu0 %v5262_v38  ;;  %v5259_v55 = vsel %vm1072_vm0, %v11811_v32, 0.0  ;;  %v5271_v50 = vmul.f32 %v11811_v32, %v11811_v32 }
0x1e1d   : > { %5260 = vadd.xlane.f32.xlu1 %v5259_v55  ;;  %v5282_v44 = vsel %vm1072_vm0, %v5272_v9, 0.0 }
0x1e1e   : > { %v5279_v41 = vsel %vm1072_vm0, %v5271_v50, 0.0 }
0x1e20   : > { %5283 = vadd.xlane.f32.xlu0 %v5282_v44 }
0x1e21   : > { %5280 = vadd.xlane.f32.xlu1 %v5279_v41 }
0x1e96   : > { %v5258_v20 = vpop.xlane.xlu1 %5257 }
0x1e97   : > { %v5255_v45 = vpop.xlane.xlu0 %5254  ;;  %v5266_v37 = vmul.f32 0.03125, %v5258_v20  ;;  %v11909_v20 = vld [vmem:[%s11903_s5 + $0x8] sm:$0xff] }
0x1e98   : > { %v5265_v23 = vmul.f32 0.03125, %v5255_v45 }
0x1e99   : > { %v5290_v16 = vmul.f32 %v5266_v37, %v5266_v37  ;;  %v5302_v8 = vsub.f32 %v11792_v63, %v5266_v37 }
0x1e9a   : > { %v5289_v59 = vmul.f32 %v5265_v23, %v5265_v23  ;;  %v5301_v7 = vsub.f32 %v11795_v29, %v5265_v23  ;;  %v11906_v23 = vld [vmem:[%s11903_s5] sm:$0xff] }
0x1e9b   : > { %v5275_v42 = vpop.xlane.xlu0 %5274  ;;  %v8729_v37 = vpack.c.bf16 %v11909_v20, %v11906_v23 }
0x1e9c   : > { %v5285_v13 = vmul.f32 0.03125, %v5275_v42  ;;  %v9158_v42 = vpack.i.bf16 %v11909_v20, %v11906_v23 }
0x1e9d   : > { %8730 = vmatprep.subr.bf16.mxu1 %v8729_v37 }
0x1e9e   : > { %v5293_v3 = vsub.f32 %v5285_v13, %v5289_v59  ;;  %v11915_v59 = vld [vmem:[#allocation14 + $0x8] sm:$0xff] }
0x1e9f   : > { %v5278_v33 = vpop.xlane.xlu0 %5277 }
0x1ea0   : > { %v5297_v30 = vmax.f32 %v5293_v3, 0.0  ;;  %v5286_v17 = vmul.f32 0.03125, %v5278_v33  ;;  %v11917_v33 = vld [vmem:[#allocation14] sm:$0xff] }
0x1ea2   : > { %v5305_v57 = vadd.f32 1e-05, %v5297_v30  ;;  %v5294_v6 = vsub.f32 %v5286_v17, %v5290_v16 }
0x1ea4   : > { %9421 = vrsqrt.f32 %v5305_v57  ;;  %v5298_v11 = vmax.f32 %v5294_v6, 0.0 }
0x1ea6   : > { %v5306_v26 = vadd.f32 1e-05, %v5298_v11 }
0x1ea8   : > { %9423 = vrsqrt.f32 %v5306_v26  ;;  %v11923_v26 = vld [vmem:[#allocation14 + $0x18] sm:$0xff] }
0x1ea9   : > { %v5264_v54 = vpop.xlane.xlu0 %5263 }
0x1eaa   : > { %v5268_v35 = vmul.f32 0.03125, %v5264_v54  ;;  %v5261_v10 = vpop.xlane.xlu1 %5260 }
0x1eab   : > { %v5267_v12 = vmul.f32 0.03125, %v5261_v10 }
0x1eac   : > { %v5292_v5 = vmul.f32 %v5268_v35, %v5268_v35  ;;  %v5304_v63 = vsub.f32 %v11808_v60, %v5268_v35 }
0x1ead   : > { %v5284_v25 = vpop.xlane.xlu0 %5283  ;;  %v5291_v47 = vmul.f32 %v5267_v12, %v5267_v12  ;;  %v5303_v56 = vsub.f32 %v11811_v32, %v5267_v12 }
0x1eae   : > { %v9422_v2 = vpop.eup %9421  ;;  %v5288_v39 = vmul.f32 0.03125, %v5284_v25  ;;  %v5281_v28 = vpop.xlane.xlu1 %5280 }
0x1eaf   : > { %v5287_v58 = vmul.f32 0.03125, %v5281_v28  ;;  %v5313_v31 = vmul.f32 %v9422_v2, %v5301_v7  ;;  %v9143_v7 = vpack.i.bf16 %v11831_v43, %v11829_v21  ;;  %v11930_v2 = vld [vmem:[%s11903_s5 + $0x10] sm:$0xff]  ;;  %v11944_v21 = vld [vmem:[%s11903_s5 + $0x28] sm:$0xff] }
0x1eb0   : > { %v5296_v61 = vsub.f32 %v5288_v39, %v5292_v5  ;;  %v11933_v5 = vld [vmem:[%s11903_s5 + $0x18] sm:$0xff] }
0x1eb1   : > { %v5295_v36 = vsub.f32 %v5287_v58, %v5291_v47  ;;  %v5323_v62 = vmul.f32 %v7494_v53, %v5313_v31  ;;  %v8733_v39 = vpack.c.bf16 %v11933_v5, %v11930_v2  ;;  %v9163_v28 = vpack.i.bf16 %v11933_v5, %v11930_v2  ;;  %v11950_v31 = vld [vmem:[#allocation14 + $0x10] sm:$0xff] }
0x1eb2   : > { %v9424_v40 = vpop.eup %9423  ;;  %v5300_v29 = vmax.f32 %v5296_v61, 0.0 }
0x1eb3   : > { %v5314_v18 = vmul.f32 %v9424_v40, %v5302_v8  ;;  %v5299_v15 = vmax.f32 %v5295_v36, 0.0  ;;  %v11864_v38 = vadd.f32 %v7495_v19, %v5323_v62  ;;  %v9153_v8 = vpack.i.bf16 %v11849_v48, %v11847_v27 }
0x1eb4   : > { %v5308_v9 = vadd.f32 1e-05, %v5300_v29 }
0x1eb5   : > { %v5307_v55 = vadd.f32 1e-05, %v5299_v15  ;;  %v5324_v50 = vmul.f32 %v7494_v53, %v5314_v18  ;;  %8285 = vmatprep.mubr.msk.f32.mxu1 %vm1072_vm0, %v11864_v38 }
0x1eb6   : > { %9425 = vrsqrt.f32 %v5308_v9 }
0x1eb7   : > { %9427 = vrsqrt.f32 %v5307_v55  ;;  %v11868_v44 = vadd.f32 %v7495_v19, %v5324_v50 }
0x1eb9   : > { %8286 = vmatmul.mubr.msk.f32.vlgmr.msra.gmra.mrb[56].mxu1 %vm1072_vm0, %v11868_v44 }
0x1eba   : > { %8732 = vmatpush3.bf16.msra.mxu1 %v8729_v37 }
0x1ebb   : > { %8734 = vmatprep.subr.bf16.mxu1 %v8733_v39 }
0x1ebe   : > { %8736 = vmatpush3.bf16.msra.mxu1 %v8733_v39 }
0x1ec0   : > { %v9426_v41 = vpop.eup %9425 }
0x1ec1   : > { %v9428_v49 = vpop.eup %9427  ;;  %v5316_v1 = vmul.f32 %v9426_v41, %v5304_v63 }
0x1ec2   : > { %v5315_v34 = vmul.f32 %v9428_v49, %v5303_v56  ;;  %v9148_v49 = vpack.i.bf16 %v11837_v14, %v11833_v52 }
0x1ec3   : > { %v5326_v46 = vmul.f32 %v7494_v53, %v5316_v1 }
0x1ec4   : > { %v5325_v24 = vmul.f32 %v7494_v53, %v5315_v34  ;;  %v11941_v53 = vld [vmem:[%s11903_s5 + $0x20] sm:$0xff] }
0x1ec5   : > { %v11876_v4 = vadd.f32 %v7495_v19, %v5326_v46  ;;  %v9168_v43 = vpack.i.bf16 %v11944_v21, %v11941_v53  ;;  %v8737_v47 = vpack.c.bf16 %v11944_v21, %v11941_v53 }
0x1ec6   : > { %v11874_v0 = vadd.f32 %v7495_v19, %v5325_v24 }
0x1ec7   : > { %8738 = vmatprep.subr.bf16.mxu1 %v8737_v47 }
0x1ec8   : > { %8288 = vmatprep.mubr.msk.f32.mxu1 %vm1072_vm0, %v11874_v0  ;;  %8740 = vmatpush3.bf16.msra.mxu1 %v8737_v47 }
0x1ec9   : > { %8289 = vmatmul.mubr.msk.f32.gmra.mrb[58].mxu1 %vm1072_vm0, %v11876_v4 }
0x1f8c   : > { %v11882_v60 = vpop.f32.mrb[56].mxu1 }
0x1f8d   : > { %v11884_v51 = vpop.f32.mrb[57].mxu1 }
0x1f8e   : > { %8303 = vmatprep.mubr.msk.f32.mxu0 %vm1182_vm1, %v11884_v51 }
0x1f8f   : > { %8304 = vmatmul.mubr.msk.f32.vlgmr.msra.gmra.mrb[56].mxu0 %vm1182_vm1, %v11882_v60 }
0x1f9c   : > { %v11890_v32 = vpop.f32.mrb[58].mxu1 }
0x1f9d   : > { %v11892_v45 = vpop.f32.mrb[59].mxu1 }
0x1f9e   : > { %8306 = vmatprep.mubr.msk.f32.mxu0 %vm1182_vm1, %v11892_v45 }
0x1f9f   : > { %8307 = vmatmul.mubr.msk.f32.gmra.mrb[58].mxu0 %vm1182_vm1, %v11890_v32 }
0x2062   : > { %v8305_v13 = vpop.f32.mrb[56].mxu0 }
0x2063   : > { %v5570_v3 = vmul.f32 0.25, %v8305_v13  ;;  %v5550_v16 = vpop.f32.mrb[57].mxu0 }
0x2064   : > { %v5569_v30 = vmul.f32 0.25, %v5550_v16 }
0x2065   : > { %v5574_v17 = vadd.f32 %v5570_v3, %v11915_v59 }
0x2066   : > { %v5573_v57 = vadd.f32 %v5569_v30, %v11917_v33 }
0x2067   : > { %v5581_v6 = vsel %vm5577_vm6, %v5574_v17, -inf }
0x2068   : > { %5582 = vmax.xlane.f32.xlu0 %v5581_v6  ;;  %v5578_v11 = vsel %vm5577_vm6, %v5573_v57, -inf }
0x2069   : > { %5579 = vmax.xlane.f32.xlu1 %v5578_v11 }
0x2072   : > { %v8308_v54 = vpop.f32.mrb[58].mxu0 }
0x2073   : > { %v5572_v35 = vmul.f32 0.25, %v8308_v54  ;;  %v5560_v10 = vpop.f32.mrb[59].mxu0 }
0x2074   : > { %v5571_v58 = vmul.f32 0.25, %v5560_v10 }
0x2075   : > { %v5576_v12 = vadd.f32 %v5572_v35, %v11923_v26 }
0x2076   : > { %v5575_v61 = vadd.f32 %v5571_v58, %v11950_v31 }
0x2077   : > { %v5587_v25 = vsel %vm5577_vm6, %v5576_v12, -inf }
0x2078   : > { %5588 = vmax.xlane.f32.xlu0 %v5587_v25  ;;  %v5584_v19 = vsel %vm5577_vm6, %v5575_v61, -inf }
0x207a   : > { %9144 = vrot.lane.b32.xlu1 %v9143_v7, %s10060_s7 }
0x209e   : > { %5585 = vmax.xlane.f32.xlu1 %v5584_v19 }
0x20af   : > { %9154 = vrot.lane.b32.xlu1 %v9153_v8, %s10060_s7 }
0x20f5   : > { %v5583_v36 = vpop.xlane.xlu0 %5582 }
0x20f6   : > { %v5591_v62 = vsub.f32 %v5574_v17, %v5583_v36  ;;  %v5580_v40 = vpop.xlane.xlu1 %5579 }
0x20f7   : > { %v5590_v29 = vsub.f32 %v5573_v57, %v5580_v40 }
0x20f8   : > { %v5596_v18 = vmul.f32 1.442695, %v5591_v62 }
0x20f9   : > { %v5594_v15 = vmul.f32 1.442695, %v5590_v29 }
0x20fa   : > { %9429 = vpow2.f32 %v5596_v18  ;;  %v9145_v9 = vpop.permute.xlu1 %9144 }
0x20fb   : > { %9431 = vpow2.f32 %v5594_v15  ;;  %v9147_v55 = vunpack.i.h.bf16 %v9145_v9  ;;  %v9146_v50 = vunpack.i.l.bf16 %v9145_v9 }
0x20fd   : > { %v8741_v63 = vpack.c.bf16 %v9147_v55, %v9146_v50 }
0x20ff   : > { %8743 = vmatprep.subr.msk.bf16.mxu1 %vm10702_vm2, %v8741_v63 }
0x2104   : > { %v9430_v41 = vpop.eup %9429 }
0x2105   : > { %v9432_v56 = vpop.eup %9431  ;;  %v5605_v27 = vsel %vm5577_vm6, %v9430_v41, 0.0  ;;  %v5589_v1 = vpop.xlane.xlu0 %5588 }
0x2106   : > { %5606 = vadd.xlane.f32.xlu0 %v5605_v27  ;;  %v5602_v48 = vsel %vm5577_vm6, %v9432_v56, 0.0  ;;  %v5593_v34 = vsub.f32 %v5576_v12, %v5589_v1 }
0x2107   : > { %5603 = vadd.xlane.f32.xlu1 %v5602_v48 }
0x2108   : > { %v5600_v46 = vmul.f32 1.442695, %v5593_v34 }
0x210a   : > { %9433 = vpow2.f32 %v5600_v46 }
0x2114   : > { %v9434_v3 = vpop.eup %9433 }
0x2115   : > { %v5611_v30 = vsel %vm5577_vm6, %v9434_v3, 0.0 }
0x2118   : > { %5719 = vrot.lane.b32.xlu1 %v11884_v51, %s10060_s7 }
0x211c   : > { %9149 = vrot.lane.b32.xlu0 %v9148_v49, %s10060_s7 }
0x212b   : > { %v5586_v24 = vpop.xlane.xlu1 %5585 }
0x212c   : > { %v5592_v37 = vsub.f32 %v5575_v61, %v5586_v24 }
0x212e   : > { %v5598_v13 = vmul.f32 1.442695, %v5592_v37 }
0x212f   : > { %v9155_v52 = vpop.permute.xlu1 %9154 }
0x2130   : > { %9435 = vpow2.f32 %v5598_v13 }
0x213a   : > { %v9436_v16 = vpop.eup %9435 }
0x213b   : > { %5612 = vadd.xlane.f32.xlu0 %v5611_v30  ;;  %v5608_v51 = vsel %vm5577_vm6, %v9436_v16, 0.0 }
0x213c   : > { %5609 = vadd.xlane.f32.xlu1 %v5608_v51 }
0x214d   : > { %5723 = vrot.lane.b32.xlu1 %v11892_v45, %s10060_s7 }
0x2151   : > { %5721 = vrot.lane.b32.xlu0 %v11882_v60, %s10060_s7  ;;  %v9157_v60 = vunpack.i.h.bf16 %v9155_v52 }
0x2155   : > { %5725 = vrot.lane.b32.xlu0 %v11890_v32, %s10060_s7  ;;  %v9156_v32 = vunpack.i.l.bf16 %v9155_v52 }
0x2157   : > { %v8753_v7 = vpack.c.bf16 %v9157_v60, %v9156_v32 }
0x2193   : > { %v5607_v14 = vpop.xlane.xlu0 %5606 }
0x2194   : > { %9437 = vrcp.f32 %v5607_v14  ;;  %v5604_v17 = vpop.xlane.xlu1 %5603 }
0x2195   : > { %9439 = vrcp.f32 %v5604_v17 }
0x2197   : > { %v9150_v57 = vpop.permute.xlu0 %9149 }
0x2198   : > { %v9152_v54 = vunpack.i.h.bf16 %v9150_v57  ;;  %v9151_v35 = vunpack.i.l.bf16 %v9150_v57  ;;  %v5720_v25 = vpop.permute.xlu1 %5719 }
0x219a   : > { %v8747_v45 = vpack.c.bf16 %v9152_v54, %v9151_v35 }
0x219e   : > { %v9438_v6 = vpop.eup %9437 }
0x219f   : > { %v9440_v11 = vpop.eup %9439  ;;  %v5619_v12 = vmul.f32 %v9438_v6, %v9430_v41 }
0x21a0   : > { %v5618_v10 = vmul.f32 %v9440_v11, %v9432_v56 }
0x21a2   : > { %8321 = vmatprep.mubr.msk.f32.mxu1 %vm5577_vm6, %v5618_v10 }
0x21a3   : > { %8322 = vmatmul.mubr.msk.f32.vlgmr.msra.gmra.mrb[60].mxu1 %vm5577_vm6, %v5619_v12 }
0x21a4   : > { %8746 = vmatpush3.bf16.xpose.msk.msra.mxu1 %vm10702_vm2, %v8741_v63 }
0x21a5   : > { %8749 = vmatprep.subr.msk.bf16.mxu1 %vm10702_vm2, %v8747_v45 }
0x21ac   : > { %8752 = vmatpush3.bf16.xpose.msk.msra.mxu1 %vm10702_vm2, %v8747_v45 }
0x21ad   : > { %8755 = vmatprep.subr.msk.bf16.mxu1 %vm10702_vm2, %v8753_v7 }
0x21b4   : > { %8758 = vmatpush3.bf16.xpose.msk.msra.mxu1 %vm10702_vm2, %v8753_v7 }
0x21c8   : > { %v5613_v39 = vpop.xlane.xlu0 %5612 }
0x21c9   : > { %9441 = vrcp.f32 %v5613_v39  ;;  %v5610_v47 = vpop.xlane.xlu1 %5609 }
0x21ca   : > { %9443 = vrcp.f32 %v5610_v47 }
0x21cc   : > { %v5722_v36 = vpop.permute.xlu0 %5721 }
0x21cd   : > { %v5724_v62 = vpop.permute.xlu1 %5723 }
0x21d0   : > { %v5726_v22 = vpop.permute.xlu0 %5725 }
0x21d3   : > { %v9442_v58 = vpop.eup %9441 }
0x21d4   : > { %v9444_v61 = vpop.eup %9443  ;;  %v5621_v8 = vmul.f32 %v9442_v58, %v9434_v3 }
0x21d5   : > { %v5620_v19 = vmul.f32 %v9444_v61, %v9436_v16 }
0x21d7   : > { %8324 = vmatprep.mubr.msk.f32.mxu1 %vm5577_vm6, %v5620_v19 }
0x21d8   : > { %8325 = vmatmul.mubr.msk.f32.gmra.mrb[62].mxu1 %vm5577_vm6, %v5621_v8 }
0x21d9   : > { %8339 = vmatprep.mubr.msk.f32.mxu1 %vm1182_vm1, %v5720_v25 }
0x21dc   : > { %8340 = vmatmul.mubr.msk.f32.vlgmr.msra.gmra.mrb[64].mxu1 %vm1182_vm1, %v5722_v36 }
0x21dd   : > { %8342 = vmatprep.mubr.msk.f32.mxu1 %vm1182_vm1, %v5724_v62 }
0x21e0   : > { %8343 = vmatmul.mubr.msk.f32.gmra.mrb[66].mxu1 %vm1182_vm1, %v5726_v22 }
0x2276   : > { %v11992_v40 = vpop.f32.mrb[60].mxu1 }
0x2277   : > { %v11994_v29 = vpop.f32.mrb[61].mxu1 }
0x22ab   : > { %v11996_v18 = vpop.f32.mrb[62].mxu1 }
0x22ac   : > { %v11998_v15 = vpop.f32.mrb[63].mxu1 }
0x22af   : > { %v8341_v9 = vpop.f32.mrb[64].mxu1 }
0x22b0   : > { %v5845_v55 = vmul.f32 0.25, %v8341_v9  ;;  %v5825_v50 = vpop.f32.mrb[65].mxu1 }
0x22b1   : > { %v5844_v63 = vmul.f32 0.25, %v5825_v50 }
0x22b2   : > { %v5849_v41 = vadd.f32 %v5845_v55, %v11915_v59 }
0x22b3   : > { %v5848_v56 = vadd.f32 %v5844_v63, %v11917_v33  ;;  %v8344_v27 = vpop.f32.mrb[66].mxu1 }
0x22b4   : > { %v5847_v48 = vmul.f32 0.25, %v8344_v27  ;;  %v5835_v49 = vpop.f32.mrb[67].mxu1  ;;  %v5855_v1 = vsel %vm5577_vm6, %v5849_v41, -inf  ;;  %v7532_v27 = vld [vmem:[%s12344_s13 + $0x60] sm:$0xff] }
0x22b5   : > { %v5846_v34 = vmul.f32 0.25, %v5835_v49  ;;  %5856 = vmax.xlane.f32.xlu0 %v5855_v1  ;;  %v5852_v46 = vsel %vm5577_vm6, %v5848_v56, -inf  ;;  %v7533_v49 = vld [vmem:[%s12344_s13 + $0x68] sm:$0xff]  ;;  %v7530_v1 = vld [vmem:[%s12343_s12 + $0x70] sm:$0xff] }
0x22b6   : > { %v5851_v24 = vadd.f32 %v5847_v48, %v11923_v26  ;;  %5853 = vmax.xlane.f32.xlu1 %v5852_v46  ;;  %v8779_v46 = vpack.c.bf16 %v7533_v49, %v7532_v27 }
0x22b7   : > { %v5850_v37 = vadd.f32 %v5846_v34, %v11950_v31  ;;  %v7531_v34 = vld [vmem:[%s12343_s12 + $0x78] sm:$0xff] }
0x22b8   : > { %v5861_v13 = vsel %vm5577_vm6, %v5851_v24, -inf  ;;  %8780 = vmatprep.subr.bf16.mxu1 %v8779_v46 }
0x22b9   : > { %v5858_v59 = vsel %vm5577_vm6, %v5850_v37, -inf  ;;  %8782 = vmatpush3.bf16.msra.mxu1 %v8779_v46 }
0x22ba   : > { %5862 = vmax.xlane.f32.xlu1 %v5861_v13  ;;  %5859 = vmax.xlane.f32.xlu0 %v5858_v59  ;;  %v7535_v13 = vld [vmem:[%s12344_s13 + $0x78] sm:$0xff] }
0x2342   : > { %v5857_v33 = vpop.xlane.xlu0 %5856 }
0x2343   : > { %v5865_v3 = vsub.f32 %v5849_v41, %v5857_v33  ;;  %v5854_v16 = vpop.xlane.xlu1 %5853  ;;  %v7528_v41 = vld [vmem:[%s12343_s12 + $0x60] sm:$0xff] }
0x2344   : > { %v5864_v30 = vsub.f32 %v5848_v56, %v5854_v16  ;;  %v7529_v56 = vld [vmem:[%s12343_s12 + $0x68] sm:$0xff]  ;;  %v7544_v33 = vld [vmem:[%s12347_s16 + $0x40] sm:$0xff] }
0x2345   : > { %v5870_v51 = vmul.f32 1.442695, %v5865_v3  ;;  %v8771_v48 = vpack.c.bf16 %v7529_v56, %v7528_v41  ;;  %v7545_v3 = vld [vmem:[%s12347_s16 + $0x48] sm:$0xff] }
0x2346   : > { %v5868_v52 = vmul.f32 1.442695, %v5864_v30  ;;  %v8787_v16 = vpack.c.bf16 %v7545_v3, %v7544_v33 }
0x2347   : > { %9445 = vpow2.f32 %v5870_v51  ;;  %v5863_v14 = vpop.xlane.xlu1 %5862  ;;  %v5860_v17 = vpop.xlane.xlu0 %5859 }
0x2348   : > { %9447 = vpow2.f32 %v5868_v52  ;;  %v5867_v26 = vsub.f32 %v5851_v24, %v5863_v14  ;;  %v5866_v57 = vsub.f32 %v5850_v37, %v5860_v17  ;;  %v8775_v24 = vpack.c.bf16 %v7531_v34, %v7530_v1  ;;  %v7534_v37 = vld [vmem:[%s12344_s13 + $0x70] sm:$0xff] }
0x2349   : > { %v8783_v59 = vpack.c.bf16 %v7535_v13, %v7534_v37  ;;  %v7546_v17 = vld [vmem:[%s12347_s16 + $0x50] sm:$0xff] }
0x234a   : > { %v5874_v6 = vmul.f32 1.442695, %v5867_v26  ;;  %v5872_v31 = vmul.f32 1.442695, %v5866_v57  ;;  %v7547_v26 = vld [vmem:[%s12347_s16 + $0x58] sm:$0xff] }
0x234b   : > { %8784 = vmatprep.subr.bf16.mxu1 %v8783_v59 }
0x234c   : > { %9449 = vpow2.f32 %v5874_v6  ;;  %8786 = vmatpush3.bf16.msra.mxu1 %v8783_v59 }
0x234d   : > { %9451 = vpow2.f32 %v5872_v31 }
0x2351   : > { %v9446_v11 = vpop.eup %9445 }
0x2352   : > { %v9448_v54 = vpop.eup %9447  ;;  %v5879_v35 = vsel %vm5577_vm6, %v9446_v11, 0.0 }
0x2353   : > { %5880 = vadd.xlane.f32.xlu1 %v5879_v35  ;;  %v5876_v10 = vsel %vm5577_vm6, %v9448_v54, 0.0 }
0x2354   : > { %5877 = vadd.xlane.f32.xlu0 %v5876_v10 }
0x2356   : > { %v9450_v12 = vpop.eup %9449 }
0x2357   : > { %v9452_v45 = vpop.eup %9451  ;;  %v5885_v60 = vsel %vm5577_vm6, %v9450_v12, 0.0 }
0x2358   : > { %5886 = vadd.xlane.f32.xlu1 %v5885_v60  ;;  %v5882_v32 = vsel %vm5577_vm6, %v9452_v45, 0.0 }
0x2359   : > { %5883 = vadd.xlane.f32.xlu0 %v5882_v32 }
0x2369   : > { %9164 = vrot.lane.b32.xlu1 %v9163_v28, %s10060_s7 }
0x236d   : > { %9169 = vrot.lane.b32.xlu1 %v9168_v43, %s10060_s7 }
0x236f   : > { %9159 = vrot.lane.b32.xlu0 %v9158_v42, %s10060_s7  ;;  %s12472_s7 = sld [smem:[#allocation42_spill]] }
0x2375   : > { %p12474_p4 = scmp.ne.s32.totalorder %s12472_s7, 0 }
0x23e0   : > { %v5881_v7 = vpop.xlane.xlu1 %5880 }
0x23e1   : > { %v5878_v25 = vpop.xlane.xlu0 %5877 }
0x23e2   : > { %9453 = vrcp.f32 %v5878_v25 }
0x23e3   : > { %9455 = vrcp.f32 %v5881_v7 }
0x23e5   : > { %v5887_v39 = vpop.xlane.xlu1 %5886 }
0x23e6   : > { %v5884_v47 = vpop.xlane.xlu0 %5883 }
0x23e7   : > { %9457 = vrcp.f32 %v5884_v47 }
0x23e8   : > { %9459 = vrcp.f32 %v5887_v39 }
0x23e9   : > { %v9165_v58 = vpop.permute.xlu1 %9164 }
0x23ea   : > { %v9160_v61 = vpop.permute.xlu0 %9159  ;;  %v9167_v19 = vunpack.i.h.bf16 %v9165_v58  ;;  %v9166_v2 = vunpack.i.l.bf16 %v9165_v58 }
0x23eb   : > { %v9162_v5 = vunpack.i.h.bf16 %v9160_v61  ;;  %v9161_v28 = vunpack.i.l.bf16 %v9160_v61 }
0x23ec   : > { %v9454_v8 = vpop.eup %9453  ;;  %v8763_v21 = vpack.c.bf16 %v9167_v19, %v9166_v2 }
0x23ed   : > { %v8759_v53 = vpack.c.bf16 %v9162_v5, %v9161_v28  ;;  %v5892_v43 = vmul.f32 %v9454_v8, %v9448_v54  ;;  %v9170_v36 = vpop.permute.xlu1 %9169  ;;  %v9456_v62 = vpop.eup %9455 }
0x23ee   : > { %v9172_v23 = vunpack.i.h.bf16 %v9170_v36  ;;  %v9171_v20 = vunpack.i.l.bf16 %v9170_v36  ;;  %v5893_v9 = vmul.f32 %v9456_v62, %v9446_v11  ;;  %v8791_v11 = vpack.c.bf16 %v7547_v26, %v7546_v17 }
0x23ef   : > { %8760 = vmatprep.subr.bf16.mxu0 %v8759_v53  ;;  %8357 = vmatprep.mubr.msk.f32.mxu0 %vm5577_vm6, %v5892_v43 }
0x23f0   : > { %8762 = vmatpush3.bf16.msra.mxu0 %v8759_v53  ;;  %v8767_v42 = vpack.c.bf16 %v9172_v23, %v9171_v20 }
0x23f1   : > { %8764 = vmatprep.subr.bf16.mxu0 %v8763_v21  ;;  %v9458_v22 = vpop.eup %9457 }
0x23f2   : > { %v9460_v55 = vpop.eup %9459  ;;  %v5894_v50 = vmul.f32 %v9458_v22, %v9452_v45 }
0x23f3   : > { %v5895_v63 = vmul.f32 %v9460_v55, %v9450_v12 }
0x23f4   : > { %8766 = vmatpush3.bf16.msra.mxu0 %v8763_v21 }
0x23f5   : > { %8768 = vmatprep.subr.bf16.mxu0 %v8767_v42 }
0x23f8   : > { %8770 = vmatpush3.bf16.msra.mxu0 %v8767_v42 }
0x23f9   : > { %8772 = vmatprep.subr.bf16.mxu0 %v8771_v48 }
0x23fb   : > { %8358 = vmatmul.mubr.msk.f32.vlgmr.msra.gmra.mrb[60].mxu0 %vm5577_vm6, %v5893_v9 }
0x23fc   : > { %8360 = vmatprep.mubr.msk.f32.mxu0 %vm5577_vm6, %v5894_v50  ;;  %8774 = vmatpush3.bf16.msra.mxu0 %v8771_v48 }
0x23fd   : > { %8776 = vmatprep.subr.bf16.mxu0 %v8775_v24 }
0x23ff   : > { %8361 = vmatmul.mubr.msk.f32.gmra.mrb[62].mxu0 %vm5577_vm6, %v5895_v63 }
0x2400   : > { %8778 = vmatpush3.bf16.msra.mxu0 %v8775_v24 }
0x2401   : > { %8788 = vmatprep.subr.bf16.mxu0 %v8787_v16 }
0x24ce   : > { %v8359_v30 = vpop.f32.mrb[60].mxu0 }
0x24cf   : > { %6023 = vrot.lane.b32.xlu1 %v8359_v30, %s10062_s22  ;;  %v5998_v51 = vpop.f32.mrb[61].mxu0 }
0x24d0   : > { %6021 = vrot.lane.b32.xlu0 %v5998_v51, %s10062_s22 }
0x24d2   : > { %v8362_v52 = vpop.f32.mrb[62].mxu0 }
0x24d3   : > { %6027 = vrot.lane.b32.xlu1 %v8362_v52, %s10062_s22  ;;  %v6008_v14 = vpop.f32.mrb[63].mxu0 }
0x24d4   : > { %6025 = vrot.lane.b32.xlu0 %v6008_v14, %s10062_s22  ;;  %s1041_s22 = sand.u32 1, %s12471_s20  }
0x24d5   : > { %s7292_s5 = sshll.u32 %s1041_s22, 5  ;;  %s12290_s8 = scalar_lea.sflag [#allocation4], %s1041_s22 }
0x24d6   : > { %s1043_s3 = scalar_lea.vmem [#allocation26], %s7292_s5 }
0x24d7   : > { %s7015_s9 = sshll.u32 %s1043_s3, 4  ;;  %s12284_s9 = int_to_ptr.vmem [resolvable:$true] %s7015_s9 }
0x24d8   : > { %s9941_s27 = scalar_lea.vmem %s12284_s9, 512 }
0x24d9   : > { %p9942_p3 = scmp.ne.s32.totalorder %s12284_s9, %s9941_s27 }
0x24db   : > { %p9943_p12 = pnand %p9942_p3, %p12474_p4 }
0x24dd   : > { %p9944_p7 = pneg %p9943_p12 }
0x2541   : > { %v6024_v57 = vpop.permute.xlu1 %6023 }
0x2542   : > { %v6022_v6 = vpop.permute.xlu0 %6021  ;;  %v6034_v54 = vsel %vm1182_vm1, %v11992_v40, %v6024_v57 }
0x2543   : > { %v6033_v31 = vsel %vm1182_vm1, %v11994_v29, %v6022_v6 }
0x2544   : > { %8371 = vmatprep.mubr.msk.f32.mxu0 %vm1072_vm0, %v6033_v31  ;;  %8385 = vmatprep.mubr.msk.f32.mxu1 %vm1072_vm0, %v6033_v31 }
0x2545   : > { %8372 = vmatmul.mubr.msk.f32.vlgmr.msra.gmra.mrb[64].mxu0 %vm1072_vm0, %v6034_v54  ;;  %8386 = vmatmul.mubr.msk.f32.vlgmr.msra.gmra.mrb[68].mxu1 %vm1072_vm0, %v6034_v54  ;;  %v6028_v35 = vpop.permute.xlu1 %6027 }
0x2546   : > { %8790 = vmatpush3.bf16.msra.mxu0 %v8787_v16  ;;  %v6026_v10 = vpop.permute.xlu0 %6025  ;;  %v6036_v29 = vsel %vm1182_vm1, %v11996_v18, %v6028_v35 }
0x2547   : > { %v6035_v12 = vsel %vm1182_vm1, %v11998_v15, %v6026_v10  ;;  %8792 = vmatprep.subr.bf16.mxu0 %v8791_v11 }
0x2548   : > { %8374 = vmatprep.mubr.msk.f32.mxu0 %vm1072_vm0, %v6035_v12  ;;  %8388 = vmatprep.mubr.msk.f32.mxu1 %vm1072_vm0, %v6035_v12 }
0x2549   : > { %8375 = vmatmul.mubr.msk.f32.gmra.mrb[66].mxu0 %vm1072_vm0, %v6036_v29  ;;  %8389 = vmatmul.mubr.msk.f32.gmra.mrb[70].mxu1 %vm1072_vm0, %v6036_v29 }
0x254a   : > { %8794 = vmatpush3.bf16.msra.mxu0 %v8791_v11  ;;  %8399 = vmatprep.mubr.msk.f32.mxu0 %vm1072_vm0, %v11864_v38 }
0x254d   : > { %8400 = vmatmul.mubr.msk.f32.vlgmr.msra.gmra.mrb[68].mxu0 %vm1072_vm0, %v11868_v44 }
0x254e   : > { %8402 = vmatprep.mubr.msk.f32.mxu0 %vm1072_vm0, %v11874_v0 }
0x2551   : > { %8403 = vmatmul.mubr.msk.f32.gmra.mrb[70].mxu0 %vm1072_vm0, %v11876_v4 }
0x2618   : > { %v12092_v40 = vpop.f32.mrb[64].mxu0  ;;  %v8387_v18 = vpop.f32.mrb[68].mxu1 }
0x2619   : > { %v6230_v15 = vmax.f32 %v8387_v18, 0.0  ;;  %v12094_v45 = vpop.f32.mrb[65].mxu0  ;;  %v6210_v60 = vpop.f32.mrb[69].mxu1  ;;  %v7548_v18 = vld [vmem:[%s12463_s11 + $0x40] sm:$0xff] }
0x261a   : > { %v6229_v32 = vmax.f32 %v6210_v60, 0.0  ;;  %v7551_v60 = vld [vmem:[%s12463_s11 + $0x58] sm:$0xff] }
0x261b   : > { %6239 = vrot.lane.b32.xlu1 %v6230_v15, %s10058_s2 }
0x261c   : > { %6237 = vrot.lane.b32.xlu0 %v6229_v32, %s10058_s2  ;;  %v12098_v7 = vpop.f32.mrb[66].mxu0  ;;  %v8390_v25 = vpop.f32.mrb[70].mxu1 }
0x261d   : > { %v6232_v39 = vmax.f32 %v8390_v25, 0.0  ;;  %v12100_v47 = vpop.f32.mrb[67].mxu0  ;;  %v6220_v58 = vpop.f32.mrb[71].mxu1 }
0x261e   : > { %v6231_v61 = vmax.f32 %v6220_v58, 0.0 }
0x261f   : > { %6243 = vrot.lane.b32.xlu1 %v6232_v39, %s10058_s2 }
0x2620   : > { %6241 = vrot.lane.b32.xlu0 %v6231_v61, %s10058_s2  ;;  %v12104_v19 = vpop.f32.mrb[68].mxu0 }
0x2621   : > { %v12106_v2 = vpop.f32.mrb[69].mxu0 }
0x2624   : > { %v12108_v5 = vpop.f32.mrb[70].mxu0 }
0x2625   : > { %v12110_v28 = vpop.f32.mrb[71].mxu0 }
0x268d   : > { %v6240_v8 = vpop.permute.xlu1 %6239 }
0x268e   : > { %v6250_v53 = vmax.f32 %v6230_v15, %v6240_v8  ;;  %v6238_v21 = vpop.permute.xlu0 %6237 }
0x268f   : > { %v6249_v43 = vmax.f32 %v6229_v32, %v6238_v21 }
0x2690   : > { %v6254_v36 = vsub.f32 %v6230_v15, %v6250_v53  ;;  %6271 = vrot.lane.b32.xlu1 %v6250_v53, %s10063_s15 }
0x2691   : > { %v6253_v23 = vsub.f32 %v6229_v32, %v6249_v43  ;;  %v6244_v20 = vpop.permute.xlu1 %6243  ;;  %6269 = vrot.lane.b32.xlu0 %v6249_v43, %s10063_s15 }
0x2692   : > { %v6259_v42 = vmul.f32 1.442695, %v6254_v36  ;;  %v6252_v62 = vmax.f32 %v6232_v39, %v6244_v20  ;;  %v6242_v22 = vpop.permute.xlu0 %6241  ;;  %v7553_v36 = vld [vmem:[#allocation19 + $0x2] ss:$0 sm:$0xff] }
0x2693   : > { %v6257_v9 = vmul.f32 1.442695, %v6253_v23  ;;  %v6251_v55 = vmax.f32 %v6231_v61, %v6242_v22 }
0x2694   : > { %9461 = vpow2.f32 %v6259_v42  ;;  %v6256_v50 = vsub.f32 %v6232_v39, %v6252_v62  ;;  %6275 = vrot.lane.b32.xlu1 %v6252_v62, %s10063_s15 }
0x2695   : > { %9463 = vpow2.f32 %v6257_v9  ;;  %v6255_v63 = vsub.f32 %v6231_v61, %v6251_v55  ;;  %6273 = vrot.lane.b32.xlu0 %v6251_v55, %s10063_s15  ;;  %v6445_v9 = vadd.f32 %v12104_v19, %v7553_v36 }
0x2696   : > { %v6263_v41 = vmul.f32 1.442695, %v6256_v50 }
0x2697   : > { %v6261_v56 = vmul.f32 1.442695, %v6255_v63  ;;  %v6440_v63 = vadd.f32 %v7553_v36, %v12106_v2 }
0x2698   : > { %9465 = vpow2.f32 %v6263_v41 }
0x2699   : > { %9467 = vpow2.f32 %v6261_v56 }
0x269e   : > { %v9462_v27 = vpop.eup %9461 }
0x269f   : > { %v9464_v48 = vpop.eup %9463  ;;  %v12117_v49 = vmul.f32 %v9462_v27, %v12092_v40 }
0x26a0   : > { %v12120_v1 = vmul.f32 %v9464_v48, %v12094_v45 }
0x26a2   : > { %v9466_v34 = vpop.eup %9465 }
0x26a3   : > { %v9468_v46 = vpop.eup %9467  ;;  %v12123_v24 = vmul.f32 %v9466_v34, %v12098_v7 }
0x26a4   : > { %v12126_v37 = vmul.f32 %v9468_v46, %v12100_v47 }
0x2702   : > { %v6272_v13 = vpop.permute.xlu1 %6271 }
0x2703   : > { %v6282_v59 = vsub.f32 %v6230_v15, %v6272_v13  ;;  %v6270_v33 = vpop.permute.xlu0 %6269  ;;  %v6455_v13 = vadd.f32 %v12108_v5, %v7553_v36 }
0x2704   : > { %v6281_v3 = vsub.f32 %v6229_v32, %v6270_v33  ;;  %v6450_v33 = vadd.f32 %v7553_v36, %v12110_v28 }
0x2705   : > { %v6287_v16 = vmul.f32 1.442695, %v6282_v59 }
0x2706   : > { %v6285_v30 = vmul.f32 1.442695, %v6281_v3  ;;  %v6276_v51 = vpop.permute.xlu1 %6275 }
0x2707   : > { %9469 = vpow2.f32 %v6287_v16  ;;  %v6284_v52 = vsub.f32 %v6232_v39, %v6276_v51  ;;  %v6274_v14 = vpop.permute.xlu0 %6273 }
0x2708   : > { %9471 = vpow2.f32 %v6285_v30  ;;  %v6283_v17 = vsub.f32 %v6231_v61, %v6274_v14 }
0x2709   : > { %v6291_v26 = vmul.f32 1.442695, %v6284_v52 }
0x270a   : > { %v6289_v57 = vmul.f32 1.442695, %v6283_v17 }
0x270b   : > { %9473 = vpow2.f32 %v6291_v26 }
0x270c   : > { %9475 = vpow2.f32 %v6289_v57 }
0x2711   : > { %v9470_v6 = vpop.eup %9469 }
0x2712   : > { %v9472_v31 = vpop.eup %9471  ;;  %6299 = vrot.lane.b32.xlu1 %v9470_v6, %s10058_s2  ;;  %v6318_v35 = vmul.f32 %v9470_v6, %v12092_v40  ;;  %v7549_v40 = vld [vmem:[%s12463_s11 + $0x48] sm:$0xff] }
0x2713   : > { %6297 = vrot.lane.b32.xlu0 %v9472_v31, %s10058_s2  ;;  %v6317_v10 = vmul.f32 %v9472_v31, %v12094_v45  ;;  %v8795_v15 = vpack.c.bf16 %v7549_v40, %v7548_v18  ;;  %v7550_v45 = vld [vmem:[%s12463_s11 + $0x50] sm:$0xff] }
0x2714   : > { %v8799_v32 = vpack.c.bf16 %v7551_v60, %v7550_v45 }
0x2715   : > { %v9474_v11 = vpop.eup %9473  ;;  %8796 = vmatprep.subr.bf16.mxu1 %v8795_v15 }
0x2716   : > { %v9476_v54 = vpop.eup %9475  ;;  %6303 = vrot.lane.b32.xlu1 %v9474_v11, %s10058_s2  ;;  %v6320_v12 = vmul.f32 %v9474_v11, %v12098_v7  ;;  %8798 = vmatpush3.bf16.msra.mxu1 %v8795_v15 }
0x2717   : > { %6301 = vrot.lane.b32.xlu0 %v9476_v54, %s10058_s2  ;;  %v6319_v29 = vmul.f32 %v9476_v54, %v12100_v47  ;;  %8800 = vmatprep.subr.bf16.mxu1 %v8799_v32 }
0x271a   : > { %6327 = vrot.lane.b32.xlu1 %v6318_v35, %s10058_s2  ;;  %8802 = vmatpush3.bf16.msra.mxu1 %v8799_v32 }
0x271b   : > { %6325 = vrot.lane.b32.xlu0 %v6317_v10, %s10058_s2 }
0x271e   : > { %6331 = vrot.lane.b32.xlu1 %v6320_v12, %s10058_s2 }
0x271f   : > { %6329 = vrot.lane.b32.xlu0 %v6319_v29, %s10058_s2  ;;  %v7562_v29 = vld [vmem:[#allocation20 + $0x2] ss:$0 sm:$0xff] }
0x2784   : > { %v6300_v7 = vpop.permute.xlu1 %6299 }
0x2785   : > { %v6310_v25 = vadd.f32 %v9462_v27, %v6300_v7  ;;  %v6298_v39 = vpop.permute.xlu0 %6297 }
0x2786   : > { %v6309_v47 = vadd.f32 %v9464_v48, %v6298_v39 }
0x2787   : > { %9477 = vrcp.f32 %v6310_v25 }
0x2788   : > { %9479 = vrcp.f32 %v6309_v47  ;;  %v6304_v58 = vpop.permute.xlu1 %6303 }
0x2789   : > { %v6312_v61 = vadd.f32 %v9466_v34, %v6304_v58  ;;  %v6302_v8 = vpop.permute.xlu0 %6301 }
0x278a   : > { %v6311_v53 = vadd.f32 %v9468_v46, %v6302_v8 }
0x278b   : > { %9481 = vrcp.f32 %v6312_v61 }
0x278c   : > { %9483 = vrcp.f32 %v6311_v53  ;;  %v6328_v21 = vpop.permute.xlu1 %6327 }
0x278d   : > { %v6326_v43 = vpop.permute.xlu0 %6325  ;;  %v6338_v23 = vadd.f32 %v6328_v21, %v12117_v49 }
0x278e   : > { %v6337_v42 = vadd.f32 %v6326_v43, %v12120_v1 }
0x2790   : > { %v6332_v62 = vpop.permute.xlu1 %6331 }
0x2791   : > { %v9478_v20 = vpop.eup %9477  ;;  %v6330_v50 = vpop.permute.xlu0 %6329  ;;  %v6340_v27 = vadd.f32 %v6332_v62, %v12123_v24 }
0x2792   : > { %v9480_v22 = vpop.eup %9479  ;;  %v6346_v55 = vmul.f32 %v9478_v20, %v6338_v23  ;;  %v6339_v46 = vadd.f32 %v6330_v50, %v12126_v37  ;;  %v6684_v50 = vld [vmem:[#allocation23 + $0x18] sm:$0xff] }
0x2793   : > { %v6345_v41 = vmul.f32 %v9480_v22, %v6337_v42  ;;  %v6681_v22 = vld [vmem:[#allocation23] sm:$0xff] }
0x2794   : > { %v6459_v56 = vmul.f32 %v6445_v9, %v6346_v55  ;;  %v6682_v9 = vld [vmem:[#allocation23 + $0x8] sm:$0xff] }
0x2795   : > { %v9482_v48 = vpop.eup %9481  ;;  %v6458_v34 = vmul.f32 %v6440_v63, %v6345_v41  ;;  %v8803_v55 = vpack.c.bf16 %v6682_v9, %v6681_v22  ;;  %v6793_v41 = vld [vmem:[%s12469_s19] sm:$0xff] }
0x2796   : > { %v9484_v49 = vpop.eup %9483  ;;  %v7559_v1 = vmul.f32 -1.442695, %v6459_v56  ;;  %v6348_v59 = vmul.f32 %v9482_v48, %v6340_v27  ;;  %v6795_v27 = vld [vmem:[%s12469_s19 + $0x10] sm:$0xff] }
0x2797   : > { %v7558_v19 = vmul.f32 -1.442695, %v6458_v34  ;;  %v6347_v3 = vmul.f32 %v9484_v49, %v6339_v46  ;;  %8804 = vmatprep.subr.bf16.mxu0 %v8803_v55  ;;  %v6797_v49 = vld [vmem:[%s12469_s19 + $0x20] sm:$0xff] }
0x2798   : > { %9485 = vpow2.f32 %v7559_v1  ;;  %v6461_v16 = vmul.f32 %v6455_v13, %v6348_v59  ;;  %8806 = vmatpush3.bf16.msra.mxu0 %v8803_v55  ;;  %v6798_v13 = vld [vmem:[%s12469_s19 + $0x28] sm:$0xff] }
0x2799   : > { %9487 = vpow2.f32 %v7558_v19  ;;  %v6460_v2 = vmul.f32 %v6450_v33, %v6347_v3  ;;  %v8819_v1 = vpack.c.bf16 %v6798_v13, %v6797_v49 }
0x279a   : > { %v7561_v30 = vmul.f32 -1.442695, %v6461_v16 }
0x279b   : > { %v7560_v51 = vmul.f32 -1.442695, %v6460_v2 }
0x279c   : > { %9489 = vpow2.f32 %v7561_v30 }
0x279d   : > { %9491 = vpow2.f32 %v7560_v51 }
0x27a2   : > { %v9486_v24 = vpop.eup %9485 }
0x27a3   : > { %v9488_v52 = vpop.eup %9487  ;;  %v6475_v37 = vadd.f32 1.0, %v9486_v24 }
0x27a4   : > { %v6474_v14 = vadd.f32 1.0, %v9488_v52 }
0x27a5   : > { %9493 = vrcp.f32 %v6475_v37 }
0x27a6   : > { %v9490_v5 = vpop.eup %9489  ;;  %9495 = vrcp.f32 %v6474_v14 }
0x27a7   : > { %v9492_v17 = vpop.eup %9491  ;;  %v6477_v26 = vadd.f32 1.0, %v9490_v5 }
0x27a8   : > { %v6476_v28 = vadd.f32 1.0, %v9492_v17 }
0x27a9   : > { %9497 = vrcp.f32 %v6477_v26 }
0x27aa   : > { %9499 = vrcp.f32 %v6476_v28 }
0x27af   : > { %v9494_v57 = vpop.eup %9493 }
0x27b0   : > { %v9496_v6 = vpop.eup %9495  ;;  %v6487_v11 = vmul.f32 %v9494_v57, %v6459_v56  ;;  %v6794_v56 = vld [vmem:[%s12469_s19 + $0x8] sm:$0xff] }
0x27b1   : > { %v6486_v31 = vmul.f32 %v9496_v6, %v6458_v34  ;;  %v8811_v48 = vpack.c.bf16 %v6794_v56, %v6793_v41  ;;  %v6796_v34 = vld [vmem:[%s12469_s19 + $0x18] sm:$0xff]  ;;  %v6799_v41 = vld [vmem:[%s12469_s19 + $0x30] sm:$0xff] }
0x27b2   : > { %v8815_v46 = vpack.c.bf16 %v6796_v34, %v6795_v27  ;;  %v7569_v27 = vld [vmem:[%s12470_s29] ss:$0 sm:$0xff]  ;;  %s10065_s29 = smov [#allocation26]  }
0x27b3   : > { %v9498_v54 = vpop.eup %9497  ;;  %8413 = vmatprep.mubr.msk.f32.mxu1 %vm1072_vm0, %v6486_v31  ;;  %8812 = vmatprep.subr.bf16.mxu1 %v8811_v48  ;;  %s9945_s15 = sshll.u32 %s10065_s29, 4  ;;  %s9946_s15 = int_to_ptr.vmem [resolvable:$false] %s9945_s15 }
0x27b4   : > { %v9500_v35 = vpop.eup %9499  ;;  %8414 = vmatmul.mubr.msk.f32.vlgmr.msra.gmra.mrb[72].mxu1 %vm1072_vm0, %v6487_v11  ;;  %v6489_v12 = vmul.f32 %v9498_v54, %v6461_v16  ;;  %s9947_s23 = scalar_lea.vmem %s9946_s15, 1024  ;;  %p9948_p8 = scmp.lt.s32.totalorder %s12284_s9, %s9946_s15 }
0x27b5   : > { %v6488_v10 = vmul.f32 %v9500_v35, %v6460_v2  ;;  %8814 = vmatpush3.bf16.msra.mxu1 %v8811_v48  ;;  %p9949_p11 = scmp.lt.s32.totalorder %s9947_s23, %s9941_s27 }
0x27b6   : > { %8816 = vmatprep.subr.bf16.mxu1 %v8815_v46 }
0x27b7   : > { %8416 = vmatprep.mubr.msk.f32.mxu1 %vm1072_vm0, %v6488_v10  ;;  %p9950_p13 = por %p9949_p11, %p9948_p8 }
0x27b8   : > { %8417 = vmatmul.mubr.msk.f32.gmra.mrb[74].mxu1 %vm1072_vm0, %v6489_v12 }
0x27b9   : > { %8818 = vmatpush3.bf16.msra.mxu1 %v8815_v46  ;;  %p9951_p1 = pnand %p9950_p13, %p9944_p7 }
0x27ba   : > { %8820 = vmatprep.subr.bf16.mxu1 %v8819_v1 }
0x27bd   : > { %8822 = vmatpush3.bf16.msra.mxu1 %v8819_v1 }
0x2887   : > { %v8415_v18 = vpop.f32.mrb[72].mxu1 }
0x2888   : > { %v6580_v40 = vadd.f32 %v8415_v18, %v7562_v29  ;;  %v6574_v15 = vpop.f32.mrb[73].mxu1 }
0x2889   : > { %v6575_v45 = vadd.f32 %v7562_v29, %v6574_v15 }
0x288a   : > { %v12165_v60 = vadd.f32 %v6580_v40, %v11868_v44 }
0x288b   : > { %v12168_v32 = vadd.f32 %v6575_v45, %v11864_v38  ;;  %v8418_v7 = vpop.f32.mrb[74].mxu1 }
0x288c   : > { %v6584_v25 = vpop.f32.mrb[75].mxu1  ;;  %v6600_v39 = vsel %vm1072_vm0, %v12165_v60, 0.0  ;;  %v6614_v61 = vmul.f32 %v12165_v60, %v12165_v60  ;;  %v6590_v8 = vadd.f32 %v8418_v7, %v7562_v29 }
0x288d   : > { %v6585_v47 = vadd.f32 %v7562_v29, %v6584_v25  ;;  %6601 = vadd.xlane.f32.xlu1 %v6600_v39  ;;  %v6597_v58 = vsel %vm1072_vm0, %v12168_v32, 0.0  ;;  %v6613_v21 = vmul.f32 %v12168_v32, %v12168_v32 }
0x288e   : > { %6598 = vadd.xlane.f32.xlu0 %v6597_v58  ;;  %v6620_v38 = vsel %vm1072_vm0, %v6614_v61, 0.0  ;;  %v12187_v36 = vadd.f32 %v6590_v8, %v11876_v4  ;;  %v6683_v4 = vld [vmem:[#allocation23 + $0x10] sm:$0xff] }
0x288f   : > { %v12177_v44 = vadd.f32 %v6585_v47, %v11874_v0  ;;  %v6617_v0 = vsel %vm1072_vm0, %v6613_v21, 0.0  ;;  %v8807_v63 = vpack.c.bf16 %v6684_v50, %v6683_v4 }
0x2890   : > { %v6606_v20 = vsel %vm1072_vm0, %v12187_v36, 0.0  ;;  %v6616_v42 = vmul.f32 %v12187_v36, %v12187_v36 }
0x2891   : > { %v6603_v53 = vsel %vm1072_vm0, %v12177_v44, 0.0  ;;  %v6615_v43 = vmul.f32 %v12177_v44, %v12177_v44  ;;  %8808 = vmatprep.subr.bf16.mxu0 %v8807_v63 }
0x2892   : > { %6621 = vadd.xlane.f32.xlu0 %v6620_v38  ;;  %6604 = vadd.xlane.f32.xlu1 %v6603_v53  ;;  %v6626_v62 = vsel %vm1072_vm0, %v6616_v42, 0.0  ;;  %v7567_v38 = vld [vmem:[%s12464_s0 + $0x2] ss:$0 sm:$0xff]  ;;  %v7568_v42 = vld [vmem:[#allocation22 + $0x2] ss:$0 sm:$0xff] }
0x2893   : > { %v6623_v23 = vsel %vm1072_vm0, %v6615_v43, 0.0  ;;  %8810 = vmatpush3.bf16.msra.mxu0 %v8807_v63 }
0x2896   : > { %6618 = vadd.xlane.f32.xlu0 %v6617_v0  ;;  %6624 = vadd.xlane.f32.xlu1 %v6623_v23 }
0x289a   : > { %6607 = vadd.xlane.f32.xlu0 %v6606_v20 }
0x289e   : > { %6627 = vadd.xlane.f32.xlu0 %v6626_v62 }
0x291a   : > { %v6602_v59 = vpop.xlane.xlu1 %6601 }
0x291b   : > { %v6599_v33 = vpop.xlane.xlu0 %6598  ;;  %v6610_v19 = vmul.f32 0.03125, %v6602_v59 }
0x291c   : > { %v6609_v3 = vmul.f32 0.03125, %v6599_v33 }
0x291d   : > { %v6634_v30 = vmul.f32 %v6610_v19, %v6610_v19  ;;  %v6646_v47 = vsub.f32 %v12165_v60, %v6610_v19 }
0x291e   : > { %v6633_v37 = vmul.f32 %v6609_v3, %v6609_v3  ;;  %v6645_v8 = vsub.f32 %v12168_v32, %v6609_v3 }
0x291f   : > { %v6622_v16 = vpop.xlane.xlu0 %6621  ;;  %v6605_v2 = vpop.xlane.xlu1 %6604 }
0x2920   : > { %v6630_v51 = vmul.f32 0.03125, %v6622_v16  ;;  %v6611_v24 = vmul.f32 0.03125, %v6605_v2 }
0x2922   : > { %v6638_v52 = vsub.f32 %v6630_v51, %v6634_v30  ;;  %v6635_v26 = vmul.f32 %v6611_v24, %v6611_v24  ;;  %v6647_v21 = vsub.f32 %v12177_v44, %v6611_v24  ;;  %v7574_v30 = vld [vmem:[#allocation25] ss:$0 sm:$0xff] }
0x2923   : > { %v6619_v14 = vpop.xlane.xlu0 %6618  ;;  %v6625_v5 = vpop.xlane.xlu1 %6624 }
0x2924   : > { %v6642_v17 = vmax.f32 %v6638_v52, 0.0  ;;  %v6629_v28 = vmul.f32 0.03125, %v6619_v14  ;;  %v6631_v57 = vmul.f32 0.03125, %v6625_v5 }
0x2926   : > { %v6650_v6 = vadd.f32 1e-05, %v6642_v17  ;;  %v6637_v31 = vsub.f32 %v6629_v28, %v6633_v37  ;;  %v6639_v11 = vsub.f32 %v6631_v57, %v6635_v26 }
0x2927   : > { %v6608_v54 = vpop.xlane.xlu0 %6607 }
0x2928   : > { %9501 = vrsqrt.f32 %v6650_v6  ;;  %v6641_v35 = vmax.f32 %v6637_v31, 0.0  ;;  %v6643_v10 = vmax.f32 %v6639_v11, 0.0  ;;  %v6612_v12 = vmul.f32 0.03125, %v6608_v54 }
0x292a   : > { %v6649_v29 = vadd.f32 1e-05, %v6641_v35  ;;  %v6651_v18 = vadd.f32 1e-05, %v6643_v10  ;;  %v6636_v15 = vmul.f32 %v6612_v12, %v6612_v12  ;;  %v6648_v4 = vsub.f32 %v12187_v36, %v6612_v12  ;;  %v6800_v36 = vld [vmem:[%s12469_s19 + $0x38] sm:$0xff] }
0x292b   : > { %v6628_v40 = vpop.xlane.xlu0 %6627  ;;  %v8823_v56 = vpack.c.bf16 %v6800_v36, %v6799_v41 }
0x292c   : > { %9503 = vrsqrt.f32 %v6649_v29  ;;  %v6632_v45 = vmul.f32 0.03125, %v6628_v40 }
0x292d   : > { %9505 = vrsqrt.f32 %v6651_v18  ;;  %8824 = vmatprep.subr.bf16.mxu1 %v8823_v56 }
0x292e   : > { %v6640_v7 = vsub.f32 %v6632_v45, %v6636_v15  ;;  %8826 = vmatpush3.bf16.msra.mxu1 %v8823_v56 }
0x2930   : > { %v6644_v25 = vmax.f32 %v6640_v7, 0.0 }
0x2932   : > { %v9502_v39 = vpop.eup %9501  ;;  %v6652_v58 = vadd.f32 1e-05, %v6644_v25 }
0x2933   : > { %v6658_v61 = vmul.f32 %v9502_v39, %v6646_v47 }
0x2934   : > { %9507 = vrsqrt.f32 %v6652_v58 }
0x2935   : > { %v6668_v23 = vmul.f32 %v7567_v38, %v6658_v61 }
0x2936   : > { %v9504_v53 = vpop.eup %9503 }
0x2937   : > { %v9506_v43 = vpop.eup %9505  ;;  %v6657_v0 = vmul.f32 %v9504_v53, %v6645_v8  ;;  %v6678_v9 = vadd.f32 %v7568_v42, %v6668_v23 }
0x2938   : > { %v6659_v20 = vmul.f32 %v9506_v43, %v6647_v21 }
0x2939   : > { %v6667_v62 = vmul.f32 %v7567_v38, %v6657_v0 }
0x293a   : > { %v6669_v22 = vmul.f32 %v7567_v38, %v6659_v20 }
0x293b   : > { %v6677_v60 = vadd.f32 %v7568_v42, %v6667_v62 }
0x293c   : > { %v6679_v32 = vadd.f32 %v7568_v42, %v6669_v22 }
0x293d   : > { %8427 = vmatprep.mubr.msk.f32.mxu0 %vm1072_vm0, %v6677_v60 }
0x293e   : > { %v9508_v55 = vpop.eup %9507  ;;  %8428 = vmatmul.mubr.msk.f32.vlgmr.msra.gmra.mrb[72].mxu0 %vm1072_vm0, %v6678_v9 }
0x293f   : > { %8430 = vmatprep.mubr.msk.f32.mxu0 %vm1072_vm0, %v6679_v32  ;;  %v6660_v44 = vmul.f32 %v9508_v55, %v6648_v4 }
0x2941   : > { %v6670_v50 = vmul.f32 %v7567_v38, %v6660_v44 }
0x2943   : > { %v6680_v63 = vadd.f32 %v7568_v42, %v6670_v50 }
0x2945   : > { %8431 = vmatmul.mubr.msk.f32.gmra.mrb[74].mxu0 %vm1072_vm0, %v6680_v63 }
0x2a11   : > { %v8429_v48 = vpop.f32.mrb[72].mxu0 }
0x2a12   : > { %v6776_v34 = vadd.f32 %v8429_v48, %v7569_v27  ;;  %v6770_v46 = vpop.f32.mrb[73].mxu0 }
0x2a13   : > { %v6771_v49 = vadd.f32 %v7569_v27, %v6770_v46 }
0x2a14   : > { %v6790_v1 = vmax.f32 %v6776_v34, 0.0 }
0x2a15   : > { %v6789_v13 = vmax.f32 %v6771_v49, 0.0 }
0x2a17   : > { %8449 = vmatprep.mubr.msk.f32.mxu1 %vm4702_vm14, %v6789_v13 }
0x2a18   : > { %v8432_v59 = vpop.f32.mrb[74].mxu0  ;;  %8450 = vmatmul.mubr.msk.f32.vlgmr.msra.gmra.mrb[76].mxu1 %vm4702_vm14, %v6790_v1 }
0x2a19   : > { %v6786_v33 = vadd.f32 %v8432_v59, %v7569_v27  ;;  %v6780_v19 = vpop.f32.mrb[75].mxu0 }
0x2a1a   : > { %v6781_v3 = vadd.f32 %v7569_v27, %v6780_v19  ;;  %v7580_v19 = vld [vmem:[%s12464_s0 + $0x3] ss:$0 sm:$0xff] }
0x2a1b   : > { %v6792_v2 = vmax.f32 %v6786_v33, 0.0 }
0x2a1c   : > { %v6791_v16 = vmax.f32 %v6781_v3, 0.0 }
0x2a1e   : > { %8452 = vmatprep.mubr.msk.f32.mxu1 %vm4702_vm14, %v6791_v16 }
0x2a1f   : > { %8453 = vmatmul.mubr.msk.f32.gmra.mrb[78].mxu1 %vm4702_vm14, %v6792_v2  ;;  %v7581_v2 = vld [vmem:[#allocation22 + $0x3] ss:$0 sm:$0xff] }
0x2aeb   : > { %v8451_v51 = vpop.f32.mrb[76].mxu1 }
0x2aec   : > { %v6892_v24 = vadd.f32 %v8451_v51, %v7574_v30  ;;  %v6886_v52 = vpop.f32.mrb[77].mxu1 }
0x2aed   : > { %v6887_v37 = vadd.f32 %v7574_v30, %v6886_v52 }
0x2aee   : > { %v12238_v14 = vadd.f32 %v6892_v24, %v6678_v9 }
0x2aef   : > { %v12240_v5 = vadd.f32 %v6887_v37, %v6677_v60 }
0x2af0   : > { %v6916_v17 = vsel %vm1072_vm0, %v12238_v14, 0.0  ;;  %v6930_v26 = vmul.f32 %v12238_v14, %v12238_v14 }
0x2af1   : > { %6917 = vadd.xlane.f32.xlu0 %v6916_v17  ;;  %v6913_v28 = vsel %vm1072_vm0, %v12240_v5, 0.0  ;;  %v6929_v57 = vmul.f32 %v12240_v5, %v12240_v5 }
0x2af2   : > { %6914 = vadd.xlane.f32.xlu1 %v6913_v28  ;;  %v8454_v6 = vpop.f32.mrb[78].mxu1  ;;  %v6936_v35 = vsel %vm1072_vm0, %v6930_v26, 0.0 }
0x2af3   : > { %v6902_v31 = vadd.f32 %v8454_v6, %v7574_v30  ;;  %v6896_v11 = vpop.f32.mrb[79].mxu1  ;;  %v6933_v12 = vsel %vm1072_vm0, %v6929_v57, 0.0 }
0x2af4   : > { %v6897_v54 = vadd.f32 %v7574_v30, %v6896_v11 }
0x2af5   : > { %v12251_v10 = vadd.f32 %v6902_v31, %v6680_v63  ;;  %6937 = vadd.xlane.f32.xlu0 %v6936_v35 }
0x2af6   : > { %v12254_v29 = vadd.f32 %v6897_v54, %v6679_v32  ;;  %6934 = vadd.xlane.f32.xlu1 %v6933_v12 }
0x2af7   : > { %v6922_v18 = vsel %vm1072_vm0, %v12251_v10, 0.0  ;;  %v6932_v15 = vmul.f32 %v12251_v10, %v12251_v10 }
0x2af8   : > { %v6919_v40 = vsel %vm1072_vm0, %v12254_v29, 0.0  ;;  %v6931_v45 = vmul.f32 %v12254_v29, %v12254_v29 }
0x2af9   : > { %6923 = vadd.xlane.f32.xlu0 %v6922_v18  ;;  %v6942_v7 = vsel %vm1072_vm0, %v6932_v15, 0.0 }
0x2afa   : > { %6920 = vadd.xlane.f32.xlu1 %v6919_v40  ;;  %v6939_v25 = vsel %vm1072_vm0, %v6931_v45, 0.0 }
0x2afd   : > { %6943 = vadd.xlane.f32.xlu0 %v6942_v7 }
0x2afe   : > { %6940 = vadd.xlane.f32.xlu1 %v6939_v25 }
0x2b7e   : > { %v6918_v39 = vpop.xlane.xlu0 %6917 }
0x2b7f   : > { %v6926_v47 = vmul.f32 0.03125, %v6918_v39  ;;  %v6915_v58 = vpop.xlane.xlu1 %6914 }
0x2b80   : > { %v6925_v61 = vmul.f32 0.03125, %v6915_v58 }
0x2b81   : > { %v6950_v38 = vmul.f32 %v6926_v47, %v6926_v47  ;;  %v6962_v1 = vsub.f32 %v12238_v14, %v6926_v47 }
0x2b82   : > { %v6938_v8 = vpop.xlane.xlu0 %6937  ;;  %v6949_v43 = vmul.f32 %v6925_v61, %v6925_v61  ;;  %v6961_v33 = vsub.f32 %v12240_v5, %v6925_v61 }
0x2b83   : > { %v6946_v53 = vmul.f32 0.03125, %v6938_v8  ;;  %v6935_v21 = vpop.xlane.xlu1 %6934 }
0x2b84   : > { %v6945_v0 = vmul.f32 0.03125, %v6935_v21 }
0x2b85   : > { %v6954_v23 = vsub.f32 %v6946_v53, %v6950_v38 }
0x2b86   : > { %v6953_v20 = vsub.f32 %v6945_v0, %v6949_v43  ;;  %v6924_v42 = vpop.xlane.xlu0 %6923 }
0x2b87   : > { %v6958_v62 = vmax.f32 %v6954_v23, 0.0  ;;  %v6928_v22 = vmul.f32 0.03125, %v6924_v42  ;;  %v6921_v60 = vpop.xlane.xlu1 %6920 }
0x2b88   : > { %v6957_v9 = vmax.f32 %v6953_v20, 0.0  ;;  %v6927_v4 = vmul.f32 0.03125, %v6921_v60 }
0x2b89   : > { %v6966_v32 = vadd.f32 1e-05, %v6958_v62  ;;  %v6952_v50 = vmul.f32 %v6928_v22, %v6928_v22  ;;  %v6964_v14 = vsub.f32 %v12251_v10, %v6928_v22 }
0x2b8a   : > { %v6965_v55 = vadd.f32 1e-05, %v6957_v9  ;;  %v6944_v44 = vpop.xlane.xlu0 %6943  ;;  %v6951_v36 = vmul.f32 %v6927_v4, %v6927_v4  ;;  %v6963_v17 = vsub.f32 %v12254_v29, %v6927_v4 }
0x2b8b   : > { %9509 = vrsqrt.f32 %v6966_v32  ;;  %v6948_v63 = vmul.f32 0.03125, %v6944_v44  ;;  %v6941_v41 = vpop.xlane.xlu1 %6940 }
0x2b8c   : > { %9511 = vrsqrt.f32 %v6965_v55  ;;  %v6947_v56 = vmul.f32 0.03125, %v6941_v41 }
0x2b8d   : > { %v6956_v27 = vsub.f32 %v6948_v63, %v6952_v50 }
0x2b8e   : > { %v6955_v48 = vsub.f32 %v6947_v56, %v6951_v36 }
0x2b8f   : > { %v6960_v34 = vmax.f32 %v6956_v27, 0.0 }
0x2b90   : > { %v6959_v46 = vmax.f32 %v6955_v48, 0.0 }
0x2b91   : > { %v6968_v49 = vadd.f32 1e-05, %v6960_v34 }
0x2b92   : > { %v6967_v13 = vadd.f32 1e-05, %v6959_v46 }
0x2b93   : > { %9513 = vrsqrt.f32 %v6968_v49 }
0x2b94   : > { %9515 = vrsqrt.f32 %v6967_v13 }
0x2b95   : > { %v9510_v59 = vpop.eup %9509 }
0x2b96   : > { %v9512_v3 = vpop.eup %9511  ;;  %v6974_v16 = vmul.f32 %v9510_v59, %v6962_v1 }
0x2b97   : > { %v6973_v30 = vmul.f32 %v9512_v3, %v6961_v33 }
0x2b98   : > { %v6984_v51 = vmul.f32 %v7580_v19, %v6974_v16 }
0x2b99   : > { %v6983_v24 = vmul.f32 %v7580_v19, %v6973_v30 }
0x2b9a   : > { %v6994_v52 = vadd.f32 %v7581_v2, %v6984_v51 }
0x2b9b   : > { %v6993_v37 = vadd.f32 %v7581_v2, %v6983_v24 }
0x2b9c   : > { %6998 = vst.msk [vmem:[%s1043_s3 + $0x8] sm:$0xff] %vm1072_vm0, %v6994_v52 }
0x2b9d   : > { %v9514_v5 = vpop.eup %9513  ;;  %6997 = vst.msk [vmem:[%s1043_s3] sm:$0xff] %vm1072_vm0, %v6993_v37 }
0x2b9e   : > { %v9516_v26 = vpop.eup %9515  ;;  %v6976_v28 = vmul.f32 %v9514_v5, %v6964_v14 }
0x2b9f   : > { %v6975_v57 = vmul.f32 %v9516_v26, %v6963_v17 }
0x2ba0   : > { %v6986_v6 = vmul.f32 %v7580_v19, %v6976_v28 }
0x2ba1   : > { %v6985_v31 = vmul.f32 %v7580_v19, %v6975_v57 }
0x2ba2   : > { %v6996_v11 = vadd.f32 %v7581_v2, %v6986_v6 }
0x2ba3   : > { %v6995_v54 = vadd.f32 %v7581_v2, %v6985_v31 }
0x2ba4   : > { %7000 = vst.msk [vmem:[%s1043_s3 + $0x18] sm:$0xff] %vm1072_vm0, %v6996_v11 }
0x2ba5   : > { %6999 = vst.msk [vmem:[%s1043_s3 + $0x10] sm:$0xff] %vm1072_vm0, %v6995_v54 }
0x2ba6   : > { %9954 = shalt.err (!%p9951_p1)
}
0x2ba7   : > { %s9955_s20 = scalar_lea.hbm %s12282_s10, 512  ;;  %s9959_s3 = scalar_lea.hbm %s12473_s6, 1024 }
0x2ba8   : > { %p9956_p6 = scmp.ne.s32.totalorder %s12282_s10, %s9955_s20  ;;  %p9960_p0 = scmp.lt.u32.totalorder %s12282_s10, %s12473_s6 }
0x2ba9   : > { %p9961_p10 = scmp.lt.u32.totalorder %s9959_s3, %s9955_s20  ;;  %p9963_p3 = scmp.lt.u32.totalorder %s9955_s20, %s12282_s10 }
0x2baa   : > { %p9957_p9 = pnand %p9956_p6, %p12474_p4 }
0x2bab   : > { %p9962_p2 = por %p9961_p10, %p9960_p0 }
0x2bac   : > { %p9958_p5 = pneg %p9957_p9 }
0x2bad   : > { %p9964_p12 = por %p9963_p3, %p9962_p2 }
0x2baf   : > { %p9965_p7 = pnand %p9964_p12, %p9958_p5 }
0x2bb1   : > { %9968 = shalt.err (!%p9965_p7)
}
0x2bb2   : > { %s10066_s28 = smov 128   ;;  %s10067_s27 = smov 8  }
0x2bb3   : > { %8888 = dma.vmem_to_hbm [thread:$0]  (%p12474_p4), %s12284_s9, 512, %s12282_s10, %s12290_s8, %s10066_s28, %s10066_s28, %s10067_s27  }
0x2bb4 PF: > { %s12475_s29 = sld [smem:[#allocation39_spill]]  ;;  %s12476_s15 = sld [smem:[#allocation36_spill]] }
0x2bb5   : > { %s12477_s23 = sld [smem:[#allocation43_spill]] }
0x2bba   : > { %p8970_p8 = scmp.ge.s32.totalorder %s12475_s29, 2  ;;  %s7030_s22 = sand.u32 1, %s12476_s15  }
0x2bbb   : > { %p12478_p11 = scmp.ne.s32.totalorder %s12477_s23, 0  ;;  %s7031_s20 = scalar_lea.sflag [#allocation4], %s7030_s22 }
0x2bbd   : > { %p8937_p13 = pnand %p8970_p8, %p12478_p11 }
0x2bbf   : > { %10018 = dma.done.wait (!%p8937_p13), %s7031_s20, 512  }
0x2bc0   : > { %10020 = vsyncadd (!%p8937_p13), %s7031_s20, 4294966784  ;;  %s12479_s28 = sld [smem:[#allocation40_spill]]  ;;  %s12480_s27 = sld [smem:[#allocation37_spill]] }
0x2bc1   : > { %s12481_s3 = sld [smem:[#allocation38_spill]]  ;;  %s12482_s7 = sld [smem:[#allocation41_spill]] }
0x2bc6   : > { %p44_p1 = scmp.ge.s32.totalorder %s12479_s28, 4  }
0x2bc8   :  { %46 = sbr.rel (!%p44_p1) target bundleno = 32 (0x20), region = 250 }
0x2bcf   :  { %7036 = vsyncpa [#allocation3], 1 }
0x2bd0   :  { %7038 = vsyncpa [#allocation3 + $0x1], 1 }
0x2bd1   :  { %7039 = vsyncpa [#allocation6], 1 }
0x2bd2   :  { %7040 = vsyncpa [#allocation9], 1 }
0x2bd3   :  { %7041 = vsyncpa [#allocation12], 1 }
0x2bd4   :  { %7042 = vsyncpa [#allocation15], 1 }
0x2bd5   :  { %7043 = vsyncpa [#allocation18], 1 }
0x2bd6   :  { %7044 = vsyncpa [#allocation21], 1 }
0x2bd7   :  { %7045 = vsyncpa [#allocation24], 1 }
0x2bd8   :  { %7046 = vsyncpa [#allocation4], 1 }
0x2bd9   :  { %7048 = vsyncpa [#allocation4 + $0x1], 1 }

</bundles_post_ra>
